<compile_context>
chip_gen: v5e
topology: v5e:2x2
jax: 0.10.0
libtpu: 0.0.40
codegen_flags: <defaults>
</compile_context>

<pallas_src>
from functools import partial

import jax
import jax.numpy as jnp
from jax.experimental import pallas as pl
from jax.experimental.pallas import tpu as pltpu


# ---------------------------------------------------------------------------
# Trace-time analysis of a 3x3 dilated conv (padding == dilation == d).
# ---------------------------------------------------------------------------
def _col_taps(W, d):
    """kx taps whose column window is non-empty (kx=1 always contributes)."""
    taps = []
    for kx in range(3):
        dx = (kx - 1) * d
        if max(0, -dx) < min(W, W - dx):
            taps.append(kx)
    return taps


def _row_groups(H, d):
    """(ky, out_row0, out_row1, in_row0) for row windows that contribute.

    ky=1 (covers every output row) is listed first so the kernel can write the
    accumulator with '=' and skip the full-tile zero-init."""
    groups = []
    for ky in (1, 0, 2):
        dy = (ky - 1) * d
        oy0, oy1 = max(0, -dy), min(H, H - dy)
        if oy0 < oy1:
            groups.append((ky, oy0, oy1, oy0 + dy))
    return groups


# ---------------------------------------------------------------------------
# Fused ASPP kernel: one grid step == one image.
# ---------------------------------------------------------------------------
def _fused_aspp_kernel(*refs, H, W, Cin, planes, branches):
    n_b = len(branches)
    x_ref = refs[0]                                   # (1, H, W, Cin) bf16
    w_pw_ref, b_pw_ref, wp_pw_ref = refs[1:4]
    br_refs = [refs[4 + 3 * i: 7 + 3 * i] for i in range(n_b)]
    base = 4 + 3 * n_b
    w_gap_ref, b_gap_ref, wp_gap_ref, b_proj_ref = refs[base: base + 4]
    o_ref = refs[base + 4]                            # (1, H, W, planes) f32
    acc_ref = refs[base + 5]                          # (H, W, planes) f32

    f32 = jnp.float32
    HW = H * W
    cdt = w_pw_ref.dtype                              # bf16 compute dtype

    x_b = x_ref[0]                                    # (H, W, Cin), tile-aligned
    x_flat = x_b.reshape(HW, Cin)

    # ---- merged point-wise group: aspp1 + every 3x3 branch that degenerates
    #      to its centre tap.  BN scale is pre-folded into the weights, so the
    #      epilogue is just add-bias + ReLU.
    z = jnp.dot(x_flat, w_pw_ref[...], preferred_element_type=f32)
    y = jnp.maximum(z + b_pw_ref[...], 0.0)
    proj = jnp.dot(y.astype(cdt), wp_pw_ref[...], preferred_element_type=f32)

    # ---- non-degenerate dilated 3x3 branches ----
    for bi, (d, col_taps, row_groups) in enumerate(branches):
        wk_ref, b_b_ref, wp_b_ref = br_refs[bi]

        # Column-shifted copies of x stacked along K (tap weights were
        # concatenated along the contraction dim on the host) -> one K-wide
        # matmul per output-row group instead of one small matmul per tap.
        # Out-of-range columns are zero (== the conv's zero padding).
        pieces = []
        for kx in col_taps:
            if kx == 1:
                pieces.append(x_b)
            else:
                zc = jnp.zeros((H, d, Cin), cdt)
                if kx == 0:       # input col = out col - d
                    pieces.append(jnp.concatenate([zc, x_b[:, :W - d, :]], axis=1))
                else:             # kx == 2, input col = out col + d
                    pieces.append(jnp.concatenate([x_b[:, d:, :], zc], axis=1))
        lhs = pieces[0] if len(pieces) == 1 else jnp.concatenate(pieces, axis=-1)
        Kb = len(col_taps) * Cin

        # First row group (ky=1) covers every output row -> '=' store, so no
        # zero-init of the accumulator is needed.
        _, oy0, oy1, iy0 = row_groups[0]
        acc_ref[...] = jnp.dot(lhs.reshape(HW, Kb), wk_ref[0],
                               preferred_element_type=f32).reshape(H, W, planes)
        for g in range(1, len(row_groups)):
            _, oy0, oy1, iy0 = row_groups[g]
            rl = oy1 - oy0
            pm = jnp.dot(lhs[iy0:iy0 + rl].reshape(rl * W, Kb), wk_ref[g],
                         preferred_element_type=f32)
            acc_ref[oy0:oy1] += pm.reshape(rl, W, planes)

        yb = jnp.maximum(acc_ref[...].reshape(HW, planes) + b_b_ref[...], 0.0)
        proj = proj + jnp.dot(yb.astype(cdt), wp_b_ref[...],
                              preferred_element_type=f32)

    # ---- global-average-pool branch: bilinear upsample of a 1x1 map with
    #      align_corners=True == broadcast; fused into the projection as a
    #      per-image additive term.
    pooled = jnp.mean(x_flat.astype(f32), axis=0, keepdims=True)    # (1, Cin)
    pooled8 = jnp.broadcast_to(pooled, (8, Cin)).astype(cdt)        # pad M rows
    z5 = jnp.dot(pooled8, w_gap_ref[...], preferred_element_type=f32)
    y5 = jnp.maximum(z5 + b_gap_ref[...], 0.0)
    g5 = jnp.dot(y5.astype(cdt), wp_gap_ref[...], preferred_element_type=f32)
    proj = proj + g5[0:1, :]                 # identical rows -> broadcast add

    # ---- final projection epilogue (proj BN scale folded into weights) ----
    out = jnp.maximum(proj + b_proj_ref[...], 0.0)
    o_ref[0] = out.reshape(H, W, planes).astype(o_ref.dtype)


# ---------------------------------------------------------------------------
# Parameter init (mirrors __init__ / _init_weight):
#   convs: kaiming_normal_ (std = sqrt(2/fan_in), fan_in = Cin*kh*kw)
#   BN:    gamma=1, beta=0, running_mean=0, running_var=1, eps=1e-5
# ---------------------------------------------------------------------------
def init_params(key, inplanes=320, planes=256):
    keys = jax.random.split(key, 6)

    def kaiming(k, shape, fan_in):
        return jax.random.normal(k, shape, jnp.float32) * jnp.sqrt(2.0 / fan_in)

    eps = 1e-5
    bn_scale = jnp.full((planes,), 1.0 / jnp.sqrt(1.0 + eps), jnp.float32)
    bn_bias = jnp.zeros((planes,), jnp.float32)

    p = {
        "w1": kaiming(keys[0], (inplanes, planes), inplanes),            # aspp1 1x1
        "w2": kaiming(keys[1], (9, inplanes, planes), inplanes * 9),     # aspp2 3x3
        "w3": kaiming(keys[2], (9, inplanes, planes), inplanes * 9),     # aspp3 3x3
        "w4": kaiming(keys[3], (9, inplanes, planes), inplanes * 9),     # aspp4 3x3
        "w_gap": kaiming(keys[4], (inplanes, planes), inplanes),         # pool 1x1
        "w_proj": kaiming(keys[5], (5 * planes, planes), 5 * planes),    # conv1 1x1
    }
    for name in ("bn1", "bn2", "bn3", "bn4", "bn_gap", "bn_proj"):
        p[name + "_scale"] = bn_scale
        p[name + "_bias"] = bn_bias
    return p


# ---------------------------------------------------------------------------
# Full ASPP forward (NCHW in / NCHW out), output_stride=16 -> dilations [1,6,12,18]
# ---------------------------------------------------------------------------
def aspp_forward(x_nchw, params, dilations=(1, 6, 12, 18)):
    x = jnp.transpose(x_nchw, (0, 2, 3, 1))           # -> NHWC (lane-dense C)
    N, H, W, Cin = x.shape
    planes = params["w1"].shape[1]
    cdt = jnp.bfloat16                                # MXU input dtype

    # ---- fold BN scales into weights (inference affine) ----
    w_proj_f = params["w_proj"] * params["bn_proj_scale"][None, :]   # (5*planes, planes)

    def proj_slice(pos):                              # concat order x1..x5
        return w_proj_f[pos * planes:(pos + 1) * planes]

    br_w_keys = ("w2", "w3", "w4")
    br_bn_keys = ("bn2", "bn3", "bn4")

    # static tap / row-window analysis per 3x3 branch
    tap_info = []
    for d in dilations[1:4]:
        tap_info.append((d, _col_taps(W, d), _row_groups(H, d)))
    deg_idx = [i for i, (d, ct, rg) in enumerate(tap_info)
               if len(ct) == 1 and len(rg) == 1]      # exact 1x1 conv
    nd_idx = [i for i, _ in enumerate(tap_info) if i not in deg_idx]

    # ---- merged point-wise group: aspp1 + degenerate 3x3 branches ----
    pw_w = [params["w1"] * params["bn1_scale"][None, :]]
    pw_b = [params["bn1_bias"]]
    pw_p = [proj_slice(0)]
    for i in deg_idx:
        s = params[br_bn_keys[i] + "_scale"][None, :]
        pw_w.append(params[br_w_keys[i]][4] * s)      # centre tap only
        pw_b.append(params[br_bn_keys[i] + "_bias"])
        pw_p.append(proj_slice(i + 1))
    W_pw = jnp.concatenate(pw_w, axis=1).astype(cdt)  # (Cin, planes*n_pw)
    b_pw = jnp.concatenate(pw_b).reshape(1, -1)
    Wp_pw = jnp.concatenate(pw_p, axis=0).astype(cdt) # (planes*n_pw, planes)

    # ---- non-degenerate 3x3 branches: K-grouped weights per row group ----
    nd_branches = []
    nd_args = []
    for i in nd_idx:
        d, ct, rg = tap_info[i]
        assert rg[0][1] == 0 and rg[0][2] == H        # ky=1 group covers all rows
        w9 = params[br_w_keys[i]].reshape(3, 3, Cin, planes)
        s = params[br_bn_keys[i] + "_scale"][None, :]
        wk = jnp.stack([
            jnp.concatenate([w9[ky, kx] * s for kx in ct], axis=0)
            for (ky, _, _, _) in rg])                 # (n_rg, n_ct*Cin, planes)
        nd_branches.append((d, tuple(ct), tuple(rg)))
        nd_args += [wk.astype(cdt),
                    params[br_bn_keys[i] + "_bias"].reshape(1, -1),
                    proj_slice(i + 1).astype(cdt)]

    # ---- GAP branch + final projection bias ----
    gap_args = [(params["w_gap"] * params["bn_gap_scale"][None, :]).astype(cdt),
                params["bn_gap_bias"].reshape(1, -1),
                proj_slice(4).astype(cdt)]
    b_proj = params["bn_proj_bias"].reshape(1, -1)

    # ---- kernel inputs: unpadded bf16 activations + folded weights ----
    xk = x.astype(cdt)
    inputs = [xk, W_pw, b_pw, Wp_pw] + nd_args + gap_args + [b_proj]

    def _const_spec(a):
        zeros = (0,) * a.ndim
        return pl.BlockSpec(a.shape, lambda n, _z=zeros: _z)

    in_specs = ([pl.BlockSpec((1, H, W, Cin), lambda n: (n, 0, 0, 0))] +
                [_const_spec(a) for a in inputs[1:]])

    kernel = partial(_fused_aspp_kernel, H=H, W=W, Cin=Cin, planes=planes,
                     branches=tuple(nd_branches))

    out_nhwc = pl.pallas_call(
        kernel,
        out_shape=jax.ShapeDtypeStruct((N, H, W, planes), jnp.float32),
        grid=(N,),
        in_specs=in_specs,
        out_specs=pl.BlockSpec((1, H, W, planes), lambda n: (n, 0, 0, 0)),
        scratch_shapes=[pltpu.VMEM((H, W, planes), jnp.float32)],
        compiler_params=pltpu.CompilerParams(
            dimension_semantics=("parallel",),        # megacore split over N
            vmem_limit_bytes=32 * 1024 * 1024),
    )(*inputs)

    # TODO(synk): nn.Dropout(0.5) uses inference semantics (identity);
    # training-mode stochastic masking is not implemented.
    return jnp.transpose(out_nhwc, (0, 3, 1, 2))      # -> NCHW


# ---------------------------------------------------------------------------
# Pure-JAX (f32) reference for correctness checking.
# ---------------------------------------------------------------------------
def aspp_reference(x_nchw, params, dilations=(1, 6, 12, 18)):
    x = jnp.transpose(x_nchw, (0, 2, 3, 1))
    N, H, W, Cin = x.shape
    planes = params["w1"].shape[1]

    def bnrelu(z, s, b):
        return jnp.maximum(z * s + b, 0.0)

    def dil(w9, d):
        w = w9.reshape(3, 3, Cin, planes)             # HWIO
        return jax.lax.conv_general_dilated(
            x, w, window_strides=(1, 1), padding=((d, d), (d, d)),
            rhs_dilation=(d, d),
            dimension_numbers=("NHWC", "HWIO", "NHWC"))

    x1 = bnrelu(jnp.einsum("nhwc,cd->nhwd", x, params["w1"]),
                params["bn1_scale"], params["bn1_bias"])
    x2 = bnrelu(dil(params["w2"], dilations[1]), params["bn2_scale"], params["bn2_bias"])
    x3 = bnrelu(dil(params["w3"], dilations[2]), params["bn3_scale"], params["bn3_bias"])
    x4 = bnrelu(dil(params["w4"], dilations[3]), params["bn4_scale"], params["bn4_bias"])

    pooled = jnp.mean(x, axis=(1, 2))                 # (N, Cin)
    x5 = bnrelu(pooled @ params["w_gap"], params["bn_gap_scale"], params["bn_gap_bias"])
    x5 = jnp.broadcast_to(x5[:, None, None, :], (N, H, W, planes))

    cat = jnp.concatenate([x1, x2, x3, x4, x5], axis=-1)
    out = bnrelu(jnp.einsum("nhwc,cd->nhwd", cat, params["w_proj"]),
                 params["bn_proj_scale"], params["bn_proj_bias"])
    return jnp.transpose(out, (0, 3, 1, 2))


if __name__ == "__main__":
    key = jax.random.PRNGKey(0)
    k_x, k_p = jax.random.split(key)

    # backbone='mobilenet' -> inplanes=320; output_stride=16; small spatial/batch.
    N, Cin, H, W = 2, 320, 8, 8
    x = jax.random.normal(k_x, (N, Cin, H, W), jnp.float32)
    params = init_params(k_p, inplanes=Cin, planes=256)

    fwd = jax.jit(lambda xx: aspp_forward(xx, params))
    out = jax.block_until_ready(fwd(x))

    assert out.shape == (N, 256, H, W), out.shape
    assert out.dtype == jnp.float32
    assert bool(jnp.all(jnp.isfinite(out)))
    assert bool(jnp.all(out >= 0.0))                  # final ReLU

    # bf16-tolerant check against the pure-JAX f32 reference.
    ref = jax.block_until_ready(aspp_reference(x, params))
    max_err = float(jnp.max(jnp.abs(out - ref)))
    denom = float(jnp.max(jnp.abs(ref))) + 1e-6
    assert max_err / denom < 0.05, (max_err, denom)

    print("KERNEL_OK")
</pallas_src>

<mosaic_0001>
module attributes {stable_mosaic.version = 11 : i64} {
  func.func @_fused_aspp_kernel(%arg0: i32, %arg1: memref<1x8x8x320xbf16, #tpu.memory_space<vmem>>, %arg2: memref<320x768xbf16, #tpu.memory_space<vmem>>, %arg3: memref<1x768xf32, #tpu.memory_space<vmem>>, %arg4: memref<768x256xbf16, #tpu.memory_space<vmem>>, %arg5: memref<3x960x256xbf16, #tpu.memory_space<vmem>>, %arg6: memref<1x256xf32, #tpu.memory_space<vmem>>, %arg7: memref<256x256xbf16, #tpu.memory_space<vmem>>, %arg8: memref<320x256xbf16, #tpu.memory_space<vmem>>, %arg9: memref<1x256xf32, #tpu.memory_space<vmem>>, %arg10: memref<256x256xbf16, #tpu.memory_space<vmem>>, %arg11: memref<1x256xf32, #tpu.memory_space<vmem>>, %arg12: memref<1x8x8x256xf32, #tpu.memory_space<vmem>>, %arg13: memref<8x8x256xf32, #tpu.memory_space<vmem>>) attributes {dimension_semantics = [#tpu.dimension_semantics<parallel>], iteration_bounds = array<i64: 2>, scalar_prefetch = 0 : i64, scratch_operands = 1 : i64, tpu.core_type = #tpu.core_type<tc>, window_params = [{transform_indices = @transform_0, window_bounds = array<i64: 1, 8, 8, 320>}, {pipeline_mode = #tpu.pipeline_mode<synchronous>, transform_indices = @transform_1, window_bounds = array<i64: 320, 768>}, {pipeline_mode = #tpu.pipeline_mode<synchronous>, transform_indices = @transform_2, window_bounds = array<i64: 1, 768>}, {pipeline_mode = #tpu.pipeline_mode<synchronous>, transform_indices = @transform_3, window_bounds = array<i64: 768, 256>}, {pipeline_mode = #tpu.pipeline_mode<synchronous>, transform_indices = @transform_4, window_bounds = array<i64: 3, 960, 256>}, {pipeline_mode = #tpu.pipeline_mode<synchronous>, transform_indices = @transform_5, window_bounds = array<i64: 1, 256>}, {pipeline_mode = #tpu.pipeline_mode<synchronous>, transform_indices = @transform_6, window_bounds = array<i64: 256, 256>}, {pipeline_mode = #tpu.pipeline_mode<synchronous>, transform_indices = @transform_7, window_bounds = array<i64: 320, 256>}, {pipeline_mode = #tpu.pipeline_mode<synchronous>, transform_indices = @transform_8, window_bounds = array<i64: 1, 256>}, {pipeline_mode = #tpu.pipeline_mode<synchronous>, transform_indices = @transform_9, window_bounds = array<i64: 256, 256>}, {pipeline_mode = #tpu.pipeline_mode<synchronous>, transform_indices = @transform_10, window_bounds = array<i64: 1, 256>}, {transform_indices = @transform_11, window_bounds = array<i64: 1, 8, 8, 256>}]} {
    %c0 = arith.constant 0 : index
    %c0_0 = arith.constant 0 : index
    %c0_1 = arith.constant 0 : index
    %c0_2 = arith.constant 0 : index
    %0 = vector.load %arg1[%c0, %c0_0, %c0_1, %c0_2] : memref<1x8x8x320xbf16, #tpu.memory_space<vmem>>, vector<1x8x8x320xbf16>
    %1 = vector.shape_cast %0 : vector<1x8x8x320xbf16> to vector<8x8x320xbf16>
    %2 = vector.shape_cast %1 : vector<8x8x320xbf16> to vector<64x320xbf16>
    %c0_3 = arith.constant 0 : index
    %c0_4 = arith.constant 0 : index
    %3 = vector.load %arg2[%c0_3, %c0_4] : memref<320x768xbf16, #tpu.memory_space<vmem>>, vector<320x768xbf16>
    %cst = arith.constant dense<0.000000e+00> : vector<64x768xf32>
    %4 = tpu.matmul %2, %3, %cst {dimension_numbers = #tpu.dot_dimension_numbers<[1], [0], [0], [1], [0, 0, 1, 1], [], []>} : vector<64x320xbf16>, vector<320x768xbf16>, vector<64x768xf32> -> vector<64x768xf32>
    %c0_5 = arith.constant 0 : index
    %c0_6 = arith.constant 0 : index
    %5 = vector.load %arg3[%c0_5, %c0_6] : memref<1x768xf32, #tpu.memory_space<vmem>>, vector<1x768xf32>
    %6 = vector.broadcast %5 : vector<1x768xf32> to vector<64x768xf32>
    %7 = arith.addf %4, %6 : vector<64x768xf32>
    %cst_7 = arith.constant 0.000000e+00 : f32
    %8 = vector.broadcast %cst_7 : f32 to vector<64x768xf32>
    %9 = arith.maximumf %7, %8 : vector<64x768xf32>
    %10 = arith.truncf %9 : vector<64x768xf32> to vector<64x768xbf16>
    %c0_8 = arith.constant 0 : index
    %c0_9 = arith.constant 0 : index
    %11 = vector.load %arg4[%c0_8, %c0_9] : memref<768x256xbf16, #tpu.memory_space<vmem>>, vector<768x256xbf16>
    %cst_10 = arith.constant dense<0.000000e+00> : vector<64x256xf32>
    %12 = tpu.matmul %10, %11, %cst_10 {dimension_numbers = #tpu.dot_dimension_numbers<[1], [0], [0], [1], [0, 0, 1, 1], [], []>} : vector<64x768xbf16>, vector<768x256xbf16>, vector<64x256xf32> -> vector<64x256xf32>
    %cst_11 = arith.constant 0.000000e+00 : bf16
    %13 = vector.broadcast %cst_11 : bf16 to vector<8x6x320xbf16>
    %14 = vector.extract_strided_slice %1 {offsets = [0, 0, 0], sizes = [8, 2, 320], strides = [1, 1, 1]} : vector<8x8x320xbf16> to vector<8x2x320xbf16>
    %15 = tpu.concatenate %13, %14 in 1 : vector<8x6x320xbf16>, vector<8x2x320xbf16> -> vector<8x8x320xbf16>
    %cst_12 = arith.constant 0.000000e+00 : bf16
    %16 = vector.broadcast %cst_12 : bf16 to vector<8x6x320xbf16>
    %17 = vector.extract_strided_slice %1 {offsets = [0, 6, 0], sizes = [8, 2, 320], strides = [1, 1, 1]} : vector<8x8x320xbf16> to vector<8x2x320xbf16>
    %18 = tpu.concatenate %17, %16 in 1 : vector<8x2x320xbf16>, vector<8x6x320xbf16> -> vector<8x8x320xbf16>
    %19 = tpu.concatenate %15, %1, %18 in 2 : vector<8x8x320xbf16>, vector<8x8x320xbf16>, vector<8x8x320xbf16> -> vector<8x8x960xbf16>
    %20 = vector.shape_cast %19 : vector<8x8x960xbf16> to vector<64x960xbf16>
    %c0_13 = arith.constant 0 : index
    %c0_14 = arith.constant 0 : index
    %c0_15 = arith.constant 0 : index
    %21 = vector.load %arg5[%c0_13, %c0_14, %c0_15] : memref<3x960x256xbf16, #tpu.memory_space<vmem>>, vector<1x960x256xbf16>
    %22 = vector.shape_cast %21 : vector<1x960x256xbf16> to vector<960x256xbf16>
    %cst_16 = arith.constant dense<0.000000e+00> : vector<64x256xf32>
    %23 = tpu.matmul %20, %22, %cst_16 {dimension_numbers = #tpu.dot_dimension_numbers<[1], [0], [0], [1], [0, 0, 1, 1], [], []>} : vector<64x960xbf16>, vector<960x256xbf16>, vector<64x256xf32> -> vector<64x256xf32>
    %24 = vector.shape_cast %23 : vector<64x256xf32> to vector<8x8x256xf32>
    %c0_17 = arith.constant 0 : index
    %c0_18 = arith.constant 0 : index
    %c0_19 = arith.constant 0 : index
    %25 = vector.load %arg13[%c0_17, %c0_18, %c0_19] : memref<8x8x256xf32, #tpu.memory_space<vmem>>, vector<8x8x256xf32>
    tpu.vector_store %arg13[%c0_17, %c0_18, %c0_19], %24 {strides = array<i32>} : memref<8x8x256xf32, #tpu.memory_space<vmem>>, vector<8x8x256xf32>,
    %26 = vector.extract_strided_slice %19 {offsets = [0, 0, 0], sizes = [2, 8, 960], strides = [1, 1, 1]} : vector<8x8x960xbf16> to vector<2x8x960xbf16>
    %27 = vector.shape_cast %26 : vector<2x8x960xbf16> to vector<16x960xbf16>
    %c1 = arith.constant 1 : index
    %c0_20 = arith.constant 0 : index
    %c0_21 = arith.constant 0 : index
    %28 = vector.load %arg5[%c1, %c0_20, %c0_21] : memref<3x960x256xbf16, #tpu.memory_space<vmem>>, vector<1x960x256xbf16>
    %29 = vector.shape_cast %28 : vector<1x960x256xbf16> to vector<960x256xbf16>
    %cst_22 = arith.constant dense<0.000000e+00> : vector<16x256xf32>
    %30 = tpu.matmul %27, %29, %cst_22 {dimension_numbers = #tpu.dot_dimension_numbers<[1], [0], [0], [1], [0, 0, 1, 1], [], []>} : vector<16x960xbf16>, vector<960x256xbf16>, vector<16x256xf32> -> vector<16x256xf32>
    %c6 = arith.constant 6 : index
    %c0_23 = arith.constant 0 : index
    %c0_24 = arith.constant 0 : index
    %31 = vector.load %arg13[%c6, %c0_23, %c0_24] : memref<8x8x256xf32, #tpu.memory_space<vmem>>, vector<2x8x256xf32>
    %32 = vector.shape_cast %30 : vector<16x256xf32> to vector<2x8x256xf32>
    %33 = arith.addf %31, %32 : vector<2x8x256xf32>
    %c6_25 = arith.constant 6 : index
    %c0_26 = arith.constant 0 : index
    %c0_27 = arith.constant 0 : index
    %34 = vector.load %arg13[%c6_25, %c0_26, %c0_27] : memref<8x8x256xf32, #tpu.memory_space<vmem>>, vector<2x8x256xf32>
    tpu.vector_store %arg13[%c6_25, %c0_26, %c0_27], %33 {strides = array<i32>} : memref<8x8x256xf32, #tpu.memory_space<vmem>>, vector<2x8x256xf32>,
    %35 = vector.extract_strided_slice %19 {offsets = [6, 0, 0], sizes = [2, 8, 960], strides = [1, 1, 1]} : vector<8x8x960xbf16> to vector<2x8x960xbf16>
    %36 = vector.shape_cast %35 : vector<2x8x960xbf16> to vector<16x960xbf16>
    %c2 = arith.constant 2 : index
    %c0_28 = arith.constant 0 : index
    %c0_29 = arith.constant 0 : index
    %37 = vector.load %arg5[%c2, %c0_28, %c0_29] : memref<3x960x256xbf16, #tpu.memory_space<vmem>>, vector<1x960x256xbf16>
    %38 = vector.shape_cast %37 : vector<1x960x256xbf16> to vector<960x256xbf16>
    %cst_30 = arith.constant dense<0.000000e+00> : vector<16x256xf32>
    %39 = tpu.matmul %36, %38, %cst_30 {dimension_numbers = #tpu.dot_dimension_numbers<[1], [0], [0], [1], [0, 0, 1, 1], [], []>} : vector<16x960xbf16>, vector<960x256xbf16>, vector<16x256xf32> -> vector<16x256xf32>
    %c0_31 = arith.constant 0 : index
    %c0_32 = arith.constant 0 : index
    %c0_33 = arith.constant 0 : index
    %40 = vector.load %arg13[%c0_31, %c0_32, %c0_33] : memref<8x8x256xf32, #tpu.memory_space<vmem>>, vector<2x8x256xf32>
    %41 = vector.shape_cast %39 : vector<16x256xf32> to vector<2x8x256xf32>
    %42 = arith.addf %40, %41 : vector<2x8x256xf32>
    %c0_34 = arith.constant 0 : index
    %c0_35 = arith.constant 0 : index
    %c0_36 = arith.constant 0 : index
    %43 = vector.load %arg13[%c0_34, %c0_35, %c0_36] : memref<8x8x256xf32, #tpu.memory_space<vmem>>, vector<2x8x256xf32>
    tpu.vector_store %arg13[%c0_34, %c0_35, %c0_36], %42 {strides = array<i32>} : memref<8x8x256xf32, #tpu.memory_space<vmem>>, vector<2x8x256xf32>,
    %c0_37 = arith.constant 0 : index
    %c0_38 = arith.constant 0 : index
    %c0_39 = arith.constant 0 : index
    %44 = vector.load %arg13[%c0_37, %c0_38, %c0_39] : memref<8x8x256xf32, #tpu.memory_space<vmem>>, vector<8x8x256xf32>
    %45 = vector.shape_cast %44 : vector<8x8x256xf32> to vector<64x256xf32>
    %c0_40 = arith.constant 0 : index
    %c0_41 = arith.constant 0 : index
    %46 = vector.load %arg6[%c0_40, %c0_41] : memref<1x256xf32, #tpu.memory_space<vmem>>, vector<1x256xf32>
    %47 = vector.broadcast %46 : vector<1x256xf32> to vector<64x256xf32>
    %48 = arith.addf %45, %47 : vector<64x256xf32>
    %cst_42 = arith.constant 0.000000e+00 : f32
    %49 = vector.broadcast %cst_42 : f32 to vector<64x256xf32>
    %50 = arith.maximumf %48, %49 : vector<64x256xf32>
    %51 = arith.truncf %50 : vector<64x256xf32> to vector<64x256xbf16>
    %c0_43 = arith.constant 0 : index
    %c0_44 = arith.constant 0 : index
    %52 = vector.load %arg7[%c0_43, %c0_44] : memref<256x256xbf16, #tpu.memory_space<vmem>>, vector<256x256xbf16>
    %cst_45 = arith.constant dense<0.000000e+00> : vector<64x256xf32>
    %53 = tpu.matmul %51, %52, %cst_45 {dimension_numbers = #tpu.dot_dimension_numbers<[1], [0], [0], [1], [0, 0, 1, 1], [], []>} : vector<64x256xbf16>, vector<256x256xbf16>, vector<64x256xf32> -> vector<64x256xf32>
    %54 = arith.addf %12, %53 : vector<64x256xf32>
    %55 = arith.extf %2 : vector<64x320xbf16> to vector<64x320xf32>
    %cst_46 = arith.constant dense<0.000000e+00> : vector<320xf32>
    %56 = vector.multi_reduction <add>, %55, %cst_46 [0] : vector<64x320xf32> to vector<320xf32>
    %57 = vector.shape_cast %56 : vector<320xf32> to vector<1x320xf32>
    %cst_47 = arith.constant 6.400000e+01 : f32
    %58 = vector.broadcast %cst_47 : f32 to vector<1x320xf32>
    %59 = arith.divf %57, %58 : vector<1x320xf32>
    %60 = vector.shape_cast %59 : vector<1x320xf32> to vector<1x320xf32>
    %61 = vector.broadcast %60 : vector<1x320xf32> to vector<8x320xf32>
    %62 = arith.truncf %61 : vector<8x320xf32> to vector<8x320xbf16>
    %c0_48 = arith.constant 0 : index
    %c0_49 = arith.constant 0 : index
    %63 = vector.load %arg8[%c0_48, %c0_49] : memref<320x256xbf16, #tpu.memory_space<vmem>>, vector<320x256xbf16>
    %cst_50 = arith.constant dense<0.000000e+00> : vector<8x256xf32>
    %64 = tpu.matmul %62, %63, %cst_50 {dimension_numbers = #tpu.dot_dimension_numbers<[1], [0], [0], [1], [0, 0, 1, 1], [], []>} : vector<8x320xbf16>, vector<320x256xbf16>, vector<8x256xf32> -> vector<8x256xf32>
    %c0_51 = arith.constant 0 : index
    %c0_52 = arith.constant 0 : index
    %65 = vector.load %arg9[%c0_51, %c0_52] : memref<1x256xf32, #tpu.memory_space<vmem>>, vector<1x256xf32>
    %66 = vector.broadcast %65 : vector<1x256xf32> to vector<8x256xf32>
    %67 = arith.addf %64, %66 : vector<8x256xf32>
    %cst_53 = arith.constant 0.000000e+00 : f32
    %68 = vector.broadcast %cst_53 : f32 to vector<8x256xf32>
    %69 = arith.maximumf %67, %68 : vector<8x256xf32>
    %70 = arith.truncf %69 : vector<8x256xf32> to vector<8x256xbf16>
    %c0_54 = arith.constant 0 : index
    %c0_55 = arith.constant 0 : index
    %71 = vector.load %arg10[%c0_54, %c0_55] : memref<256x256xbf16, #tpu.memory_space<vmem>>, vector<256x256xbf16>
    %cst_56 = arith.constant dense<0.000000e+00> : vector<8x256xf32>
    %72 = tpu.matmul %70, %71, %cst_56 {dimension_numbers = #tpu.dot_dimension_numbers<[1], [0], [0], [1], [0, 0, 1, 1], [], []>} : vector<8x256xbf16>, vector<256x256xbf16>, vector<8x256xf32> -> vector<8x256xf32>
    %73 = vector.extract_strided_slice %72 {offsets = [0, 0], sizes = [1, 256], strides = [1, 1]} : vector<8x256xf32> to vector<1x256xf32>
    %74 = vector.broadcast %73 : vector<1x256xf32> to vector<64x256xf32>
    %75 = arith.addf %54, %74 : vector<64x256xf32>
    %c0_57 = arith.constant 0 : index
    %c0_58 = arith.constant 0 : index
    %76 = vector.load %arg11[%c0_57, %c0_58] : memref<1x256xf32, #tpu.memory_space<vmem>>, vector<1x256xf32>
    %77 = vector.broadcast %76 : vector<1x256xf32> to vector<64x256xf32>
    %78 = arith.addf %75, %77 : vector<64x256xf32>
    %cst_59 = arith.constant 0.000000e+00 : f32
    %79 = vector.broadcast %cst_59 : f32 to vector<64x256xf32>
    %80 = arith.maximumf %78, %79 : vector<64x256xf32>
    %81 = vector.shape_cast %80 : vector<64x256xf32> to vector<8x8x256xf32>
    %c0_60 = arith.constant 0 : index
    %c0_61 = arith.constant 0 : index
    %c0_62 = arith.constant 0 : index
    %c0_63 = arith.constant 0 : index
    %82 = vector.load %arg12[%c0_60, %c0_61, %c0_62, %c0_63] : memref<1x8x8x256xf32, #tpu.memory_space<vmem>>, vector<1x8x8x256xf32>
    %83 = vector.shape_cast %82 : vector<1x8x8x256xf32> to vector<8x8x256xf32>
    %84 = vector.shape_cast %81 : vector<8x8x256xf32> to vector<1x8x8x256xf32>
    tpu.vector_store %arg12[%c0_60, %c0_61, %c0_62, %c0_63], %84 {strides = array<i32>} : memref<1x8x8x256xf32, #tpu.memory_space<vmem>>, vector<1x8x8x256xf32>,
    return
  }
  func.func @transform_0(%arg0: i32) -> (i32, i32, i32, i32) {
    %c0_i32 = arith.constant 0 : i32
    %c0_i32_0 = arith.constant 0 : i32
    %c0_i32_1 = arith.constant 0 : i32
    %c0_i32_2 = arith.constant 0 : i32
    return %arg0, %c0_i32, %c0_i32_0, %c0_i32_1 : i32, i32, i32, i32
  }
  func.func @transform_1(%arg0: i32) -> (i32, i32) {
    %c0_i32 = arith.constant 0 : i32
    %c0_i32_0 = arith.constant 0 : i32
    %c0_i32_1 = arith.constant 0 : i32
    return %c0_i32, %c0_i32_0 : i32, i32
  }
  func.func @transform_2(%arg0: i32) -> (i32, i32) {
    %c0_i32 = arith.constant 0 : i32
    %c0_i32_0 = arith.constant 0 : i32
    %c0_i32_1 = arith.constant 0 : i32
    return %c0_i32, %c0_i32_0 : i32, i32
  }
  func.func @transform_3(%arg0: i32) -> (i32, i32) {
    %c0_i32 = arith.constant 0 : i32
    %c0_i32_0 = arith.constant 0 : i32
    %c0_i32_1 = arith.constant 0 : i32
    return %c0_i32, %c0_i32_0 : i32, i32
  }
  func.func @transform_4(%arg0: i32) -> (i32, i32, i32) {
    %c0_i32 = arith.constant 0 : i32
    %c0_i32_0 = arith.constant 0 : i32
    %c0_i32_1 = arith.constant 0 : i32
    %c0_i32_2 = arith.constant 0 : i32
    return %c0_i32, %c0_i32_0, %c0_i32_1 : i32, i32, i32
  }
  func.func @transform_5(%arg0: i32) -> (i32, i32) {
    %c0_i32 = arith.constant 0 : i32
    %c0_i32_0 = arith.constant 0 : i32
    %c0_i32_1 = arith.constant 0 : i32
    return %c0_i32, %c0_i32_0 : i32, i32
  }
  func.func @transform_6(%arg0: i32) -> (i32, i32) {
    %c0_i32 = arith.constant 0 : i32
    %c0_i32_0 = arith.constant 0 : i32
    %c0_i32_1 = arith.constant 0 : i32
    return %c0_i32, %c0_i32_0 : i32, i32
  }
  func.func @transform_7(%arg0: i32) -> (i32, i32) {
    %c0_i32 = arith.constant 0 : i32
    %c0_i32_0 = arith.constant 0 : i32
    %c0_i32_1 = arith.constant 0 : i32
    return %c0_i32, %c0_i32_0 : i32, i32
  }
  func.func @transform_8(%arg0: i32) -> (i32, i32) {
    %c0_i32 = arith.constant 0 : i32
    %c0_i32_0 = arith.constant 0 : i32
    %c0_i32_1 = arith.constant 0 : i32
    return %c0_i32, %c0_i32_0 : i32, i32
  }
  func.func @transform_9(%arg0: i32) -> (i32, i32) {
    %c0_i32 = arith.constant 0 : i32
    %c0_i32_0 = arith.constant 0 : i32
    %c0_i32_1 = arith.constant 0 : i32
    return %c0_i32, %c0_i32_0 : i32, i32
  }
  func.func @transform_10(%arg0: i32) -> (i32, i32) {
    %c0_i32 = arith.constant 0 : i32
    %c0_i32_0 = arith.constant 0 : i32
    %c0_i32_1 = arith.constant 0 : i32
    return %c0_i32, %c0_i32_0 : i32, i32
  }
  func.func @transform_11(%arg0: i32) -> (i32, i32, i32, i32) {
    %c0_i32 = arith.constant 0 : i32
    %c0_i32_0 = arith.constant 0 : i32
    %c0_i32_1 = arith.constant 0 : i32
    %c0_i32_2 = arith.constant 0 : i32
    return %arg0, %c0_i32, %c0_i32_0, %c0_i32_1 : i32, i32, i32, i32
  }
}

</mosaic_0001>

<bundles_post_ra>
// kernel: _lambda_.1
= control target key start
LH: loop header
LB: loop body
LE: loop exit
PB: predicated region body
PF: predicated region fallthrough
CT: control target
= control target key end

     0   :  { %s13369_s0 = inlined_call_operand.vmem [shape: bf16[2,8,8,320], index: 0, kind: input, shape index: {}]   ;;  %s13370_s1 = inlined_call_operand.hbm [shape: bf16[320,768], index: 1, kind: input, shape index: {}]   ;;  %s13371_s2 = inlined_call_operand.vmem [shape: f32[1,768], index: 2, kind: input, shape index: {}]   ;;  %s13372_s3 = inlined_call_operand.hbm [shape: bf16[768,256], index: 3, kind: input, shape index: {}]   ;;  %s13373_s4 = inlined_call_operand.hbm [shape: bf16[3,960,256], index: 4, kind: input, shape index: {}]   ;;  %s13374_s5 = inlined_call_operand.vmem [shape: f32[1,256], index: 5, kind: input, shape index: {}, may-alias: {5,8,10}]   ;;  %s13375_s6 = inlined_call_operand.hbm [shape: bf16[256,256], index: 6, kind: input, shape index: {}]   ;;  %s13376_s7 = inlined_call_operand.hbm [shape: bf16[320,256], index: 7, kind: input, shape index: {}]   ;;  %s13377_s8 = inlined_call_operand.vmem [shape: f32[1,256], index: 8, kind: input, shape index: {}, may-alias: {5,8,10}]   ;;  %s13378_s9 = inlined_call_operand.hbm [shape: bf16[256,256], index: 9, kind: input, shape index: {}]   ;;  %s13379_s10 = inlined_call_operand.vmem [shape: f32[1,256], index: 10, kind: input, shape index: {}, may-alias: {5,8,10}]   ;;  %s13380_s11 = inlined_call_operand.hbm [shape: f32[2,8,8,256], index: 11, kind: output, shape index: {}]  }
   0x1   :  { %13440 = sst [smem:[#allocation71_spill]] %s13370_s1 }
   0x2   :  { %13441 = sst [smem:[#allocation72_spill]] %s13372_s3 }
   0x3   :  { %13442 = sst [smem:[#allocation73_spill]] %s13375_s6 }
   0x4   :  { %16 = vsyncpa [#allocation4], 0 }
   0x5   :  { %17 = vsyncpa [#allocation7], 0 }
   0x6   :  { %18 = vsyncpa [#allocation10], 0 }
   0x7   :  { %19 = vsyncpa [#allocation13], 0 }
   0x8   :  { %20 = vsyncpa [#allocation5], 0 }
   0x9   :  { %22 = vsyncpa [#allocation5 + $0x1], 0  ;;  %s11531_s17 = smov 0   ;;  %s11533_s18 = smov 0  }
   0xa   :  { %s11535_s19 = smov 0   ;;  %s11537_s20 = smov 0  }
   0xb LB: > { %13443 = sst [smem:[#allocation20_spill]] %s11443_s17  ;;  %s11552_s21 = sadd.s32 4294967295, %s11455_s20   ;;  %s11455_s20 = sphi %s11537_s20, %s13587_s20   ;;  %s11451_s19 = sphi %s11535_s19, %s13589_s19   ;;  %s11447_s18 = sphi %s11533_s18, %s13591_s18   ;;  %s11443_s17 = sphi %s11531_s17, %s13590_s17  }
   0xc   : > { %13444 = sst [smem:[#allocation21_spill]] %s11451_s19  ;;  %s7617_s22 = sadd.s32 4294967294, %s11455_s20  }
   0xd   : > { %s11556_s23 = sadd.s32 1, %s11455_s20   ;;  %s271_s24 = sadd.s32 1, %s11451_s19 }
   0xe   : > { %13445 = sst [smem:[#allocation22_spill]] %s11556_s23  ;;  %s268_s25 = ssub.s32 %s11455_s20, %s11556_s23 }
   0xf   : > { %p281_p0 = scmp.ne.s32.totalorder %s11451_s19, %s11447_s18  ;;  %p269_p1 = scmp.eq.s32.totalorder %s268_s25, 0 }
  0x10   : > { %p282_p2 = scmp.eq.s32.totalorder %s11552_s21, 1  ;;  %p287_p3 = scmp.ne.s32.totalorder %s11447_s18, %s11443_s17 }
  0x11   : > { %p288_p4 = scmp.eq.s32.totalorder %s7617_s22, 1  ;;  %p7618_p7 = scmp.ge.s32.totalorder %s11455_s20, 1 }
  0x12   : > { %s11567_s26 = scalar_select %p269_p1, %s11451_s19, %s271_s24  }
  0x13   : > { %p11569_p5 = por %p282_p2, %p281_p0  ;;  %p11573_p6 = por %p288_p4, %p287_p3 }
  0x14   : > { %13446 = sst [smem:[#allocation23_spill]] %s11567_s26  ;;  %p295_p8 = scmp.lt.s32.totalorder %s11455_s20, 3 }
  0x15   : > { %s13448_s28 = scalar_select %p11573_p6, 1, 0 }
  0x16   : > { %p11129_p9 = scmp.eq.s32.totalorder %s11552_s21, 0  ;;  %p11580_p10 = pnand %p7618_p7, %p295_p8 }
  0x17   : > { %13449 = sst [smem:[#allocation24_spill]] %s13448_s28  ;;  %s11457_s14 = smov [#allocation6]  }
  0x18   : > { %s13451_s3 = sld [smem:[#allocation72_spill]]  ;;  %p11106_p11 = pneg %p11580_p10 }
  0x19   : > { %s325_s15 = sshll.u32 %s11457_s14, 4  ;;  %s13453_s6 = sld [smem:[#allocation73_spill]]  ;;  %s326_s15 = int_to_ptr.vmem [resolvable:$true] %s325_s15 }
  0x1a   : > { %p11591_p12 = pnand %p11129_p9, %p11106_p11  ;;  %s11458_s30 = smov 128  }
  0x1b   : > { %s11459_s12 = smov 8   ;;  %s11460_s14 = smov [#allocation9]  }
  0x1c   : > { %s13454_s1 = sld [smem:[#allocation71_spill]]  ;;  %s11461_s22 = smov [#allocation3]  }
  0x1d   : > { %s308_s24 = sshll.u32 %s11461_s22, 4  ;;  %s11464_s19 = smov [#allocation8]   ;;  %s309_s24 = int_to_ptr.vmem [resolvable:$true] %s308_s24 }
  0x1e   : > { %s323_s13 = sshll.u32 %s13451_s3, 4  ;;  %s356_s3 = sshll.u32 %s11460_s14, 4  ;;  %s324_s13 = int_to_ptr.hbm [resolvable:$true] %s323_s13  ;;  %s357_s3 = int_to_ptr.vmem [resolvable:$true] %s356_s3 }
  0x1f   : > { %s354_s25 = sshll.u32 %s13453_s6, 4  ;;  %s11463_s14 = smov 24   ;;  %s355_s25 = int_to_ptr.hbm [resolvable:$true] %s354_s25 }
  0x20   : > { %11112 = dma.hbm_to_vmem [thread:$0]  (!%p11591_p12), %s324_s13, 12288, %s326_s15, [#allocation7], %s11458_s30, %s11458_s30, %s11459_s12  }
  0x21   : > { %11118 = dma.hbm_to_vmem [thread:$0]  (!%p11591_p12), %s355_s25, 4096, %s357_s3, [#allocation10], %s11458_s30, %s11458_s30, %s11459_s12  }
  0x22   : > { %s306_s23 = sshll.u32 %s13454_s1, 4  ;;  %s337_s13 = sshll.u32 %s13373_s4, 4  ;;  %s307_s23 = int_to_ptr.hbm [resolvable:$true] %s306_s23  ;;  %s338_s13 = int_to_ptr.hbm [resolvable:$true] %s337_s13 }
  0x23   : > { %s11462_s15 = smov 384   ;;  %s339_s26 = sshll.u32 %s11464_s19, 4  ;;  %s340_s26 = int_to_ptr.vmem [resolvable:$true] %s339_s26 }
  0x24   : > { %11109 = dma.hbm_to_vmem [thread:$0]  (!%p11591_p12), %s307_s23, 15360, %s309_s24, [#allocation4], %s11462_s15, %s11462_s15, %s11463_s14  }
  0x25   : > { %s368_s3 = sshll.u32 %s13376_s7, 4  ;;  %s385_s25 = sshll.u32 %s13378_s9, 4  ;;  %s369_s3 = int_to_ptr.hbm [resolvable:$true] %s368_s3  ;;  %s386_s25 = int_to_ptr.hbm [resolvable:$true] %s385_s25 }
  0x26   : > { %11115 = dma.hbm_to_vmem [thread:$0]  (!%p11591_p12), %s338_s13, 46080, %s340_s26, [#allocation7], %s11458_s30, %s11458_s30, %s11459_s12  }
  0x27   : > { %s11465_s23 = smov [#allocation11]   ;;  %s11466_s1 = smov [#allocation12]  }
  0x28   : > { %s370_s22 = sshll.u32 %s11465_s23, 4  ;;  %s387_s17 = sshll.u32 %s11466_s1, 4  ;;  %s371_s22 = int_to_ptr.vmem [resolvable:$true] %s370_s22  ;;  %s388_s17 = int_to_ptr.vmem [resolvable:$true] %s387_s17 }
  0x29   : > { %11121 = dma.hbm_to_vmem [thread:$0]  (!%p11591_p12), %s369_s3, 5120, %s371_s22, [#allocation10], %s11458_s30, %s11458_s30, %s11459_s12  }
  0x2a   : > { %11124 = dma.hbm_to_vmem [thread:$0]  (!%p11591_p12), %s386_s25, 4096, %s388_s17, [#allocation13], %s11458_s30, %s11458_s30, %s11459_s12  }
  0x2b   : > { %414 = sbr.rel (%p11580_p10) target bundleno = 1531 (0x5fb), region = 64 }
  0x30   : > { %11422 = dma.done.wait (%p11129_p9), [#allocation4], 15360  }
  0x31   : > { %11424 = vsyncadd (%p11129_p9), [#allocation4], 4294951936 }
  0x32   : > { %11426 = dma.done.wait (%p11129_p9), [#allocation7], 58368  }
  0x33   : > { %11428 = vsyncadd (%p11129_p9), [#allocation7], 4294908928 }
  0x34   : > { %11430 = dma.done.wait (%p11129_p9), [#allocation10], 9216  }
  0x35   : > { %11432 = vsyncadd (%p11129_p9), [#allocation10], 4294958080 }
  0x36   : > { %11434 = dma.done.wait (%p11129_p9), [#allocation13], 4096  }
  0x37   : > { %11436 = vsyncadd (%p11129_p9), [#allocation13], 4294963200  ;;  %p480_p13 = scmp.lt.s32.totalorder %s11552_s21, 1  ;;  %v7805_v0 = vld [vmem:[#allocation3 + $0x150] sm:$0xf]  ;;  %vm1296_vm0 = vcmask 523264  }
  0x38   : > { %v10443_v1 = vld [vmem:[#allocation3 + $0x164] sm:$0xf0]  ;;  %v7997_v2 = vld [vmem:[#allocation3 + $0x2d0] sm:$0xf]  ;;  %v10440_v9 = vld [vmem:[#allocation3 + $0x154] sm:$0xf] }
  0x39   : > { %s11657_s29 = scalar_select %p480_p13, %s11552_s21, 1  ;;  %v7806_v3 = vor.u32 %v10443_v1, %v7805_v0  ;;  %v10491_v4 = vld [vmem:[#allocation3 + $0x2e4] sm:$0xf0]  ;;  %v8093_v5 = vld [vmem:[#allocation3 + $0x390] sm:$0xf]  ;;  %vm2047_vm1 = vcmask 1042432  }
  0x3a   : > { %v10515_v6 = vld [vmem:[#allocation3 + $0x3a4] sm:$0xf0]  ;;  %v7998_v7 = vor.u32 %v10491_v4, %v7997_v2  ;;  %v7807_v10 = vld [vmem:[#allocation3 + $0x168] sm:$0xf0]  ;;  %v7781_v11 = vld [vmem:[#allocation3 + $0x120] sm:$0xf] }
  0x3b   : > { %s11079_s16 = smul.u32 96, %s11657_s29  ;;  %v8094_v8 = vor.u32 %v10515_v6, %v8093_v5  ;;  %1309 = vmatpush.bf16.msra.mxu0 %v7806_v3  ;;  %v7810_v12 = vor.u32 %v10440_v9, %v7807_v10  ;;  %v10437_v13 = vld [vmem:[#allocation3 + $0x134] sm:$0xf0]  ;;  %v7973_v14 = vld [vmem:[#allocation3 + $0x2a0] sm:$0xf]  ;;  %s11467_s13 = smov 64  }
  0x3c   : > { %v10485_v15 = vld [vmem:[#allocation3 + $0x2b4] sm:$0xf0]  ;;  %1338 = vmatpush.bf16.msra.mxu1 %v7998_v7  ;;  %v7782_v16 = vor.u32 %v10437_v13, %v7781_v11  ;;  %v8069_v18 = vld [vmem:[#allocation3 + $0x360] sm:$0xf]  ;;  %v10434_v20 = vld [vmem:[#allocation3 + $0x124] sm:$0xf] }
  0x3d   : > { %1371 = vmatpush.bf16.msra.mxu2 %v8094_v8  ;;  %v7974_v17 = vor.u32 %v10485_v15, %v7973_v14  ;;  %v10509_v19 = vld [vmem:[#allocation3 + $0x374] sm:$0xf0]  ;;  %1396 = vmatpush.bf16.msra.mxu3 %v7810_v12  ;;  %v7783_v22 = vld [vmem:[#allocation3 + $0x138] sm:$0xf0]  ;;  %v7757_v23 = vld [vmem:[#allocation3 + $0xf0] sm:$0xf]  ;;  %s11665_s24 = scalar_lea.vmem %s13369_s0, %s11079_s16 }
  0x3e   : > { %v8070_v21 = vor.u32 %v10509_v19, %v8069_v18  ;;  %v10431_v24 = vld [vmem:[#allocation3 + $0x104] sm:$0xf0]  ;;  %v7786_v25 = vor.u32 %v10434_v20, %v7783_v22  ;;  %v7949_v26 = vld [vmem:[#allocation3 + $0x270] sm:$0xf]  ;;  %v10428_v31 = vld [vmem:[#allocation3 + $0xf4] sm:$0xf] }
  0x3f   : > { %v10479_v27 = vld [vmem:[#allocation3 + $0x284] sm:$0xf0]  ;;  %v8045_v28 = vld [vmem:[#allocation3 + $0x330] sm:$0xf]  ;;  %1310 = vmatpush.bf16.msra.mxu0 %v7782_v16  ;;  %v7758_v29 = vor.u32 %v10431_v24, %v7757_v23  ;;  %v7759_v32 = vld [vmem:[#allocation3 + $0x108] sm:$0xf0] }
  0x40   : > { %v10503_v30 = vld [vmem:[#allocation3 + $0x344] sm:$0xf0]  ;;  %1339 = vmatpush.bf16.msra.mxu1 %v7974_v17  ;;  %v7950_v33 = vor.u32 %v10479_v27, %v7949_v26  ;;  %v7733_v35 = vld [vmem:[#allocation3 + $0xc0] sm:$0xf]  ;;  %v10425_v36 = vld [vmem:[#allocation3 + $0xd4] sm:$0xf0]  ;;  %v7762_v38 = vor.u32 %v10428_v31, %v7759_v32 }
  0x41   : > { %1372 = vmatpush.bf16.msra.mxu2 %v8070_v21  ;;  %v8046_v34 = vor.u32 %v10503_v30, %v8045_v28  ;;  %v7925_v37 = vld [vmem:[#allocation3 + $0x240] sm:$0xf]  ;;  %1397 = vmatpush.bf16.msra.mxu3 %v7786_v25  ;;  %v10473_v39 = vld [vmem:[#allocation3 + $0x254] sm:$0xf0]  ;;  %v10422_v42 = vld [vmem:[#allocation3 + $0xc4] sm:$0xf]  ;;  %v7734_v45 = vor.u32 %v10425_v36, %v7733_v35 }
  0x42   : > { %v8021_v40 = vld [vmem:[#allocation3 + $0x300] sm:$0xf]  ;;  %v10497_v41 = vld [vmem:[#allocation3 + $0x314] sm:$0xf0]  ;;  %v7735_v43 = vld [vmem:[#allocation3 + $0xd8] sm:$0xf0]  ;;  %v7926_v49 = vor.u32 %v10473_v39, %v7925_v37 }
  0x43   : > { %v487_v44 = vld [vmem:[%s11665_s24 + $0x8] sm:$0xf]  ;;  %1311 = vmatpush.bf16.msra.mxu0 %v7758_v29  ;;  %v489_v46 = vld [vmem:[%s11665_s24 + $0x14] sm:$0xf]  ;;  %v8022_v50 = vor.u32 %v10497_v41, %v8021_v40  ;;  %v7709_v53 = vld [vmem:[#allocation3 + $0x90] sm:$0xf]  ;;  %v7738_v55 = vor.u32 %v10422_v42, %v7735_v43 }
  0x44   : > { %v11669_v47 = vunpack.c.l.b16 %v487_v44  ;;  %v6750_v48 = vunpack.c.l.bf16 %v487_v44  ;;  %1340 = vmatpush.bf16.msra.mxu1 %v7950_v33  ;;  %v11671_v51 = vunpack.c.l.b16 %v489_v46  ;;  %v6753_v52 = vunpack.c.l.bf16 %v489_v46  ;;  %v10419_v54 = vld [vmem:[#allocation3 + $0xa4] sm:$0xf0]  ;;  %v7901_v57 = vld [vmem:[#allocation3 + $0x210] sm:$0xf]  ;;  %v10416_v60 = vld [vmem:[#allocation3 + $0x94] sm:$0xf] }
  0x45   : > { %1373 = vmatpush.bf16.msra.mxu2 %v8046_v34  ;;  %1398 = vmatpush.bf16.msra.mxu3 %v7762_v38  ;;  %v10467_v58 = vld [vmem:[#allocation3 + $0x224] sm:$0xf0]  ;;  %v7711_v61 = vld [vmem:[#allocation3 + $0xa8] sm:$0xf0]  ;;  %v486_v62 = vld [vmem:[%s11665_s24] sm:$0xff]  ;;  %v7710_v1 = vor.u32 %v10419_v54, %v7709_v53  ;;  %vm2121_vm2 = vcmask 1040384  }
  0x46   : > { %v6798_v56 = vsel %vm1296_vm0, %v6750_v48, 0.0  ;;  %v6799_v59 = vsel %vm1296_vm0, %v6753_v52, 0.0  ;;  %v11678_v63 = vpack.c.b16 %v11671_v51, %v11669_v47  ;;  %v488_v2 = vld [vmem:[%s11665_s24 + $0xc] sm:$0xff]  ;;  %v6748_v3 = vunpack.c.l.bf16 %v486_v62  ;;  %v7685_v5 = vld [vmem:[#allocation3 + $0x60] sm:$0xf]  ;;  %v11686_v28 = vld [vmem:[%s11665_s24 + $0x18] sm:$0xff] }
  0x47   : > { %1312 = vmatpush.bf16.msra.mxu0 %v7734_v45  ;;  %v6800_v0 = vadd.f32 %v6799_v59, %v6798_v56  ;;  %v7902_v4 = vor.u32 %v10467_v58, %v7901_v57  ;;  %v10413_v6 = vld [vmem:[#allocation3 + $0x74] sm:$0xf0]  ;;  %v6749_v7 = vunpack.c.h.bf16 %v486_v62  ;;  %v6751_v8 = vunpack.c.l.bf16 %v488_v2  ;;  %v7877_v10 = vld [vmem:[#allocation3 + $0x1e0] sm:$0xf]  ;;  %v10410_v13 = vld [vmem:[#allocation3 + $0x64] sm:$0xf] }
  0x48   : > { %1341 = vmatpush.bf16.msra.mxu1 %v7926_v49  ;;  %v7714_v9 = vor.u32 %v10416_v60, %v7711_v61  ;;  %v10461_v11 = vld [vmem:[#allocation3 + $0x1f4] sm:$0xf0]  ;;  %v6752_v12 = vunpack.c.h.bf16 %v488_v2  ;;  %v7687_v14 = vld [vmem:[#allocation3 + $0x78] sm:$0xf0]  ;;  %v7686_v16 = vor.u32 %v10413_v6, %v7685_v5  ;;  %v7661_v17 = vld [vmem:[#allocation3 + $0x30] sm:$0xf]  ;;  %v6754_v32 = vunpack.c.l.bf16 %v11686_v28 }
  0x49   : > { %1374 = vmatpush.bf16.msra.mxu2 %v8022_v50  ;;  %1399 = vmatpush.bf16.msra.mxu3 %v7738_v55  ;;  %v6772_v15 = vadd.f32 %v6751_v8, %v6748_v3  ;;  %v7878_v19 = vor.u32 %v10461_v11, %v7877_v10  ;;  %v10407_v20 = vld [vmem:[#allocation3 + $0x44] sm:$0xf0]  ;;  %v491_v21 = vld [vmem:[%s11665_s24 + $0x20] sm:$0xf]  ;;  %v493_v22 = vld [vmem:[%s11665_s24 + $0x2c] sm:$0xf]  ;;  %v7690_v23 = vor.u32 %v10410_v13, %v7687_v14  ;;  %v6755_v33 = vunpack.c.h.bf16 %v11686_v28 }
  0x4a   : > { %v6785_v18 = vadd.f32 %v6752_v12, %v6749_v7  ;;  %v7853_v24 = vld [vmem:[#allocation3 + $0x1b0] sm:$0xf]  ;;  %v10455_v25 = vld [vmem:[#allocation3 + $0x1c4] sm:$0xf0]  ;;  %v6756_v26 = vunpack.c.l.bf16 %v491_v21  ;;  %v6759_v27 = vunpack.c.l.bf16 %v493_v22  ;;  %v10404_v29 = vld [vmem:[#allocation3 + $0x34] sm:$0xf]  ;;  %v7662_v34 = vor.u32 %v10407_v20, %v7661_v17 }
  0x4b   : > { %1313 = vmatpush.bf16.msra.mxu0 %v7710_v1  ;;  %v7663_v30 = vld [vmem:[#allocation3 + $0x48] sm:$0xf0]  ;;  %v7637_v31 = vld [vmem:[#allocation3] sm:$0xf]  ;;  %v10401_v35 = vld [vmem:[#allocation3 + $0x14] sm:$0xf0]  ;;  %v7854_v39 = vor.u32 %v10455_v25, %v7853_v24  ;;  %v11692_v41 = vunpack.c.l.b16 %v486_v62  ;;  %v11694_v43 = vadd.f32 %v6772_v15, %v6754_v32  ;;  %v11696_v49 = vunpack.c.l.b16 %v488_v2 }
  0x4c   : > { %8115 = vmatmul.msk.bf16.vlgmr.msra.gmra.mxu2 %vm1296_vm0, %v11678_v63  ;;  %1342 = vmatpush.bf16.msra.mxu1 %v7902_v4  ;;  %v7829_v36 = vld [vmem:[#allocation3 + $0x180] sm:$0xf]  ;;  %v6801_v37 = vsel %vm1296_vm0, %v6756_v26, 0.0  ;;  %v6803_v38 = vsel %vm1296_vm0, %v6759_v27, 0.0  ;;  %v10449_v40 = vld [vmem:[#allocation3 + $0x194] sm:$0xf0]  ;;  %v7666_v46 = vor.u32 %v10404_v29, %v7663_v30  ;;  %v11698_v50 = vunpack.c.h.b16 %v486_v62 }
  0x4d   : > { %1400 = vmatpush.bf16.msra.mxu3 %v7714_v9  ;;  %v6802_v42 = vadd.f32 %v6801_v37, %v6800_v0  ;;  %13455 = vst [vmem:[#allocation25_spill] sm:$0xff] %v11694_v43  ;;  %v10488_v44 = vld [vmem:[#allocation3 + $0x2d4] sm:$0xf]  ;;  %v7999_v45 = vld [vmem:[#allocation3 + $0x2e8] sm:$0xf0]  ;;  %v11700_v52 = vadd.f32 %v6785_v18, %v6755_v33  ;;  %v11708_v56 = vunpack.c.h.b16 %v488_v2  ;;  %v7638_v0 = vor.u32 %v10401_v35, %v7637_v31  ;;  %s477_s29 = sand.u32 1, %s11447_s18  }
  0x4e   : > { %v10398_v48 = vld [vmem:[#allocation3 + $0x4] sm:$0xf]  ;;  %v11703_v53 = vld [vmem:[%s11665_s24 + $0x38] sm:$0xf]  ;;  %v7639_v55 = vld [vmem:[#allocation3 + $0x18] sm:$0xf0]  ;;  %v11712_v62 = vunpack.c.l.b16 %v491_v21  ;;  %v11714_v1 = vunpack.c.l.b16 %v493_v22  ;;  %v8002_v3 = vor.u32 %v10488_v44, %v7999_v45  ;;  %v7830_v4 = vor.u32 %v10449_v40, %v7829_v36 }
  0x4f   : > { %1314 = vmatpush.bf16.msra.mxu0 %v7686_v16  ;;  %13456 = vst [vmem:[#allocation26_spill] sm:$0xff] %v11700_v52  ;;  %v11706_v54 = vld [vmem:[%s11665_s24 + $0x44] sm:$0xf]  ;;  %v6804_v57 = vadd.f32 %v6803_v38, %v6802_v42  ;;  %v6762_v58 = vunpack.c.l.bf16 %v11703_v53  ;;  %v7975_v61 = vld [vmem:[#allocation3 + $0x2b8] sm:$0xf0]  ;;  %v7642_v6 = vor.u32 %v10398_v48, %v7639_v55  ;;  %v11720_v9 = vpack.c.b16 %v11696_v49, %v11692_v41  ;;  %s7633_s16 = sshll.u32 %s477_s29, 7 }
  0x50   : > { %1343 = vmatpush.bf16.msra.mxu1 %v7878_v19  ;;  %v6765_v59 = vunpack.c.l.bf16 %v11706_v54  ;;  %v10482_v60 = vld [vmem:[#allocation3 + $0x2a4] sm:$0xf]  ;;  %1425 = vmatpush.bf16.msrb.mxu2 %v8002_v3  ;;  %v10476_v10 = vld [vmem:[#allocation3 + $0x274] sm:$0xf]  ;;  %v7951_v11 = vld [vmem:[#allocation3 + $0x288] sm:$0xf0]  ;;  %v11724_v12 = vpack.c.b16 %v11708_v56, %v11698_v50  ;;  %v11728_v13 = vpack.c.b16 %v11714_v1, %v11712_v62 }
  0x51   : > { %1401 = vmatpush.bf16.msra.mxu3 %v7690_v23  ;;  %v6805_v5 = vsel %vm1296_vm0, %v6762_v58, 0.0  ;;  %v7978_v8 = vor.u32 %v10482_v60, %v7975_v61  ;;  %v7954_v15 = vor.u32 %v10476_v10, %v7951_v11  ;;  %v10470_v16 = vld [vmem:[#allocation3 + $0x244] sm:$0xf]  ;;  %v7927_v17 = vld [vmem:[#allocation3 + $0x258] sm:$0xf0]  ;;  %v11749_v61 = vunpack.c.l.b16 %v11686_v28  ;;  %s13309_s30 = scalar_lea.vmem [#allocation14], %s7633_s16 }
  0x52   : > { %v6807_v2 = vsel %vm1296_vm0, %v6765_v59, 0.0  ;;  %v6806_v7 = vadd.f32 %v6805_v5, %v6804_v57  ;;  %v11732_v18 = vld [vmem:[%s11665_s24 + $0x50] sm:$0xf]  ;;  %v11735_v19 = vld [vmem:[%s11665_s24 + $0x5c] sm:$0xf]  ;;  %v7930_v32 = vor.u32 %v10470_v16, %v7927_v17  ;;  %v492_v44 = vld [vmem:[%s11665_s24 + $0x24] sm:$0xff]  ;;  %v11762_v10 = vunpack.c.l.b16 %v11706_v54 }
  0x53   : > { %1315 = vmatpush.bf16.msra.mxu0 %v7662_v34  ;;  %v7813_v20 = vld [vmem:[#allocation3 + $0x158] sm:$0xf]  ;;  %v6768_v21 = vunpack.c.l.bf16 %v11732_v18  ;;  %v6771_v22 = vunpack.c.l.bf16 %v11735_v19  ;;  %v10444_v23 = vld [vmem:[#allocation3 + $0x16c] sm:$0xf0]  ;;  %v10464_v26 = vld [vmem:[#allocation3 + $0x214] sm:$0xf] }
  0x54   : > { %1344 = vmatpush.bf16.msra.mxu1 %v7854_v39  ;;  %v6808_v14 = vadd.f32 %v6807_v2, %v6806_v7  ;;  %1426 = vmatpush.bf16.msrb.mxu2 %v7978_v8  ;;  %v8005_v24 = vld [vmem:[#allocation3 + $0x2d8] sm:$0xf]  ;;  %v10492_v25 = vld [vmem:[#allocation3 + $0x2ec] sm:$0xf0]  ;;  %v7903_v27 = vld [vmem:[#allocation3 + $0x228] sm:$0xf0]  ;;  %v7814_v29 = vor.u32 %v10444_v23, %v7813_v20  ;;  %v11756_v7 = vunpack.c.h.b16 %v492_v44  ;;  %v11759_v8 = vunpack.c.l.b16 %v11703_v53 }
  0x55   : > { %1402 = vmatpush.bf16.msra.mxu3 %v7666_v46  ;;  %v8006_v30 = vor.u32 %v10492_v25, %v8005_v24  ;;  %v10512_v31 = vld [vmem:[#allocation3 + $0x394] sm:$0xf]  ;;  %v6809_v33 = vsel %vm1296_vm0, %v6768_v21, 0.0  ;;  %v6811_v34 = vsel %vm1296_vm0, %v6771_v22, 0.0  ;;  %v8095_v35 = vld [vmem:[#allocation3 + $0x3a8] sm:$0xf0]  ;;  %v7906_v60 = vor.u32 %v10464_v26, %v7903_v27 }
  0x56   : > { %v7789_v36 = vld [vmem:[#allocation3 + $0x128] sm:$0xf]  ;;  %v6810_v37 = vadd.f32 %v6809_v33, %v6808_v14  ;;  %v8098_v38 = vor.u32 %v10512_v31, %v8095_v35  ;;  %v10438_v39 = vld [vmem:[#allocation3 + $0x13c] sm:$0xf0]  ;;  %v7765_v48 = vld [vmem:[#allocation3 + $0xf8] sm:$0xf]  ;;  %v11774_v54 = vpack.c.b16 %v11762_v10, %v11759_v8 }
  0x57   : > { %1316 = vmatpush.bf16.msra.mxu0 %v7638_v0  ;;  %v7981_v40 = vld [vmem:[#allocation3 + $0x2a8] sm:$0xf]  ;;  %v10486_v42 = vld [vmem:[#allocation3 + $0x2bc] sm:$0xf0]  ;;  %v7790_v45 = vor.u32 %v10438_v39, %v7789_v36  ;;  %v10432_v57 = vld [vmem:[#allocation3 + $0x10c] sm:$0xf0]  ;;  %v11751_v0 = vunpack.c.l.b16 %v492_v44 }
  0x58   : > { %1345 = vmatpush.bf16.msra.mxu1 %v7830_v4  ;;  %1427 = vmatpush.bf16.msrb.mxu2 %v7954_v15  ;;  %v7982_v46 = vor.u32 %v10486_v42, %v7981_v40  ;;  %v11746_v55 = vadd.f32 %v6811_v34, %v6810_v37  ;;  %v7957_v58 = vld [vmem:[#allocation3 + $0x278] sm:$0xf]  ;;  %v10480_v59 = vld [vmem:[#allocation3 + $0x28c] sm:$0xf0]  ;;  %v10458_v3 = vld [vmem:[#allocation3 + $0x1e4] sm:$0xf]  ;;  %v7766_v5 = vor.u32 %v10432_v57, %v7765_v48 }
  0x59   : > { %1403 = vmatpush.bf16.msra.mxu3 %v7642_v6  ;;  %v7879_v4 = vld [vmem:[#allocation3 + $0x1f8] sm:$0xf0]  ;;  %v7958_v2 = vor.u32 %v10480_v59, %v7957_v58  ;;  %v11754_v6 = vunpack.c.h.b16 %v11686_v28  ;;  %v7741_v11 = vld [vmem:[#allocation3 + $0xc8] sm:$0xf]  ;;  %v10426_v14 = vld [vmem:[#allocation3 + $0xdc] sm:$0xf0]  ;;  %v11766_v17 = vpack.c.b16 %v11751_v0, %v11749_v61 }
  0x5a   : > { %1317 = vmatmul.bf16.vlgmr.msra.gmra.mxu0 %v11720_v9  ;;  %13457 = vst [vmem:[#allocation27_spill] sm:$0xff] %v11746_v55  ;;  %v7882_v15 = vor.u32 %v10458_v3, %v7879_v4  ;;  %v10452_v16 = vld [vmem:[#allocation3 + $0x1b4] sm:$0xf]  ;;  %v7855_v20 = vld [vmem:[#allocation3 + $0x1c8] sm:$0xf0]  ;;  %v7742_v28 = vor.u32 %v10426_v14, %v7741_v11  ;;  %v496_v57 = vld [vmem:[%s11665_s24 + $0x3c] sm:$0xff] }
  0x5b   : > { %1346 = vmatmul.bf16.vlgmr.msra.gmra.mxu1 %v11724_v12  ;;  %1458 = vmatpush.bf16.msrb.mxu0 %v8098_v38  ;;  %v7933_v21 = vld [vmem:[#allocation3 + $0x248] sm:$0xf]  ;;  %v10474_v22 = vld [vmem:[#allocation3 + $0x25c] sm:$0xf0]  ;;  %v11770_v53 = vpack.c.b16 %v11756_v7, %v11754_v6  ;;  %v7858_v23 = vor.u32 %v10452_v16, %v7855_v20  ;;  %v10446_v24 = vld [vmem:[#allocation3 + $0x184] sm:$0xf]  ;;  %v11785_v11 = vunpack.c.l.b16 %v496_v57 }
  0x5c   : > { %8116 = vmatmul.msk.bf16.gmra.mxu2 %vm1296_vm0, %v11728_v13  ;;  %1404 = vmatmul.bf16.vlgmr.msra.gmra.mxu3 %v11720_v9  ;;  %v7831_v25 = vld [vmem:[#allocation3 + $0x198] sm:$0xf0]  ;;  %v7934_v26 = vor.u32 %v10474_v22, %v7933_v21  ;;  %v7717_v27 = vld [vmem:[#allocation3 + $0x98] sm:$0xf]  ;;  %v10506_v33 = vld [vmem:[#allocation3 + $0x364] sm:$0xf]  ;;  %v11792_v21 = vunpack.c.l.b16 %v11732_v18  ;;  %v11795_v22 = vunpack.c.l.b16 %v11735_v19 }
  0x5d   : > { %1483 = vmatpush.bf16.msrb.mxu1 %v7814_v29  ;;  %1512 = vmatpush.bf16.msrb.mxu3 %v8006_v30  ;;  %v10420_v29 = vld [vmem:[#allocation3 + $0xac] sm:$0xf0]  ;;  %v7909_v30 = vld [vmem:[#allocation3 + $0x218] sm:$0xf]  ;;  %v8071_v34 = vld [vmem:[#allocation3 + $0x378] sm:$0xf0]  ;;  %v7834_v37 = vor.u32 %v10446_v24, %v7831_v25 }
  0x5e   : > { %1428 = vmatpush.bf16.msrb.mxu2 %v7930_v32  ;;  %v7718_v31 = vor.u32 %v10420_v29, %v7717_v27  ;;  %v10468_v32 = vld [vmem:[#allocation3 + $0x22c] sm:$0xf0]  ;;  %v7693_v35 = vld [vmem:[#allocation3 + $0x68] sm:$0xf]  ;;  %v8074_v39 = vor.u32 %v10506_v33, %v8071_v34  ;;  %v10414_v40 = vld [vmem:[#allocation3 + $0x7c] sm:$0xf0] }
  0x5f   : > { %v494_v36 = vld [vmem:[%s11665_s24 + $0x30] sm:$0xff]  ;;  %v7910_v38 = vor.u32 %v10468_v32, %v7909_v30  ;;  %v7885_v42 = vld [vmem:[#allocation3 + $0x1e8] sm:$0xf]  ;;  %v7694_v44 = vor.u32 %v10414_v40, %v7693_v35  ;;  %v8047_v48 = vld [vmem:[#allocation3 + $0x348] sm:$0xf0]  ;;  %s11078_s12 = sshll.u32 %s11552_s21, 7 }
  0x60   : > { %1459 = vmatpush.bf16.msrb.mxu0 %v8074_v39  ;;  %v7669_v59 = vld [vmem:[#allocation3 + $0x38] sm:$0xf]  ;;  %v10494_v3 = vld [vmem:[#allocation3 + $0x304] sm:$0xf]  ;;  %v8023_v4 = vld [vmem:[#allocation3 + $0x318] sm:$0xf0]  ;;  %v11787_v14 = vunpack.c.h.b16 %v494_v36  ;;  %s7491_s15 = scalar_lea.hbm %s13380_s11, %s11078_s12 }
  0x61   : > { %1484 = vmatpush.bf16.msrb.mxu1 %v7790_v45  ;;  %1513 = vmatpush.bf16.msrb.mxu3 %v7982_v46  ;;  %v10462_v45 = vld [vmem:[#allocation3 + $0x1fc] sm:$0xf0]  ;;  %v10500_v46 = vld [vmem:[#allocation3 + $0x334] sm:$0xf]  ;;  %v7861_v16 = vld [vmem:[#allocation3 + $0x1b8] sm:$0xf] }
  0x62   : > { %1429 = vmatpush.bf16.msrb.mxu2 %v7906_v60  ;;  %v8050_v58 = vor.u32 %v10500_v46, %v8047_v48  ;;  %v10408_v60 = vld [vmem:[#allocation3 + $0x4c] sm:$0xf0]  ;;  %v7645_v24 = vld [vmem:[#allocation3 + $0x8] sm:$0xf]  ;;  %v10402_v25 = vld [vmem:[#allocation3 + $0x1c] sm:$0xf0] }
  0x63   : > { %v10456_v20 = vld [vmem:[#allocation3 + $0x1cc] sm:$0xf0]  ;;  %v7646_v29 = vor.u32 %v10402_v25, %v7645_v24  ;;  %v7837_v30 = vld [vmem:[#allocation3 + $0x188] sm:$0xf]  ;;  %v10450_v18 = vld [vmem:[#allocation3 + $0x19c] sm:$0xf0] }
  0x64   : > { %1460 = vmatpush.bf16.msrb.mxu0 %v8050_v58  ;;  %v7838_v32 = vor.u32 %v10450_v18, %v7837_v30  ;;  %v498_v33 = vld [vmem:[%s11665_s24 + $0x48] sm:$0xff]  ;;  %v500_v34 = vld [vmem:[%s11665_s24 + $0x54] sm:$0xff]  ;;  %v10429_v30 = vld [vmem:[#allocation3 + $0xfc] sm:$0xf]  ;;  %s7492_s21 = sshll.u32 %s13309_s30, 4  ;;  %s7494_s14 = sshll.u32 %s7491_s15, 4  ;;  %s7493_s21 = int_to_ptr.vmem [resolvable:$true] %s7492_s21  ;;  %s7495_s14 = int_to_ptr.hbm [resolvable:$true] %s7494_s14 }
  0x65   : > { %1485 = vmatpush.bf16.msrb.mxu1 %v7766_v5  ;;  %1514 = vmatpush.bf16.msrb.mxu3 %v7958_v2  ;;  %v7886_v5 = vor.u32 %v10462_v45, %v7885_v42  ;;  %v11783_v2 = vunpack.c.l.b16 %v494_v36  ;;  %v11816_v35 = vunpack.c.l.b16 %v498_v33  ;;  %v11818_v36 = vunpack.c.l.b16 %v500_v34  ;;  %v8101_v42 = vld [vmem:[#allocation3 + $0x398] sm:$0xf]  ;;  %v10441_v45 = vld [vmem:[#allocation3 + $0x15c] sm:$0xf]  ;;  %v7815_v48 = vld [vmem:[#allocation3 + $0x170] sm:$0xf0] }
  0x66   : > { %1430 = vmatpush.bf16.msrb.mxu2 %v7882_v15  ;;  %v7670_v15 = vor.u32 %v10408_v60, %v7669_v59  ;;  %v8007_v58 = vld [vmem:[#allocation3 + $0x2f0] sm:$0xf0]  ;;  %v7818_v59 = vor.u32 %v10441_v45, %v7815_v48  ;;  %v8029_v45 = vld [vmem:[#allocation3 + $0x308] sm:$0xf]  ;;  %v10471_v48 = vld [vmem:[#allocation3 + $0x24c] sm:$0xf] }
  0x67   : > { %v11799_v27 = vpack.c.b16 %v11785_v11, %v11783_v2  ;;  %v11826_v39 = vpack.c.b16 %v11818_v36, %v11816_v35  ;;  %v7767_v18 = vld [vmem:[#allocation3 + $0x110] sm:$0xf0]  ;;  %v10430_v55 = vld [vmem:[#allocation3 + $0x104] sm:$0xf]  ;;  %v7775_v52 = vld [vmem:[#allocation3 + $0x118] sm:$0xf0] }
  0x68   : > { %s7480_s19 = scalar_lea.sflag [#allocation5], %s477_s29  ;;  %s11391_s26 = sshra.s32 %s7495_s14, 4  ;;  %s11392_s26 = int_to_ptr.hbm [resolvable:$true] %s11391_s26 }
  0x69   : > { %1486 = vmatpush.bf16.msrb.mxu1 %v7742_v28  ;;  %1515 = vmatpush.bf16.msrb.mxu3 %v7934_v26  ;;  %v11789_v28 = vunpack.c.h.b16 %v496_v57  ;;  %v7862_v26 = vor.u32 %v10456_v20, %v7861_v16  ;;  %v10489_v57 = vld [vmem:[#allocation3 + $0x2dc] sm:$0xf]  ;;  %v7791_v16 = vld [vmem:[#allocation3 + $0x140] sm:$0xf0]  ;;  %v10483_v20 = vld [vmem:[#allocation3 + $0x2ac] sm:$0xf]  ;;  %p11398_p3 = scmp.lt.s32.totalorder %s11392_s26, %s13380_s11 }
  0x6a   : > { %1322 = vmatmul.bf16.gmra.mxu0 %v11766_v17  ;;  %1431 = vmatpush.bf16.msrb.mxu2 %v7858_v23  ;;  %v8026_v23 = vor.u32 %v10494_v3, %v8023_v4  ;;  %v8010_v60 = vor.u32 %v10489_v57, %v8007_v58  ;;  %v8077_v3 = vld [vmem:[#allocation3 + $0x368] sm:$0xf]  ;;  %v10510_v4 = vld [vmem:[#allocation3 + $0x37c] sm:$0xf0]  ;;  %v7935_v57 = vld [vmem:[#allocation3 + $0x260] sm:$0xf0] }
  0x6b   : > { %1351 = vmatmul.bf16.gmra.mxu1 %v11770_v53  ;;  %v11803_v19 = vpack.c.b16 %v11789_v28, %v11787_v14  ;;  %s11393_s3 = scalar_lea.hbm %s11392_s26, 128  ;;  %s11397_s25 = scalar_lea.hbm %s13380_s11, 256 }
  0x6c   : > { %8117 = vmatmul.msk.bf16.gmra.mxu2 %vm1296_vm0, %v11774_v54  ;;  %1409 = vmatmul.bf16.gmra.mxu3 %v11766_v17  ;;  %p11394_p0 = scmp.ne.s32.totalorder %s11392_s26, %s11393_s3  ;;  %p11399_p4 = scmp.lt.s32.totalorder %s11397_s25, %s11393_s3 }
  0x6d   : > { %1487 = vmatpush.bf16.msrb.mxu1 %v7718_v31  ;;  %1516 = vmatpush.bf16.msrb.mxu3 %v7910_v38  ;;  %v11807_v31 = vpack.c.b16 %v11795_v22, %v11792_v21  ;;  %v11822_v38 = vunpack.c.h.b16 %v500_v34 }
  0x6e   : > { %1432 = vmatpush.bf16.msrb.mxu2 %v7834_v37  ;;  %1461 = vmatpush.bf16.msrb.mxu0 %v8026_v23  ;;  %v11820_v37 = vunpack.c.h.b16 %v498_v33  ;;  %v7983_v23 = vld [vmem:[#allocation3 + $0x2c0] sm:$0xf0]  ;;  %v7959_v33 = vld [vmem:[#allocation3 + $0x290] sm:$0xf0]  ;;  %p11395_p1 = pnand %p11394_p0, %p11569_p5  ;;  %p11400_p7 = por %p11399_p4, %p11398_p3 }
  0x6f   : > { %v7986_v25 = vor.u32 %v10483_v20, %v7983_v23  ;;  %v7911_v20 = vld [vmem:[#allocation3 + $0x230] sm:$0xf0]  ;;  %v10513_v23 = vld [vmem:[#allocation3 + $0x39c] sm:$0xf] }
  0x70   : > { %v11830_v40 = vpack.c.b16 %v11822_v38, %v11820_v37  ;;  %p11396_p2 = pneg %p11395_p1 }
  0x71   : > { %1488 = vmatpush.bf16.msrb.mxu1 %v7694_v44  ;;  %1517 = vmatpush.bf16.msrb.mxu3 %v7886_v5  ;;  %v10516_v44 = vld [vmem:[#allocation3 + $0x3ac] sm:$0xf0]  ;;  %v10435_v5 = vld [vmem:[#allocation3 + $0x12c] sm:$0xf] }
  0x72   : > { %v8102_v46 = vor.u32 %v10516_v44, %v8101_v42  ;;  %1570 = vmatpush.bf16.msra.mxu0 %v7818_v59  ;;  %v7794_v24 = vor.u32 %v10435_v5, %v7791_v16  ;;  %v7770_v42 = vor.u32 %v10429_v30, %v7767_v18  ;;  %v10423_v59 = vld [vmem:[#allocation3 + $0xcc] sm:$0xf]  ;;  %v10417_v5 = vld [vmem:[#allocation3 + $0x9c] sm:$0xf]  ;;  %v7695_v18 = vld [vmem:[#allocation3 + $0x80] sm:$0xf0]  ;;  %p11401_p8 = pnand %p11400_p7, %p11396_p2 }
  0x73   : > { %v10465_v16 = vld [vmem:[#allocation3 + $0x21c] sm:$0xf]  ;;  %v10411_v30 = vld [vmem:[#allocation3 + $0x6c] sm:$0xf] }
  0x74   : > { %1545 = vmatpush.bf16.msra.mxu2 %v8102_v46  ;;  %v10498_v46 = vld [vmem:[#allocation3 + $0x31c] sm:$0xf0] }
  0x75   : > { %1489 = vmatpush.bf16.msrb.mxu1 %v7670_v15  ;;  %1518 = vmatpush.bf16.msrb.mxu3 %v7862_v26  ;;  %v8078_v15 = vor.u32 %v10510_v4, %v8077_v3  ;;  %v8053_v26 = vld [vmem:[#allocation3 + $0x338] sm:$0xf]  ;;  %v8030_v58 = vor.u32 %v10498_v46, %v8029_v45  ;;  %v7938_v3 = vor.u32 %v10471_v48, %v7935_v57  ;;  %v10405_v48 = vld [vmem:[#allocation3 + $0x3c] sm:$0xf]  ;;  %v7671_v57 = vld [vmem:[#allocation3 + $0x50] sm:$0xf0] }
  0x76   : > { %1571 = vmatpush.bf16.msra.mxu0 %v7794_v24  ;;  %v8103_v24 = vld [vmem:[#allocation3 + $0x3b0] sm:$0xf0] }
  0x78   : > { %1546 = vmatpush.bf16.msra.mxu2 %v8078_v15  ;;  %v7719_v15 = vld [vmem:[#allocation3 + $0xb0] sm:$0xf0] }
  0x79   : > { %1490 = vmatpush.bf16.msrb.mxu1 %v7646_v29  ;;  %1519 = vmatpush.bf16.msrb.mxu3 %v7838_v32  ;;  %v10504_v29 = vld [vmem:[#allocation3 + $0x34c] sm:$0xf0]  ;;  %v10477_v32 = vld [vmem:[#allocation3 + $0x27c] sm:$0xf] }
  0x7a   : > { %1327 = vmatmul.bf16.gmra.mxu0 %v11799_v27  ;;  %v8054_v34 = vor.u32 %v10504_v29, %v8053_v26  ;;  %v7962_v44 = vor.u32 %v10477_v32, %v7959_v33  ;;  %v7914_v26 = vor.u32 %v10465_v16, %v7911_v20  ;;  %v8106_v29 = vor.u32 %v10513_v23, %v8103_v24  ;;  %v10459_v32 = vld [vmem:[#allocation3 + $0x1ec] sm:$0xf]  ;;  %v7887_v33 = vld [vmem:[#allocation3 + $0x200] sm:$0xf0] }
  0x7b   : > { %1356 = vmatmul.bf16.gmra.mxu1 %v11803_v19  ;;  %1572 = vmatpush.bf16.msra.mxu0 %v7770_v42  ;;  %v8079_v42 = vld [vmem:[#allocation3 + $0x380] sm:$0xf0]  ;;  %v7890_v45 = vor.u32 %v10459_v32, %v7887_v33  ;;  %v10399_v16 = vld [vmem:[#allocation3 + $0xc] sm:$0xf]  ;;  %v7821_v32 = vld [vmem:[#allocation3 + $0x160] sm:$0xf] }
  0x7c   : > { %8118 = vmatmul.msk.bf16.gmra.mxu2 %vm1296_vm0, %v11807_v31  ;;  %1414 = vmatmul.bf16.gmra.mxu3 %v11799_v27  ;;  %v7647_v20 = vld [vmem:[#allocation3 + $0x20] sm:$0xf0]  ;;  %v10447_v23 = vld [vmem:[#allocation3 + $0x18c] sm:$0xf]  ;;  %v10445_v33 = vld [vmem:[#allocation3 + $0x174] sm:$0xf0] }
  0x7d   : > { %1599 = vmatpush.bf16.msra.mxu1 %v8010_v60  ;;  %1547 = vmatpush.bf16.msra.mxu2 %v8054_v34  ;;  %v7743_v60 = vld [vmem:[#allocation3 + $0xe0] sm:$0xf0]  ;;  %v10507_v34 = vld [vmem:[#allocation3 + $0x36c] sm:$0xf] }
  0x7e   : > { %v7746_v4 = vor.u32 %v10423_v59, %v7743_v60  ;;  %1632 = vmatpush.bf16.msra.mxu3 %v8106_v29  ;;  %v8082_v46 = vor.u32 %v10507_v34, %v8079_v42  ;;  %v7863_v59 = vld [vmem:[#allocation3 + $0x1d0] sm:$0xf0]  ;;  %v10501_v60 = vld [vmem:[#allocation3 + $0x33c] sm:$0xf]  ;;  %v7839_v24 = vld [vmem:[#allocation3 + $0x1a0] sm:$0xf0]  ;;  %v7822_v34 = vor.u32 %v10445_v33, %v7821_v32  ;;  %v11859_v42 = vpack.c.b16 %v11698_v50, %v11698_v50 }
  0x7f   : > { %v10495_v29 = vld [vmem:[#allocation3 + $0x30c] sm:$0xf]  ;;  %v11872_v50 = vld [vmem:[%s13371_s2] sm:$0x3f]  ;;  %v7823_v33 = vld [vmem:[#allocation3 + $0x178] sm:$0xf0] }
  0x80   : > { %1573 = vmatpush.bf16.msra.mxu0 %v7746_v4  ;;  %2172 = vrot.lane.b32.xlu1 %v11859_v42, %s11467_s13  ;;  %v10442_v32 = vld [vmem:[#allocation3 + $0x164] sm:$0xf] }
  0x81   : > { %1600 = vmatpush.bf16.msra.mxu1 %v7986_v25  ;;  %1548 = vmatpush.bf16.msra.mxu2 %v8030_v58  ;;  %v7722_v25 = vor.u32 %v10417_v5, %v7719_v15  ;;  %v10453_v58 = vld [vmem:[#allocation3 + $0x1bc] sm:$0xf]  ;;  %v7674_v15 = vor.u32 %v10405_v48, %v7671_v57  ;;  %v10439_v48 = vld [vmem:[#allocation3 + $0x144] sm:$0xf0] }
  0x82   : > { %1633 = vmatpush.bf16.msra.mxu3 %v8082_v46  ;;  %v7866_v4 = vor.u32 %v10453_v58, %v7863_v59  ;;  %v7797_v46 = vld [vmem:[#allocation3 + $0x130] sm:$0xf]  ;;  %v10433_v58 = vld [vmem:[#allocation3 + $0x114] sm:$0xf0] }
  0x83   : > { %v7798_v57 = vor.u32 %v10439_v48, %v7797_v46  ;;  %v7826_v48 = vor.u32 %v10442_v32, %v7823_v33  ;;  %v10409_v32 = vld [vmem:[#allocation3 + $0x54] sm:$0xf0]  ;;  %v7965_v33 = vld [vmem:[#allocation3 + $0x280] sm:$0xf] }
  0x84   : > { %1574 = vmatpush.bf16.msra.mxu0 %v7722_v25  ;;  %v7650_v25 = vor.u32 %v10399_v16, %v7647_v20  ;;  %v7749_v16 = vld [vmem:[#allocation3 + $0xd0] sm:$0xf]  ;;  %v10427_v20 = vld [vmem:[#allocation3 + $0xe4] sm:$0xf0] }
  0x85   : > { %1601 = vmatpush.bf16.msra.mxu1 %v7962_v44  ;;  %v7698_v44 = vor.u32 %v10411_v30, %v7695_v18  ;;  %v8031_v30 = vld [vmem:[#allocation3 + $0x320] sm:$0xf0] }
  0x86   : > { %v8034_v18 = vor.u32 %v10495_v29, %v8031_v30  ;;  %v8013_v29 = vld [vmem:[#allocation3 + $0x2e0] sm:$0xf] }
  0x88   : > { %1575 = vmatpush.bf16.msra.mxu0 %v7698_v44  ;;  %v11863_v44 = vpack.c.b16 %v11692_v41, %v11692_v41  ;;  %v7773_v41 = vld [vmem:[#allocation3 + $0x100] sm:$0xf] }
  0x89   : > { %1602 = vmatpush.bf16.msra.mxu1 %v7938_v3  ;;  %v8055_v3 = vld [vmem:[#allocation3 + $0x350] sm:$0xf0]  ;;  %v7774_v59 = vor.u32 %v10433_v58, %v7773_v41  ;;  %v11902_v41 = vpack.c.b16 %v11754_v6, %v11754_v6 }
  0x8a   : > { %1332 = vmatmul.bf16.gmra.mxu0 %v11826_v39  ;;  %v8058_v5 = vor.u32 %v10501_v60, %v8055_v3  ;;  %2170 = vrot.lane.b32.xlu0 %v11863_v44, %s11467_s13  ;;  %v11875_v60 = vperm.slane %v11872_v50, 0  ;;  %v11879_v3 = vpack.c.b16 %v11708_v56, %v11708_v56 }
  0x8b   : > { %1361 = vmatmul.bf16.gmra.mxu1 %v11830_v40 }
  0x8c   : > { %1433 = vmatmul.bf16.vlgmr.msrb.gmra.mxu2 %v11724_v12  ;;  %1419 = vmatmul.bf16.gmra.mxu3 %v11826_v39 }
  0x8d   : > { %1603 = vmatpush.bf16.msra.mxu1 %v7914_v26  ;;  %1634 = vmatpush.bf16.msra.mxu3 %v8058_v5  ;;  %v7842_v26 = vor.u32 %v10447_v23, %v7839_v24 }
  0x8e   : > { %1576 = vmatpush.bf16.msra.mxu0 %v7674_v15  ;;  %1657 = vmatpush.bf16.msrb.mxu2 %v7822_v34 }
  0x8f   : > { %2178 = vrot.lane.b32.xlu1 %v11879_v3, %s11467_s13 }
  0x91   : > { %1604 = vmatpush.bf16.msra.mxu1 %v7890_v45  ;;  %1635 = vmatpush.bf16.msra.mxu3 %v8034_v18  ;;  %v10493_v18 = vld [vmem:[#allocation3 + $0x2f4] sm:$0xf0] }
  0x92   : > { %1577 = vmatpush.bf16.msra.mxu0 %v7650_v25  ;;  %1658 = vmatpush.bf16.msrb.mxu2 %v7798_v57  ;;  %v7750_v25 = vor.u32 %v10427_v20, %v7749_v16  ;;  %v8014_v46 = vor.u32 %v10493_v18, %v8013_v29  ;;  %v11898_v57 = vpack.c.b16 %v11756_v7, %v11756_v7  ;;  %v7989_v7 = vld [vmem:[#allocation3 + $0x2b0] sm:$0xf]  ;;  %v10487_v20 = vld [vmem:[#allocation3 + $0x2c4] sm:$0xf0]  ;;  %v7677_v18 = vld [vmem:[#allocation3 + $0x40] sm:$0xf] }
  0x94   : > { %13458 = vst [vmem:[#allocation28_spill] sm:$0xff] %v11898_v57 }
  0x95   : > { %1605 = vmatpush.bf16.msra.mxu1 %v7866_v4  ;;  %v11883_v4 = vpack.c.b16 %v11696_v49, %v11696_v49  ;;  %v7725_v49 = vld [vmem:[#allocation3 + $0xa0] sm:$0xf] }
  0x96   : > { %1659 = vmatpush.bf16.msrb.mxu2 %v7774_v59  ;;  %v7701_v59 = vld [vmem:[#allocation3 + $0x70] sm:$0xf] }
  0x97   : > { %2176 = vrot.lane.b32.xlu0 %v11883_v4, %s11467_s13  ;;  %2190 = vrot.lane.b32.xlu1 %v11898_v57, %s11467_s13 }
  0x99   : > { %1606 = vmatpush.bf16.msra.mxu1 %v7842_v26  ;;  %v10421_v26 = vld [vmem:[#allocation3 + $0xb4] sm:$0xf0] }
  0x9a   : > { %8119 = vmatmul.msk.bf16.vlgmr.msrb.gmra.mxu0 %vm1296_vm0, %v11678_v63  ;;  %v7726_v30 = vor.u32 %v10421_v26, %v7725_v49  ;;  %1660 = vmatpush.bf16.msrb.mxu2 %v7750_v25  ;;  %v7990_v25 = vor.u32 %v10487_v20, %v7989_v7  ;;  %v7799_v49 = vld [vmem:[#allocation3 + $0x148] sm:$0xf0] }
  0x9b   : > { %1491 = vmatmul.bf16.vlgmr.msrb.gmra.mxu1 %v11720_v9  ;;  %1686 = vmatpush.bf16.msrb.mxu0 %v8014_v46  ;;  %v7678_v46 = vor.u32 %v10409_v32, %v7677_v18  ;;  %v10469_v18 = vld [vmem:[#allocation3 + $0x234] sm:$0xf0]  ;;  %v8109_v32 = vld [vmem:[#allocation3 + $0x3a0] sm:$0xf] }
  0x9c   : > { %1438 = vmatmul.bf16.gmra.mxu2 %v11770_v53  ;;  %1520 = vmatmul.bf16.vlgmr.msrb.gmra.mxu3 %v11724_v12 }
  0x9d   : > { %1744 = vmatpush.bf16.msrb.mxu3 %v7826_v48  ;;  %v10481_v48 = vld [vmem:[#allocation3 + $0x294] sm:$0xf0] }
  0x9e   : > { %1661 = vmatpush.bf16.msrb.mxu2 %v7726_v30  ;;  %v7966_v57 = vor.u32 %v10481_v48, %v7965_v33  ;;  %v11915_v30 = vpack.c.b16 %v11787_v14, %v11787_v14  ;;  %v10424_v14 = vld [vmem:[#allocation3 + $0xd4] sm:$0xf]  ;;  %v10418_v48 = vld [vmem:[#allocation3 + $0xa4] sm:$0xf] }
  0x9f   : > { %2184 = vrot.lane.b32.xlu0 %v11902_v41, %s11467_s13  ;;  %1687 = vmatpush.bf16.msrb.mxu0 %v7990_v25 }
  0xa0   : > { %13459 = vst [vmem:[#allocation29_spill] sm:$0xff] %v11915_v30  ;;  %2196 = vrot.lane.b32.xlu1 %v11915_v30, %s11467_s13 }
  0xa3   : > { %1688 = vmatpush.bf16.msrb.mxu0 %v7966_v57  ;;  %v7751_v57 = vld [vmem:[#allocation3 + $0xe8] sm:$0xf0] }
  0xaa   : > { %8120 = vmatmul.msk.bf16.gmra.mxu0 %vm1296_vm0, %v11728_v13 }
  0xab   : > { %1496 = vmatmul.bf16.gmra.mxu1 %v11766_v17 }
  0xac   : > { %1443 = vmatmul.bf16.gmra.mxu2 %v11803_v19  ;;  %1525 = vmatmul.bf16.gmra.mxu3 %v11770_v53 }
  0xba   : > { %8121 = vmatmul.msk.bf16.gmra.mxu0 %vm1296_vm0, %v11774_v54 }
  0xbb   : > { %1501 = vmatmul.bf16.gmra.mxu1 %v11799_v27 }
  0xbc   : > { %1448 = vmatmul.bf16.gmra.mxu2 %v11830_v40  ;;  %1530 = vmatmul.bf16.gmra.mxu3 %v11803_v19 }
  0xca   : > { %8122 = vmatmul.msk.bf16.gmra.mxu0 %vm1296_vm0, %v11807_v31 }
  0xcb   : > { %1506 = vmatmul.bf16.gmra.mxu1 %v11826_v39 }
  0xcc   : > { %8123 = vmatmul.msk.bf16.vlgmr.msra.gmra.mxu2 %vm1296_vm0, %v11678_v63  ;;  %1535 = vmatmul.bf16.gmra.mxu3 %v11830_v40 }
  0xcf   : > { %v1376_v45 = vpop.f32.mrf.mxu2 }
  0xd7   : > { %v1378_v5 = vpop.f32.mrf.mxu2  ;;  %v1318_v15 = vpop.f32.mrf.mxu0 }
  0xd8   : > { %v1319_v23 = vadd.f32 %v1318_v15, %v11875_v60  ;;  %v1347_v24 = vpop.f32.mrf.mxu1 }
  0xda   : > { %v1348_v56 = vadd.f32 %v1347_v24, %v1319_v23  ;;  %1578 = vmatmul.bf16.vlgmr.msra.gmra.mxu0 %v11720_v9  ;;  %v10436_v23 = vld [vmem:[#allocation3 + $0x134] sm:$0xf] }
  0xdb   : > { %1607 = vmatmul.bf16.vlgmr.msra.gmra.mxu1 %v11724_v12  ;;  %v7802_v26 = vor.u32 %v10436_v23, %v7799_v49  ;;  %v7653_v23 = vld [vmem:[#allocation3 + $0x10] sm:$0xf]  ;;  %v7754_v49 = vor.u32 %v10424_v14, %v7751_v57  ;;  %v10463_v14 = vld [vmem:[#allocation3 + $0x204] sm:$0xf0] }
  0xdc   : > { %8124 = vmatmul.msk.bf16.gmra.mxu2 %vm1296_vm0, %v11728_v13  ;;  %v1377_v34 = vadd.f32 %v1376_v45, %v1348_v56  ;;  %8127 = vmatmul.msk.bf16.vlgmr.msra.gmra.mxu3 %vm1296_vm0, %v11678_v63  ;;  %v10415_v45 = vld [vmem:[#allocation3 + $0x84] sm:$0xf0] }
  0xdd   : > { %v7702_v56 = vor.u32 %v10415_v45, %v7701_v59  ;;  %1745 = vmatpush.bf16.msrb.mxu3 %v7802_v26  ;;  %v11919_v59 = vpack.c.b16 %v11785_v11, %v11785_v11 }
  0xde   : > { %v1831_v45 = vmax.f32 %v1377_v34, 0.0 }
  0xdf   : > { %v11904_v58 = vpop.f32.mrf.mxu2  ;;  %v11906_v15 = vpop.f32.mrf.mxu3  ;;  %1662 = vmatpush.bf16.msrb.mxu2 %v7702_v56  ;;  %2200 = vrot.lane.b32.xlu0 %v11919_v59, %s11467_s13 }
  0xe0   : > { %v1320_v16 = vpop.f32.mrf.mxu0  ;;  %v1349_v24 = vpop.f32.mrf.mxu1 }
  0xe1   : > { %v1321_v6 = vadd.f32 %v1320_v16, %v11875_v60  ;;  %v7778_v16 = vor.u32 %v10430_v55, %v7775_v52  ;;  %v7941_v52 = vld [vmem:[#allocation3 + $0x250] sm:$0xf]  ;;  %v10475_v55 = vld [vmem:[#allocation3 + $0x264] sm:$0xf0] }
  0xe2   : > { %v7942_v25 = vor.u32 %v10475_v55, %v7941_v52  ;;  %v7893_v55 = vld [vmem:[#allocation3 + $0x1f0] sm:$0xf] }
  0xe3   : > { %v1350_v29 = vadd.f32 %v1349_v24, %v1321_v6  ;;  %v10403_v6 = vld [vmem:[#allocation3 + $0x24] sm:$0xf0]  ;;  %1746 = vmatpush.bf16.msrb.mxu3 %v7778_v16  ;;  %1663 = vmatpush.bf16.msrb.mxu2 %v7678_v46  ;;  %v10517_v46 = vld [vmem:[#allocation3 + $0x3b4] sm:$0xf0]  ;;  %v7727_v16 = vld [vmem:[#allocation3 + $0xb8] sm:$0xf0] }
  0xe4   : > { %v7654_v34 = vor.u32 %v10403_v6, %v7653_v23  ;;  %v7730_v23 = vor.u32 %v10418_v48, %v7727_v16  ;;  %1689 = vmatpush.bf16.msrb.mxu0 %v7942_v25  ;;  %v11943_v6 = vpack.c.b16 %v11749_v61, %v11749_v61  ;;  %v10511_v61 = vld [vmem:[#allocation3 + $0x384] sm:$0xf0]  ;;  %v10412_v25 = vld [vmem:[#allocation3 + $0x74] sm:$0xf]  ;;  %v8061_v48 = vld [vmem:[#allocation3 + $0x340] sm:$0xf] }
  0xe5   : > { %v1379_v43 = vadd.f32 %v1378_v5, %v1350_v29  ;;  %v7917_v29 = vld [vmem:[#allocation3 + $0x220] sm:$0xf]  ;;  %v10505_v16 = vld [vmem:[#allocation3 + $0x354] sm:$0xf0] }
  0xe6   : > { %v7918_v33 = vor.u32 %v10469_v18, %v7917_v29  ;;  %2182 = vrot.lane.b32.xlu2 %v11943_v6, %s11467_s13  ;;  %v8062_v30 = vor.u32 %v10505_v16, %v8061_v48 }
  0xe7   : > { %v1837_v7 = vmax.f32 %v1379_v43, 0.0  ;;  %v11921_v20 = vpop.f32.mrf.mxu2  ;;  %v11923_v24 = vpop.f32.mrf.mxu3  ;;  %1664 = vmatpush.bf16.msrb.mxu2 %v7654_v34  ;;  %1747 = vmatpush.bf16.msrb.mxu3 %v7754_v49  ;;  %v7703_v49 = vld [vmem:[#allocation3 + $0x88] sm:$0xf0] }
  0xe8   : > { %v1323_v5 = vpop.f32.mrf.mxu0  ;;  %v1352_v43 = vpop.f32.mrf.mxu1  ;;  %1690 = vmatpush.bf16.msrb.mxu0 %v7918_v33  ;;  %v7706_v29 = vor.u32 %v10412_v25, %v7703_v49  ;;  %v11967_v33 = vpack.c.b16 %v11751_v0, %v11751_v0  ;;  %v8037_v0 = vld [vmem:[#allocation3 + $0x310] sm:$0xf] }
  0xe9   : > { %v11927_v56 = vpack.c.bf16 %v1837_v7, %v1831_v45  ;;  %v1324_v11 = vadd.f32 %v1323_v5, %v11875_v60  ;;  %v8110_v7 = vor.u32 %v10517_v46, %v8109_v32  ;;  %v11947_v5 = vpack.c.b16 %v11671_v51, %v11671_v51  ;;  %v8085_v51 = vld [vmem:[#allocation3 + $0x370] sm:$0xf]  ;;  %v7869_v32 = vld [vmem:[#allocation3 + $0x1c0] sm:$0xf]  ;;  %v10457_v46 = vld [vmem:[#allocation3 + $0x1d4] sm:$0xf0] }
  0xea   : > { %1583 = vmatmul.bf16.gmra.mxu0 %v11766_v17  ;;  %v8086_v57 = vor.u32 %v10511_v61, %v8085_v51  ;;  %v10451_v61 = vld [vmem:[#allocation3 + $0x1a4] sm:$0xf0] }
  0xeb   : > { %13460 = vst [vmem:[#allocation30_spill] sm:$0xff] %v11927_v56  ;;  %v1353_v26 = vadd.f32 %v1352_v43, %v1324_v11  ;;  %1612 = vmatmul.bf16.gmra.mxu1 %v11770_v53  ;;  %2180 = vrot.lane.b32.xlu1 %v11947_v5, %s11467_s13  ;;  %v7679_v56 = vld [vmem:[#allocation3 + $0x58] sm:$0xf0] }
  0xec   : > { %8125 = vmatmul.msk.bf16.gmra.mxu2 %vm1296_vm0, %v11774_v54  ;;  %8128 = vmatmul.msk.bf16.gmra.mxu3 %vm1296_vm0, %v11728_v13  ;;  %13461 = vst [vmem:[#allocation31_spill] sm:$0xff] %v11947_v5  ;;  %v7870_v5 = vor.u32 %v10457_v46, %v7869_v32  ;;  %v12006_v46 = vpack.c.b16 %v11712_v62, %v11712_v62 }
  0xed   : > { %v11937_v45 = vadd.f32 %v11904_v58, %v1353_v26  ;;  %v11951_v58 = vpack.c.b16 %v11669_v47, %v11669_v47  ;;  %1719 = vmatpush.bf16.msrb.mxu1 %v8110_v7  ;;  %1748 = vmatpush.bf16.msrb.mxu3 %v7730_v23  ;;  %v7894_v26 = vor.u32 %v10463_v14, %v7893_v55  ;;  %v10406_v7 = vld [vmem:[#allocation3 + $0x44] sm:$0xf] }
  0xee   : > { %v11971_v23 = vpack.c.b16 %v11820_v37, %v11820_v37  ;;  %v11975_v55 = vpack.c.b16 %v11818_v36, %v11818_v36  ;;  %2188 = vrot.lane.b32.xlu2 %v11967_v33, %s11467_s13  ;;  %v12019_v62 = vpack.c.b16 %v11789_v28, %v11789_v28 }
  0xef   : > { %13462 = vst [vmem:[#allocation32_spill] sm:$0xff] %v11951_v58  ;;  %v11953_v52 = vpop.f32.mrf.mxu2  ;;  %v11955_v11 = vpop.f32.mrf.mxu3  ;;  %2174 = vrot.lane.b32.xlu0 %v11951_v58, %s11467_s13  ;;  %v7682_v58 = vor.u32 %v10406_v7, %v7679_v56  ;;  %1691 = vmatpush.bf16.msrb.mxu0 %v7894_v26  ;;  %v1843_v14 = vmax.f32 %v11937_v45, 0.0  ;;  %v7845_v56 = vld [vmem:[#allocation3 + $0x190] sm:$0xf]  ;;  %v10499_v45 = vld [vmem:[#allocation3 + $0x324] sm:$0xf0] }
  0xf0   : > { %v1325_v43 = vpop.f32.mrf.mxu0  ;;  %v1354_v47 = vpop.f32.mrf.mxu1  ;;  %v7846_v49 = vor.u32 %v10451_v61, %v7845_v56  ;;  %v8038_v26 = vor.u32 %v10499_v45, %v8037_v0  ;;  %13464 = vst [vmem:[#allocation34_spill] sm:$0xff] %v12019_v62  ;;  %v10490_v45 = vld [vmem:[#allocation3 + $0x2e4] sm:$0xf] }
  0xf1   : > { %v1326_v34 = vadd.f32 %v1325_v43, %v11875_v60  ;;  %1720 = vmatpush.bf16.msrb.mxu1 %v8086_v57  ;;  %1749 = vmatpush.bf16.msrb.mxu3 %v7706_v29  ;;  %v7655_v57 = vld [vmem:[#allocation3 + $0x28] sm:$0xf0] }
  0xf3   : > { %v1355_v18 = vadd.f32 %v1354_v47, %v1326_v34  ;;  %2208 = vrot.lane.b32.xlu1 %v11971_v23, %s11467_s13  ;;  %1692 = vmatpush.bf16.msrb.mxu0 %v7870_v5  ;;  %v11998_v5 = vpack.c.b16 %v11783_v2, %v11783_v2 }
  0xf5   : > { %v1384_v43 = vadd.f32 %v11921_v20, %v1355_v18  ;;  %1721 = vmatpush.bf16.msrb.mxu1 %v8062_v30  ;;  %v10400_v30 = vld [vmem:[#allocation3 + $0x14] sm:$0xf]  ;;  %1750 = vmatpush.bf16.msrb.mxu3 %v7682_v58  ;;  %v12002_v58 = vpack.c.b16 %v11714_v1, %v11714_v1 }
  0xf6   : > { %v7658_v29 = vor.u32 %v10400_v30, %v7655_v57  ;;  %2194 = vrot.lane.b32.xlu2 %v11998_v5, %s11467_s13  ;;  %v8015_v30 = vld [vmem:[#allocation3 + $0x2f8] sm:$0xf0] }
  0xf7   : > { %v1849_v20 = vmax.f32 %v1384_v43, 0.0  ;;  %v1388_v51 = vpop.f32.mrf.mxu2  ;;  %v11978_v34 = vpop.f32.mrf.mxu3  ;;  %2212 = vrot.lane.b32.xlu0 %v11975_v55, %s11467_s13  ;;  %1693 = vmatpush.bf16.msrb.mxu0 %v7846_v49  ;;  %v8018_v57 = vor.u32 %v10490_v45, %v8015_v30 }
  0xf8   : > { %v1328_v47 = vpop.f32.mrf.mxu0  ;;  %v1357_v37 = vpop.f32.mrf.mxu1 }
  0xf9   : > { %v1329_v36 = vadd.f32 %v1328_v47, %v11875_v60  ;;  %v11987_v25 = vpack.c.bf16 %v1849_v20, %v1843_v14  ;;  %1722 = vmatpush.bf16.msrb.mxu1 %v8038_v26  ;;  %1751 = vmatpush.bf16.msrb.mxu3 %v7658_v29  ;;  %v12023_v14 = vpack.c.b16 %v11762_v10, %v11762_v10  ;;  %v12035_v10 = vperm.slane %v11872_v50, 1 }
  0xfa   : > { %1588 = vmatmul.bf16.gmra.mxu0 %v11799_v27  ;;  %v12044_v26 = vpack.c.b16 %v11816_v35, %v11816_v35  ;;  %1773 = vmatpush.bf16.msra.mxu2 %v8018_v57 }
  0xfb   : > { %13463 = vst [vmem:[#allocation33_spill] sm:$0xff] %v11987_v25  ;;  %v1358_v18 = vadd.f32 %v1357_v37, %v1329_v36  ;;  %1617 = vmatmul.bf16.gmra.mxu1 %v11803_v19  ;;  %2192 = vrot.lane.b32.xlu1 %v12002_v58, %s11467_s13  ;;  %v1406_v29 = vadd.f32 %v11906_v15, %v12035_v10 }
  0xfc   : > { %8126 = vmatmul.msk.bf16.gmra.mxu2 %vm1296_vm0, %v11807_v31  ;;  %8129 = vmatmul.msk.bf16.gmra.mxu3 %vm1296_vm0, %v11774_v54  ;;  %13465 = vst [vmem:[#allocation35_spill] sm:$0xff] %v12023_v14  ;;  %v12055_v15 = vpack.c.b16 %v11792_v21, %v11792_v21 }
  0xfd   : > { %v1387_v32 = vadd.f32 %v11953_v52, %v1358_v18 }
  0xfe   : > { %2202 = vrot.lane.b32.xlu2 %v12019_v62, %s11467_s13  ;;  %13467 = vst [vmem:[#allocation37_spill] sm:$0xff] %v12055_v15 }
  0xff   : > { %v1391_v48 = vpop.f32.mrf.mxu2  ;;  %v12008_v52 = vpop.f32.mrf.mxu3  ;;  %2186 = vrot.lane.b32.xlu0 %v12006_v46, %s11467_s13  ;;  %v1855_v20 = vmax.f32 %v1387_v32, 0.0  ;;  %v10484_v32 = vld [vmem:[#allocation3 + $0x2b4] sm:$0xf] }
 0x100   : > { %v1330_v16 = vpop.f32.mrf.mxu0  ;;  %v1359_v1 = vpop.f32.mrf.mxu1 }
 0x101   : > { %v1331_v2 = vadd.f32 %v1330_v16, %v11875_v60 }
 0x103   : > { %v1360_v7 = vadd.f32 %v1359_v1, %v1331_v2  ;;  %2210 = vrot.lane.b32.xlu1 %v12055_v15, %s11467_s13 }
 0x105   : > { %v1389_v43 = vadd.f32 %v1388_v51, %v1360_v7 }
 0x106   : > { %2206 = vrot.lane.b32.xlu2 %v12044_v26, %s11467_s13 }
 0x107   : > { %v1861_v56 = vmax.f32 %v1389_v43, 0.0  ;;  %v1393_v61 = vpop.f32.mrf.mxu2  ;;  %v12025_v47 = vpop.f32.mrf.mxu3  ;;  %2204 = vrot.lane.b32.xlu0 %v12023_v14, %s11467_s13  ;;  %v10502_v14 = vld [vmem:[#allocation3 + $0x344] sm:$0xf] }
 0x108   : > { %v1333_v0 = vpop.f32.mrf.mxu0  ;;  %v1362_v51 = vpop.f32.mrf.mxu1 }
 0x109   : > { %v1334_v36 = vadd.f32 %v1333_v0, %v11875_v60  ;;  %v12032_v28 = vpack.c.bf16 %v1861_v56, %v1855_v20  ;;  %v10478_v56 = vld [vmem:[#allocation3 + $0x284] sm:$0xf]  ;;  %v7967_v0 = vld [vmem:[#allocation3 + $0x298] sm:$0xf0] }
 0x10a   : > { %1593 = vmatmul.bf16.gmra.mxu0 %v11826_v39 }
 0x10b   : > { %13466 = vst [vmem:[#allocation36_spill] sm:$0xff] %v12032_v28  ;;  %v1363_v37 = vadd.f32 %v1362_v51, %v1334_v36  ;;  %1622 = vmatmul.bf16.gmra.mxu1 %v11830_v40  ;;  %v7970_v36 = vor.u32 %v10478_v56, %v7967_v0  ;;  %v12059_v51 = vpack.c.b16 %v11822_v38, %v11822_v38  ;;  %v10629_v56 = vld [vmem:[#allocation8 + $0x74] sm:$0xf0]  ;;  %v10454_v28 = vld [vmem:[#allocation3 + $0x1c4] sm:$0xf] }
 0x10c   : > { %1665 = vmatmul.bf16.vlgmr.msrb.gmra.mxu2 %v11720_v9  ;;  %8130 = vmatmul.msk.bf16.gmra.mxu3 %vm1296_vm0, %v11807_v31 }
 0x10d   : > { %v1392_v49 = vadd.f32 %v1391_v48, %v1363_v37  ;;  %v7991_v48 = vld [vmem:[#allocation3 + $0x2c8] sm:$0xf0]  ;;  %13468 = vst [vmem:[#allocation38_spill] sm:$0xff] %v12059_v51 }
 0x10e   : > { %v7994_v20 = vor.u32 %v10484_v32, %v7991_v48  ;;  %2214 = vrot.lane.b32.xlu2 %v12059_v51, %s11467_s13  ;;  %v12070_v48 = vperm.slane %v11872_v50, 2 }
 0x10f   : > { %v1434_v18 = vpop.f32.mrf.mxu2  ;;  %v12048_v16 = vpop.f32.mrf.mxu3  ;;  %v1867_v45 = vmax.f32 %v1392_v49, 0.0  ;;  %v10466_v49 = vld [vmem:[#allocation3 + $0x224] sm:$0xf] }
 0x110   : > { %v1435_v2 = vadd.f32 %v1434_v18, %v1406_v29  ;;  %v1335_v1 = vpop.f32.mrf.mxu0  ;;  %v1364_v43 = vpop.f32.mrf.mxu1  ;;  %1774 = vmatpush.bf16.msra.mxu2 %v7994_v20  ;;  %v10472_v29 = vld [vmem:[#allocation3 + $0x254] sm:$0xf]  ;;  %v7943_v18 = vld [vmem:[#allocation3 + $0x268] sm:$0xf0] }
 0x111   : > { %v1336_v7 = vadd.f32 %v1335_v1, %v11875_v60  ;;  %v1408_v60 = vadd.f32 %v11923_v24, %v12035_v10  ;;  %v7946_v38 = vor.u32 %v10472_v29, %v7943_v18  ;;  %v10460_v29 = vld [vmem:[#allocation3 + $0x1f4] sm:$0xf]  ;;  %v7895_v18 = vld [vmem:[#allocation3 + $0x208] sm:$0xf0] }
 0x113   : > { %v1365_v35 = vadd.f32 %v1364_v43, %v1336_v7  ;;  %v7919_v43 = vld [vmem:[#allocation3 + $0x238] sm:$0xf0] }
 0x114   : > { %1775 = vmatpush.bf16.msra.mxu2 %v7970_v36  ;;  %v7922_v20 = vor.u32 %v10466_v49, %v7919_v43  ;;  %v8189_v49 = vld [vmem:[#allocation8 + $0x60] sm:$0xf] }
 0x115   : > { %v1394_v37 = vadd.f32 %v1393_v61, %v1365_v35  ;;  %v8197_v35 = vld [vmem:[#allocation8 + $0x70] sm:$0xf]  ;;  %v8253_v43 = vld [vmem:[#allocation8 + $0xe0] sm:$0xf] }
 0x116   : > { %v8198_v36 = vor.u32 %v10629_v56, %v8197_v35 }
 0x117   : > { %v1873_v30 = vmax.f32 %v1394_v37, 0.0  ;;  %v1436_v57 = vpop.f32.mrf.mxu2  ;;  %v12065_v21 = vpop.f32.mrf.mxu3  ;;  %v10645_v37 = vld [vmem:[#allocation8 + $0xf4] sm:$0xf0] }
 0x118   : > { %v1437_v32 = vadd.f32 %v1436_v57, %v1408_v60  ;;  %v1463_v1 = vpop.f32.mrf.mxu0  ;;  %v1492_v7 = vpop.f32.mrf.mxu1  ;;  %1776 = vmatpush.bf16.msra.mxu2 %v7946_v38  ;;  %v12082_v60 = vpack.c.b16 %v11759_v8, %v11759_v8  ;;  %3155 = vmatpush.bf16.msra.mxu1 %v8198_v36  ;;  %v10627_v8 = vld [vmem:[#allocation8 + $0x64] sm:$0xf0] }
 0x119   : > { %v1464_v61 = vadd.f32 %v1463_v1, %v1435_v2  ;;  %v12072_v24 = vpack.c.bf16 %v1873_v30, %v1867_v45  ;;  %v8261_v2 = vld [vmem:[#allocation8 + $0xf0] sm:$0xf]  ;;  %v1493_v0 = vadd.f32 %v1492_v7, %v12070_v48  ;;  %v1411_v45 = vadd.f32 %v11955_v11, %v12035_v10 }
 0x11a   : > { %1694 = vmatmul.bf16.vlgmr.msrb.gmra.mxu0 %v11724_v12  ;;  %v8262_v30 = vor.u32 %v10645_v37, %v8261_v2  ;;  %2198 = vrot.lane.b32.xlu2 %v12082_v60, %s11467_s13  ;;  %v8190_v2 = vor.u32 %v10627_v8, %v8189_v49  ;;  %v1413_v49 = vadd.f32 %v11978_v34, %v12035_v10 }
 0x11b   : > { %13469 = vst [vmem:[#allocation39_spill] sm:$0xff] %v12072_v24  ;;  %8131 = vmatmul.msk.bf16.vlgmr.msrb.gmra.mxu1 %vm1296_vm0, %v11678_v63  ;;  %v1832_v37 = vmax.f32 %v1464_v61, 0.0 }
 0x11c   : > { %1670 = vmatmul.bf16.gmra.mxu2 %v11766_v17  ;;  %1752 = vmatmul.bf16.vlgmr.msrb.gmra.mxu3 %v11720_v9  ;;  %v7898_v9 = vor.u32 %v10460_v29, %v7895_v18  ;;  %v7871_v29 = vld [vmem:[#allocation3 + $0x1d8] sm:$0xf0]  ;;  %v8181_v18 = vld [vmem:[#allocation8 + $0x50] sm:$0xf] }
 0x11d   : > { %1777 = vmatpush.bf16.msra.mxu2 %v7922_v20  ;;  %3184 = vmatpush.bf16.msra.mxu3 %v8262_v30  ;;  %v10643_v20 = vld [vmem:[#allocation8 + $0xe4] sm:$0xf0] }
 0x11e   : > { %v8254_v36 = vor.u32 %v10643_v20, %v8253_v43  ;;  %3156 = vmatpush.bf16.msra.mxu1 %v8190_v2  ;;  %v7847_v2 = vld [vmem:[#allocation3 + $0x1a8] sm:$0xf0]  ;;  %v8173_v20 = vld [vmem:[#allocation8 + $0x40] sm:$0xf] }
 0x11f   : > { %v1439_v57 = vpop.f32.mrf.mxu2  ;;  %v1521_v38 = vpop.f32.mrf.mxu3 }
 0x120   : > { %v1440_v1 = vadd.f32 %v1439_v57, %v1411_v45  ;;  %v1465_v7 = vpop.f32.mrf.mxu0  ;;  %v12088_v35 = vadd.f32 %v1521_v38, %v1493_v0  ;;  %v1494_v56 = vpop.f32.mrf.mxu1  ;;  %v10514_v45 = vld [vmem:[#allocation3 + $0x3a4] sm:$0xf]  ;;  %v8111_v57 = vld [vmem:[#allocation3 + $0x3b8] sm:$0xf0]  ;;  %v7874_v0 = vor.u32 %v10454_v28, %v7871_v29  ;;  %v10625_v38 = vld [vmem:[#allocation8 + $0x54] sm:$0xf0] }
 0x121   : > { %v1466_v11 = vadd.f32 %v1465_v7, %v1437_v32  ;;  %1778 = vmatpush.bf16.msra.mxu2 %v7898_v9  ;;  %v8114_v30 = vor.u32 %v10514_v45, %v8111_v57  ;;  %3185 = vmatpush.bf16.msra.mxu3 %v8254_v36  ;;  %v8245_v32 = vld [vmem:[#allocation8 + $0xd0] sm:$0xf]  ;;  %v10641_v7 = vld [vmem:[#allocation8 + $0xd4] sm:$0xf0]  ;;  %v8182_v61 = vor.u32 %v10625_v38, %v8181_v18  ;;  %v10623_v45 = vld [vmem:[#allocation8 + $0x44] sm:$0xf0] }
 0x122   : > { %v8246_v9 = vor.u32 %v10641_v7, %v8245_v32  ;;  %v1495_v8 = vadd.f32 %v1494_v56, %v12070_v48  ;;  %v8237_v57 = vld [vmem:[#allocation8 + $0xc0] sm:$0xf]  ;;  %v10639_v29 = vld [vmem:[#allocation8 + $0xc4] sm:$0xf0]  ;;  %v8174_v38 = vor.u32 %v10623_v45, %v8173_v20  ;;  %v10621_v32 = vld [vmem:[#allocation8 + $0x34] sm:$0xf0]  ;;  %v1416_v20 = vadd.f32 %v12008_v52, %v12035_v10 }
 0x123   : > { %v1838_v24 = vmax.f32 %v1466_v11, 0.0  ;;  %1806 = vmatpush.bf16.msra.mxu0 %v8114_v30  ;;  %v10448_v11 = vld [vmem:[#allocation3 + $0x194] sm:$0xf]  ;;  %3157 = vmatpush.bf16.msra.mxu1 %v8182_v61  ;;  %v8238_v56 = vor.u32 %v10639_v29, %v8237_v57  ;;  %v2024_v7 = vrot.slane %v11859_v42, 5  ;;  %v10637_v61 = vld [vmem:[#allocation8 + $0xb4] sm:$0xf0] }
 0x124   : > { %v7850_v28 = vor.u32 %v10448_v11, %v7847_v2  ;;  %v2027_v11 = vrot.slane %v11879_v3, 5  ;;  %v2026_v2 = vrot.slane %v11883_v4, 5 }
 0x125   : > { %v12090_v25 = vpack.c.bf16 %v1838_v24, %v1832_v37  ;;  %1779 = vmatpush.bf16.msra.mxu2 %v7874_v0  ;;  %3186 = vmatpush.bf16.msra.mxu3 %v8246_v9  ;;  %v8165_v0 = vld [vmem:[#allocation8 + $0x30] sm:$0xf] }
 0x126   : > { %v2058_v15 = vsel %vm2047_vm1, 0, %v2027_v11  ;;  %v1418_v11 = vadd.f32 %v12025_v47, %v12035_v10 }
 0x127   : > { %13470 = vst [vmem:[#allocation40_spill] sm:$0xff] %v12090_v25  ;;  %v1441_v43 = vpop.f32.mrf.mxu2  ;;  %v1523_v24 = vpop.f32.mrf.mxu3  ;;  %3158 = vmatpush.bf16.msra.mxu1 %v8174_v38  ;;  %v10619_v38 = vld [vmem:[#allocation8 + $0x24] sm:$0xf0] }
 0x128   : > { %v1442_v36 = vadd.f32 %v1441_v43, %v1413_v49  ;;  %v1468_v37 = vpop.f32.mrf.mxu0  ;;  %v12095_v34 = vadd.f32 %v1523_v24, %v1495_v8  ;;  %v1497_v18 = vpop.f32.mrf.mxu1  ;;  %v8229_v49 = vld [vmem:[#allocation8 + $0xb0] sm:$0xf]  ;;  %v8166_v8 = vor.u32 %v10621_v32, %v8165_v0  ;;  %v12107_v43 = vpack.c.b16 %v11795_v22, %v11795_v22  ;;  %v8221_v0 = vld [vmem:[#allocation8 + $0xa0] sm:$0xf] }
 0x129   : > { %v1469_v30 = vadd.f32 %v1468_v37, %v1440_v1  ;;  %1780 = vmatpush.bf16.msra.mxu2 %v7850_v28  ;;  %v2023_v1 = vrot.slane %v11863_v44, 5  ;;  %v1498_v9 = vadd.f32 %v1497_v18, %v12070_v48  ;;  %3187 = vmatpush.bf16.msra.mxu3 %v8238_v56  ;;  %v8230_v24 = vor.u32 %v10637_v61, %v8229_v49  ;;  %v8087_v28 = vld [vmem:[#allocation3 + $0x388] sm:$0xf0]  ;;  %v8157_v18 = vld [vmem:[#allocation8 + $0x20] sm:$0xf] }
 0x12a   : > { %1699 = vmatmul.bf16.gmra.mxu0 %v11770_v53  ;;  %13471 = vst [vmem:[#allocation41_spill] sm:$0xff] %v12107_v43  ;;  %2216 = vrot.lane.b32.xlu2 %v12107_v43, %s11467_s13  ;;  %v2052_v32 = vsel %vm2047_vm1, 0, %v2024_v7  ;;  %v8158_v49 = vor.u32 %v10619_v38, %v8157_v18  ;;  %v10635_v61 = vld [vmem:[#allocation8 + $0xa4] sm:$0xf0]  ;;  %v8063_v7 = vld [vmem:[#allocation3 + $0x358] sm:$0xf0] }
 0x12b   : > { %8132 = vmatmul.msk.bf16.gmra.mxu1 %vm1296_vm0, %v11728_v13  ;;  %v2050_v43 = vsel %vm2047_vm1, 0, %v2023_v1  ;;  %v10633_v18 = vld [vmem:[#allocation8 + $0x94] sm:$0xf0]  ;;  %v2300_v1 = vunpack.c.l.b16 %v2052_v32  ;;  %v10615_v32 = vld [vmem:[#allocation8 + $0x4] sm:$0xf0] }
 0x12c   : > { %1675 = vmatmul.bf16.gmra.mxu2 %v11799_v27  ;;  %1757 = vmatmul.bf16.gmra.mxu3 %v11766_v17  ;;  %v10508_v17 = vld [vmem:[#allocation3 + $0x374] sm:$0xf] }
 0x12d   : > { %v8090_v22 = vor.u32 %v10508_v17, %v8087_v28  ;;  %3159 = vmatpush.bf16.msra.mxu1 %v8166_v8  ;;  %3188 = vmatpush.bf16.msra.mxu3 %v8230_v24  ;;  %v1844_v17 = vmax.f32 %v1469_v30, 0.0  ;;  %v2299_v30 = vunpack.c.l.b16 %v2050_v43  ;;  %v2308_v24 = vunpack.c.l.b16 %v2058_v15 }
 0x12f   : > { %v1444_v37 = vpop.f32.mrf.mxu2  ;;  %v1526_v57 = vpop.f32.mrf.mxu3  ;;  %1807 = vmatpush.bf16.msra.mxu0 %v8090_v22 }
 0x130   : > { %v1445_v45 = vadd.f32 %v1444_v37, %v1416_v20  ;;  %v1470_v29 = vpop.f32.mrf.mxu0  ;;  %v12116_v25 = vadd.f32 %v1526_v57, %v1498_v9  ;;  %v1499_v56 = vpop.f32.mrf.mxu1  ;;  %v2056_v20 = vsel %vm2047_vm1, 0, %v2026_v2  ;;  %v8222_v37 = vor.u32 %v10635_v61, %v8221_v0  ;;  %v8149_v57 = vld [vmem:[#allocation8 + $0x10] sm:$0xf]  ;;  %v8039_v61 = vld [vmem:[#allocation3 + $0x328] sm:$0xf0] }
 0x131   : > { %v1471_v52 = vadd.f32 %v1470_v29, %v1442_v36  ;;  %v8066_v9 = vor.u32 %v10502_v14, %v8063_v7  ;;  %v10617_v36 = vld [vmem:[#allocation8 + $0x14] sm:$0xf0]  ;;  %v8213_v29 = vld [vmem:[#allocation8 + $0x90] sm:$0xf]  ;;  %3160 = vmatpush.bf16.msra.mxu1 %v8158_v49  ;;  %v2307_v22 = vunpack.c.l.b16 %v2056_v20  ;;  %v1500_v14 = vadd.f32 %v1499_v56, %v12070_v48  ;;  %v8141_v49 = vld [vmem:[#allocation8] sm:$0xf] }
 0x132   : > { %v8150_v8 = vor.u32 %v10617_v36, %v8149_v57  ;;  %3189 = vmatpush.bf16.msra.mxu3 %v8222_v37  ;;  %v8214_v2 = vor.u32 %v10633_v18, %v8213_v29  ;;  %v8205_v36 = vld [vmem:[#allocation8 + $0x80] sm:$0xf]  ;;  %v8142_v15 = vor.u32 %v10615_v32, %v8141_v49  ;;  %v12131_v20 = vpack.c.b16 %v2308_v24, %v2300_v1  ;;  %v10661_v32 = vld [vmem:[#allocation8 + $0x174] sm:$0xf0] }
 0x133   : > { %v1850_v28 = vmax.f32 %v1471_v52, 0.0  ;;  %1808 = vmatpush.bf16.msra.mxu0 %v8066_v9  ;;  %v10496_v52 = vld [vmem:[#allocation3 + $0x314] sm:$0xf]  ;;  %v12129_v56 = vpack.c.b16 %v2307_v22, %v2299_v30 }
 0x134   : > { %13474 = vst [vmem:[#allocation44_spill] sm:$0xff] %v12131_v20 }
 0x135   : > { %v12121_v38 = vpack.c.bf16 %v1850_v28, %v1844_v17  ;;  %v8042_v28 = vor.u32 %v10496_v52, %v8039_v61  ;;  %3161 = vmatpush.bf16.msra.mxu1 %v8150_v8  ;;  %13473 = vst [vmem:[#allocation43_spill] sm:$0xff] %v12129_v56 }
 0x136   : > { %3190 = vmatpush.bf16.msra.mxu3 %v8214_v2 }
 0x137   : > { %13472 = vst [vmem:[#allocation42_spill] sm:$0xff] %v12121_v38  ;;  %v1446_v0 = vpop.f32.mrf.mxu2  ;;  %v1528_v57 = vpop.f32.mrf.mxu3  ;;  %v10631_v38 = vld [vmem:[#allocation8 + $0x84] sm:$0xf0]  ;;  %1809 = vmatpush.bf16.msra.mxu0 %v8042_v28 }
 0x138   : > { %v1447_v7 = vadd.f32 %v1446_v0, %v1418_v11  ;;  %v1473_v17 = vpop.f32.mrf.mxu0  ;;  %v12126_v47 = vadd.f32 %v1528_v57, %v1500_v14  ;;  %v1502_v9 = vpop.f32.mrf.mxu1  ;;  %v8206_v43 = vor.u32 %v10631_v38, %v8205_v36 }
 0x139   : > { %v1474_v37 = vadd.f32 %v1473_v17, %v1445_v45  ;;  %v1503_v29 = vadd.f32 %v1502_v9, %v12070_v48  ;;  %3162 = vmatpush.bf16.msra.mxu1 %v8142_v15  ;;  %v1421_v45 = vadd.f32 %v12048_v16, %v12035_v10  ;;  %v10659_v9 = vld [vmem:[#allocation8 + $0x164] sm:$0xf0] }
 0x13a   : > { %1704 = vmatmul.bf16.gmra.mxu0 %v11803_v19  ;;  %3191 = vmatpush.bf16.msra.mxu3 %v8206_v43 }
 0x13b   : > { %8133 = vmatmul.msk.bf16.gmra.mxu1 %vm1296_vm0, %v11774_v54  ;;  %v1856_v24 = vmax.f32 %v1474_v37, 0.0  ;;  %v8317_v37 = vld [vmem:[#allocation8 + $0x160] sm:$0xf] }
 0x13c   : > { %1680 = vmatmul.bf16.gmra.mxu2 %v11826_v39  ;;  %1762 = vmatmul.bf16.gmra.mxu3 %v11799_v27  ;;  %v1423_v27 = vadd.f32 %v12065_v21, %v12035_v10 }
 0x13f   : > { %v1449_v8 = vpop.f32.mrf.mxu2  ;;  %v1531_v38 = vpop.f32.mrf.mxu3 }
 0x140   : > { %v1450_v18 = vadd.f32 %v1449_v8, %v1421_v45  ;;  %v1475_v11 = vpop.f32.mrf.mxu0  ;;  %v12140_v1 = vadd.f32 %v1531_v38, %v1503_v29  ;;  %v1504_v30 = vpop.f32.mrf.mxu1  ;;  %v8318_v38 = vor.u32 %v10659_v9, %v8317_v37  ;;  %v8293_v9 = vld [vmem:[#allocation8 + $0x130] sm:$0xf] }
 0x141   : > { %v1476_v2 = vadd.f32 %v1475_v11, %v1447_v7  ;;  %v1505_v0 = vadd.f32 %v1504_v30, %v12070_v48  ;;  %v8325_v7 = vld [vmem:[#allocation8 + $0x170] sm:$0xf]  ;;  %v10657_v30 = vld [vmem:[#allocation8 + $0x154] sm:$0xf0] }
 0x142   : > { %v8326_v10 = vor.u32 %v10661_v32, %v8325_v7  ;;  %v2029_v32 = vrot.slane %v11943_v6, 5 }
 0x143   : > { %v1862_v22 = vmax.f32 %v1476_v2, 0.0  ;;  %v8309_v2 = vld [vmem:[#allocation8 + $0x150] sm:$0xf] }
 0x144   : > { %3213 = vmatpush.bf16.msrb.mxu2 %v8326_v10 }
 0x145   : > { %v12142_v14 = vpack.c.bf16 %v1862_v22, %v1856_v24  ;;  %v8310_v24 = vor.u32 %v10657_v30, %v8309_v2  ;;  %v10693_v2 = vld [vmem:[#allocation8 + $0x274] sm:$0xf0]  ;;  %v8517_v30 = vld [vmem:[#allocation8 + $0x2f0] sm:$0xf] }
 0x147   : > { %13475 = vst [vmem:[#allocation45_spill] sm:$0xff] %v12142_v14  ;;  %v1451_v52 = vpop.f32.mrf.mxu2  ;;  %v1533_v61 = vpop.f32.mrf.mxu3 }
 0x148   : > { %v1452_v16 = vadd.f32 %v1451_v52, %v1423_v27  ;;  %v1478_v49 = vpop.f32.mrf.mxu0  ;;  %v12147_v57 = vadd.f32 %v1533_v61, %v1505_v0  ;;  %v1507_v28 = vpop.f32.mrf.mxu1  ;;  %3214 = vmatpush.bf16.msrb.mxu2 %v8318_v38  ;;  %v2097_v27 = vrot.slane %v11863_v44, 3  ;;  %v8301_v52 = vld [vmem:[#allocation8 + $0x140] sm:$0xf]  ;;  %v12183_v38 = vsel %vm2047_vm1, 0, %v2029_v32 }
 0x149   : > { %v1479_v17 = vadd.f32 %v1478_v49, %v1450_v18  ;;  %v1508_v21 = vadd.f32 %v1507_v28, %v12070_v48 }
 0x14a   : > { %1709 = vmatmul.bf16.gmra.mxu0 %v11830_v40  ;;  %v12173_v37 = vsel %vm2121_vm2, %v2097_v27, 0 }
 0x14b   : > { %8134 = vmatmul.msk.bf16.gmra.mxu1 %vm1296_vm0, %v11807_v31  ;;  %v1868_v11 = vmax.f32 %v1479_v17, 0.0 }
 0x14c   : > { %1781 = vmatmul.bf16.vlgmr.msra.gmra.mxu2 %v11724_v12  ;;  %1767 = vmatmul.bf16.gmra.mxu3 %v11826_v39  ;;  %v12159_v39 = vperm.slane %v11872_v50, 3 }
 0x14d   : > { %3215 = vmatpush.bf16.msrb.mxu2 %v8310_v24 }
 0x14f   : > { %v1550_v36 = vpop.f32.mrf.mxu2  ;;  %v1536_v15 = vpop.f32.mrf.mxu3 }
 0x150   : > { %v1551_v43 = vadd.f32 %v1550_v36, %v12088_v35  ;;  %v1480_v29 = vpop.f32.mrf.mxu0  ;;  %v12156_v45 = vadd.f32 %v1536_v15, %v1508_v21  ;;  %v1509_v18 = vpop.f32.mrf.mxu1  ;;  %v2030_v36 = vrot.slane %v11902_v41, 5  ;;  %v10653_v15 = vld [vmem:[#allocation8 + $0x134] sm:$0xf0] }
 0x151   : > { %v1481_v8 = vadd.f32 %v1480_v29, %v1452_v16  ;;  %v1510_v35 = vadd.f32 %v1509_v18, %v12070_v48  ;;  %v10655_v16 = vld [vmem:[#allocation8 + $0x144] sm:$0xf0]  ;;  %v2032_v48 = vrot.slane %v11967_v33, 5  ;;  %v8453_v18 = vld [vmem:[#allocation8 + $0x270] sm:$0xf] }
 0x152   : > { %v8302_v10 = vor.u32 %v10655_v16, %v8301_v52  ;;  %v1833_v44 = vmax.f32 %v1551_v43, 0.0  ;;  %v8389_v43 = vld [vmem:[#allocation8 + $0x1f0] sm:$0xf]  ;;  %v12192_v16 = vpop.permute.xlu1 %2172 }
 0x153   : > { %v1874_v12 = vmax.f32 %v1481_v8, 0.0  ;;  %v10677_v8 = vld [vmem:[#allocation8 + $0x1f4] sm:$0xf0]  ;;  %v12187_v24 = vsel %vm2047_vm1, 0, %v2032_v48  ;;  %v8445_v48 = vld [vmem:[#allocation8 + $0x260] sm:$0xf] }
 0x154   : > { %3216 = vmatpush.bf16.msrb.mxu2 %v8302_v10  ;;  %v8390_v27 = vor.u32 %v10677_v8, %v8389_v43 }
 0x155   : > { %v12161_v22 = vpack.c.bf16 %v1874_v12, %v1868_v11  ;;  %v13478_v11 = vld [vmem:[#allocation28_spill] sm:$0xff] }
 0x156   : > { %v2033_v12 = vrot.slane %v13478_v11, 5  ;;  %3242 = vmatpush.bf16.msrb.mxu0 %v8390_v27  ;;  %v10673_v27 = vld [vmem:[#allocation8 + $0x1d4] sm:$0xf0] }
 0x157   : > { %13476 = vst [vmem:[#allocation46_spill] sm:$0xff] %v12161_v22  ;;  %v1552_v0 = vpop.f32.mrf.mxu2  ;;  %v1538_v61 = vpop.f32.mrf.mxu3 }
 0x158   : > { %v1553_v49 = vadd.f32 %v1552_v0, %v12095_v34  ;;  %v1579_v17 = vpop.f32.mrf.mxu0  ;;  %v12166_v28 = vadd.f32 %v1538_v61, %v1510_v35  ;;  %v1608_v7 = vpop.f32.mrf.mxu1  ;;  %v8454_v35 = vor.u32 %v10693_v2, %v8453_v18  ;;  %v10709_v0 = vld [vmem:[#allocation8 + $0x2f4] sm:$0xf0]  ;;  %v2070_v18 = vsel %vm2047_vm1, 0, %v2033_v12  ;;  %v8509_v2 = vld [vmem:[#allocation8 + $0x2e0] sm:$0xf] }
 0x159   : > { %v1580_v50 = vadd.f32 %v1579_v17, %v12159_v39  ;;  %v8518_v61 = vor.u32 %v10709_v0, %v8517_v30  ;;  %v10651_v17 = vld [vmem:[#allocation8 + $0x124] sm:$0xf0]  ;;  %v2315_v12 = vunpack.c.l.b16 %v12183_v38 }
 0x15a   : > { %v1839_v21 = vmax.f32 %v1553_v49, 0.0  ;;  %8135 = vmatmul.msk.bf16.vlgmr.msra.gmra.mxu0 %vm1296_vm0, %v11678_v63  ;;  %v8294_v63 = vor.u32 %v10653_v15, %v8293_v9  ;;  %v8285_v49 = vld [vmem:[#allocation8 + $0x120] sm:$0xf]  ;;  %3271 = vmatpush.bf16.msrb.mxu1 %v8454_v35  ;;  %v12199_v15 = vpop.permute.xlu0 %2170  ;;  %v10707_v30 = vld [vmem:[#allocation8 + $0x2e4] sm:$0xf0]  ;;  %v2045_v35 = vrot.slane %v12059_v51, 5 }
 0x15b   : > { %v1609_v34 = vadd.f32 %v1608_v7, %v1580_v50  ;;  %3163 = vmatmul.bf16.vlgmr.msra.gmra.mxu1 %v12129_v56  ;;  %v8381_v50 = vld [vmem:[#allocation8 + $0x1e0] sm:$0xf]  ;;  %3300 = vmatpush.bf16.msrb.mxu3 %v8518_v61  ;;  %v10687_v38 = vld [vmem:[#allocation8 + $0x244] sm:$0xf0] }
 0x15c   : > { %v12177_v29 = vpack.c.bf16 %v1839_v21, %v1833_v44  ;;  %1786 = vmatmul.bf16.gmra.mxu2 %v11770_v53  ;;  %3192 = vmatmul.bf16.vlgmr.msra.gmra.mxu3 %v12131_v20  ;;  %v12190_v53 = vsel %vm2047_vm1, 0, %v2030_v36  ;;  %v8286_v44 = vor.u32 %v10651_v17, %v8285_v49  ;;  %v10675_v21 = vld [vmem:[#allocation8 + $0x1e4] sm:$0xf0]  ;;  %v2041_v49 = vrot.slane %v12044_v26, 5 }
 0x15d   : > { %v10691_v36 = vld [vmem:[#allocation8 + $0x264] sm:$0xf0]  ;;  %3217 = vmatpush.bf16.msrb.mxu2 %v8294_v63  ;;  %v2323_v63 = vunpack.c.l.b16 %v12187_v24  ;;  %v2316_v61 = vunpack.c.l.b16 %v12190_v53 }
 0x15e   : > { %13477 = vst [vmem:[#allocation47_spill] sm:$0xff] %v12177_v29  ;;  %v8446_v0 = vor.u32 %v10691_v36, %v8445_v48  ;;  %v8437_v48 = vld [vmem:[#allocation8 + $0x250] sm:$0xf]  ;;  %v10703_v29 = vld [vmem:[#allocation8 + $0x2c4] sm:$0xf0] }
 0x15f   : > { %v1555_v52 = vpop.f32.mrf.mxu2  ;;  %v1637_v32 = vpop.f32.mrf.mxu3  ;;  %v10699_v20 = vld [vmem:[#allocation8 + $0x2a4] sm:$0xf0] }
 0x160   : > { %v12195_v7 = vadd.f32 %v1555_v52, %v12116_v25  ;;  %v1581_v10 = vpop.f32.mrf.mxu0  ;;  %v12197_v9 = vadd.f32 %v1637_v32, %v1609_v34  ;;  %v1610_v8 = vpop.f32.mrf.mxu1  ;;  %v8382_v25 = vor.u32 %v10675_v21, %v8381_v50  ;;  %v8510_v52 = vor.u32 %v10707_v30, %v8509_v2  ;;  %v8277_v32 = vld [vmem:[#allocation8 + $0x110] sm:$0xf]  ;;  %3272 = vmatpush.bf16.msrb.mxu1 %v8446_v0  ;;  %v10689_v30 = vld [vmem:[#allocation8 + $0x254] sm:$0xf0]  ;;  %v8365_v0 = vld [vmem:[#allocation8 + $0x1c0] sm:$0xf] }
 0x161   : > { %v1582_v43 = vadd.f32 %v1581_v10, %v12159_v39  ;;  %v2044_v34 = vrot.slane %v11975_v55, 5  ;;  %v10649_v10 = vld [vmem:[#allocation8 + $0x114] sm:$0xf0]  ;;  %v2324_v50 = vunpack.c.l.b16 %v2070_v18  ;;  %v8373_v21 = vld [vmem:[#allocation8 + $0x1d0] sm:$0xf]  ;;  %3218 = vmatpush.bf16.msrb.mxu2 %v8286_v44  ;;  %v8438_v24 = vor.u32 %v10689_v30, %v8437_v48  ;;  %v12219_v30 = vpop.permute.xlu1 %2178 }
 0x162   : > { %3243 = vmatpush.bf16.msrb.mxu0 %v8382_v25  ;;  %3301 = vmatpush.bf16.msrb.mxu3 %v8510_v52  ;;  %v8278_v36 = vor.u32 %v10649_v10, %v8277_v32  ;;  %v8374_v2 = vor.u32 %v10673_v27, %v8373_v21  ;;  %v8269_v18 = vld [vmem:[#allocation8 + $0x100] sm:$0xf]  ;;  %v10647_v25 = vld [vmem:[#allocation8 + $0x104] sm:$0xf0]  ;;  %v12215_v32 = vpack.c.b16 %v2323_v63, %v2315_v12  ;;  %v2086_v12 = vsel %vm2047_vm1, 0, %v2041_v49 }
 0x163   : > { %v1611_v17 = vadd.f32 %v1610_v8, %v1582_v43  ;;  %v8501_v43 = vld [vmem:[#allocation8 + $0x2d0] sm:$0xf]  ;;  %v10705_v8 = vld [vmem:[#allocation8 + $0x2d4] sm:$0xf0]  ;;  %v12217_v27 = vpack.c.b16 %v2324_v50, %v2316_v61  ;;  %v10671_v10 = vld [vmem:[#allocation8 + $0x1c4] sm:$0xf0]  ;;  %v2347_v49 = vunpack.c.l.b16 %v2086_v12 }
 0x164   : > { %v8502_v22 = vor.u32 %v10705_v8, %v8501_v43  ;;  %13479 = vst [vmem:[#allocation28_spill] sm:$0xff] %v12215_v32  ;;  %3273 = vmatpush.bf16.msrb.mxu1 %v8438_v24  ;;  %v8429_v21 = vld [vmem:[#allocation8 + $0x240] sm:$0xf]  ;;  %v2038_v63 = vrot.slane %v11919_v59, 5  ;;  %v8366_v61 = vor.u32 %v10671_v10, %v8365_v0 }
 0x165   : > { %13480 = vst [vmem:[#allocation48_spill] sm:$0xff] %v12217_v27  ;;  %3219 = vmatpush.bf16.msrb.mxu2 %v8278_v36  ;;  %v8430_v50 = vor.u32 %v10687_v38, %v8429_v21  ;;  %v10669_v38 = vld [vmem:[#allocation8 + $0x1b4] sm:$0xf0]  ;;  %v13483_v10 = vld [vmem:[#allocation29_spill] sm:$0xff] }
 0x166   : > { %3244 = vmatpush.bf16.msrb.mxu0 %v8374_v2  ;;  %3302 = vmatpush.bf16.msrb.mxu3 %v8502_v22  ;;  %v2092_v2 = vsel %vm2047_vm1, 0, %v2044_v34  ;;  %v2036_v21 = vrot.slane %v13483_v10, 5 }
 0x167   : > { %v1557_v53 = vpop.f32.mrf.mxu2  ;;  %v1639_v44 = vpop.f32.mrf.mxu3  ;;  %v2355_v36 = vunpack.c.l.b16 %v2092_v2 }
 0x168   : > { %v12213_v14 = vadd.f32 %v1557_v53, %v12126_v47  ;;  %v1584_v52 = vpop.f32.mrf.mxu0  ;;  %v1640_v48 = vadd.f32 %v1639_v44, %v1611_v17  ;;  %v1613_v8 = vpop.f32.mrf.mxu1  ;;  %v8270_v47 = vor.u32 %v10647_v25, %v8269_v18  ;;  %v8493_v53 = vld [vmem:[#allocation8 + $0x2c0] sm:$0xf]  ;;  %v1834_v17 = vmax.f32 %v12197_v9, 0.0  ;;  %v8357_v18 = vld [vmem:[#allocation8 + $0x1b0] sm:$0xf]  ;;  %3274 = vmatpush.bf16.msrb.mxu1 %v8430_v50 }
 0x169   : > { %v1585_v43 = vadd.f32 %v1584_v52, %v12159_v39  ;;  %v12226_v44 = vpop.permute.xlu0 %2176  ;;  %v8494_v22 = vor.u32 %v10703_v29, %v8493_v53  ;;  %v8421_v25 = vld [vmem:[#allocation8 + $0x230] sm:$0xf]  ;;  %v13482_v9 = vrot.slane %v11971_v23, 5  ;;  %v10685_v29 = vld [vmem:[#allocation8 + $0x234] sm:$0xf0]  ;;  %v8358_v2 = vor.u32 %v10669_v38, %v8357_v18 }
 0x16a   : > { %v1840_v24 = vmax.f32 %v1640_v48, 0.0  ;;  %8136 = vmatmul.msk.bf16.gmra.mxu0 %vm1296_vm0, %v11728_v13  ;;  %3220 = vmatpush.bf16.msrb.mxu2 %v8270_v47  ;;  %v2094_v13 = vsel %vm2047_vm1, 0, %v2045_v35  ;;  %v2039_v48 = vrot.slane %v12019_v62, 5  ;;  %v10701_v53 = vld [vmem:[#allocation8 + $0x2b4] sm:$0xf0]  ;;  %v8422_v50 = vor.u32 %v10685_v29, %v8421_v25 }
 0x16b   : > { %v1614_v52 = vadd.f32 %v1613_v8, %v1585_v43  ;;  %3168 = vmatmul.bf16.gmra.mxu1 %v12215_v32  ;;  %v2088_v0 = vsel %vm2047_vm1, 0, %v13482_v9  ;;  %3245 = vmatpush.bf16.msrb.mxu0 %v8366_v61  ;;  %v12241_v43 = vpack.c.b16 %v2355_v36, %v2347_v49  ;;  %v2356_v47 = vunpack.c.l.b16 %v2094_v13  ;;  %v8413_v9 = vld [vmem:[#allocation8 + $0x220] sm:$0xf]  ;;  %v10683_v36 = vld [vmem:[#allocation8 + $0x224] sm:$0xf0] }
 0x16c   : > { %1791 = vmatmul.bf16.gmra.mxu2 %v11803_v19  ;;  %v12232_v34 = vpack.c.bf16 %v1840_v24, %v1834_v17  ;;  %3197 = vmatmul.bf16.gmra.mxu3 %v12217_v27  ;;  %v8485_v19 = vld [vmem:[#allocation8 + $0x2b0] sm:$0xf]  ;;  %v2348_v8 = vunpack.c.l.b16 %v2088_v0  ;;  %v8349_v17 = vld [vmem:[#allocation8 + $0x1a0] sm:$0xf]  ;;  %v10667_v24 = vld [vmem:[#allocation8 + $0x1a4] sm:$0xf0]  ;;  %v12249_v0 = vpop.permute.xlu2 %2182  ;;  %v8414_v29 = vor.u32 %v10683_v36, %v8413_v9 }
 0x16d   : > { %3303 = vmatpush.bf16.msrb.mxu3 %v8494_v22  ;;  %v13484_v32 = vrot.slane %v11998_v5, 5  ;;  %v8486_v49 = vor.u32 %v10701_v53, %v8485_v19  ;;  %v2080_v13 = vsel %vm2047_vm1, 0, %v2038_v63  ;;  %v2076_v56 = vsel %vm2047_vm1, 0, %v2036_v21  ;;  %3275 = vmatpush.bf16.msrb.mxu1 %v8422_v50  ;;  %v12263_v19 = vpop.permute.xlu1 %2190  ;;  %v10665_v53 = vld [vmem:[#allocation8 + $0x194] sm:$0xf0] }
 0x16e   : > { %13481 = vst [vmem:[#allocation49_spill] sm:$0xff] %v12232_v34  ;;  %v8350_v25 = vor.u32 %v10667_v24, %v8349_v17  ;;  %v2339_v21 = vunpack.c.l.b16 %v2080_v13  ;;  %v8469_v50 = vld [vmem:[#allocation8 + $0x290] sm:$0xf]  ;;  %v1845_v17 = vmax.f32 %v12195_v7, 0.0  ;;  %v10697_v36 = vld [vmem:[#allocation8 + $0x294] sm:$0xf0] }
 0x16f   : > { %v1560_v12 = vpop.f32.mrf.mxu2  ;;  %v1642_v34 = vpop.f32.mrf.mxu3  ;;  %v2074_v61 = vsel %vm2047_vm1, 0, %v13484_v32  ;;  %v2082_v32 = vsel %vm2047_vm1, 0, %v2039_v48  ;;  %3246 = vmatpush.bf16.msrb.mxu0 %v8358_v2  ;;  %v8405_v48 = vld [vmem:[#allocation8 + $0x210] sm:$0xf]  ;;  %v10681_v2 = vld [vmem:[#allocation8 + $0x214] sm:$0xf0] }
 0x170   : > { %v12244_v35 = vadd.f32 %v1560_v12, %v12140_v1  ;;  %v1586_v27 = vpop.f32.mrf.mxu0  ;;  %v12251_v22 = vadd.f32 %v1642_v34, %v1614_v52  ;;  %v1615_v38 = vpop.f32.mrf.mxu1  ;;  %v12255_v1 = vpack.c.b16 %v2356_v47, %v2348_v8  ;;  %v8477_v12 = vld [vmem:[#allocation8 + $0x2a0] sm:$0xf]  ;;  %v13485_v52 = vrot.slane %v11883_v4, 3  ;;  %v8341_v8 = vld [vmem:[#allocation8 + $0x190] sm:$0xf] }
 0x171   : > { %v1587_v18 = vadd.f32 %v1586_v27, %v12159_v39  ;;  %v1851_v27 = vmax.f32 %v12213_v14, 0.0  ;;  %3304 = vmatpush.bf16.msrb.mxu3 %v8486_v49  ;;  %v2331_v47 = vunpack.c.l.b16 %v2074_v61  ;;  %v8478_v62 = vor.u32 %v10699_v20, %v8477_v12  ;;  %v12266_v24 = vpop.permute.xlu0 %2184  ;;  %3276 = vmatpush.bf16.msrb.mxu1 %v8414_v29  ;;  %v8333_v13 = vld [vmem:[#allocation8 + $0x180] sm:$0xf]  ;;  %v10663_v12 = vld [vmem:[#allocation8 + $0x184] sm:$0xf0] }
 0x172   : > { %v2129_v34 = vsel %vm2121_vm2, %v13485_v52, 0  ;;  %v2332_v4 = vunpack.c.l.b16 %v2076_v56  ;;  %v2340_v9 = vunpack.c.l.b16 %v2082_v32  ;;  %v8342_v14 = vor.u32 %v10665_v53, %v8341_v8  ;;  %v8397_v52 = vld [vmem:[#allocation8 + $0x200] sm:$0xf]  ;;  %v10695_v8 = vld [vmem:[#allocation8 + $0x284] sm:$0xf0] }
 0x173   : > { %v1616_v63 = vadd.f32 %v1615_v38, %v1587_v18  ;;  %3247 = vmatpush.bf16.msrb.mxu0 %v8350_v25  ;;  %v8406_v18 = vor.u32 %v10681_v2, %v8405_v48  ;;  %v2304_v49 = vunpack.c.l.b16 %v12173_v37  ;;  %v2312_v38 = vunpack.c.l.b16 %v2129_v34  ;;  %v10679_v25 = vld [vmem:[#allocation8 + $0x204] sm:$0xf0]  ;;  %v8461_v29 = vld [vmem:[#allocation8 + $0x280] sm:$0xf] }
 0x174   : > { %v8470_v20 = vor.u32 %v10697_v36, %v8469_v50  ;;  %v12269_v10 = vpack.c.bf16 %v1851_v27, %v1845_v17  ;;  %v12272_v51 = vpack.c.b16 %v2339_v21, %v2331_v47  ;;  %v1857_v37 = vmax.f32 %v12244_v35, 0.0  ;;  %v12279_v47 = vpop.permute.xlu2 %2188  ;;  %v13489_v36 = vld [vmem:[#allocation31_spill] sm:$0xff] }
 0x175   : > { %3305 = vmatpush.bf16.msrb.mxu3 %v8478_v62  ;;  %v12276_v48 = vpack.c.b16 %v2340_v9, %v2332_v4  ;;  %v1846_v27 = vmax.f32 %v12251_v22, 0.0  ;;  %3277 = vmatpush.bf16.msrb.mxu1 %v8406_v18  ;;  %v8398_v50 = vor.u32 %v10679_v25, %v8397_v52  ;;  %v8462_v35 = vor.u32 %v10695_v8, %v8461_v29  ;;  %v13488_v4 = vld [vmem:[#allocation32_spill] sm:$0xff]  ;;  %v12291_v18 = vpop.permute.xlu1 %2196 }
 0x176   : > { %13486 = vst [vmem:[#allocation50_spill] sm:$0xff] %v12269_v10  ;;  %v2025_v9 = vrot.slane %v13488_v4, 5  ;;  %v2028_v22 = vrot.slane %v13489_v36, 5 }
 0x177   : > { %v1562_v61 = vpop.f32.mrf.mxu2  ;;  %v1644_v56 = vpop.f32.mrf.mxu3  ;;  %3248 = vmatpush.bf16.msrb.mxu0 %v8342_v14 }
 0x178   : > { %v1563_v7 = vadd.f32 %v1562_v61, %v12147_v57  ;;  %v1589_v32 = vpop.f32.mrf.mxu0  ;;  %v1645_v34 = vadd.f32 %v1644_v56, %v1616_v63  ;;  %v1618_v53 = vpop.f32.mrf.mxu1  ;;  %v8334_v57 = vor.u32 %v10663_v12, %v8333_v13  ;;  %v12283_v63 = vpack.c.b16 %v2312_v38, %v2304_v49 }
 0x179   : > { %v1590_v62 = vadd.f32 %v1589_v32, %v12159_v39  ;;  %3306 = vmatpush.bf16.msrb.mxu3 %v8470_v20  ;;  %3278 = vmatpush.bf16.msrb.mxu1 %v8398_v50  ;;  %v2054_v38 = vsel %vm2047_vm1, 0, %v2025_v9 }
 0x17a   : > { %v1863_v2 = vmax.f32 %v1563_v7, 0.0  ;;  %v1852_v21 = vmax.f32 %v1645_v34, 0.0  ;;  %8137 = vmatmul.msk.bf16.gmra.mxu0 %vm1296_vm0, %v11774_v54  ;;  %13487 = vst [vmem:[#allocation51_spill] sm:$0xff] %v12283_v63  ;;  %v12296_v54 = vpop.permute.xlu0 %2200  ;;  %v2236_v32 = vsel %vm1296_vm0, %v2054_v38, %v12199_v15 }
 0x17b   : > { %v1619_v17 = vadd.f32 %v1618_v53, %v1590_v62  ;;  %3173 = vmatmul.bf16.gmra.mxu1 %v12272_v51  ;;  %3249 = vmatpush.bf16.msrb.mxu0 %v8334_v57  ;;  %v2031_v57 = vrot.slane %v12006_v46, 5 }
 0x17c   : > { %1796 = vmatmul.bf16.gmra.mxu2 %v11830_v40  ;;  %v12289_v14 = vpack.c.bf16 %v1863_v2, %v1857_v37  ;;  %3202 = vmatmul.bf16.gmra.mxu3 %v12276_v48  ;;  %v12294_v61 = vpack.c.bf16 %v1852_v21, %v1846_v27  ;;  %v2060_v40 = vsel %vm2047_vm1, 0, %v2028_v22  ;;  %v12306_v8 = vpop.permute.xlu2 %2194  ;;  %v2301_v37 = vunpack.c.l.b16 %v2236_v32 }
 0x17d   : > { %3307 = vmatpush.bf16.msrb.mxu3 %v8462_v35  ;;  %v2238_v25 = vsel %vm1296_vm0, %v2060_v40, %v12226_v44  ;;  %v2181_v62 = vpop.permute.xlu1 %2180  ;;  %v2034_v22 = vrot.slane %v12002_v58, 5 }
 0x17e   : > { %13490 = vst [vmem:[#allocation32_spill] sm:$0xff] %v12289_v14  ;;  %v2309_v34 = vunpack.c.l.b16 %v2238_v25 }
 0x17f   : > { %13491 = vst [vmem:[#allocation31_spill] sm:$0xff] %v12294_v61  ;;  %v1565_v49 = vpop.f32.mrf.mxu2  ;;  %v1647_v13 = vpop.f32.mrf.mxu3 }
 0x180   : > { %v1566_v20 = vadd.f32 %v1565_v49, %v12156_v45  ;;  %v1591_v12 = vpop.f32.mrf.mxu0  ;;  %v1648_v52 = vadd.f32 %v1647_v13, %v1619_v17  ;;  %v1620_v56 = vpop.f32.mrf.mxu1  ;;  %v12311_v9 = vpack.c.b16 %v2309_v34, %v2301_v37  ;;  %v8573_v37 = vld [vmem:[#allocation8 + $0x360] sm:$0xf]  ;;  %v10723_v34 = vld [vmem:[#allocation8 + $0x364] sm:$0xf0] }
 0x181   : > { %v1592_v7 = vadd.f32 %v1591_v12, %v12159_v39 }
 0x182   : > { %v2175_v50 = vpop.permute.xlu0 %2174  ;;  %v1869_v49 = vmax.f32 %v1566_v20, 0.0  ;;  %v1858_v40 = vmax.f32 %v1648_v52, 0.0  ;;  %v2066_v20 = vsel %vm2047_vm1, 0, %v2031_v57  ;;  %v2072_v52 = vsel %vm2047_vm1, 0, %v2034_v22 }
 0x183   : > { %v1621_v29 = vadd.f32 %v1620_v56, %v1592_v7  ;;  %v10725_v7 = vld [vmem:[#allocation8 + $0x374] sm:$0xf0]  ;;  %v2240_v57 = vsel %vm1296_vm0, %v2066_v20, %v12249_v0  ;;  %v2221_v22 = vsel %vm1296_vm0, %v12226_v44, %v12219_v30 }
 0x187   : > { %v1567_v53 = vpop.f32.mrf.mxu2  ;;  %v1649_v27 = vpop.f32.mrf.mxu3 }
 0x188   : > { %v1568_v45 = vadd.f32 %v1567_v53, %v12166_v28  ;;  %v1594_v2 = vpop.f32.mrf.mxu0  ;;  %v1650_v21 = vadd.f32 %v1649_v27, %v1621_v29  ;;  %v1623_v35 = vpop.f32.mrf.mxu1  ;;  %v8581_v28 = vld [vmem:[#allocation8 + $0x370] sm:$0xf]  ;;  %v8574_v27 = vor.u32 %v10723_v34, %v8573_v37 }
 0x189   : > { %v1595_v17 = vadd.f32 %v1594_v2, %v12159_v39  ;;  %v8582_v56 = vor.u32 %v10725_v7, %v8581_v28  ;;  %v12325_v29 = vpop.permute.xlu2 %2202  ;;  %v8565_v28 = vld [vmem:[#allocation8 + $0x350] sm:$0xf]  ;;  %v10721_v7 = vld [vmem:[#allocation8 + $0x354] sm:$0xf0] }
 0x18a   : > { %v1875_v38 = vmax.f32 %v1568_v45, 0.0  ;;  %v1864_v13 = vmax.f32 %v1650_v21, 0.0  ;;  %8138 = vmatmul.msk.bf16.gmra.mxu0 %vm1296_vm0, %v11807_v31 }
 0x18b   : > { %v1624_v12 = vadd.f32 %v1623_v35, %v1595_v17  ;;  %3178 = vmatmul.bf16.gmra.mxu1 %v12241_v43  ;;  %3329 = vmatpush.bf16.msra.mxu2 %v8582_v56  ;;  %v2219_v35 = vsel %vm1296_vm0, %v12199_v15, %v12192_v16  ;;  %v12346_v15 = vpop.permute.xlu0 %2212 }
 0x18c   : > { %3221 = vmatmul.bf16.vlgmr.msrb.gmra.mxu2 %v12311_v9  ;;  %v12318_v32 = vpack.c.bf16 %v1875_v38, %v1869_v49  ;;  %3207 = vmatmul.bf16.gmra.mxu3 %v12255_v1  ;;  %v12321_v25 = vpack.c.bf16 %v1864_v13, %v1858_v40  ;;  %v2242_v49 = vsel %vm1296_vm0, %v2072_v52, %v12279_v47  ;;  %v12344_v40 = vpop.permute.xlu1 %2208  ;;  %v12351_v13 = vld [vmem:[%s13371_s2] sm:$0x3f]  ;;  %v2302_v56 = vunpack.c.l.b16 %v2219_v35 }
 0x18d   : > { %v2222_v38 = vsel %vm1296_vm0, %v12219_v30, %v2181_v62  ;;  %v12354_v44 = vperm.slane %v12351_v13, 4  ;;  %v2098_v30 = vrot.slane %v11859_v42, 3  ;;  %v8566_v62 = vor.u32 %v10721_v7, %v8565_v28 }
 0x18e   : > { %13492 = vst [vmem:[#allocation52_spill] sm:$0xff] %v12318_v32  ;;  %v2325_v20 = vunpack.c.l.b16 %v2242_v49  ;;  %v2311_v52 = vunpack.c.l.b16 %v2222_v38 }
 0x18f   : > { %13493 = vst [vmem:[#allocation53_spill] sm:$0xff] %v12321_v25  ;;  %v1666_v31 = vpop.f32.mrf.mxu2  ;;  %v1652_v53 = vpop.f32.mrf.mxu3  ;;  %3330 = vmatpush.bf16.msra.mxu2 %v8574_v27  ;;  %v10719_v27 = vld [vmem:[#allocation8 + $0x344] sm:$0xf0]  ;;  %v12359_v25 = vsel %vm2121_vm2, %v2098_v30, 0 }
 0x190   : > { %v1596_v45 = vpop.f32.mrf.mxu0  ;;  %v12327_v2 = vadd.f32 %v1652_v53, %v1624_v12  ;;  %v1625_v17 = vpop.f32.mrf.mxu1  ;;  %v1667_v34 = vadd.f32 %v1666_v31, %v12354_v44 }
 0x191   : > { %v1597_v21 = vadd.f32 %v1596_v45, %v12159_v39  ;;  %v2220_v39 = vsel %vm1296_vm0, %v12192_v16, %v2175_v50  ;;  %v2310_v16 = vunpack.c.l.b16 %v2221_v22  ;;  %v2317_v50 = vunpack.c.l.b16 %v2240_v57  ;;  %v8557_v45 = vld [vmem:[#allocation8 + $0x340] sm:$0xf] }
 0x192   : > { %v2303_v37 = vunpack.c.l.b16 %v2220_v39  ;;  %v8558_v28 = vor.u32 %v10719_v27, %v8557_v45  ;;  %v2037_v57 = vrot.slane %v12082_v60, 5  ;;  %v13495_v39 = vld [vmem:[#allocation35_spill] sm:$0xff]  ;;  %v1870_v45 = vmax.f32 %v12327_v2, 0.0 }
 0x193   : > { %v1626_v12 = vadd.f32 %v1625_v17, %v1597_v21  ;;  %3331 = vmatpush.bf16.msra.mxu2 %v8566_v62  ;;  %v2101_v21 = vrot.slane %v11879_v3, 3  ;;  %v12362_v35 = vpack.c.b16 %v2310_v16, %v2302_v56  ;;  %v2040_v31 = vrot.slane %v13495_v39, 5  ;;  %v12368_v62 = vpop.permute.xlu2 %2206 }
 0x194   : > { %v12366_v7 = vpack.c.b16 %v2311_v52, %v2303_v37  ;;  %v12370_v30 = vpack.c.b16 %v2325_v20, %v2317_v50  ;;  %v2103_v3 = vrot.slane %v11943_v6, 3  ;;  %v10628_v37 = vld [vmem:[#allocation8 + $0x74] sm:$0xf]  ;;  %v8199_v50 = vld [vmem:[#allocation8 + $0x78] sm:$0xf0]  ;;  %v2078_v6 = vsel %vm2047_vm1, 0, %v2037_v57  ;;  %v2193_v27 = vpop.permute.xlu1 %2192 }
 0x195   : > { %13494 = vst [vmem:[#allocation54_spill] sm:$0xff] %v12362_v35  ;;  %v10644_v20 = vld [vmem:[#allocation8 + $0xf4] sm:$0xf]  ;;  %v2106_v2 = vrot.slane %v11967_v33, 3  ;;  %v12399_v33 = vsel %vm1296_vm0, %v12249_v0, %v12266_v24 }
 0x196   : > { %13496 = vst [vmem:[#allocation35_spill] sm:$0xff] %v12366_v7 }
 0x197   : > { %v1668_v53 = vpop.f32.mrf.mxu2  ;;  %v1654_v17 = vpop.f32.mrf.mxu3  ;;  %13497 = vst [vmem:[#allocation55_spill] sm:$0xff] %v12370_v30  ;;  %3332 = vmatpush.bf16.msra.mxu2 %v8558_v28  ;;  %v8263_v28 = vld [vmem:[#allocation8 + $0xf8] sm:$0xf0] }
 0x198   : > { %v1695_v42 = vpop.f32.mrf.mxu0  ;;  %v1655_v22 = vadd.f32 %v1654_v17, %v1626_v12  ;;  %v1724_v38 = vpop.f32.mrf.mxu1  ;;  %v8549_v12 = vld [vmem:[#allocation8 + $0x330] sm:$0xf]  ;;  %v8266_v57 = vor.u32 %v10644_v20, %v8263_v28  ;;  %v8191_v20 = vld [vmem:[#allocation8 + $0x68] sm:$0xf0] }
 0x199   : > { %v1696_v49 = vadd.f32 %v1695_v42, %v1667_v34  ;;  %v10717_v34 = vld [vmem:[#allocation8 + $0x334] sm:$0xf0]  ;;  %v2187_v17 = vpop.permute.xlu0 %2186  ;;  %v8202_v42 = vor.u32 %v10628_v37, %v8199_v50  ;;  %v8255_v28 = vld [vmem:[#allocation8 + $0xe8] sm:$0xf0] }
 0x19a   : > { %v1876_v56 = vmax.f32 %v1655_v22, 0.0  ;;  %3250 = vmatmul.bf16.vlgmr.msrb.gmra.mxu0 %v12362_v35  ;;  %v8550_v52 = vor.u32 %v10717_v34, %v8549_v12  ;;  %v12389_v12 = vsel %vm2121_vm2, %v2103_v3, 0  ;;  %v12394_v34 = vsel %vm1296_vm0, %v12279_v47, %v12263_v19  ;;  %v10626_v3 = vld [vmem:[#allocation8 + $0x64] sm:$0xf]  ;;  %3416 = vmatpush.bf16.msra.mxu3 %v8266_v57 }
 0x19b   : > { %v12374_v16 = vadd.f32 %v1724_v38, %v1696_v49  ;;  %3279 = vmatmul.bf16.vlgmr.msrb.gmra.mxu1 %v12366_v7  ;;  %v12385_v49 = vsel %vm2121_vm2, %v2101_v21, 0  ;;  %v2084_v38 = vsel %vm2047_vm1, 0, %v2040_v31  ;;  %v1669_v21 = vadd.f32 %v1668_v53, %v12354_v44  ;;  %v8541_v31 = vld [vmem:[#allocation8 + $0x320] sm:$0xf] }
 0x19c   : > { %3226 = vmatmul.bf16.gmra.mxu2 %v12370_v30  ;;  %3308 = vmatmul.bf16.vlgmr.msrb.gmra.mxu3 %v12283_v63  ;;  %v12382_v22 = vpack.c.bf16 %v1876_v56, %v1870_v45  ;;  %v10715_v56 = vld [vmem:[#allocation8 + $0x324] sm:$0xf0]  ;;  %v12408_v47 = vsel %vm1296_vm0, %v12263_v19, %v2193_v27  ;;  %v12412_v37 = vsel %vm1296_vm0, %v12266_v24, %v2187_v17  ;;  %v2118_v19 = vrot.slane %v11975_v55, 3  ;;  %v12425_v55 = vpop.permute.xlu2 %2214  ;;  %v13499_v63 = vld [vmem:[#allocation37_spill] sm:$0xff] }
 0x19d   : > { %3333 = vmatpush.bf16.msra.mxu2 %v8550_v52  ;;  %3387 = vmatpush.bf16.msra.mxu1 %v8202_v42  ;;  %v12404_v52 = vsel %vm1296_vm0, %v2078_v6, %v12306_v8  ;;  %v8542_v50 = vor.u32 %v10715_v56, %v8541_v31  ;;  %v10642_v42 = vld [vmem:[#allocation8 + $0xe4] sm:$0xf]  ;;  %v2141_v6 = vsel %vm2121_vm2, %v2106_v2, 0  ;;  %v8194_v32 = vor.u32 %v10626_v3, %v8191_v20  ;;  %v8533_v2 = vld [vmem:[#allocation8 + $0x310] sm:$0xf] }
 0x19e   : > { %13498 = vst [vmem:[#allocation56_spill] sm:$0xff] %v12382_v22  ;;  %v8258_v14 = vor.u32 %v10642_v42, %v8255_v28  ;;  %v2115_v27 = vrot.slane %v12044_v26, 3  ;;  %v2326_v24 = vunpack.c.l.b16 %v12394_v34  ;;  %v2318_v17 = vunpack.c.l.b16 %v12399_v33  ;;  %v10713_v3 = vld [vmem:[#allocation8 + $0x314] sm:$0xf0]  ;;  %v10640_v20 = vld [vmem:[#allocation8 + $0xd4] sm:$0xf] }
 0x19f   : > { %v1671_v45 = vpop.f32.mrf.mxu2  ;;  %v12414_v0 = vpop.f32.mrf.mxu3  ;;  %v2333_v57 = vunpack.c.l.b16 %v12404_v52  ;;  %v2246_v31 = vsel %vm1296_vm0, %v2084_v38, %v12296_v54  ;;  %v2319_v26 = vunpack.c.l.b16 %v12412_v37  ;;  %v2320_v34 = vunpack.c.l.b16 %v12389_v12  ;;  %v8183_v52 = vld [vmem:[#allocation8 + $0x58] sm:$0xf0]  ;;  %v13500_v30 = vld [vmem:[#allocation41_spill] sm:$0xff] }
 0x1a0   : > { %v1697_v53 = vpop.f32.mrf.mxu0  ;;  %v1726_v61 = vpop.f32.mrf.mxu1  ;;  %v2328_v33 = vunpack.c.l.b16 %v2141_v6  ;;  %3417 = vmatpush.bf16.msra.mxu3 %v8258_v14  ;;  %v8247_v42 = vld [vmem:[#allocation8 + $0xd8] sm:$0xf0]  ;;  %v1835_v38 = vmax.f32 %v12374_v16, 0.0  ;;  %v2341_v10 = vunpack.c.l.b16 %v2246_v31  ;;  %v2043_v7 = vrot.slane %v13499_v63, 5 }
 0x1a1   : > { %v1698_v22 = vadd.f32 %v1697_v53, %v1669_v21  ;;  %3334 = vmatpush.bf16.msra.mxu2 %v8542_v50  ;;  %v2327_v21 = vunpack.c.l.b16 %v12408_v47  ;;  %3388 = vmatpush.bf16.msra.mxu1 %v8194_v32  ;;  %v10624_v53 = vld [vmem:[#allocation8 + $0x54] sm:$0xf]  ;;  %v8534_v50 = vor.u32 %v10713_v3, %v8533_v2  ;;  %v10733_v32 = vld [vmem:[#allocation8 + $0x3b4] sm:$0xf0]  ;;  %v8250_v28 = vor.u32 %v10640_v20, %v8247_v42  ;;  %v10711_v3 = vld [vmem:[#allocation8 + $0x304] sm:$0xf0] }
 0x1a2   : > { %v2046_v37 = vrot.slane %v13500_v30, 5  ;;  %v2305_v14 = vunpack.c.l.b16 %v12359_v25  ;;  %v2313_v12 = vunpack.c.l.b16 %v12385_v49  ;;  %v1672_v6 = vadd.f32 %v1671_v45, %v12354_v44  ;;  %v8175_v25 = vld [vmem:[#allocation8 + $0x48] sm:$0xf0]  ;;  %v10638_v42 = vld [vmem:[#allocation8 + $0xc4] sm:$0xf] }
 0x1a3   : > { %v1727_v56 = vadd.f32 %v1726_v61, %v1698_v22  ;;  %v8613_v61 = vld [vmem:[#allocation8 + $0x3b0] sm:$0xf]  ;;  %v8186_v22 = vor.u32 %v10624_v53, %v8183_v52  ;;  %v10622_v53 = vld [vmem:[#allocation8 + $0x44] sm:$0xf]  ;;  %v12439_v20 = vpack.c.b16 %v2326_v24, %v2318_v17  ;;  %v8239_v49 = vld [vmem:[#allocation8 + $0xc8] sm:$0xf0] }
 0x1a4   : > { %v8614_v35 = vor.u32 %v10733_v32, %v8613_v61  ;;  %3418 = vmatpush.bf16.msra.mxu3 %v8250_v28  ;;  %v8178_v32 = vor.u32 %v10622_v53, %v8175_v25  ;;  %v2159_v24 = vsel %vm2121_vm2, %v2115_v27, 0  ;;  %v8231_v27 = vld [vmem:[#allocation8 + $0xb8] sm:$0xf0] }
 0x1a5   : > { %v1841_v47 = vmax.f32 %v1727_v56, 0.0  ;;  %3335 = vmatpush.bf16.msra.mxu2 %v8534_v50  ;;  %3389 = vmatpush.bf16.msra.mxu1 %v8186_v22  ;;  %v8525_v56 = vld [vmem:[#allocation8 + $0x300] sm:$0xf]  ;;  %v12445_v22 = vpack.c.b16 %v2341_v10, %v2333_v57  ;;  %v2352_v28 = vunpack.c.l.b16 %v2159_v24 }
 0x1a6   : > { %3362 = vmatpush.bf16.msra.mxu0 %v8614_v35  ;;  %v8526_v50 = vor.u32 %v10711_v3, %v8525_v56  ;;  %v2165_v35 = vsel %vm2121_vm2, %v2118_v19, 0  ;;  %v2109_v19 = vrot.slane %v11998_v5, 3  ;;  %v2090_v56 = vsel %vm2047_vm1, 0, %v2043_v7  ;;  %v10618_v7 = vld [vmem:[#allocation8 + $0x24] sm:$0xf] }
 0x1a7   : > { %v12435_v2 = vpack.c.bf16 %v1841_v47, %v1835_v38  ;;  %v1673_v16 = vpop.f32.mrf.mxu2  ;;  %v12437_v31 = vpop.f32.mrf.mxu3  ;;  %v12441_v38 = vpack.c.b16 %v2327_v21, %v2319_v26  ;;  %v12443_v47 = vpack.c.b16 %v2328_v33, %v2320_v34  ;;  %v12452_v21 = vpack.c.b16 %v2313_v12, %v2305_v14  ;;  %v10620_v26 = vld [vmem:[#allocation8 + $0x34] sm:$0xf]  ;;  %v8167_v34 = vld [vmem:[#allocation8 + $0x38] sm:$0xf0] }
 0x1a8   : > { %v1700_v52 = vpop.f32.mrf.mxu0  ;;  %v1729_v45 = vpop.f32.mrf.mxu1  ;;  %v10636_v33 = vld [vmem:[#allocation8 + $0xb4] sm:$0xf]  ;;  %v8170_v10 = vor.u32 %v10620_v26, %v8167_v34  ;;  %v2096_v14 = vsel %vm2047_vm1, 0, %v2046_v37  ;;  %v2112_v3 = vrot.slane %v11919_v59, 3  ;;  %v1674_v25 = vadd.f32 %v1673_v16, %v12354_v44 }
 0x1a9   : > { %13501 = vst [vmem:[#allocation37_spill] sm:$0xff] %v12435_v2  ;;  %v1701_v61 = vadd.f32 %v1700_v52, %v1672_v6  ;;  %3336 = vmatpush.bf16.msra.mxu2 %v8526_v50  ;;  %v8242_v2 = vor.u32 %v10638_v42, %v8239_v49  ;;  %3390 = vmatpush.bf16.msra.mxu1 %v8178_v32  ;;  %v2360_v6 = vunpack.c.l.b16 %v2165_v35  ;;  %v2199_v12 = vpop.permute.xlu2 %2198  ;;  %v2205_v50 = vpop.permute.xlu0 %2204  ;;  %v8605_v42 = vld [vmem:[#allocation8 + $0x3a0] sm:$0xf]  ;;  %v10731_v49 = vld [vmem:[#allocation8 + $0x3a4] sm:$0xf0] }
 0x1aa   : > { %3255 = vmatmul.bf16.gmra.mxu0 %v12439_v20  ;;  %v8234_v53 = vor.u32 %v10636_v33, %v8231_v27  ;;  %v12466_v52 = vsel %vm1296_vm0, %v12306_v8, %v12291_v18  ;;  %v2229_v37 = vsel %vm1296_vm0, %v12296_v54, %v12325_v29  ;;  %v10634_v32 = vld [vmem:[#allocation8 + $0xa4] sm:$0xf]  ;;  %v8223_v8 = vld [vmem:[#allocation8 + $0xa8] sm:$0xf0]  ;;  %v2248_v24 = vsel %vm1296_vm0, %v2090_v56, %v12368_v62 }
 0x1ab   : > { %v12449_v17 = vadd.f32 %v1729_v45, %v1701_v61  ;;  %3284 = vmatmul.bf16.gmra.mxu1 %v12441_v38  ;;  %v12458_v57 = vpack.c.b16 %v2360_v6, %v2352_v28  ;;  %3419 = vmatpush.bf16.msra.mxu3 %v8242_v2  ;;  %v8606_v61 = vor.u32 %v10731_v49, %v8605_v42  ;;  %v8159_v45 = vld [vmem:[#allocation8 + $0x28] sm:$0xf0]  ;;  %v2147_v28 = vsel %vm2121_vm2, %v2109_v19, 0  ;;  %v8597_v19 = vld [vmem:[#allocation8 + $0x390] sm:$0xf] }
 0x1ac   : > { %3231 = vmatmul.bf16.gmra.mxu2 %v12445_v22  ;;  %3313 = vmatmul.bf16.gmra.mxu3 %v12443_v47  ;;  %v8162_v6 = vor.u32 %v10618_v7, %v8159_v45  ;;  %v2334_v26 = vunpack.c.l.b16 %v12466_v52  ;;  %v2153_v34 = vsel %vm2121_vm2, %v2112_v3, 0  ;;  %v8226_v54 = vor.u32 %v10634_v32, %v8223_v8  ;;  %v10616_v42 = vld [vmem:[#allocation8 + $0x14] sm:$0xf]  ;;  %v8151_v7 = vld [vmem:[#allocation8 + $0x18] sm:$0xf0] }
 0x1ad   : > { %3391 = vmatpush.bf16.msra.mxu1 %v8170_v10  ;;  %3363 = vmatpush.bf16.msra.mxu0 %v8606_v61  ;;  %v2250_v33 = vsel %vm1296_vm0, %v2096_v14, %v12346_v15  ;;  %v2228_v10 = vsel %vm1296_vm0, %v12291_v18, %v2199_v12  ;;  %v2230_v27 = vsel %vm1296_vm0, %v12325_v29, %v2205_v50  ;;  %v2342_v52 = vunpack.c.l.b16 %v2229_v37  ;;  %v8215_v61 = vld [vmem:[#allocation8 + $0x98] sm:$0xf0] }
 0x1ae   : > { %v2349_v49 = vunpack.c.l.b16 %v2248_v24  ;;  %v2336_v3 = vunpack.c.l.b16 %v2147_v28  ;;  %v1847_v14 = vmax.f32 %v12449_v17, 0.0  ;;  %v2344_v32 = vunpack.c.l.b16 %v2153_v34  ;;  %v8589_v24 = vld [vmem:[#allocation8 + $0x380] sm:$0xf]  ;;  %v10614_v28 = vld [vmem:[#allocation8 + $0x4] sm:$0xf] }
 0x1af   : > { %v1676_v5 = vpop.f32.mrf.mxu2  ;;  %v12472_v59 = vpop.f32.mrf.mxu3  ;;  %3420 = vmatpush.bf16.msra.mxu3 %v8234_v53  ;;  %v8154_v18 = vor.u32 %v10616_v42, %v8151_v7  ;;  %v2357_v12 = vunpack.c.l.b16 %v2250_v33  ;;  %v2335_v8 = vunpack.c.l.b16 %v2228_v10  ;;  %v2343_v29 = vunpack.c.l.b16 %v2230_v27  ;;  %v10630_v33 = vld [vmem:[#allocation8 + $0x84] sm:$0xf]  ;;  %v8207_v10 = vld [vmem:[#allocation8 + $0x88] sm:$0xf0] }
 0x1b0   : > { %v1702_v2 = vpop.f32.mrf.mxu0  ;;  %v1731_v35 = vpop.f32.mrf.mxu1  ;;  %v12493_v42 = vpack.c.b16 %v2344_v32, %v2336_v3 }
 0x1b1   : > { %v1703_v16 = vadd.f32 %v1702_v2, %v1674_v25  ;;  %3392 = vmatpush.bf16.msra.mxu1 %v8162_v6  ;;  %v10729_v25 = vld [vmem:[#allocation8 + $0x394] sm:$0xf0]  ;;  %v10632_v2 = vld [vmem:[#allocation8 + $0x94] sm:$0xf]  ;;  %v12497_v7 = vpack.c.b16 %v2343_v29, %v2335_v8  ;;  %v2233_v8 = vsel %vm1296_vm0, %v12346_v15, %v12425_v55 }
 0x1b2   : > { %v8598_v53 = vor.u32 %v10729_v25, %v8597_v19  ;;  %v8218_v50 = vor.u32 %v10632_v2, %v8215_v61  ;;  %v12491_v25 = vpack.c.b16 %v2342_v52, %v2334_v26  ;;  %v8210_v2 = vor.u32 %v10630_v33, %v8207_v10  ;;  %v2217_v26 = vpop.permute.xlu2 %2216  ;;  %v2211_v52 = vpop.permute.xlu1 %2210 }
 0x1b3   : > { %v1732_v56 = vadd.f32 %v1731_v35, %v1703_v16  ;;  %3421 = vmatpush.bf16.msra.mxu3 %v8226_v54  ;;  %v1677_v16 = vadd.f32 %v1676_v5, %v12354_v44  ;;  %v10727_v35 = vld [vmem:[#allocation8 + $0x384] sm:$0xf0]  ;;  %v2234_v29 = vsel %vm1296_vm0, %v12425_v55, %v2217_v26 }
 0x1b4   : > { %3364 = vmatpush.bf16.msra.mxu0 %v8598_v53  ;;  %v8590_v34 = vor.u32 %v10727_v35, %v8589_v24  ;;  %v12495_v53 = vpack.c.b16 %v2357_v12, %v2349_v49  ;;  %v2231_v12 = vsel %vm1296_vm0, %v12368_v62, %v12344_v40  ;;  %v2358_v24 = vunpack.c.l.b16 %v2233_v8  ;;  %v10658_v8 = vld [vmem:[#allocation8 + $0x164] sm:$0xf] }
 0x1b5   : > { %v1853_v45 = vmax.f32 %v1732_v56, 0.0  ;;  %3393 = vmatpush.bf16.msra.mxu1 %v8154_v18  ;;  %v8143_v56 = vld [vmem:[#allocation8 + $0x8] sm:$0xf0] }
 0x1b6   : > { %v8146_v5 = vor.u32 %v10614_v28, %v8143_v56 }
 0x1b7   : > { %v1678_v37 = vpop.f32.mrf.mxu2  ;;  %v12487_v6 = vpack.c.bf16 %v1853_v45, %v1847_v14  ;;  %v12489_v19 = vpop.f32.mrf.mxu3  ;;  %3422 = vmatpush.bf16.msra.mxu3 %v8218_v50  ;;  %v2232_v50 = vsel %vm1296_vm0, %v12344_v40, %v2211_v52  ;;  %v12524_v40 = vperm.slane %v12351_v13, 5  ;;  %v10660_v52 = vld [vmem:[#allocation8 + $0x174] sm:$0xf]  ;;  %v2107_v13 = vrot.slane %v13478_v11, 3 }
 0x1b8   : > { %v1705_v17 = vpop.f32.mrf.mxu0  ;;  %v1734_v54 = vpop.f32.mrf.mxu1  ;;  %3365 = vmatpush.bf16.msra.mxu0 %v8590_v34  ;;  %v1679_v49 = vadd.f32 %v1678_v37, %v12354_v44  ;;  %v2350_v37 = vunpack.c.l.b16 %v2231_v12  ;;  %v2351_v34 = vunpack.c.l.b16 %v2232_v50 }
 0x1b9   : > { %13502 = vst [vmem:[#allocation41_spill] sm:$0xff] %v12487_v6  ;;  %v1706_v27 = vadd.f32 %v1705_v17, %v1677_v16  ;;  %3394 = vmatpush.bf16.msra.mxu1 %v8146_v5  ;;  %v2359_v17 = vunpack.c.l.b16 %v2234_v29  ;;  %v8319_v29 = vld [vmem:[#allocation8 + $0x168] sm:$0xf0]  ;;  %v10696_v6 = vld [vmem:[#allocation8 + $0x294] sm:$0xf] }
 0x1ba   : > { %3260 = vmatmul.bf16.gmra.mxu0 %v12491_v25 }
 0x1bb   : > { %v1735_v61 = vadd.f32 %v1734_v54, %v1706_v27  ;;  %3289 = vmatmul.bf16.gmra.mxu1 %v12497_v7  ;;  %3423 = vmatpush.bf16.msra.mxu3 %v8210_v2  ;;  %v12521_v27 = vpack.c.b16 %v2358_v24, %v2350_v37  ;;  %v12526_v5 = vpack.c.b16 %v2359_v17, %v2351_v34  ;;  %v2102_v2 = vrot.slane %v13489_v36, 3 }
 0x1bc   : > { %3236 = vmatmul.bf16.gmra.mxu2 %v12495_v53  ;;  %3318 = vmatmul.bf16.gmra.mxu3 %v12493_v42  ;;  %v1754_v36 = vadd.f32 %v12414_v0, %v12524_v40  ;;  %v2143_v37 = vsel %vm2121_vm2, %v2107_v13, 0  ;;  %v8322_v24 = vor.u32 %v10658_v8, %v8319_v29  ;;  %v1756_v13 = vadd.f32 %v12437_v31, %v12524_v40  ;;  %v10654_v8 = vld [vmem:[#allocation8 + $0x144] sm:$0xf] }
 0x1bd   : > { %v1859_v35 = vmax.f32 %v1735_v61, 0.0  ;;  %v2099_v61 = vrot.slane %v13488_v4, 3  ;;  %v2133_v4 = vsel %vm2121_vm2, %v2102_v2, 0 }
 0x1bf   : > { %v1681_v3 = vpop.f32.mrf.mxu2  ;;  %v12504_v14 = vpop.f32.mrf.mxu3 }
 0x1c0   : > { %v1707_v45 = vpop.f32.mrf.mxu0  ;;  %v1736_v18 = vpop.f32.mrf.mxu1  ;;  %v1682_v56 = vadd.f32 %v1681_v3, %v12354_v44  ;;  %v2104_v3 = vrot.slane %v11902_v41, 3 }
 0x1c1   : > { %v1708_v32 = vadd.f32 %v1707_v45, %v1679_v49  ;;  %v8327_v49 = vld [vmem:[#allocation8 + $0x178] sm:$0xf0] }
 0x1c2   : > { %v8330_v45 = vor.u32 %v10660_v52, %v8327_v49 }
 0x1c3   : > { %v1737_v16 = vadd.f32 %v1736_v18, %v1708_v32  ;;  %v2127_v32 = vsel %vm2121_vm2, %v2099_v61, 0 }
 0x1c4   : > { %3445 = vmatpush.bf16.msrb.mxu2 %v8330_v45  ;;  %v2306_v17 = vunpack.c.l.b16 %v2127_v32 }
 0x1c5   : > { %v1865_v28 = vmax.f32 %v1737_v16, 0.0  ;;  %v2137_v16 = vsel %vm2121_vm2, %v2104_v3, 0 }
 0x1c7   : > { %v1683_v62 = vpop.f32.mrf.mxu2  ;;  %v12517_v33 = vpack.c.bf16 %v1865_v28, %v1859_v35  ;;  %v12519_v10 = vpop.f32.mrf.mxu3  ;;  %v2314_v28 = vunpack.c.l.b16 %v2133_v4  ;;  %v13505_v4 = vld [vmem:[#allocation29_spill] sm:$0xff] }
 0x1c8   : > { %v1710_v15 = vpop.f32.mrf.mxu0  ;;  %v1739_v54 = vpop.f32.mrf.mxu1  ;;  %v1684_v18 = vadd.f32 %v1683_v62, %v12354_v44  ;;  %3446 = vmatpush.bf16.msrb.mxu2 %v8322_v24  ;;  %v2329_v44 = vunpack.c.l.b16 %v2143_v37  ;;  %v10656_v62 = vld [vmem:[#allocation8 + $0x154] sm:$0xf]  ;;  %v2110_v32 = vrot.slane %v13505_v4, 3 }
 0x1c9   : > { %13503 = vst [vmem:[#allocation57_spill] sm:$0xff] %v12517_v33  ;;  %v1711_v55 = vadd.f32 %v1710_v15, %v1682_v56  ;;  %v2321_v56 = vunpack.c.l.b16 %v2137_v16  ;;  %v8311_v15 = vld [vmem:[#allocation8 + $0x158] sm:$0xf0]  ;;  %v12547_v3 = vpack.c.b16 %v2314_v28, %v2306_v17  ;;  %v10708_v4 = vld [vmem:[#allocation8 + $0x2f4] sm:$0xf] }
 0x1ca   : > { %3265 = vmatmul.bf16.gmra.mxu0 %v12521_v27  ;;  %v8314_v61 = vor.u32 %v10656_v62, %v8311_v15  ;;  %v8407_v33 = vld [vmem:[#allocation8 + $0x218] sm:$0xf0] }
 0x1cb   : > { %v1740_v26 = vadd.f32 %v1739_v54, %v1711_v55  ;;  %3294 = vmatmul.bf16.gmra.mxu1 %v12526_v5  ;;  %v2116_v55 = vrot.slane %v11971_v23, 3  ;;  %v13504_v54 = vld [vmem:[#allocation38_spill] sm:$0xff] }
 0x1cc   : > { %3337 = vmatmul.bf16.vlgmr.msra.gmra.mxu2 %v12452_v21  ;;  %3323 = vmatmul.bf16.gmra.mxu3 %v12458_v57  ;;  %v2119_v2 = vrot.slane %v13504_v54, 3  ;;  %v8303_v23 = vld [vmem:[#allocation8 + $0x148] sm:$0xf0]  ;;  %v13508_v54 = vld [vmem:[#allocation43_spill] sm:$0xff] }
 0x1cd   : > { %v1871_v52 = vmax.f32 %v1740_v26, 0.0  ;;  %3447 = vmatpush.bf16.msrb.mxu2 %v8314_v61  ;;  %v8306_v37 = vor.u32 %v10654_v8, %v8303_v23  ;;  %v2161_v24 = vsel %vm2121_vm2, %v2116_v55, 0  ;;  %v8295_v55 = vld [vmem:[#allocation8 + $0x138] sm:$0xf0]  ;;  %v10692_v61 = vld [vmem:[#allocation8 + $0x274] sm:$0xf] }
 0x1ce   : > { %v2167_v31 = vsel %vm2121_vm2, %v2119_v2, 0  ;;  %v2353_v28 = vunpack.c.l.b16 %v2161_v24  ;;  %v8391_v2 = vld [vmem:[#allocation8 + $0x1f8] sm:$0xf0]  ;;  %v8287_v24 = vld [vmem:[#allocation8 + $0x128] sm:$0xf0] }
 0x1cf   : > { %v1782_v12 = vpop.f32.mrf.mxu2  ;;  %v12541_v50 = vpop.f32.mrf.mxu3  ;;  %v2361_v17 = vunpack.c.l.b16 %v2167_v31  ;;  %v10674_v31 = vld [vmem:[#allocation8 + $0x1e4] sm:$0xf] }
 0x1d0   : > { %v1783_v41 = vadd.f32 %v1782_v12, %v1754_v36  ;;  %v1712_v11 = vpop.f32.mrf.mxu0  ;;  %v1741_v35 = vpop.f32.mrf.mxu1  ;;  %v12551_v36 = vpack.c.b16 %v2329_v44, %v2321_v56  ;;  %v2105_v56 = vrot.slane %v12006_v46, 3  ;;  %v12568_v44 = vsel %vm2121_vm2, %v2110_v32, 0  ;;  %v10676_v46 = vld [vmem:[#allocation8 + $0x1f4] sm:$0xf]  ;;  %v8519_v32 = vld [vmem:[#allocation8 + $0x2f8] sm:$0xf0] }
 0x1d1   : > { %v1713_v0 = vadd.f32 %v1712_v11, %v1684_v18  ;;  %v13506_v18 = vld [vmem:[#allocation34_spill] sm:$0xff]  ;;  %3448 = vmatpush.bf16.msrb.mxu2 %v8306_v37  ;;  %v12573_v15 = vpack.c.b16 %v2361_v17, %v2353_v28  ;;  %v8522_v23 = vor.u32 %v10708_v4, %v8519_v32  ;;  %v10650_v37 = vld [vmem:[#allocation8 + $0x124] sm:$0xf] }
 0x1d2   : > { %v2113_v12 = vrot.slane %v13506_v18, 3  ;;  %v2139_v18 = vsel %vm2121_vm2, %v2105_v56, 0  ;;  %v10706_v4 = vld [vmem:[#allocation8 + $0x2e4] sm:$0xf] }
 0x1d3   : > { %v1742_v34 = vadd.f32 %v1741_v35, %v1713_v0  ;;  %3532 = vmatpush.bf16.msrb.mxu3 %v8522_v23  ;;  %v10648_v23 = vld [vmem:[#allocation8 + $0x114] sm:$0xf] }
 0x1d4   : > { %v12571_v62 = vsel %vm2121_vm2, %v2113_v12, 0 }
 0x1d5   : > { %v1877_v49 = vmax.f32 %v1742_v34, 0.0  ;;  %v2108_v34 = vrot.slane %v12002_v58, 3 }
 0x1d7   : > { %v1784_v45 = vpop.f32.mrf.mxu2  ;;  %v12555_v29 = vpack.c.bf16 %v1877_v49, %v1871_v52  ;;  %v12557_v11 = vpop.f32.mrf.mxu3  ;;  %v1759_v52 = vadd.f32 %v12472_v59, %v12524_v40  ;;  %v13509_v49 = vld [vmem:[#allocation44_spill] sm:$0xff]  ;;  %v2145_v12 = vsel %vm2121_vm2, %v2108_v34, 0 }
 0x1d8   : > { %v1785_v26 = vadd.f32 %v1784_v45, %v1756_v13  ;;  %v1811_v16 = vpop.f32.mrf.mxu0  ;;  %v3164_v35 = vpop.f32.mrf.mxu1  ;;  %v8394_v13 = vor.u32 %v10676_v46, %v8391_v2  ;;  %v8455_v45 = vld [vmem:[#allocation8 + $0x278] sm:$0xf0]  ;;  %v10690_v46 = vld [vmem:[#allocation8 + $0x264] sm:$0xf]  ;;  %v8447_v2 = vld [vmem:[#allocation8 + $0x268] sm:$0xf0] }
 0x1d9   : > { %13507 = vst [vmem:[#allocation38_spill] sm:$0xff] %v12555_v29  ;;  %v12561_v0 = vadd.f32 %v1811_v16, %v1783_v41  ;;  %v10652_v41 = vld [vmem:[#allocation8 + $0x134] sm:$0xf]  ;;  %v8458_v8 = vor.u32 %v10692_v61, %v8455_v45  ;;  %v8450_v45 = vor.u32 %v10690_v46, %v8447_v2  ;;  %v2322_v29 = vunpack.c.l.b16 %v2139_v18  ;;  %v8503_v18 = vld [vmem:[#allocation8 + $0x2d8] sm:$0xf0] }
 0x1da   : > { %8619 = vmatmul.msk.bf16.vlgmr.msra.gmra.mxu0 %vm1296_vm0, %v12547_v3  ;;  %v8298_v58 = vor.u32 %v10652_v41, %v8295_v55  ;;  %v8290_v41 = vor.u32 %v10650_v37, %v8287_v24  ;;  %v8383_v55 = vld [vmem:[#allocation8 + $0x1e8] sm:$0xf0]  ;;  %v8279_v37 = vld [vmem:[#allocation8 + $0x118] sm:$0xf0]  ;;  %v2337_v24 = vunpack.c.l.b16 %v12568_v44  ;;  %v10704_v46 = vld [vmem:[#allocation8 + $0x2d4] sm:$0xf] }
 0x1db   : > { %3395 = vmatmul.bf16.vlgmr.msra.gmra.mxu1 %v13508_v54  ;;  %3474 = vmatpush.bf16.msrb.mxu0 %v8394_v13  ;;  %v8386_v61 = vor.u32 %v10674_v31, %v8383_v55  ;;  %v8511_v13 = vld [vmem:[#allocation8 + $0x2e8] sm:$0xf0]  ;;  %v10672_v31 = vld [vmem:[#allocation8 + $0x1d4] sm:$0xf]  ;;  %v8506_v44 = vor.u32 %v10704_v46, %v8503_v18  ;;  %v2111_v46 = vrot.slane %v12082_v60, 3 }
 0x1dc   : > { %3342 = vmatmul.bf16.gmra.mxu2 %v12551_v36  ;;  %3424 = vmatmul.bf16.vlgmr.msra.gmra.mxu3 %v13509_v49  ;;  %v8514_v32 = vor.u32 %v10706_v4, %v8511_v13  ;;  %v10670_v4 = vld [vmem:[#allocation8 + $0x1c4] sm:$0xf]  ;;  %v10668_v18 = vld [vmem:[#allocation8 + $0x1b4] sm:$0xf] }
 0x1dd   : > { %3449 = vmatpush.bf16.msrb.mxu2 %v8298_v58  ;;  %3503 = vmatpush.bf16.msrb.mxu1 %v8458_v8  ;;  %v2330_v8 = vunpack.c.l.b16 %v2145_v12  ;;  %v1761_v12 = vadd.f32 %v12489_v19, %v12524_v40  ;;  %v10686_v19 = vld [vmem:[#allocation8 + $0x244] sm:$0xf] }
 0x1de   : > { %3533 = vmatpush.bf16.msrb.mxu3 %v8514_v32 }
 0x1df   : > { %v1787_v16 = vpop.f32.mrf.mxu2  ;;  %v3193_v59 = vpop.f32.mrf.mxu3  ;;  %3475 = vmatpush.bf16.msrb.mxu0 %v8386_v61  ;;  %v10646_v61 = vld [vmem:[#allocation8 + $0x104] sm:$0xf] }
 0x1e0   : > { %v1788_v28 = vadd.f32 %v1787_v16, %v1759_v52  ;;  %v1813_v17 = vpop.f32.mrf.mxu0  ;;  %v12582_v56 = vadd.f32 %v3193_v59, %v3164_v35  ;;  %v3166_v58 = vpop.f32.mrf.mxu1  ;;  %v1836_v52 = vmax.f32 %v12561_v0, 0.0  ;;  %v2345_v35 = vunpack.c.l.b16 %v12571_v62  ;;  %v8375_v59 = vld [vmem:[#allocation8 + $0x1d8] sm:$0xf0] }
 0x1e1   : > { %v1814_v34 = vadd.f32 %v1813_v17, %v1785_v26  ;;  %3450 = vmatpush.bf16.msrb.mxu2 %v8290_v41  ;;  %3504 = vmatpush.bf16.msrb.mxu1 %v8450_v45  ;;  %v8282_v26 = vor.u32 %v10648_v23, %v8279_v37  ;;  %v10688_v17 = vld [vmem:[#allocation8 + $0x254] sm:$0xf]  ;;  %v8378_v55 = vor.u32 %v10672_v31, %v8375_v59  ;;  %v8439_v0 = vld [vmem:[#allocation8 + $0x258] sm:$0xf0]  ;;  %v8271_v45 = vld [vmem:[#allocation8 + $0x108] sm:$0xf0] }
 0x1e2   : > { %v8442_v2 = vor.u32 %v10688_v17, %v8439_v0  ;;  %v12591_v62 = vpack.c.b16 %v2330_v8, %v2322_v29  ;;  %3534 = vmatpush.bf16.msrb.mxu3 %v8506_v44  ;;  %v8274_v23 = vor.u32 %v10646_v61, %v8271_v45  ;;  %v8367_v37 = vld [vmem:[#allocation8 + $0x1c8] sm:$0xf0]  ;;  %v10702_v17 = vld [vmem:[#allocation8 + $0x2c4] sm:$0xf]  ;;  %v2114_v0 = vrot.slane %v13495_v39, 3 }
 0x1e3   : > { %v1842_v16 = vmax.f32 %v1814_v34, 0.0  ;;  %3476 = vmatpush.bf16.msrb.mxu0 %v8378_v55  ;;  %v8370_v8 = vor.u32 %v10670_v4, %v8367_v37  ;;  %v8495_v55 = vld [vmem:[#allocation8 + $0x2c8] sm:$0xf0]  ;;  %v10700_v44 = vld [vmem:[#allocation8 + $0x2b4] sm:$0xf]  ;;  %v1764_v39 = vadd.f32 %v12504_v14, %v12524_v40  ;;  %v2151_v45 = vsel %vm2121_vm2, %v2111_v46, 0 }
 0x1e4   : > { %v8487_v61 = vld [vmem:[#allocation8 + $0x2b8] sm:$0xf0]  ;;  %v2157_v4 = vsel %vm2121_vm2, %v2114_v0, 0  ;;  %v10666_v37 = vld [vmem:[#allocation8 + $0x1a4] sm:$0xf] }
 0x1e5   : > { %v12587_v41 = vpack.c.bf16 %v1842_v16, %v1836_v52  ;;  %3451 = vmatpush.bf16.msrb.mxu2 %v8282_v26  ;;  %v12593_v16 = vpack.c.b16 %v2345_v35, %v2337_v24  ;;  %3505 = vmatpush.bf16.msrb.mxu1 %v8442_v2  ;;  %v8431_v26 = vld [vmem:[#allocation8 + $0x248] sm:$0xf0]  ;;  %v8498_v35 = vor.u32 %v10702_v17, %v8495_v55  ;;  %v8423_v2 = vld [vmem:[#allocation8 + $0x238] sm:$0xf0] }
 0x1e6   : > { %v8434_v24 = vor.u32 %v10686_v19, %v8431_v26  ;;  %v8351_v19 = vld [vmem:[#allocation8 + $0x1a8] sm:$0xf0]  ;;  %v10682_v26 = vld [vmem:[#allocation8 + $0x224] sm:$0xf] }
 0x1e7   : > { %13510 = vst [vmem:[#allocation29_spill] sm:$0xff] %v12587_v41  ;;  %v1789_v34 = vpop.f32.mrf.mxu2  ;;  %v3195_v32 = vpop.f32.mrf.mxu3  ;;  %3477 = vmatpush.bf16.msrb.mxu0 %v8370_v8  ;;  %3535 = vmatpush.bf16.msrb.mxu3 %v8498_v35  ;;  %v8479_v8 = vld [vmem:[#allocation8 + $0x2a8] sm:$0xf0]  ;;  %v8354_v0 = vor.u32 %v10666_v37, %v8351_v19  ;;  %v10680_v41 = vld [vmem:[#allocation8 + $0x214] sm:$0xf] }
 0x1e8   : > { %v1790_v13 = vadd.f32 %v1789_v34, %v1761_v12  ;;  %v1816_v52 = vpop.f32.mrf.mxu0  ;;  %v12595_v31 = vadd.f32 %v3195_v32, %v3166_v58  ;;  %v3169_v29 = vpop.f32.mrf.mxu1  ;;  %v8359_v12 = vld [vmem:[#allocation8 + $0x1b8] sm:$0xf0]  ;;  %v8335_v37 = vld [vmem:[#allocation8 + $0x188] sm:$0xf0]  ;;  %v10678_v19 = vld [vmem:[#allocation8 + $0x204] sm:$0xf] }
 0x1e9   : > { %v1817_v59 = vadd.f32 %v1816_v52, %v1788_v28  ;;  %3452 = vmatpush.bf16.msrb.mxu2 %v8274_v23  ;;  %v13511_v58 = vld [vmem:[#allocation28_spill] sm:$0xff]  ;;  %v10684_v28 = vld [vmem:[#allocation8 + $0x234] sm:$0xf]  ;;  %v8362_v60 = vor.u32 %v10668_v18, %v8359_v12  ;;  %3506 = vmatpush.bf16.msrb.mxu1 %v8434_v24  ;;  %v8490_v52 = vor.u32 %v10700_v44, %v8487_v61  ;;  %v2338_v44 = vunpack.c.l.b16 %v2151_v45 }
 0x1ea   : > { %8620 = vmatmul.msk.bf16.gmra.mxu0 %vm1296_vm0, %v12591_v62  ;;  %v13512_v34 = vld [vmem:[#allocation48_spill] sm:$0xff]  ;;  %v8426_v32 = vor.u32 %v10684_v28, %v8423_v2  ;;  %v2346_v61 = vunpack.c.l.b16 %v2157_v4  ;;  %v10662_v4 = vld [vmem:[#allocation8 + $0x184] sm:$0xf] }
 0x1eb   : > { %3400 = vmatmul.bf16.gmra.mxu1 %v13511_v58  ;;  %v8415_v58 = vld [vmem:[#allocation8 + $0x228] sm:$0xf0]  ;;  %3478 = vmatpush.bf16.msrb.mxu0 %v8362_v60  ;;  %v1848_v28 = vmax.f32 %v1817_v59, 0.0  ;;  %v1766_v60 = vadd.f32 %v12519_v10, %v12524_v40 }
 0x1ec   : > { %3347 = vmatmul.bf16.gmra.mxu2 %v12593_v16  ;;  %3429 = vmatmul.bf16.gmra.mxu3 %v13512_v34  ;;  %v10698_v34 = vld [vmem:[#allocation8 + $0x2a4] sm:$0xf]  ;;  %v8418_v24 = vor.u32 %v10682_v26, %v8415_v58  ;;  %v12614_v45 = vpack.c.b16 %v2346_v61, %v2338_v44 }
 0x1ed   : > { %3507 = vmatpush.bf16.msrb.mxu1 %v8426_v32  ;;  %3536 = vmatpush.bf16.msrb.mxu3 %v8490_v52  ;;  %v8482_v35 = vor.u32 %v10698_v34, %v8479_v8  ;;  %v8410_v32 = vor.u32 %v10680_v41, %v8407_v33  ;;  %v8399_v34 = vld [vmem:[#allocation8 + $0x208] sm:$0xf0]  ;;  %v10694_v8 = vld [vmem:[#allocation8 + $0x284] sm:$0xf]  ;;  %v2117_v41 = vrot.slane %v13499_v63, 3 }
 0x1ef   : > { %v1792_v23 = vpop.f32.mrf.mxu2  ;;  %v3198_v55 = vpop.f32.mrf.mxu3  ;;  %3479 = vmatpush.bf16.msrb.mxu0 %v8354_v0  ;;  %v2163_v63 = vsel %vm2121_vm2, %v2117_v41, 0 }
 0x1f0   : > { %v1793_v17 = vadd.f32 %v1792_v23, %v1764_v39  ;;  %v1818_v14 = vpop.f32.mrf.mxu0  ;;  %v12608_v18 = vadd.f32 %v3198_v55, %v3169_v29  ;;  %v3171_v46 = vpop.f32.mrf.mxu1  ;;  %v10664_v39 = vld [vmem:[#allocation8 + $0x194] sm:$0xf]  ;;  %v8343_v23 = vld [vmem:[#allocation8 + $0x198] sm:$0xf0] }
 0x1f1   : > { %v1819_v12 = vadd.f32 %v1818_v14, %v1790_v13  ;;  %v8346_v29 = vor.u32 %v10664_v39, %v8343_v23  ;;  %v8471_v55 = vld [vmem:[#allocation8 + $0x298] sm:$0xf0]  ;;  %3508 = vmatpush.bf16.msrb.mxu1 %v8418_v24  ;;  %3537 = vmatpush.bf16.msrb.mxu3 %v8482_v35  ;;  %v8338_v24 = vor.u32 %v10662_v4, %v8335_v37  ;;  %v2120_v35 = vrot.slane %v13500_v30, 3  ;;  %v8685_v39 = vld [vmem:[#allocation8 + $0x430] sm:$0xf] }
 0x1f2   : > { %v8474_v59 = vor.u32 %v10696_v6, %v8471_v55  ;;  %v8402_v6 = vor.u32 %v10678_v19, %v8399_v34  ;;  %v10749_v23 = vld [vmem:[#allocation8 + $0x434] sm:$0xf0]  ;;  %v8677_v19 = vld [vmem:[#allocation8 + $0x420] sm:$0xf] }
 0x1f3   : > { %v1854_v2 = vmax.f32 %v1819_v12, 0.0  ;;  %v8463_v12 = vld [vmem:[#allocation8 + $0x288] sm:$0xf0]  ;;  %3480 = vmatpush.bf16.msrb.mxu0 %v8346_v29  ;;  %v2169_v30 = vsel %vm2121_vm2, %v2120_v35, 0  ;;  %v8686_v55 = vor.u32 %v10749_v23, %v8685_v39  ;;  %v10765_v4 = vld [vmem:[#allocation8 + $0x4b4] sm:$0xf0] }
 0x1f4   : > { %v8466_v33 = vor.u32 %v10694_v8, %v8463_v12  ;;  %v1771_v8 = vadd.f32 %v12557_v11, %v12524_v40  ;;  %v8669_v35 = vld [vmem:[#allocation8 + $0x410] sm:$0xf]  ;;  %v8583_v11 = vld [vmem:[#allocation8 + $0x378] sm:$0xf0]  ;;  %v10761_v23 = vld [vmem:[#allocation8 + $0x494] sm:$0xf0] }
 0x1f5   : > { %v12610_v13 = vpack.c.bf16 %v1854_v2, %v1848_v28  ;;  %3509 = vmatpush.bf16.msrb.mxu1 %v8410_v32  ;;  %3538 = vmatpush.bf16.msrb.mxu3 %v8474_v59  ;;  %v2362_v59 = vunpack.c.l.b16 %v2169_v30  ;;  %v8733_v39 = vld [vmem:[#allocation8 + $0x490] sm:$0xf] }
 0x1f7   : > { %13513 = vst [vmem:[#allocation34_spill] sm:$0xff] %v12610_v13  ;;  %v1794_v52 = vpop.f32.mrf.mxu2  ;;  %v3200_v14 = vpop.f32.mrf.mxu3  ;;  %3481 = vmatpush.bf16.msrb.mxu0 %v8338_v24 }
 0x1f8   : > { %v1795_v26 = vadd.f32 %v1794_v52, %v1766_v60  ;;  %v1821_v58 = vpop.f32.mrf.mxu0  ;;  %v12616_v0 = vadd.f32 %v3200_v14, %v3171_v46  ;;  %v3174_v10 = vpop.f32.mrf.mxu1  ;;  %v8749_v52 = vld [vmem:[#allocation8 + $0x4b0] sm:$0xf]  ;;  %v10747_v14 = vld [vmem:[#allocation8 + $0x424] sm:$0xf0] }
 0x1f9   : > { %v1822_v28 = vadd.f32 %v1821_v58, %v1793_v17  ;;  %v1769_v17 = vadd.f32 %v12541_v50, %v12524_v40  ;;  %3510 = vmatpush.bf16.msrb.mxu1 %v8402_v6  ;;  %3539 = vmatpush.bf16.msrb.mxu3 %v8466_v33  ;;  %v2354_v50 = vunpack.c.l.b16 %v2163_v63  ;;  %v8750_v37 = vor.u32 %v10765_v4, %v8749_v52  ;;  %v10724_v40 = vld [vmem:[#allocation8 + $0x374] sm:$0xf] }
 0x1fa   : > { %8621 = vmatmul.msk.bf16.gmra.mxu0 %vm1296_vm0, %v12614_v45  ;;  %v8678_v58 = vor.u32 %v10747_v14, %v8677_v19  ;;  %v8586_v30 = vor.u32 %v10724_v40, %v8583_v11  ;;  %v10759_v14 = vld [vmem:[#allocation8 + $0x484] sm:$0xf0]  ;;  %v8717_v40 = vld [vmem:[#allocation8 + $0x470] sm:$0xf]  ;;  %v10757_v11 = vld [vmem:[#allocation8 + $0x474] sm:$0xf0] }
 0x1fb   : > { %3405 = vmatmul.bf16.gmra.mxu1 %v12272_v51  ;;  %v1860_v60 = vmax.f32 %v1822_v28, 0.0  ;;  %v12635_v12 = vpack.c.b16 %v2362_v59, %v2354_v50  ;;  %v8741_v28 = vld [vmem:[#allocation8 + $0x4a0] sm:$0xf]  ;;  %v8575_v50 = vld [vmem:[#allocation8 + $0x368] sm:$0xf0] }
 0x1fc   : > { %3352 = vmatmul.bf16.gmra.mxu2 %v12573_v15  ;;  %3434 = vmatmul.bf16.gmra.mxu3 %v12276_v48  ;;  %v8725_v59 = vld [vmem:[#allocation8 + $0x480] sm:$0xf] }
 0x1fd   : > { %4356 = vmatpush.bf16.msra.mxu1 %v8686_v55  ;;  %4370 = vmatpush.bf16.msra.mxu3 %v8750_v37 }
 0x1fe   : > { %3561 = vmatpush.bf16.msra.mxu2 %v8586_v30  ;;  %v8645_v30 = vld [vmem:[#allocation8 + $0x3e0] sm:$0xf] }
 0x1ff   : > { %v1797_v46 = vpop.f32.mrf.mxu2  ;;  %v3203_v44 = vpop.f32.mrf.mxu3 }
 0x200   : > { %v1798_v2 = vadd.f32 %v1797_v46, %v1769_v17  ;;  %v1823_v61 = vpop.f32.mrf.mxu0  ;;  %v12629_v29 = vadd.f32 %v3203_v44, %v3174_v10  ;;  %v3176_v48 = vpop.f32.mrf.mxu1  ;;  %v10763_v10 = vld [vmem:[#allocation8 + $0x4a4] sm:$0xf0]  ;;  %v10745_v17 = vld [vmem:[#allocation8 + $0x414] sm:$0xf0] }
 0x201   : > { %v1824_v51 = vadd.f32 %v1823_v61, %v1795_v26  ;;  %4357 = vmatpush.bf16.msra.mxu1 %v8678_v58  ;;  %v8742_v41 = vor.u32 %v10763_v10, %v8741_v28  ;;  %v8670_v63 = vor.u32 %v10745_v17, %v8669_v35  ;;  %v8653_v58 = vld [vmem:[#allocation8 + $0x3f0] sm:$0xf]  ;;  %v10720_v17 = vld [vmem:[#allocation8 + $0x354] sm:$0xf] }
 0x203   : > { %v1866_v32 = vmax.f32 %v1824_v51, 0.0  ;;  %4371 = vmatpush.bf16.msra.mxu3 %v8742_v41  ;;  %v8661_v51 = vld [vmem:[#allocation8 + $0x400] sm:$0xf] }
 0x205   : > { %v12631_v34 = vpack.c.bf16 %v1866_v32, %v1860_v60  ;;  %4358 = vmatpush.bf16.msra.mxu1 %v8670_v63  ;;  %v10722_v32 = vld [vmem:[#allocation8 + $0x364] sm:$0xf]  ;;  %v8567_v63 = vld [vmem:[#allocation8 + $0x358] sm:$0xf0] }
 0x206   : > { %v8578_v19 = vor.u32 %v10722_v32, %v8575_v50 }
 0x207   : > { %13514 = vst [vmem:[#allocation43_spill] sm:$0xff] %v12631_v34  ;;  %v1799_v26 = vpop.f32.mrf.mxu2  ;;  %v3205_v6 = vpop.f32.mrf.mxu3  ;;  %v10885_v34 = vld [vmem:[#allocation8 + $0x874] sm:$0xf0] }
 0x208   : > { %v1800_v24 = vadd.f32 %v1799_v26, %v1771_v8  ;;  %v1826_v33 = vpop.f32.mrf.mxu0  ;;  %v12637_v46 = vadd.f32 %v3205_v6, %v3176_v48  ;;  %v3179_v61 = vpop.f32.mrf.mxu1  ;;  %v10743_v48 = vld [vmem:[#allocation8 + $0x404] sm:$0xf0]  ;;  %v10741_v8 = vld [vmem:[#allocation8 + $0x3f4] sm:$0xf0]  ;;  %v8726_v6 = vor.u32 %v10759_v14, %v8725_v59  ;;  %3562 = vmatpush.bf16.msra.mxu2 %v8578_v19 }
 0x209   : > { %v1827_v44 = vadd.f32 %v1826_v33, %v1798_v2  ;;  %v8734_v2 = vor.u32 %v10761_v23, %v8733_v39  ;;  %v8662_v55 = vor.u32 %v10743_v48, %v8661_v51  ;;  %v8654_v33 = vor.u32 %v10741_v8, %v8653_v58  ;;  %v10739_v23 = vld [vmem:[#allocation8 + $0x3e4] sm:$0xf0]  ;;  %v8559_v48 = vld [vmem:[#allocation8 + $0x348] sm:$0xf0] }
 0x20a   : > { %8622 = vmatmul.msk.bf16.gmra.mxu0 %vm1296_vm0, %v12635_v12  ;;  %v8718_v39 = vor.u32 %v10757_v11, %v8717_v40  ;;  %v10755_v59 = vld [vmem:[#allocation8 + $0x464] sm:$0xf0]  ;;  %v10753_v40 = vld [vmem:[#allocation8 + $0x454] sm:$0xf0] }
 0x20b   : > { %3410 = vmatmul.bf16.gmra.mxu1 %v12241_v43  ;;  %4372 = vmatpush.bf16.msra.mxu3 %v8734_v2  ;;  %v1872_v41 = vmax.f32 %v1827_v44, 0.0  ;;  %v10718_v2 = vld [vmem:[#allocation8 + $0x344] sm:$0xf]  ;;  %v8709_v44 = vld [vmem:[#allocation8 + $0x460] sm:$0xf] }
 0x20c   : > { %3453 = vmatmul.bf16.vlgmr.msrb.gmra.mxu2 %v12311_v9  ;;  %3439 = vmatmul.bf16.gmra.mxu3 %v12255_v1  ;;  %v8562_v50 = vor.u32 %v10718_v2, %v8559_v48  ;;  %v8710_v8 = vor.u32 %v10755_v59, %v8709_v44  ;;  %v10735_v11 = vld [vmem:[#allocation8 + $0x3c4] sm:$0xf0]  ;;  %v10714_v48 = vld [vmem:[#allocation8 + $0x324] sm:$0xf]  ;;  %v8543_v44 = vld [vmem:[#allocation8 + $0x328] sm:$0xf0] }
 0x20d   : > { %4359 = vmatpush.bf16.msra.mxu1 %v8662_v55 }
 0x20f   : > { %v3222_v60 = vpop.f32.mrf.mxu2  ;;  %v3208_v52 = vpop.f32.mrf.mxu3  ;;  %4373 = vmatpush.bf16.msra.mxu3 %v8726_v6 }
 0x210   : > { %v3223_v4 = vadd.f32 %v3222_v60, %v12582_v56  ;;  %v1828_v37 = vpop.f32.mrf.mxu0  ;;  %v12645_v26 = vadd.f32 %v3208_v52, %v3179_v61  ;;  %v3181_v10 = vpop.f32.mrf.mxu1  ;;  %v8570_v56 = vor.u32 %v10720_v17, %v8567_v63  ;;  %v8637_v52 = vld [vmem:[#allocation8 + $0x3d0] sm:$0xf] }
 0x211   : > { %v1829_v28 = vadd.f32 %v1828_v37, %v1800_v24  ;;  %4360 = vmatpush.bf16.msra.mxu1 %v8654_v33  ;;  %v8646_v24 = vor.u32 %v10739_v23, %v8645_v30  ;;  %v10737_v37 = vld [vmem:[#allocation8 + $0x3d4] sm:$0xf0]  ;;  %v13516_v33 = vld [vmem:[#allocation54_spill] sm:$0xff]  ;;  %v13517_v17 = vld [vmem:[#allocation55_spill] sm:$0xff] }
 0x212   : > { %3563 = vmatpush.bf16.msra.mxu2 %v8570_v56  ;;  %v13518_v63 = vld [vmem:[#allocation35_spill] sm:$0xff] }
 0x213   : > { %v1878_v35 = vmax.f32 %v1829_v28, 0.0  ;;  %4374 = vmatpush.bf16.msra.mxu3 %v8718_v39  ;;  %v8638_v28 = vor.u32 %v10737_v37, %v8637_v52  ;;  %v8813_v23 = vld [vmem:[#allocation8 + $0x530] sm:$0xf]  ;;  %v8546_v52 = vor.u32 %v10714_v48, %v8543_v44  ;;  %v10751_v37 = vld [vmem:[#allocation8 + $0x444] sm:$0xf0] }
 0x214   : > { %v10777_v44 = vld [vmem:[#allocation8 + $0x514] sm:$0xf0] }
 0x215   : > { %v12647_v51 = vpack.c.bf16 %v1878_v35, %v1872_v41  ;;  %4361 = vmatpush.bf16.msra.mxu1 %v8646_v24  ;;  %v10716_v41 = vld [vmem:[#allocation8 + $0x334] sm:$0xf]  ;;  %v8551_v35 = vld [vmem:[#allocation8 + $0x338] sm:$0xf0]  ;;  %v10781_v24 = vld [vmem:[#allocation8 + $0x534] sm:$0xf0] }
 0x216   : > { %3564 = vmatpush.bf16.msra.mxu2 %v8562_v50  ;;  %v8554_v56 = vor.u32 %v10716_v41, %v8551_v35 }
 0x217   : > { %13515 = vst [vmem:[#allocation44_spill] sm:$0xff] %v12647_v51  ;;  %v3224_v61 = vpop.f32.mrf.mxu2  ;;  %v3210_v55 = vpop.f32.mrf.mxu3  ;;  %4375 = vmatpush.bf16.msra.mxu3 %v8710_v8 }
 0x218   : > { %v3225_v60 = vadd.f32 %v3224_v61, %v12595_v31  ;;  %v3251_v32 = vpop.f32.mrf.mxu0  ;;  %v12650_v19 = vadd.f32 %v3210_v55, %v3181_v10  ;;  %v3280_v58 = vpop.f32.mrf.mxu1  ;;  %v8701_v31 = vld [vmem:[#allocation8 + $0x450] sm:$0xf]  ;;  %v8629_v10 = vld [vmem:[#allocation8 + $0x3c0] sm:$0xf]  ;;  %v8814_v61 = vor.u32 %v10781_v24, %v8813_v23  ;;  %v8535_v24 = vld [vmem:[#allocation8 + $0x318] sm:$0xf0] }
 0x219   : > { %v3252_v14 = vadd.f32 %v3251_v32, %v3223_v4  ;;  %v13519_v4 = vld [vmem:[#allocation51_spill] sm:$0xff]  ;;  %4362 = vmatpush.bf16.msra.mxu1 %v8638_v28  ;;  %v8702_v30 = vor.u32 %v10753_v40, %v8701_v31  ;;  %v8630_v39 = vor.u32 %v10735_v11, %v8629_v10  ;;  %v8693_v55 = vld [vmem:[#allocation8 + $0x440] sm:$0xf]  ;;  %v8615_v11 = vld [vmem:[#allocation8 + $0x3b8] sm:$0xf0] }
 0x21a   : > { %3482 = vmatmul.bf16.vlgmr.msrb.gmra.mxu0 %v13516_v33  ;;  %3565 = vmatpush.bf16.msra.mxu2 %v8554_v56  ;;  %v8694_v35 = vor.u32 %v10751_v37, %v8693_v55  ;;  %v10779_v56 = vld [vmem:[#allocation8 + $0x524] sm:$0xf0] }
 0x21b   : > { %v3281_v6 = vadd.f32 %v3280_v58, %v3252_v14  ;;  %3511 = vmatmul.bf16.vlgmr.msrb.gmra.mxu1 %v13518_v63  ;;  %4376 = vmatpush.bf16.msra.mxu3 %v8702_v30  ;;  %v8877_v14 = vld [vmem:[#allocation8 + $0x5b0] sm:$0xf]  ;;  %v10797_v58 = vld [vmem:[#allocation8 + $0x5b4] sm:$0xf0]  ;;  %v10712_v30 = vld [vmem:[#allocation8 + $0x314] sm:$0xf] }
 0x21c   : > { %3458 = vmatmul.bf16.gmra.mxu2 %v13517_v17  ;;  %3540 = vmatmul.bf16.vlgmr.msrb.gmra.mxu3 %v13519_v4  ;;  %v8878_v31 = vor.u32 %v10797_v58, %v8877_v14  ;;  %v8805_v17 = vld [vmem:[#allocation8 + $0x520] sm:$0xf] }
 0x21d   : > { %4363 = vmatpush.bf16.msra.mxu1 %v8630_v39  ;;  %v8806_v40 = vor.u32 %v10779_v56, %v8805_v17  ;;  %v8797_v39 = vld [vmem:[#allocation8 + $0x510] sm:$0xf]  ;;  %v8789_v56 = vld [vmem:[#allocation8 + $0x500] sm:$0xf] }
 0x21e   : > { %3566 = vmatpush.bf16.msra.mxu2 %v8546_v52  ;;  %v8798_v55 = vor.u32 %v10777_v44, %v8797_v39 }
 0x21f   : > { %v3227_v2 = vpop.f32.mrf.mxu2  ;;  %v3309_v50 = vpop.f32.mrf.mxu3  ;;  %4377 = vmatpush.bf16.msra.mxu3 %v8694_v35 }
 0x220   : > { %v3228_v32 = vadd.f32 %v3227_v2, %v12608_v18  ;;  %v3253_v59 = vpop.f32.mrf.mxu0  ;;  %v12657_v8 = vadd.f32 %v3309_v50, %v3281_v6  ;;  %v3282_v41 = vpop.f32.mrf.mxu1  ;;  %v10732_v18 = vld [vmem:[#allocation8 + $0x3b4] sm:$0xf]  ;;  %v8869_v6 = vld [vmem:[#allocation8 + $0x5a0] sm:$0xf]  ;;  %v10795_v2 = vld [vmem:[#allocation8 + $0x5a4] sm:$0xf0] }
 0x221   : > { %v3254_v28 = vadd.f32 %v3253_v59, %v3225_v60  ;;  %4384 = vmatpush.bf16.msrb.mxu1 %v8814_v61  ;;  %v8618_v23 = vor.u32 %v10732_v18, %v8615_v11  ;;  %v8538_v60 = vor.u32 %v10712_v30, %v8535_v24  ;;  %v8870_v48 = vor.u32 %v10795_v2, %v8869_v6  ;;  %v10710_v50 = vld [vmem:[#allocation8 + $0x304] sm:$0xf]  ;;  %v8527_v59 = vld [vmem:[#allocation8 + $0x308] sm:$0xf0]  ;;  %v10775_v18 = vld [vmem:[#allocation8 + $0x504] sm:$0xf0] }
 0x222   : > { %v8530_v58 = vor.u32 %v10710_v50, %v8527_v59  ;;  %v8790_v11 = vor.u32 %v10775_v18, %v8789_v56  ;;  %v8599_v56 = vld [vmem:[#allocation8 + $0x398] sm:$0xf0]  ;;  %v8837_v18 = vld [vmem:[#allocation8 + $0x560] sm:$0xf] }
 0x223   : > { %v3283_v10 = vadd.f32 %v3282_v41, %v3254_v28  ;;  %4398 = vmatpush.bf16.msrb.mxu3 %v8878_v31  ;;  %3594 = vmatpush.bf16.msra.mxu0 %v8618_v23  ;;  %v8861_v28 = vld [vmem:[#allocation8 + $0x590] sm:$0xf]  ;;  %v10793_v41 = vld [vmem:[#allocation8 + $0x594] sm:$0xf0]  ;;  %v10791_v23 = vld [vmem:[#allocation8 + $0x584] sm:$0xf0] }
 0x224   : > { %3567 = vmatpush.bf16.msra.mxu2 %v8538_v60  ;;  %v10730_v60 = vld [vmem:[#allocation8 + $0x3a4] sm:$0xf] }
 0x225   : > { %4385 = vmatpush.bf16.msrb.mxu1 %v8806_v40  ;;  %v8862_v40 = vor.u32 %v10793_v41, %v8861_v28 }
 0x227   : > { %v3229_v61 = vpop.f32.mrf.mxu2  ;;  %v3311_v37 = vpop.f32.mrf.mxu3  ;;  %4399 = vmatpush.bf16.msrb.mxu3 %v8870_v48  ;;  %v8607_v48 = vld [vmem:[#allocation8 + $0x3a8] sm:$0xf0] }
 0x228   : > { %v3230_v52 = vadd.f32 %v3229_v61, %v12616_v0  ;;  %v3256_v14 = vpop.f32.mrf.mxu0  ;;  %v12660_v35 = vadd.f32 %v3311_v37, %v3283_v10  ;;  %v3285_v17 = vpop.f32.mrf.mxu1  ;;  %3568 = vmatpush.bf16.msra.mxu2 %v8530_v58  ;;  %v8853_v0 = vld [vmem:[#allocation8 + $0x580] sm:$0xf]  ;;  %v8781_v10 = vld [vmem:[#allocation8 + $0x4f0] sm:$0xf]  ;;  %v10813_v37 = vld [vmem:[#allocation8 + $0x634] sm:$0xf0] }
 0x229   : > { %v3257_v31 = vadd.f32 %v3256_v14, %v3228_v32  ;;  %4386 = vmatpush.bf16.msrb.mxu1 %v8798_v55  ;;  %v10773_v32 = vld [vmem:[#allocation8 + $0x4f4] sm:$0xf0]  ;;  %v8854_v24 = vor.u32 %v10791_v23, %v8853_v0  ;;  %v8845_v55 = vld [vmem:[#allocation8 + $0x570] sm:$0xf]  ;;  %v8773_v14 = vld [vmem:[#allocation8 + $0x4e0] sm:$0xf] }
 0x22a   : > { %3487 = vmatmul.bf16.gmra.mxu0 %v12439_v20  ;;  %v8782_v6 = vor.u32 %v10773_v32, %v8781_v10  ;;  %v8941_v61 = vld [vmem:[#allocation8 + $0x630] sm:$0xf]  ;;  %v10771_v58 = vld [vmem:[#allocation8 + $0x4e4] sm:$0xf0]  ;;  %v10769_v10 = vld [vmem:[#allocation8 + $0x4d4] sm:$0xf0] }
 0x22b   : > { %v3286_v30 = vadd.f32 %v3285_v17, %v3257_v31  ;;  %3516 = vmatmul.bf16.gmra.mxu1 %v12441_v38  ;;  %4400 = vmatpush.bf16.msrb.mxu3 %v8862_v40  ;;  %v10789_v38 = vld [vmem:[#allocation8 + $0x574] sm:$0xf0]  ;;  %v8942_v41 = vor.u32 %v10813_v37, %v8941_v61  ;;  %v8774_v31 = vor.u32 %v10771_v58, %v8773_v14  ;;  %v10811_v0 = vld [vmem:[#allocation8 + $0x624] sm:$0xf0]  ;;  %v8765_v23 = vld [vmem:[#allocation8 + $0x4d0] sm:$0xf] }
 0x22c   : > { %3463 = vmatmul.bf16.gmra.mxu2 %v12445_v22  ;;  %3545 = vmatmul.bf16.gmra.mxu3 %v12443_v47  ;;  %v8610_v22 = vor.u32 %v10730_v60, %v8607_v48  ;;  %v8846_v28 = vor.u32 %v10789_v38, %v8845_v55  ;;  %v8591_v60 = vld [vmem:[#allocation8 + $0x388] sm:$0xf0]  ;;  %v10785_v55 = vld [vmem:[#allocation8 + $0x554] sm:$0xf0]  ;;  %v8925_v38 = vld [vmem:[#allocation8 + $0x610] sm:$0xf] }
 0x22d   : > { %4387 = vmatpush.bf16.msrb.mxu1 %v8790_v11  ;;  %4412 = vmatpush.bf16.msrb.mxu2 %v8942_v41  ;;  %v10787_v11 = vld [vmem:[#allocation8 + $0x564] sm:$0xf0]  ;;  %v10809_v14 = vld [vmem:[#allocation8 + $0x614] sm:$0xf0]  ;;  %v8757_v58 = vld [vmem:[#allocation8 + $0x4c0] sm:$0xf] }
 0x22e   : > { %3595 = vmatpush.bf16.msra.mxu0 %v8610_v22  ;;  %v8838_v32 = vor.u32 %v10787_v11, %v8837_v18  ;;  %v8829_v22 = vld [vmem:[#allocation8 + $0x550] sm:$0xf]  ;;  %v10807_v18 = vld [vmem:[#allocation8 + $0x604] sm:$0xf0] }
 0x22f   : > { %v3232_v2 = vpop.f32.mrf.mxu2  ;;  %v3314_v39 = vpop.f32.mrf.mxu3  ;;  %4401 = vmatpush.bf16.msrb.mxu3 %v8854_v24  ;;  %v8766_v24 = vor.u32 %v10769_v10, %v8765_v23  ;;  %v8830_v41 = vor.u32 %v10785_v55, %v8829_v22  ;;  %v8909_v23 = vld [vmem:[#allocation8 + $0x5f0] sm:$0xf]  ;;  %v10805_v10 = vld [vmem:[#allocation8 + $0x5f4] sm:$0xf0]  ;;  %v10803_v22 = vld [vmem:[#allocation8 + $0x5e4] sm:$0xf0] }
 0x230   : > { %v3233_v20 = vadd.f32 %v3232_v2, %v12629_v29  ;;  %v3258_v44 = vpop.f32.mrf.mxu0  ;;  %v12667_v50 = vadd.f32 %v3314_v39, %v3286_v30  ;;  %v3287_v59 = vpop.f32.mrf.mxu1  ;;  %v10728_v29 = vld [vmem:[#allocation8 + $0x394] sm:$0xf]  ;;  %v8933_v30 = vld [vmem:[#allocation8 + $0x620] sm:$0xf]  ;;  %v10726_v2 = vld [vmem:[#allocation8 + $0x384] sm:$0xf] }
 0x231   : > { %v3259_v47 = vadd.f32 %v3258_v44, %v3230_v52  ;;  %4388 = vmatpush.bf16.msrb.mxu1 %v8782_v6  ;;  %v8602_v40 = vor.u32 %v10728_v29, %v8599_v56  ;;  %v8934_v52 = vor.u32 %v10811_v0, %v8933_v30  ;;  %v8594_v37 = vor.u32 %v10726_v2, %v8591_v60  ;;  %v10783_v56 = vld [vmem:[#allocation8 + $0x544] sm:$0xf0]  ;;  %v8997_v55 = vld [vmem:[#allocation8 + $0x6a0] sm:$0xf] }
 0x232   : > { %v8910_v2 = vor.u32 %v10805_v10, %v8909_v23 }
 0x233   : > { %v3288_v17 = vadd.f32 %v3287_v59, %v3259_v47  ;;  %4402 = vmatpush.bf16.msrb.mxu3 %v8846_v28  ;;  %3596 = vmatpush.bf16.msra.mxu0 %v8602_v40  ;;  %v10767_v28 = vld [vmem:[#allocation8 + $0x4c4] sm:$0xf0] }
 0x234   : > { %4413 = vmatpush.bf16.msrb.mxu2 %v8934_v52 }
 0x235   : > { %4389 = vmatpush.bf16.msrb.mxu1 %v8774_v31  ;;  %v8926_v31 = vor.u32 %v10809_v14, %v8925_v38 }
 0x237   : > { %v3234_v6 = vpop.f32.mrf.mxu2  ;;  %v3316_v39 = vpop.f32.mrf.mxu3  ;;  %4403 = vmatpush.bf16.msrb.mxu3 %v8838_v32  ;;  %3597 = vmatpush.bf16.msra.mxu0 %v8594_v37 }
 0x238   : > { %v3235_v48 = vadd.f32 %v3234_v6, %v12637_v46  ;;  %v3261_v44 = vpop.f32.mrf.mxu0  ;;  %v12670_v61 = vadd.f32 %v3316_v39, %v3288_v17  ;;  %v3290_v59 = vpop.f32.mrf.mxu1  ;;  %v8758_v46 = vor.u32 %v10767_v28, %v8757_v58  ;;  %v8821_v17 = vld [vmem:[#allocation8 + $0x540] sm:$0xf]  ;;  %4414 = vmatpush.bf16.msrb.mxu2 %v8926_v31  ;;  %v8893_v58 = vld [vmem:[#allocation8 + $0x5d0] sm:$0xf]  ;;  %v10801_v28 = vld [vmem:[#allocation8 + $0x5d4] sm:$0xf0] }
 0x239   : > { %v3262_v47 = vadd.f32 %v3261_v44, %v3233_v20  ;;  %4390 = vmatpush.bf16.msrb.mxu1 %v8766_v24  ;;  %v8917_v20 = vld [vmem:[#allocation8 + $0x600] sm:$0xf]  ;;  %v8822_v40 = vor.u32 %v10783_v56, %v8821_v17  ;;  %v10825_v17 = vld [vmem:[#allocation8 + $0x694] sm:$0xf0]  ;;  %v8894_v56 = vor.u32 %v10801_v28, %v8893_v58  ;;  %v10744_v28 = vld [vmem:[#allocation8 + $0x414] sm:$0xf] }
 0x23a   : > { %3492 = vmatmul.bf16.gmra.mxu0 %v12491_v25  ;;  %v8918_v11 = vor.u32 %v10807_v18, %v8917_v20  ;;  %v8901_v44 = vld [vmem:[#allocation8 + $0x5e0] sm:$0xf]  ;;  %v10845_v58 = vld [vmem:[#allocation8 + $0x734] sm:$0xf0] }
 0x23b   : > { %v3291_v29 = vadd.f32 %v3290_v59, %v3262_v47  ;;  %3521 = vmatmul.bf16.gmra.mxu1 %v12497_v7  ;;  %4404 = vmatpush.bf16.msrb.mxu3 %v8830_v41  ;;  %v9005_v7 = vld [vmem:[#allocation8 + $0x6b0] sm:$0xf]  ;;  %v8902_v38 = vor.u32 %v10803_v22, %v8901_v44  ;;  %v10821_v22 = vld [vmem:[#allocation8 + $0x674] sm:$0xf0] }
 0x23c   : > { %3468 = vmatmul.bf16.gmra.mxu2 %v12495_v53  ;;  %3550 = vmatmul.bf16.gmra.mxu3 %v12493_v42  ;;  %v10829_v42 = vld [vmem:[#allocation8 + $0x6b4] sm:$0xf0]  ;;  %v8989_v41 = vld [vmem:[#allocation8 + $0x690] sm:$0xf] }
 0x23d   : > { %4391 = vmatpush.bf16.msrb.mxu1 %v8758_v46  ;;  %4415 = vmatpush.bf16.msrb.mxu2 %v8918_v11  ;;  %v9006_v60 = vor.u32 %v10829_v42, %v9005_v7  ;;  %v8990_v20 = vor.u32 %v10825_v17, %v8989_v41  ;;  %v8981_v11 = vld [vmem:[#allocation8 + $0x680] sm:$0xf]  ;;  %v8973_v44 = vld [vmem:[#allocation8 + $0x670] sm:$0xf]  ;;  %v8671_v41 = vld [vmem:[#allocation8 + $0x418] sm:$0xf0] }
 0x23e   : > { %v10853_v17 = vld [vmem:[#allocation8 + $0x774] sm:$0xf0] }
 0x23f   : > { %v3237_v30 = vpop.f32.mrf.mxu2  ;;  %v3319_v0 = vpop.f32.mrf.mxu3  ;;  %4405 = vmatpush.bf16.msrb.mxu3 %v8822_v40  ;;  %4426 = vmatpush.bf16.msrb.mxu0 %v9006_v60  ;;  %v10799_v40 = vld [vmem:[#allocation8 + $0x5c4] sm:$0xf0] }
 0x240   : > { %v3238_v25 = vadd.f32 %v3237_v30, %v12645_v26  ;;  %v3263_v52 = vpop.f32.mrf.mxu0  ;;  %v12677_v32 = vadd.f32 %v3319_v0, %v3291_v29  ;;  %v3292_v6 = vpop.f32.mrf.mxu1  ;;  %v10827_v26 = vld [vmem:[#allocation8 + $0x6a4] sm:$0xf0]  ;;  %v10748_v0 = vld [vmem:[#allocation8 + $0x434] sm:$0xf] }
 0x241   : > { %v3264_v24 = vadd.f32 %v3263_v52, %v3235_v48  ;;  %4416 = vmatpush.bf16.msrb.mxu2 %v8910_v2  ;;  %v8998_v47 = vor.u32 %v10827_v26, %v8997_v55  ;;  %v8687_v52 = vld [vmem:[#allocation8 + $0x438] sm:$0xf0]  ;;  %v8974_v55 = vor.u32 %v10821_v22, %v8973_v44  ;;  %v10746_v26 = vld [vmem:[#allocation8 + $0x424] sm:$0xf] }
 0x242   : > { %v8690_v7 = vor.u32 %v10748_v0, %v8687_v52  ;;  %v9061_v0 = vld [vmem:[#allocation8 + $0x720] sm:$0xf]  ;;  %v8957_v52 = vld [vmem:[#allocation8 + $0x650] sm:$0xf] }
 0x243   : > { %v3293_v39 = vadd.f32 %v3292_v6, %v3264_v24  ;;  %4427 = vmatpush.bf16.msrb.mxu0 %v8998_v47 }
 0x245   : > { %4417 = vmatpush.bf16.msrb.mxu2 %v8902_v38  ;;  %v8679_v38 = vld [vmem:[#allocation8 + $0x428] sm:$0xf0] }
 0x246   : > { %v8682_v47 = vor.u32 %v10746_v26, %v8679_v38  ;;  %v8949_v26 = vld [vmem:[#allocation8 + $0x640] sm:$0xf]  ;;  %v10815_v38 = vld [vmem:[#allocation8 + $0x644] sm:$0xf0] }
 0x247   : > { %v3239_v59 = vpop.f32.mrf.mxu2  ;;  %v3321_v14 = vpop.f32.mrf.mxu3  ;;  %4428 = vmatpush.bf16.msrb.mxu0 %v8990_v20 }
 0x248   : > { %v3240_v37 = vadd.f32 %v3239_v59, %v12650_v19  ;;  %v3266_v48 = vpop.f32.mrf.mxu0  ;;  %v12680_v31 = vadd.f32 %v3321_v14, %v3293_v39  ;;  %v3295_v46 = vpop.f32.mrf.mxu1  ;;  %v8885_v19 = vld [vmem:[#allocation8 + $0x5c0] sm:$0xf]  ;;  %v9069_v59 = vld [vmem:[#allocation8 + $0x730] sm:$0xf] }
 0x249   : > { %v3267_v29 = vadd.f32 %v3266_v48, %v3238_v25  ;;  %4418 = vmatpush.bf16.msrb.mxu2 %v8894_v56  ;;  %v8886_v30 = vor.u32 %v10799_v40, %v8885_v19  ;;  %v10823_v25 = vld [vmem:[#allocation8 + $0x684] sm:$0xf0]  ;;  %v8965_v14 = vld [vmem:[#allocation8 + $0x660] sm:$0xf]  ;;  %v8674_v56 = vor.u32 %v10744_v28, %v8671_v41  ;;  %v9085_v28 = vld [vmem:[#allocation8 + $0x750] sm:$0xf] }
 0x24a   : > { %3497 = vmatmul.bf16.gmra.mxu0 %v12521_v27  ;;  %v8982_v10 = vor.u32 %v10823_v25, %v8981_v11  ;;  %v10819_v48 = vld [vmem:[#allocation8 + $0x664] sm:$0xf0]  ;;  %v9070_v25 = vor.u32 %v10845_v58, %v9069_v59  ;;  %v8950_v59 = vor.u32 %v10815_v38, %v8949_v26  ;;  %v10780_v58 = vld [vmem:[#allocation8 + $0x534] sm:$0xf]  ;;  %v8639_v38 = vld [vmem:[#allocation8 + $0x3d8] sm:$0xf0] }
 0x24b   : > { %v3296_v18 = vadd.f32 %v3295_v46, %v3267_v29  ;;  %3526 = vmatmul.bf16.gmra.mxu1 %v12526_v5  ;;  %v9101_v46 = vld [vmem:[#allocation8 + $0x770] sm:$0xf]  ;;  %v10736_v26 = vld [vmem:[#allocation8 + $0x3d4] sm:$0xf] }
 0x24c   : > { %3569 = vmatmul.bf16.vlgmr.msra.gmra.mxu2 %v12452_v21  ;;  %3555 = vmatmul.bf16.gmra.mxu3 %v12458_v57 }
 0x24d   : > { %4429 = vmatpush.bf16.msrb.mxu0 %v8982_v10  ;;  %4419 = vmatpush.bf16.msrb.mxu2 %v8886_v30  ;;  %v9102_v10 = vor.u32 %v10853_v17, %v9101_v46 }
 0x24f   : > { %v3338_v23 = vpop.f32.mrf.mxu2  ;;  %v3324_v24 = vpop.f32.mrf.mxu3 }
 0x250   : > { %v3339_v6 = vadd.f32 %v3338_v23, %v12657_v8  ;;  %v3268_v42 = vpop.f32.mrf.mxu0  ;;  %v12687_v2 = vadd.f32 %v3324_v24, %v3296_v18  ;;  %v3297_v39 = vpop.f32.mrf.mxu1  ;;  %v8966_v8 = vor.u32 %v10819_v48, %v8965_v14  ;;  %v10817_v23 = vld [vmem:[#allocation8 + $0x654] sm:$0xf0]  ;;  %v10740_v14 = vld [vmem:[#allocation8 + $0x3f4] sm:$0xf]  ;;  %v8655_v48 = vld [vmem:[#allocation8 + $0x3f8] sm:$0xf0] }
 0x251   : > { %v3269_v60 = vadd.f32 %v3268_v42, %v3240_v37  ;;  %4468 = vmatpush.bf16.msra.mxu2 %v8690_v7  ;;  %4430 = vmatpush.bf16.msrb.mxu0 %v8974_v55  ;;  %v10843_v7 = vld [vmem:[#allocation8 + $0x724] sm:$0xf0]  ;;  %v8958_v24 = vor.u32 %v10817_v23, %v8957_v52  ;;  %v10742_v42 = vld [vmem:[#allocation8 + $0x404] sm:$0xf]  ;;  %v10841_v55 = vld [vmem:[#allocation8 + $0x714] sm:$0xf0]  ;;  %v8658_v41 = vor.u32 %v10740_v14, %v8655_v48 }
 0x252   : > { %v9062_v22 = vor.u32 %v10843_v7, %v9061_v0  ;;  %v9045_v52 = vld [vmem:[#allocation8 + $0x700] sm:$0xf]  ;;  %v10839_v23 = vld [vmem:[#allocation8 + $0x704] sm:$0xf0]  ;;  %v10738_v7 = vld [vmem:[#allocation8 + $0x3e4] sm:$0xf]  ;;  %v8642_v14 = vor.u32 %v10736_v26, %v8639_v38 }
 0x253   : > { %v3298_v29 = vadd.f32 %v3297_v39, %v3269_v60  ;;  %v8663_v60 = vld [vmem:[#allocation8 + $0x408] sm:$0xf0]  ;;  %v10851_v39 = vld [vmem:[#allocation8 + $0x764] sm:$0xf0]  ;;  %v10776_v48 = vld [vmem:[#allocation8 + $0x514] sm:$0xf] }
 0x254   : > { %v8666_v44 = vor.u32 %v10742_v42, %v8663_v60  ;;  %v10778_v42 = vld [vmem:[#allocation8 + $0x524] sm:$0xf]  ;;  %v10847_v60 = vld [vmem:[#allocation8 + $0x744] sm:$0xf0] }
 0x255   : > { %4469 = vmatpush.bf16.msra.mxu2 %v8682_v47  ;;  %4431 = vmatpush.bf16.msrb.mxu0 %v8966_v8 }
 0x257   : > { %v3340_v37 = vpop.f32.mrf.mxu2  ;;  %v3326_v20 = vpop.f32.mrf.mxu3 }
 0x258   : > { %v3341_v18 = vadd.f32 %v3340_v37, %v12660_v35  ;;  %v3367_v19 = vpop.f32.mrf.mxu0  ;;  %v12690_v40 = vadd.f32 %v3326_v20, %v3298_v29  ;;  %v3396_v30 = vpop.f32.mrf.mxu1  ;;  %v9093_v35 = vld [vmem:[#allocation8 + $0x760] sm:$0xf]  ;;  %v8815_v29 = vld [vmem:[#allocation8 + $0x538] sm:$0xf0] }
 0x259   : > { %v12692_v11 = vadd.f32 %v3367_v19, %v3339_v6  ;;  %4470 = vmatpush.bf16.msra.mxu2 %v8674_v56  ;;  %v9053_v6 = vld [vmem:[#allocation8 + $0x710] sm:$0xf]  ;;  %v9094_v47 = vor.u32 %v10851_v39, %v9093_v35  ;;  %4432 = vmatpush.bf16.msrb.mxu0 %v8958_v24  ;;  %v8818_v56 = vor.u32 %v10780_v58, %v8815_v29  ;;  %v8647_v24 = vld [vmem:[#allocation8 + $0x3e8] sm:$0xf0]  ;;  %v8799_v58 = vld [vmem:[#allocation8 + $0x518] sm:$0xf0] }
 0x25a   : > { %8623 = vmatmul.msk.bf16.vlgmr.msra.gmra.mxu0 %vm1296_vm0, %v12547_v3  ;;  %v9054_v0 = vor.u32 %v10841_v55, %v9053_v6  ;;  %v8807_v35 = vld [vmem:[#allocation8 + $0x528] sm:$0xf0]  ;;  %v10764_v55 = vld [vmem:[#allocation8 + $0x4b4] sm:$0xf]  ;;  %v5566_v29 = vld [vmem:[%s13374_s5] sm:$0x3] }
 0x25b   : > { %4364 = vmatmul.bf16.vlgmr.msra.gmra.mxu1 %v13508_v54  ;;  %v8810_v39 = vor.u32 %v10778_v42, %v8807_v35  ;;  %v10774_v42 = vld [vmem:[#allocation8 + $0x504] sm:$0xf] }
 0x25c   : > { %3574 = vmatmul.bf16.gmra.mxu2 %v12551_v36  ;;  %4378 = vmatmul.bf16.vlgmr.msra.gmra.mxu3 %v13509_v49  ;;  %v10849_v36 = vld [vmem:[#allocation8 + $0x754] sm:$0xf0] }
 0x25d   : > { %4440 = vmatpush.bf16.msra.mxu1 %v9070_v25  ;;  %4458 = vmatpush.bf16.msra.mxu3 %v9102_v10  ;;  %v9086_v10 = vor.u32 %v10849_v36, %v9085_v28 }
 0x25e   : > { %4471 = vmatpush.bf16.msra.mxu2 %v8666_v44  ;;  %4433 = vmatpush.bf16.msrb.mxu0 %v8950_v59  ;;  %v9037_v44 = vld [vmem:[#allocation8 + $0x6f0] sm:$0xf]  ;;  %v8751_v59 = vld [vmem:[#allocation8 + $0x4b8] sm:$0xf0] }
 0x25f   : > { %v3343_v8 = vpop.f32.mrf.mxu2  ;;  %v3425_v46 = vpop.f32.mrf.mxu3 }
 0x260   : > { %v3344_v37 = vadd.f32 %v3343_v8, %v12667_v50  ;;  %v3369_v17 = vpop.f32.mrf.mxu0  ;;  %v12700_v20 = vadd.f32 %v3425_v46, %v3396_v30  ;;  %v12704_v25 = vpop.f32.mrf.mxu1  ;;  %v9077_v50 = vld [vmem:[#allocation8 + $0x740] sm:$0xf]  ;;  %v8650_v30 = vor.u32 %v10738_v7, %v8647_v24  ;;  %v10734_v7 = vld [vmem:[#allocation8 + $0x3c4] sm:$0xf]  ;;  %v8631_v24 = vld [vmem:[#allocation8 + $0x3c8] sm:$0xf0] }
 0x261   : > { %4441 = vmatpush.bf16.msra.mxu1 %v9062_v22  ;;  %v12702_v19 = vadd.f32 %v3369_v17, %v3341_v18  ;;  %4459 = vmatpush.bf16.msra.mxu3 %v9094_v47  ;;  %v9046_v18 = vor.u32 %v10839_v23, %v9045_v52  ;;  %v10837_v22 = vld [vmem:[#allocation8 + $0x6f4] sm:$0xf0]  ;;  %v9078_v6 = vor.u32 %v10847_v60, %v9077_v50  ;;  %v10762_v23 = vld [vmem:[#allocation8 + $0x4a4] sm:$0xf]  ;;  %v8791_v50 = vld [vmem:[#allocation8 + $0x508] sm:$0xf0] }
 0x262   : > { %4472 = vmatpush.bf16.msra.mxu2 %v8658_v41  ;;  %4496 = vmatpush.bf16.msra.mxu0 %v8818_v56  ;;  %v9038_v17 = vor.u32 %v10837_v22, %v9037_v44  ;;  %v9029_v56 = vld [vmem:[#allocation8 + $0x6e0] sm:$0xf]  ;;  %v8754_v52 = vor.u32 %v10764_v55, %v8751_v59  ;;  %v12716_v60 = vperm.slane %v5566_v29, 0  ;;  %v8794_v44 = vor.u32 %v10774_v42, %v8791_v50  ;;  %v10772_v55 = vld [vmem:[#allocation8 + $0x4f4] sm:$0xf] }
 0x263   : > { %v10770_v42 = vld [vmem:[#allocation8 + $0x4e4] sm:$0xf]  ;;  %v8775_v50 = vld [vmem:[#allocation8 + $0x4e8] sm:$0xf0] }
 0x265   : > { %4442 = vmatpush.bf16.msra.mxu1 %v9054_v0  ;;  %4460 = vmatpush.bf16.msra.mxu3 %v9086_v10  ;;  %v10835_v0 = vld [vmem:[#allocation8 + $0x6e4] sm:$0xf0]  ;;  %v8802_v10 = vor.u32 %v10776_v48, %v8799_v58 }
 0x266   : > { %4473 = vmatpush.bf16.msra.mxu2 %v8650_v30  ;;  %4497 = vmatpush.bf16.msra.mxu0 %v8810_v39  ;;  %v9030_v30 = vor.u32 %v10835_v0, %v9029_v56  ;;  %v9021_v39 = vld [vmem:[#allocation8 + $0x6d0] sm:$0xf]  ;;  %v10831_v56 = vld [vmem:[#allocation8 + $0x6c4] sm:$0xf0]  ;;  %v10758_v0 = vld [vmem:[#allocation8 + $0x484] sm:$0xf] }
 0x267   : > { %v3345_v47 = vpop.f32.mrf.mxu2  ;;  %v12707_v28 = vpop.f32.mrf.mxu3 }
 0x268   : > { %v3346_v8 = vadd.f32 %v3345_v47, %v12670_v61  ;;  %v3372_v36 = vpop.f32.mrf.mxu0  ;;  %v3401_v46 = vpop.f32.mrf.mxu1  ;;  %v8743_v61 = vld [vmem:[#allocation8 + $0x4a8] sm:$0xf0] }
 0x269   : > { %4443 = vmatpush.bf16.msra.mxu1 %v9046_v18  ;;  %v3373_v41 = vadd.f32 %v3372_v36, %v3344_v37  ;;  %4461 = vmatpush.bf16.msra.mxu3 %v9078_v6  ;;  %v8634_v37 = vor.u32 %v10734_v7, %v8631_v24  ;;  %v8746_v35 = vor.u32 %v10762_v23, %v8743_v61  ;;  %v10833_v18 = vld [vmem:[#allocation8 + $0x6d4] sm:$0xf0]  ;;  %v8735_v6 = vld [vmem:[#allocation8 + $0x498] sm:$0xf0]  ;;  %v8727_v23 = vld [vmem:[#allocation8 + $0x488] sm:$0xf0] }
 0x26a   : > { %8624 = vmatmul.msk.bf16.gmra.mxu0 %vm1296_vm0, %v12591_v62  ;;  %4474 = vmatpush.bf16.msra.mxu2 %v8642_v14  ;;  %v10760_v62 = vld [vmem:[#allocation8 + $0x494] sm:$0xf]  ;;  %v9022_v36 = vor.u32 %v10833_v18, %v9021_v39  ;;  %v8879_v7 = vld [vmem:[#allocation8 + $0x5b8] sm:$0xf0]  ;;  %v10794_v39 = vld [vmem:[#allocation8 + $0x5a4] sm:$0xf] }
 0x26b   : > { %4392 = vmatmul.bf16.vlgmr.msrb.gmra.mxu1 %v12311_v9  ;;  %4498 = vmatpush.bf16.msra.mxu0 %v8802_v10  ;;  %v5576_v59 = vadd.f32 %v12716_v60, %v3373_v41  ;;  %v8738_v29 = vor.u32 %v10760_v62, %v8735_v6  ;;  %v10796_v10 = vld [vmem:[#allocation8 + $0x5b4] sm:$0xf]  ;;  %v8871_v18 = vld [vmem:[#allocation8 + $0x5a8] sm:$0xf0] }
 0x26c   : > { %3579 = vmatmul.bf16.gmra.mxu2 %v12593_v16  ;;  %4406 = vmatmul.bf16.vlgmr.msrb.gmra.mxu3 %v13516_v33  ;;  %v8783_v16 = vld [vmem:[#allocation8 + $0x4f8] sm:$0xf0]  ;;  %v8882_v61 = vor.u32 %v10796_v10, %v8879_v7  ;;  %v8759_v10 = vld [vmem:[#allocation8 + $0x4c8] sm:$0xf0] }
 0x26d   : > { %4444 = vmatpush.bf16.msra.mxu1 %v9038_v17  ;;  %4482 = vmatpush.bf16.msrb.mxu3 %v8754_v52  ;;  %v9013_v17 = vld [vmem:[#allocation8 + $0x6c0] sm:$0xf]  ;;  %v8786_v52 = vor.u32 %v10772_v55, %v8783_v16  ;;  %v5592_v41 = vmax.f32 %v5576_v59, 0.0  ;;  %v8874_v59 = vor.u32 %v10794_v39, %v8871_v18  ;;  %v8703_v7 = vld [vmem:[#allocation8 + $0x458] sm:$0xf0] }
 0x26e   : > { %4475 = vmatpush.bf16.msra.mxu2 %v8634_v37  ;;  %v9014_v24 = vor.u32 %v10831_v56, %v9013_v17  ;;  %v10756_v37 = vld [vmem:[#allocation8 + $0x474] sm:$0xf]  ;;  %v8711_v17 = vld [vmem:[#allocation8 + $0x468] sm:$0xf0] }
 0x26f   : > { %v3348_v22 = vpop.f32.mrf.mxu2  ;;  %v3430_v38 = vpop.f32.mrf.mxu3  ;;  %4499 = vmatpush.bf16.msra.mxu0 %v8794_v44  ;;  %v10792_v56 = vld [vmem:[#allocation8 + $0x594] sm:$0xf] }
 0x270   : > { %v3349_v26 = vadd.f32 %v3348_v22, %v12677_v32  ;;  %v3374_v47 = vpop.f32.mrf.mxu0  ;;  %v12721_v14 = vadd.f32 %v3430_v38, %v3401_v46  ;;  %v12723_v58 = vpop.f32.mrf.mxu1  ;;  %v8778_v38 = vor.u32 %v10770_v42, %v8775_v50 }
 0x271   : > { %4445 = vmatpush.bf16.msra.mxu1 %v9030_v30  ;;  %v3375_v48 = vadd.f32 %v3374_v47, %v3346_v8  ;;  %4483 = vmatpush.bf16.msrb.mxu3 %v8746_v35  ;;  %v8730_v8 = vor.u32 %v10758_v0, %v8727_v23  ;;  %v8719_v35 = vld [vmem:[#allocation8 + $0x478] sm:$0xf0]  ;;  %v10766_v23 = vld [vmem:[#allocation8 + $0x4c4] sm:$0xf] }
 0x272   : > { %v8722_v47 = vor.u32 %v10756_v37, %v8719_v35  ;;  %v8762_v35 = vor.u32 %v10766_v23, %v8759_v10 }
 0x273   : > { %v5578_v32 = vadd.f32 %v12716_v60, %v3375_v48  ;;  %4500 = vmatpush.bf16.msra.mxu0 %v8786_v52  ;;  %v10754_v48 = vld [vmem:[#allocation8 + $0x464] sm:$0xf] }
 0x274   : > { %v8714_v0 = vor.u32 %v10754_v48, %v8711_v17  ;;  %v10828_v48 = vld [vmem:[#allocation8 + $0x6b4] sm:$0xf] }
 0x275   : > { %v5594_v46 = vmax.f32 %v5578_v32, 0.0  ;;  %4446 = vmatpush.bf16.msra.mxu1 %v9022_v36  ;;  %4484 = vmatpush.bf16.msrb.mxu3 %v8738_v29  ;;  %v10768_v36 = vld [vmem:[#allocation8 + $0x4d4] sm:$0xf]  ;;  %v8767_v29 = vld [vmem:[#allocation8 + $0x4d8] sm:$0xf0] }
 0x276   : > { %v10752_v32 = vld [vmem:[#allocation8 + $0x454] sm:$0xf] }
 0x277   : > { %v3350_v30 = vpop.f32.mrf.mxu2  ;;  %v12726_v62 = vpack.c.bf16 %v5594_v46, %v5592_v41  ;;  %v12729_v22 = vpop.f32.mrf.mxu3  ;;  %4501 = vmatpush.bf16.msra.mxu0 %v8778_v38  ;;  %v10790_v41 = vld [vmem:[#allocation8 + $0x584] sm:$0xf]  ;;  %v8855_v46 = vld [vmem:[#allocation8 + $0x588] sm:$0xf0]  ;;  %v8706_v39 = vor.u32 %v10752_v32, %v8703_v7  ;;  %v10812_v17 = vld [vmem:[#allocation8 + $0x634] sm:$0xf] }
 0x278   : > { %v3351_v44 = vadd.f32 %v3350_v30, %v12680_v31  ;;  %v3377_v6 = vpop.f32.mrf.mxu0  ;;  %v3406_v16 = vpop.f32.mrf.mxu1  ;;  %v8863_v31 = vld [vmem:[#allocation8 + $0x598] sm:$0xf0]  ;;  %v8858_v18 = vor.u32 %v10790_v41, %v8855_v46  ;;  %v8999_v7 = vld [vmem:[#allocation8 + $0x6a8] sm:$0xf0] }
 0x279   : > { %4447 = vmatpush.bf16.msra.mxu1 %v9014_v24  ;;  %v3378_v55 = vadd.f32 %v3377_v6, %v3349_v26  ;;  %4485 = vmatpush.bf16.msrb.mxu3 %v8730_v8  ;;  %v8770_v26 = vor.u32 %v10768_v36, %v8767_v29  ;;  %v8866_v52 = vor.u32 %v10792_v56, %v8863_v31  ;;  %v10750_v6 = vld [vmem:[#allocation8 + $0x444] sm:$0xf]  ;;  %v9007_v36 = vld [vmem:[#allocation8 + $0x6b8] sm:$0xf0] }
 0x27a   : > { %8625 = vmatmul.msk.bf16.gmra.mxu0 %vm1296_vm0, %v12614_v45  ;;  %v8943_v56 = vld [vmem:[#allocation8 + $0x638] sm:$0xf0] }
 0x27b   : > { %v5580_v37 = vadd.f32 %v12716_v60, %v3378_v55  ;;  %4502 = vmatpush.bf16.msra.mxu0 %v8770_v26  ;;  %v9010_v26 = vor.u32 %v10828_v48, %v9007_v36 }
 0x27c   : > { %3584 = vmatmul.bf16.gmra.mxu2 %v12573_v15  ;;  %4448 = vmatmul.bf16.vlgmr.msra.gmra.mxu1 %v12452_v21 }
 0x27d   : > { %4510 = vmatpush.bf16.msrb.mxu1 %v8882_v61  ;;  %9107 = vmatmul.msk.bf16.vlgmr.msra.gmra.mxu3 %vm1296_vm0, %v12547_v3  ;;  %v5596_v55 = vmax.f32 %v5580_v37, 0.0  ;;  %v10810_v37 = vld [vmem:[#allocation8 + $0x624] sm:$0xf] }
 0x27e   : > { %4486 = vmatpush.bf16.msrb.mxu3 %v8722_v47  ;;  %v8695_v47 = vld [vmem:[#allocation8 + $0x448] sm:$0xf0] }
 0x27f   : > { %v3353_v45 = vpop.f32.mrf.mxu2  ;;  %v3435_v8 = vpop.f32.mrf.mxu3  ;;  %4503 = vmatpush.bf16.msra.mxu0 %v8762_v35 }
 0x280   : > { %v3354_v24 = vadd.f32 %v3353_v45, %v12687_v2  ;;  %v3379_v61 = vpop.f32.mrf.mxu0  ;;  %v12739_v42 = vadd.f32 %v3435_v8, %v3406_v16  ;;  %v12741_v30 = vpop.f32.mrf.mxu1  ;;  %v10788_v2 = vld [vmem:[#allocation8 + $0x574] sm:$0xf]  ;;  %v10826_v45 = vld [vmem:[#allocation8 + $0x6a4] sm:$0xf]  ;;  %v8946_v8 = vor.u32 %v10812_v17, %v8943_v56 }
 0x281   : > { %4511 = vmatpush.bf16.msrb.mxu1 %v8874_v59  ;;  %v3380_v50 = vadd.f32 %v3379_v61, %v3351_v44  ;;  %13520 = vst [vmem:[#allocation28_spill] sm:$0xff] %v12741_v30  ;;  %v8847_v59 = vld [vmem:[#allocation8 + $0x578] sm:$0xf0]  ;;  %v8698_v44 = vor.u32 %v10750_v6, %v8695_v47  ;;  %v9002_v35 = vor.u32 %v10826_v45, %v8999_v7  ;;  %v10824_v6 = vld [vmem:[#allocation8 + $0x694] sm:$0xf] }
 0x282   : > { %4487 = vmatpush.bf16.msrb.mxu3 %v8714_v0  ;;  %v8850_v29 = vor.u32 %v10788_v2, %v8847_v59  ;;  %v10786_v0 = vld [vmem:[#allocation8 + $0x564] sm:$0xf]  ;;  %v10808_v2 = vld [vmem:[#allocation8 + $0x614] sm:$0xf]  ;;  %v8927_v59 = vld [vmem:[#allocation8 + $0x618] sm:$0xf0] }
 0x283   : > { %v5582_v38 = vadd.f32 %v12716_v60, %v3380_v50  ;;  %v8935_v50 = vld [vmem:[#allocation8 + $0x628] sm:$0xf0]  ;;  %v8930_v45 = vor.u32 %v10808_v2, %v8927_v59 }
 0x285   : > { %4512 = vmatpush.bf16.msrb.mxu1 %v8866_v52  ;;  %v5598_v16 = vmax.f32 %v5582_v38, 0.0  ;;  %v8839_v52 = vld [vmem:[#allocation8 + $0x568] sm:$0xf0]  ;;  %v8991_v38 = vld [vmem:[#allocation8 + $0x698] sm:$0xf0] }
 0x286   : > { %4488 = vmatpush.bf16.msrb.mxu3 %v8706_v39  ;;  %v8842_v61 = vor.u32 %v10786_v0, %v8839_v52  ;;  %v10784_v39 = vld [vmem:[#allocation8 + $0x554] sm:$0xf]  ;;  %v8994_v36 = vor.u32 %v10824_v6, %v8991_v38  ;;  %v9103_v52 = vld [vmem:[#allocation8 + $0x778] sm:$0xf0] }
 0x287   : > { %v12744_v31 = vpop.f32.mrf.mxu2  ;;  %v12746_v32 = vpack.c.bf16 %v5598_v16, %v5596_v55  ;;  %v12748_v23 = vpop.f32.mrf.mxu3  ;;  %v10782_v55 = vld [vmem:[#allocation8 + $0x544] sm:$0xf]  ;;  %v8823_v16 = vld [vmem:[#allocation8 + $0x548] sm:$0xf0]  ;;  %v10852_v0 = vld [vmem:[#allocation8 + $0x774] sm:$0xf] }
 0x288   : > { %13521 = vst [vmem:[#allocation48_spill] sm:$0xff] %v12748_v23  ;;  %v3382_v10 = vpop.f32.mrf.mxu0  ;;  %v3411_v46 = vpop.f32.mrf.mxu1  ;;  %v8826_v7 = vor.u32 %v10782_v55, %v8823_v16  ;;  %v10804_v38 = vld [vmem:[#allocation8 + $0x5f4] sm:$0xf] }
 0x289   : > { %4513 = vmatpush.bf16.msrb.mxu1 %v8858_v18  ;;  %v12750_v41 = vadd.f32 %v3382_v10, %v3354_v24  ;;  %v8831_v18 = vld [vmem:[#allocation8 + $0x558] sm:$0xf0]  ;;  %v8938_v24 = vor.u32 %v10810_v37, %v8935_v50  ;;  %v9106_v50 = vor.u32 %v10852_v0, %v9103_v52  ;;  %v10868_v23 = vld [vmem:[#allocation8 + $0x7f4] sm:$0xf] }
 0x28a   : > { %4489 = vmatpush.bf16.msrb.mxu3 %v8698_v44  ;;  %8626 = vmatmul.msk.bf16.gmra.mxu0 %vm1296_vm0, %v12635_v12  ;;  %v8834_v47 = vor.u32 %v10784_v39, %v8831_v18  ;;  %v10822_v44 = vld [vmem:[#allocation8 + $0x684] sm:$0xf]  ;;  %v9095_v18 = vld [vmem:[#allocation8 + $0x768] sm:$0xf0] }
 0x28b   : > { %v10850_v39 = vld [vmem:[#allocation8 + $0x764] sm:$0xf] }
 0x28c   : > { %4420 = vmatmul.bf16.vlgmr.msrb.gmra.mxu2 %v13518_v63  ;;  %v9098_v59 = vor.u32 %v10850_v39, %v9095_v18  ;;  %v10816_v18 = vld [vmem:[#allocation8 + $0x654] sm:$0xf] }
 0x28d   : > { %4514 = vmatpush.bf16.msrb.mxu1 %v8850_v29  ;;  %4524 = vmatpush.bf16.msrb.mxu2 %v8946_v8  ;;  %v10806_v8 = vld [vmem:[#allocation8 + $0x604] sm:$0xf] }
 0x28e   : > { %4538 = vmatpush.bf16.msra.mxu3 %v9010_v26  ;;  %v8983_v26 = vld [vmem:[#allocation8 + $0x688] sm:$0xf0] }
 0x28f   : > { %4490 = vmatmul.bf16.vlgmr.msrb.gmra.mxu3 %v13509_v49  ;;  %v3454_v48 = vpop.f32.mrf.mxu2  ;;  %v3440_v29 = vpop.f32.mrf.mxu3  ;;  %v8986_v37 = vor.u32 %v10822_v44, %v8983_v26  ;;  %v8967_v44 = vld [vmem:[#allocation8 + $0x668] sm:$0xf0]  ;;  %v9087_v26 = vld [vmem:[#allocation8 + $0x758] sm:$0xf0] }
 0x290   : > { %v3455_v17 = vadd.f32 %v3454_v48, %v12700_v20  ;;  %v12757_v56 = vpop.f32.mrf.mxu0  ;;  %v12759_v10 = vadd.f32 %v3440_v29, %v3411_v46  ;;  %v12761_v49 = vpop.f32.mrf.mxu1  ;;  %v8975_v20 = vld [vmem:[#allocation8 + $0x678] sm:$0xf0]  ;;  %v10848_v29 = vld [vmem:[#allocation8 + $0x754] sm:$0xf] }
 0x291   : > { %4515 = vmatpush.bf16.msrb.mxu1 %v8842_v61  ;;  %4525 = vmatpush.bf16.msrb.mxu2 %v8938_v24  ;;  %13522 = vst [vmem:[#allocation54_spill] sm:$0xff] %v12761_v49  ;;  %v8919_v61 = vld [vmem:[#allocation8 + $0x608] sm:$0xf0]  ;;  %v8911_v46 = vld [vmem:[#allocation8 + $0x5f8] sm:$0xf0]  ;;  %v9090_v39 = vor.u32 %v10848_v29, %v9087_v26 }
 0x292   : > { %4539 = vmatpush.bf16.msra.mxu3 %v9002_v35  ;;  %v10820_v35 = vld [vmem:[#allocation8 + $0x674] sm:$0xf]  ;;  %v8922_v6 = vor.u32 %v10806_v8, %v8919_v61  ;;  %v9071_v48 = vld [vmem:[#allocation8 + $0x738] sm:$0xf0]  ;;  %v10802_v8 = vld [vmem:[#allocation8 + $0x5e4] sm:$0xf] }
 0x293   : > { %v10844_v24 = vld [vmem:[#allocation8 + $0x734] sm:$0xf]  ;;  %v8978_v2 = vor.u32 %v10820_v35, %v8975_v20  ;;  %v8903_v61 = vld [vmem:[#allocation8 + $0x5e8] sm:$0xf0]  ;;  %v10814_v26 = vld [vmem:[#allocation8 + $0x644] sm:$0xf] }
 0x295   : > { %4516 = vmatpush.bf16.msrb.mxu1 %v8834_v47  ;;  %4526 = vmatpush.bf16.msrb.mxu2 %v8930_v45  ;;  %v8914_v45 = vor.u32 %v10804_v38, %v8911_v46  ;;  %v8906_v38 = vor.u32 %v10802_v8, %v8903_v61  ;;  %v9295_v8 = vld [vmem:[#allocation8 + $0x8f0] sm:$0xf]  ;;  %v10901_v61 = vld [vmem:[#allocation8 + $0x8f4] sm:$0xf0] }
 0x296   : > { %4540 = vmatpush.bf16.msra.mxu3 %v8994_v36  ;;  %v10818_v36 = vld [vmem:[#allocation8 + $0x664] sm:$0xf] }
 0x297   : > { %v12763_v47 = vpop.f32.mrf.mxu2  ;;  %v12765_v55 = vpop.f32.mrf.mxu3  ;;  %v8970_v20 = vor.u32 %v10818_v36, %v8967_v44 }
 0x298   : > { %13523 = vst [vmem:[#allocation55_spill] sm:$0xff] %v12765_v55  ;;  %v3483_v16 = vpop.f32.mrf.mxu0  ;;  %v3512_v52 = vpop.f32.mrf.mxu1  ;;  %v10836_v55 = vld [vmem:[#allocation8 + $0x6f4] sm:$0xf] }
 0x299   : > { %4517 = vmatpush.bf16.msrb.mxu1 %v8826_v7  ;;  %4527 = vmatpush.bf16.msrb.mxu2 %v8922_v6  ;;  %v3484_v0 = vadd.f32 %v3483_v16, %v3455_v17  ;;  %v9074_v7 = vor.u32 %v10844_v24, %v9071_v48  ;;  %v10846_v6 = vld [vmem:[#allocation8 + $0x744] sm:$0xf]  ;;  %v9079_v17 = vld [vmem:[#allocation8 + $0x748] sm:$0xf0]  ;;  %v9167_v24 = vld [vmem:[#allocation8 + $0x7f0] sm:$0xf] }
 0x29a   : > { %4541 = vmatpush.bf16.msra.mxu3 %v8986_v37  ;;  %v10842_v37 = vld [vmem:[#allocation8 + $0x724] sm:$0xf]  ;;  %4434 = vmatmul.bf16.vlgmr.msrb.gmra.mxu0 %v13519_v4  ;;  %v10869_v48 = vld [vmem:[#allocation8 + $0x7f4] sm:$0xf0]  ;;  %v10800_v16 = vld [vmem:[#allocation8 + $0x5d4] sm:$0xf]  ;;  %v9082_v29 = vor.u32 %v10846_v6, %v9079_v17 }
 0x29b   : > { %v3513_v35 = vadd.f32 %v3512_v52, %v3484_v0  ;;  %4552 = vmatpush.bf16.msrb.mxu0 %v9074_v7  ;;  %v8895_v0 = vld [vmem:[#allocation8 + $0x5d8] sm:$0xf0]  ;;  %v8951_v7 = vld [vmem:[#allocation8 + $0x648] sm:$0xf0]  ;;  %v10798_v6 = vld [vmem:[#allocation8 + $0x5c4] sm:$0xf] }
 0x29c   : > { %4518 = vmatmul.bf16.vlgmr.msrb.gmra.mxu1 %v13516_v33  ;;  %4476 = vmatmul.bf16.vlgmr.msra.gmra.mxu2 %v13508_v54  ;;  %v8959_v33 = vld [vmem:[#allocation8 + $0x658] sm:$0xf0]  ;;  %v8887_v17 = vld [vmem:[#allocation8 + $0x5c8] sm:$0xf0] }
 0x29d   : > { %4570 = vmatpush.bf16.msra.mxu1 %v9106_v50  ;;  %v9063_v50 = vld [vmem:[#allocation8 + $0x728] sm:$0xf0]  ;;  %4528 = vmatpush.bf16.msrb.mxu2 %v8914_v45  ;;  %v8962_v44 = vor.u32 %v10816_v18, %v8959_v33  ;;  %v9168_v45 = vor.u32 %v10869_v48, %v9167_v24  ;;  %v9159_v18 = vld [vmem:[#allocation8 + $0x7e0] sm:$0xf]  ;;  %v10867_v33 = vld [vmem:[#allocation8 + $0x7e4] sm:$0xf0]  ;;  %v8954_v24 = vor.u32 %v10814_v26, %v8951_v7 }
 0x29e   : > { %4542 = vmatpush.bf16.msra.mxu3 %v8978_v2  ;;  %v9066_v46 = vor.u32 %v10842_v37, %v9063_v50  ;;  %v10840_v2 = vld [vmem:[#allocation8 + $0x714] sm:$0xf]  ;;  %v9231_v48 = vld [vmem:[#allocation8 + $0x870] sm:$0xf]  ;;  %v10883_v26 = vld [vmem:[#allocation8 + $0x864] sm:$0xf0] }
 0x29f   : > { %v3459_v36 = vpop.f32.mrf.mxu2  ;;  %v3541_v52 = vpop.f32.mrf.mxu3  ;;  %v9232_v13 = vor.u32 %v10885_v34, %v9231_v48  ;;  %v10897_v34 = vld [vmem:[#allocation8 + $0x8d4] sm:$0xf0]  ;;  %v9031_v48 = vld [vmem:[#allocation8 + $0x6e8] sm:$0xf0] }
 0x2a0   : > { %v3460_v54 = vadd.f32 %v3459_v36, %v12721_v14  ;;  %v12771_v51 = vpop.f32.mrf.mxu0  ;;  %v12773_v37 = vadd.f32 %v3541_v52, %v3513_v35  ;;  %4553 = vmatpush.bf16.msrb.mxu0 %v9066_v46  ;;  %v12775_v50 = vpop.f32.mrf.mxu1  ;;  %v10838_v14 = vld [vmem:[#allocation8 + $0x704] sm:$0xf]  ;;  %v9047_v36 = vld [vmem:[#allocation8 + $0x708] sm:$0xf0]  ;;  %v9296_v35 = vor.u32 %v10901_v61, %v9295_v8  ;;  %v9160_v52 = vor.u32 %v10867_v33, %v9159_v18  ;;  %v9143_v33 = vld [vmem:[#allocation8 + $0x7c0] sm:$0xf] }
 0x2a1   : > { %4571 = vmatpush.bf16.msra.mxu1 %v9098_v59  ;;  %v9055_v59 = vld [vmem:[#allocation8 + $0x718] sm:$0xf0]  ;;  %4529 = vmatpush.bf16.msrb.mxu2 %v8906_v38  ;;  %v9287_v38 = vld [vmem:[#allocation8 + $0x8e0] sm:$0xf]  ;;  %v8890_v46 = vor.u32 %v10798_v6, %v8887_v17  ;;  %v10863_v6 = vld [vmem:[#allocation8 + $0x7c4] sm:$0xf0] }
 0x2a2   : > { %4543 = vmatpush.bf16.msra.mxu3 %v8970_v20  ;;  %v8898_v20 = vor.u32 %v10800_v16, %v8895_v0  ;;  %v9050_v16 = vor.u32 %v10838_v14, %v9047_v36  ;;  %v10899_v0 = vld [vmem:[#allocation8 + $0x8e4] sm:$0xf0]  ;;  %v10834_v36 = vld [vmem:[#allocation8 + $0x6e4] sm:$0xf] }
 0x2a3   : > { %v9288_v8 = vor.u32 %v10899_v0, %v9287_v38  ;;  %v9144_v38 = vor.u32 %v10863_v6, %v9143_v33  ;;  %v10859_v33 = vld [vmem:[#allocation8 + $0x7a4] sm:$0xf0] }
 0x2a5   : > { %4572 = vmatpush.bf16.msra.mxu1 %v9090_v39  ;;  %v9058_v39 = vor.u32 %v10840_v2, %v9055_v59  ;;  %4530 = vmatpush.bf16.msrb.mxu2 %v8898_v20  ;;  %v9151_v2 = vld [vmem:[#allocation8 + $0x7d0] sm:$0xf]  ;;  %v10865_v59 = vld [vmem:[#allocation8 + $0x7d4] sm:$0xf0] }
 0x2a6   : > { %4544 = vmatpush.bf16.msra.mxu3 %v8962_v44  ;;  %v9039_v44 = vld [vmem:[#allocation8 + $0x6f8] sm:$0xf0]  ;;  %v9152_v61 = vor.u32 %v10865_v59, %v9151_v2  ;;  %v9279_v20 = vld [vmem:[#allocation8 + $0x8d0] sm:$0xf]  ;;  %v10832_v2 = vld [vmem:[#allocation8 + $0x6d4] sm:$0xf] }
 0x2a7   : > { %4554 = vmatpush.bf16.msrb.mxu0 %v9058_v39  ;;  %v12777_v49 = vpop.f32.mrf.mxu2  ;;  %v9042_v17 = vor.u32 %v10836_v55, %v9039_v44  ;;  %v9135_v55 = vld [vmem:[#allocation8 + $0x7b0] sm:$0xf]  ;;  %v9023_v44 = vld [vmem:[#allocation8 + $0x6d8] sm:$0xf0] }
 0x2a8   : > { %v3488_v7 = vpop.f32.mrf.mxu0  ;;  %v3517_v18 = vpop.f32.mrf.mxu1  ;;  %v9026_v6 = vor.u32 %v10832_v2, %v9023_v44  ;;  %v10875_v44 = vld [vmem:[#allocation8 + $0x824] sm:$0xf0] }
 0x2a9   : > { %4573 = vmatpush.bf16.msra.mxu1 %v9082_v29  ;;  %v9223_v29 = vld [vmem:[#allocation8 + $0x860] sm:$0xf]  ;;  %4531 = vmatpush.bf16.msrb.mxu2 %v8890_v46  ;;  %v3489_v39 = vadd.f32 %v3488_v7, %v3460_v54  ;;  %v9280_v54 = vor.u32 %v10897_v34, %v9279_v20 }
 0x2aa   : > { %4545 = vmatpush.bf16.msra.mxu3 %v8954_v24  ;;  %v9224_v14 = vor.u32 %v10883_v26, %v9223_v29  ;;  %v9271_v46 = vld [vmem:[#allocation8 + $0x8c0] sm:$0xf]  ;;  %4504 = vmatmul.bf16.vlgmr.msra.gmra.mxu0 %v12311_v9  ;;  %v10879_v29 = vld [vmem:[#allocation8 + $0x844] sm:$0xf0] }
 0x2ab   : > { %4555 = vmatpush.bf16.msrb.mxu0 %v9050_v16  ;;  %v3518_v24 = vadd.f32 %v3517_v18, %v3489_v39  ;;  %v9034_v16 = vor.u32 %v10834_v36, %v9031_v48  ;;  %v10893_v18 = vld [vmem:[#allocation8 + $0x8b4] sm:$0xf0]  ;;  %v9127_v34 = vld [vmem:[#allocation8 + $0x7a0] sm:$0xf]  ;;  %v9199_v36 = vld [vmem:[#allocation8 + $0x830] sm:$0xf] }
 0x2ac   : > { %9108 = vmatmul.msk.bf16.vlgmr.msra.gmra.mxu1 %vm1296_vm0, %v12547_v3  ;;  %4532 = vmatmul.bf16.vlgmr.msrb.gmra.mxu2 %v13518_v63  ;;  %v9207_v3 = vld [vmem:[#allocation8 + $0x840] sm:$0xf]  ;;  %v10877_v48 = vld [vmem:[#allocation8 + $0x834] sm:$0xf0] }
 0x2ad   : > { %5314 = vmatpush.bf16.msrb.mxu1 %v9168_v45  ;;  %v12779_v45 = vpop.f32.mrf.mxu3  ;;  %5328 = vmatpush.bf16.msra.mxu2 %v9232_v13  ;;  %v10895_v13 = vld [vmem:[#allocation8 + $0x8c4] sm:$0xf0] }
 0x2ae   : > { %5342 = vmatpush.bf16.msrb.mxu3 %v9296_v35  ;;  %v9215_v35 = vld [vmem:[#allocation8 + $0x850] sm:$0xf]  ;;  %v9272_v63 = vor.u32 %v10895_v13, %v9271_v46  ;;  %v10891_v46 = vld [vmem:[#allocation8 + $0x8a4] sm:$0xf0] }
 0x2af   : > { %4546 = vmatmul.bf16.vlgmr.msra.gmra.mxu3 %v13519_v4  ;;  %v10861_v4 = vld [vmem:[#allocation8 + $0x7b4] sm:$0xf0]  ;;  %4556 = vmatpush.bf16.msrb.mxu0 %v9042_v17  ;;  %v3464_v59 = vpop.f32.mrf.mxu2  ;;  %v9208_v17 = vor.u32 %v10879_v29, %v9207_v3  ;;  %v9119_v13 = vld [vmem:[#allocation8 + $0x790] sm:$0xf] }
 0x2b0   : > { %v3465_v26 = vadd.f32 %v3464_v59, %v12739_v42  ;;  %v12787_v9 = vpop.f32.mrf.mxu0  ;;  %v12791_v39 = vpop.f32.mrf.mxu1  ;;  %v9015_v42 = vld [vmem:[#allocation8 + $0x6c8] sm:$0xf0]  ;;  %v9191_v59 = vld [vmem:[#allocation8 + $0x820] sm:$0xf] }
 0x2b1   : > { %5315 = vmatpush.bf16.msrb.mxu1 %v9160_v52  ;;  %v10881_v52 = vld [vmem:[#allocation8 + $0x854] sm:$0xf0]  ;;  %5329 = vmatpush.bf16.msra.mxu2 %v9224_v14  ;;  %13524 = vst [vmem:[#allocation35_spill] sm:$0xff] %v12791_v39  ;;  %v10830_v14 = vld [vmem:[#allocation8 + $0x6c4] sm:$0xf] }
 0x2b2   : > { %5343 = vmatpush.bf16.msrb.mxu3 %v9288_v8  ;;  %v9216_v0 = vor.u32 %v10881_v52, %v9215_v35  ;;  %v9136_v8 = vor.u32 %v10861_v4, %v9135_v55  ;;  %v9128_v52 = vor.u32 %v10859_v33, %v9127_v34  ;;  %v10857_v55 = vld [vmem:[#allocation8 + $0x794] sm:$0xf0]  ;;  %v9018_v4 = vor.u32 %v10830_v14, %v9015_v42  ;;  %v10855_v14 = vld [vmem:[#allocation8 + $0x784] sm:$0xf0]  ;;  %v9425_v39 = vld [vmem:[#allocation8 + $0x9f8] sm:$0xf0] }
 0x2b3   : > { %4557 = vmatpush.bf16.msrb.mxu0 %v9034_v16  ;;  %v9200_v16 = vor.u32 %v10877_v48, %v9199_v36  ;;  %v9192_v42 = vor.u32 %v10875_v44, %v9191_v59  ;;  %v9423_v36 = vld [vmem:[#allocation8 + $0x9f0] sm:$0xf]  ;;  %v10933_v48 = vld [vmem:[#allocation8 + $0x9f4] sm:$0xf0] }
 0x2b4   : > { %v10965_v44 = vld [vmem:[#allocation8 + $0xaf4] sm:$0xf0] }
 0x2b5   : > { %5316 = vmatpush.bf16.msrb.mxu1 %v9152_v61  ;;  %v3546_v7 = vpop.f32.mrf.mxu3  ;;  %v9263_v61 = vld [vmem:[#allocation8 + $0x8b0] sm:$0xf]  ;;  %5330 = vmatpush.bf16.msra.mxu2 %v9216_v0 }
 0x2b6   : > { %5344 = vmatpush.bf16.msrb.mxu3 %v9280_v54  ;;  %v12789_v20 = vadd.f32 %v3546_v7, %v3518_v24  ;;  %v9264_v35 = vor.u32 %v10893_v18, %v9263_v61  ;;  %v9359_v54 = vld [vmem:[#allocation8 + $0x970] sm:$0xf]  ;;  %v10917_v24 = vld [vmem:[#allocation8 + $0x974] sm:$0xf0]  ;;  %v10915_v61 = vld [vmem:[#allocation8 + $0x964] sm:$0xf0] }
 0x2b7   : > { %4558 = vmatpush.bf16.msrb.mxu0 %v9026_v6  ;;  %v12793_v0 = vpop.f32.mrf.mxu2  ;;  %v9360_v2 = vor.u32 %v10917_v24, %v9359_v54  ;;  %v9247_v18 = vld [vmem:[#allocation8 + $0x890] sm:$0xf]  ;;  %v10889_v6 = vld [vmem:[#allocation8 + $0x894] sm:$0xf0] }
 0x2b8   : > { %13525 = vst [vmem:[#allocation51_spill] sm:$0xff] %v12793_v0  ;;  %v3493_v29 = vpop.f32.mrf.mxu0  ;;  %v3522_v33 = vpop.f32.mrf.mxu1  ;;  %v10873_v24 = vld [vmem:[#allocation8 + $0x814] sm:$0xf0]  ;;  %v10967_v0 = vld [vmem:[#allocation8 + $0xb04] sm:$0xf0] }
 0x2b9   : > { %5317 = vmatpush.bf16.msrb.mxu1 %v9144_v38  ;;  %v9255_v38 = vld [vmem:[#allocation8 + $0x8a0] sm:$0xf]  ;;  %5331 = vmatpush.bf16.msra.mxu2 %v9208_v17  ;;  %v3494_v34 = vadd.f32 %v3493_v29, %v3465_v26  ;;  %v10913_v26 = vld [vmem:[#allocation8 + $0x954] sm:$0xf0] }
 0x2ba   : > { %5345 = vmatpush.bf16.msrb.mxu3 %v9272_v63  ;;  %v9256_v7 = vor.u32 %v10891_v46, %v9255_v38  ;;  %v9120_v63 = vor.u32 %v10857_v55, %v9119_v13  ;;  %v9111_v17 = vld [vmem:[#allocation8 + $0x780] sm:$0xf]  ;;  %v9248_v38 = vor.u32 %v10889_v6, %v9247_v18  ;;  %v9343_v13 = vld [vmem:[#allocation8 + $0x950] sm:$0xf]  ;;  %v9424_v55 = vor.u32 %v10933_v48, %v9423_v36 }
 0x2bb   : > { %4559 = vmatpush.bf16.msrb.mxu0 %v9018_v4  ;;  %v9112_v46 = vor.u32 %v10855_v14, %v9111_v17  ;;  %v9239_v29 = vld [vmem:[#allocation8 + $0x880] sm:$0xf]  ;;  %v10887_v4 = vld [vmem:[#allocation8 + $0x884] sm:$0xf0] }
 0x2bc   : > { %v9240_v6 = vor.u32 %v10887_v4, %v9239_v29  ;;  %v9335_v17 = vld [vmem:[#allocation8 + $0x940] sm:$0xf]  ;;  %v10911_v14 = vld [vmem:[#allocation8 + $0x944] sm:$0xf0]  ;;  %v9327_v29 = vld [vmem:[#allocation8 + $0x930] sm:$0xf] }
 0x2bd   : > { %5318 = vmatpush.bf16.msrb.mxu1 %v9136_v8  ;;  %v12795_v3 = vpop.f32.mrf.mxu3  ;;  %v9351_v8 = vld [vmem:[#allocation8 + $0x960] sm:$0xf]  ;;  %5332 = vmatpush.bf16.msra.mxu2 %v9200_v16  ;;  %v9551_v16 = vld [vmem:[#allocation8 + $0xaf0] sm:$0xf] }
 0x2be   : > { %5346 = vmatpush.bf16.msrb.mxu3 %v9264_v35  ;;  %13526 = vst [vmem:[#allocation58_spill] sm:$0xff] %v12795_v3  ;;  %v3523_v35 = vadd.f32 %v3522_v33, %v3494_v34  ;;  %v9352_v54 = vor.u32 %v10915_v61, %v9351_v8  ;;  %4560 = vmatmul.bf16.vlgmr.msrb.gmra.mxu0 %v12452_v21  ;;  %v9415_v34 = vld [vmem:[#allocation8 + $0x9e0] sm:$0xf]  ;;  %v10932_v3 = vld [vmem:[#allocation8 + $0x9f4] sm:$0xf] }
 0x2bf   : > { %5356 = vmatpush.bf16.msra.mxu0 %v9360_v2  ;;  %v10931_v2 = vld [vmem:[#allocation8 + $0x9e4] sm:$0xf0]  ;;  %v3469_v8 = vpop.f32.mrf.mxu2  ;;  %v9344_v61 = vor.u32 %v10913_v26, %v9343_v13  ;;  %v9552_v48 = vor.u32 %v10965_v44, %v9551_v16  ;;  %v9543_v13 = vld [vmem:[#allocation8 + $0xae0] sm:$0xf]  ;;  %v9407_v26 = vld [vmem:[#allocation8 + $0x9d0] sm:$0xf] }
 0x2c0   : > { %v3470_v18 = vadd.f32 %v3469_v8, %v12759_v10  ;;  %v12799_v21 = vpop.f32.mrf.mxu0  ;;  %v12803_v36 = vpop.f32.mrf.mxu1  ;;  %v10963_v10 = vld [vmem:[#allocation8 + $0xae4] sm:$0xf0]  ;;  %v10929_v8 = vld [vmem:[#allocation8 + $0x9d4] sm:$0xf0]  ;;  %v9479_v16 = vld [vmem:[#allocation8 + $0xa60] sm:$0xf] }
 0x2c1   : > { %5319 = vmatpush.bf16.msrb.mxu1 %v9128_v52  ;;  %v9183_v52 = vld [vmem:[#allocation8 + $0x810] sm:$0xf]  ;;  %5333 = vmatpush.bf16.msra.mxu2 %v9192_v42  ;;  %13527 = vst [vmem:[#allocation59_spill] sm:$0xff] %v12799_v21  ;;  %v9544_v4 = vor.u32 %v10963_v10, %v9543_v13  ;;  %v10947_v44 = vld [vmem:[#allocation8 + $0xa64] sm:$0xf0] }
 0x2c2   : > { %5347 = vmatpush.bf16.msrb.mxu3 %v9256_v7  ;;  %v9184_v59 = vor.u32 %v10873_v24, %v9183_v52  ;;  %v9175_v7 = vld [vmem:[#allocation8 + $0x800] sm:$0xf]  ;;  %13528 = vst [vmem:[#allocation60_spill] sm:$0xff] %v12803_v36  ;;  %v9487_v52 = vld [vmem:[#allocation8 + $0xa70] sm:$0xf] }
 0x2c3   : > { %5357 = vmatpush.bf16.msra.mxu0 %v9352_v54  ;;  %v9416_v54 = vor.u32 %v10931_v2, %v9415_v34  ;;  %v10949_v24 = vld [vmem:[#allocation8 + $0xa74] sm:$0xf0]  ;;  %v9535_v34 = vld [vmem:[#allocation8 + $0xad0] sm:$0xf]  ;;  %v9559_v21 = vld [vmem:[#allocation8 + $0xb00] sm:$0xf] }
 0x2c4   : > { %v10961_v2 = vld [vmem:[#allocation8 + $0xad4] sm:$0xf0]  ;;  %v9471_v13 = vld [vmem:[#allocation8 + $0xa50] sm:$0xf] }
 0x2c5   : > { %5320 = vmatpush.bf16.msrb.mxu1 %v9120_v63  ;;  %v10871_v63 = vld [vmem:[#allocation8 + $0x804] sm:$0xf0]  ;;  %v3551_v33 = vpop.f32.mrf.mxu3  ;;  %5334 = vmatpush.bf16.msra.mxu2 %v9184_v59  ;;  %v9408_v59 = vor.u32 %v10929_v8, %v9407_v26  ;;  %v10945_v10 = vld [vmem:[#allocation8 + $0xa54] sm:$0xf0]  ;;  %v9527_v26 = vld [vmem:[#allocation8 + $0xac0] sm:$0xf] }
 0x2c6   : > { %5348 = vmatpush.bf16.msrb.mxu3 %v9248_v38  ;;  %v12801_v42 = vadd.f32 %v3551_v33, %v3523_v35  ;;  %v9176_v38 = vor.u32 %v10871_v63, %v9175_v7  ;;  %v9488_v35 = vor.u32 %v10949_v24, %v9487_v52  ;;  %v9399_v63 = vld [vmem:[#allocation8 + $0x9c0] sm:$0xf]  ;;  %v10927_v33 = vld [vmem:[#allocation8 + $0x9c4] sm:$0xf0]  ;;  %v9503_v36 = vld [vmem:[#allocation8 + $0xa90] sm:$0xf] }
 0x2c7   : > { %5358 = vmatpush.bf16.msra.mxu0 %v9344_v61  ;;  %v12807_v61 = vpop.f32.mrf.mxu2  ;;  %v10959_v8 = vld [vmem:[#allocation8 + $0xac4] sm:$0xf0] }
 0x2c8   : > { %13529 = vst [vmem:[#allocation61_spill] sm:$0xff] %v12807_v61  ;;  %v3527_v24 = vpop.f32.mrf.mxu1  ;;  %v10925_v61 = vld [vmem:[#allocation8 + $0x9b4] sm:$0xf0] }
 0x2c9   : > { %5321 = vmatpush.bf16.msrb.mxu1 %v9112_v46  ;;  %v9336_v46 = vor.u32 %v10911_v14, %v9335_v17  ;;  %5335 = vmatpush.bf16.msra.mxu2 %v9176_v38  ;;  %v3498_v17 = vpop.f32.mrf.mxu0  ;;  %v9480_v14 = vor.u32 %v10947_v44, %v9479_v16  ;;  %v9536_v38 = vor.u32 %v10961_v2, %v9535_v34  ;;  %v9311_v44 = vld [vmem:[#allocation8 + $0x910] sm:$0xf] }
 0x2ca   : > { %5349 = vmatpush.bf16.msrb.mxu3 %v9240_v6  ;;  %v3499_v52 = vadd.f32 %v3498_v17, %v3470_v18  ;;  %v9472_v16 = vor.u32 %v10945_v10, %v9471_v13  ;;  %v9463_v18 = vld [vmem:[#allocation8 + $0xa40] sm:$0xf]  ;;  %v10943_v17 = vld [vmem:[#allocation8 + $0xa44] sm:$0xf0]  ;;  %v9519_v2 = vld [vmem:[#allocation8 + $0xab0] sm:$0xf] }
 0x2cb   : > { %5359 = vmatpush.bf16.msra.mxu0 %v9336_v46  ;;  %v9400_v46 = vor.u32 %v10927_v33, %v9399_v63  ;;  %v10903_v13 = vld [vmem:[#allocation8 + $0x904] sm:$0xf0]  ;;  %v9455_v10 = vld [vmem:[#allocation8 + $0xa30] sm:$0xf] }
 0x2cc   : > { %5322 = vmatmul.bf16.vlgmr.msrb.gmra.mxu1 %v12241_v43  ;;  %5336 = vmatmul.bf16.vlgmr.msra.gmra.mxu2 %v12255_v1 }
 0x2cd   : > { %5370 = vmatpush.bf16.msra.mxu1 %v9424_v55  ;;  %v10909_v55 = vld [vmem:[#allocation8 + $0x934] sm:$0xf0]  ;;  %5350 = vmatmul.bf16.vlgmr.msrb.gmra.mxu3 %v12495_v53  ;;  %v12809_v6 = vpop.f32.mrf.mxu3 }
 0x2ce   : > { %5398 = vmatpush.bf16.msra.mxu3 %v9552_v48  ;;  %v9328_v7 = vor.u32 %v10909_v55, %v9327_v29  ;;  %5384 = vmatpush.bf16.msrb.mxu2 %v9488_v35  ;;  %13530 = vst [vmem:[#allocation62_spill] sm:$0xff] %v12809_v6  ;;  %v9319_v48 = vld [vmem:[#allocation8 + $0x920] sm:$0xf]  ;;  %v3528_v29 = vadd.f32 %v3527_v24, %v3499_v52  ;;  %v9391_v55 = vld [vmem:[#allocation8 + $0x9b0] sm:$0xf] }
 0x2cf   : > { %v9528_v6 = vor.u32 %v10959_v8, %v9527_v26  ;;  %v9392_v34 = vor.u32 %v10925_v61, %v9391_v55  ;;  %v3570_v63 = vpop.f32.mrf.mxu2  ;;  %v9383_v52 = vld [vmem:[#allocation8 + $0x9a0] sm:$0xf]  ;;  %v9464_v24 = vor.u32 %v10943_v17, %v9463_v18  ;;  %v10941_v8 = vld [vmem:[#allocation8 + $0xa34] sm:$0xf0] }
 0x2d0   : > { %5360 = vmatpush.bf16.msra.mxu0 %v9328_v7  ;;  %v10923_v7 = vld [vmem:[#allocation8 + $0x9a4] sm:$0xf0]  ;;  %v12817_v61 = vpop.f32.mrf.mxu1  ;;  %v10973_v55 = vld [vmem:[#allocation8 + $0xb34] sm:$0xf0]  ;;  %v9456_v17 = vor.u32 %v10941_v8, %v9455_v10  ;;  %v10884_v8 = vld [vmem:[#allocation8 + $0x874] sm:$0xf] }
 0x2d1   : > { %5371 = vmatpush.bf16.msra.mxu1 %v9416_v54  ;;  %v10907_v54 = vld [vmem:[#allocation8 + $0x924] sm:$0xf0]  ;;  %13532 = vst [vmem:[#allocation64_spill] sm:$0xff] %v12817_v61  ;;  %v10921_v18 = vld [vmem:[#allocation8 + $0x994] sm:$0xf0] }
 0x2d2   : > { %5399 = vmatpush.bf16.msra.mxu3 %v9544_v4  ;;  %v9320_v35 = vor.u32 %v10907_v54, %v9319_v48  ;;  %5385 = vmatpush.bf16.msrb.mxu2 %v9480_v14  ;;  %v10905_v4 = vld [vmem:[#allocation8 + $0x914] sm:$0xf0]  ;;  %v3571_v14 = vadd.f32 %v3570_v63, %v12773_v37  ;;  %v12813_v54 = vpop.f32.mrf.mxu0  ;;  %v9375_v63 = vld [vmem:[#allocation8 + $0x990] sm:$0xf]  ;;  %v9575_v61 = vld [vmem:[#allocation8 + $0xb20] sm:$0xf] }
 0x2d3   : > { %v9312_v33 = vor.u32 %v10905_v4, %v9311_v44  ;;  %13531 = vst [vmem:[#allocation63_spill] sm:$0xff] %v12813_v54  ;;  %v9511_v44 = vld [vmem:[#allocation8 + $0xaa0] sm:$0xf]  ;;  %v10955_v4 = vld [vmem:[#allocation8 + $0xaa4] sm:$0xf0] }
 0x2d4   : > { %5361 = vmatpush.bf16.msra.mxu0 %v9320_v35  ;;  %v9583_v35 = vld [vmem:[#allocation8 + $0xb30] sm:$0xf] }
 0x2d5   : > { %5372 = vmatpush.bf16.msra.mxu1 %v9408_v59  ;;  %v10957_v59 = vld [vmem:[#allocation8 + $0xab4] sm:$0xf0]  ;;  %v3556_v48 = vpop.f32.mrf.mxu3  ;;  %v9584_v54 = vor.u32 %v10973_v55, %v9583_v35  ;;  %v9233_v35 = vld [vmem:[#allocation8 + $0x878] sm:$0xf0] }
 0x2d6   : > { %5400 = vmatpush.bf16.msra.mxu3 %v9536_v38  ;;  %5386 = vmatpush.bf16.msrb.mxu2 %v9472_v16  ;;  %v9303_v38 = vld [vmem:[#allocation8 + $0x900] sm:$0xf]  ;;  %v12815_v26 = vadd.f32 %v3556_v48, %v3528_v29  ;;  %v9384_v16 = vor.u32 %v10923_v7, %v9383_v52  ;;  %v10939_v48 = vld [vmem:[#allocation8 + $0xa24] sm:$0xf0] }
 0x2d7   : > { %v9304_v37 = vor.u32 %v10903_v13, %v9303_v38  ;;  %v9447_v29 = vld [vmem:[#allocation8 + $0xa20] sm:$0xf]  ;;  %v12819_v52 = vpop.f32.mrf.mxu2  ;;  %v10919_v7 = vld [vmem:[#allocation8 + $0x984] sm:$0xf0] }
 0x2d8   : > { %5362 = vmatpush.bf16.msra.mxu0 %v9312_v33  ;;  %v9367_v33 = vld [vmem:[#allocation8 + $0x980] sm:$0xf]  ;;  %v9448_v13 = vor.u32 %v10939_v48, %v9447_v29  ;;  %v10916_v29 = vld [vmem:[#allocation8 + $0x974] sm:$0xf] }
 0x2d9   : > { %5373 = vmatpush.bf16.msra.mxu1 %v9400_v46  ;;  %v9520_v46 = vor.u32 %v10957_v59, %v9519_v2  ;;  %v10971_v2 = vld [vmem:[#allocation8 + $0xb24] sm:$0xf0]  ;;  %v9376_v59 = vor.u32 %v10921_v18, %v9375_v63  ;;  %v10969_v63 = vld [vmem:[#allocation8 + $0xb14] sm:$0xf0]  ;;  %v9495_v18 = vld [vmem:[#allocation8 + $0xa80] sm:$0xf] }
 0x2da   : > { %5401 = vmatpush.bf16.msra.mxu3 %v9528_v6  ;;  %5387 = vmatpush.bf16.msrb.mxu2 %v9464_v24  ;;  %v9512_v6 = vor.u32 %v10955_v4, %v9511_v44  ;;  %v3599_v38 = vpop.f32.mrf.mxu0  ;;  %v9576_v10 = vor.u32 %v10971_v2, %v9575_v61  ;;  %v10937_v4 = vld [vmem:[#allocation8 + $0xa14] sm:$0xf0]  ;;  %v9361_v61 = vld [vmem:[#allocation8 + $0x978] sm:$0xf0]  ;;  %v9431_v48 = vld [vmem:[#allocation8 + $0xa00] sm:$0xf] }
 0x2db   : > { %v12823_v55 = vadd.f32 %v3599_v38, %v3571_v14  ;;  %v10935_v2 = vld [vmem:[#allocation8 + $0xa04] sm:$0xf0]  ;;  %v10882_v38 = vld [vmem:[#allocation8 + $0x864] sm:$0xf] }
 0x2dc   : > { %5363 = vmatpush.bf16.msra.mxu0 %v9304_v37  ;;  %v9567_v37 = vld [vmem:[#allocation8 + $0xb10] sm:$0xf] }
 0x2dd   : > { %5374 = vmatpush.bf16.msra.mxu1 %v9392_v34  ;;  %v10953_v34 = vld [vmem:[#allocation8 + $0xa94] sm:$0xf0]  ;;  %v12821_v24 = vpop.f32.mrf.mxu3  ;;  %v9568_v14 = vor.u32 %v10969_v63, %v9567_v37  ;;  %v9432_v37 = vor.u32 %v10935_v2, %v9431_v48  ;;  %v9560_v63 = vor.u32 %v10967_v0, %v9559_v21  ;;  %v9345_v48 = vld [vmem:[#allocation8 + $0x958] sm:$0xf0]  ;;  %v10878_v2 = vld [vmem:[#allocation8 + $0x844] sm:$0xf] }
 0x2de   : > { %5402 = vmatpush.bf16.msra.mxu3 %v9520_v46  ;;  %5388 = vmatpush.bf16.msrb.mxu2 %v9456_v17  ;;  %13533 = vst [vmem:[#allocation65_spill] sm:$0xff] %v12821_v24  ;;  %v9439_v46 = vld [vmem:[#allocation8 + $0xa10] sm:$0xf]  ;;  %v9504_v44 = vor.u32 %v10953_v34, %v9503_v36  ;;  %v10951_v17 = vld [vmem:[#allocation8 + $0xa84] sm:$0xf0]  ;;  %v9236_v24 = vor.u32 %v10884_v8, %v9233_v35 }
 0x2df   : > { %5364 = vmatmul.bf16.vlgmr.msra.gmra.mxu0 %v12521_v27  ;;  %v9225_v36 = vld [vmem:[#allocation8 + $0x868] sm:$0xf0]  ;;  %v9496_v34 = vor.u32 %v10951_v17, %v9495_v18  ;;  %v9297_v8 = vld [vmem:[#allocation8 + $0x8f8] sm:$0xf0]  ;;  %v3575_v35 = vpop.f32.mrf.mxu2 }
 0x2e0   : > { %5416 = vmatpush.bf16.msrb.mxu0 %v9584_v54  ;;  %v9368_v54 = vor.u32 %v10919_v7, %v9367_v33  ;;  %v9169_v33 = vld [vmem:[#allocation8 + $0x7f8] sm:$0xf0]  ;;  %v10900_v7 = vld [vmem:[#allocation8 + $0x8f4] sm:$0xf]  ;;  %v9228_v30 = vor.u32 %v10882_v38, %v9225_v36  ;;  %v9289_v36 = vld [vmem:[#allocation8 + $0x8e8] sm:$0xf0] }
 0x2e1   : > { %5375 = vmatpush.bf16.msra.mxu1 %v9384_v16  ;;  %v4365_v16 = vpop.f32.mrf.mxu1  ;;  %v9172_v17 = vor.u32 %v10868_v23, %v9169_v33  ;;  %v9217_v38 = vld [vmem:[#allocation8 + $0x858] sm:$0xf0]  ;;  %v10864_v23 = vld [vmem:[#allocation8 + $0x7d4] sm:$0xf] }
 0x2e2   : > { %5403 = vmatpush.bf16.msra.mxu3 %v9512_v6  ;;  %5389 = vmatpush.bf16.msrb.mxu2 %v9448_v13  ;;  %v9440_v6 = vor.u32 %v10937_v4, %v9439_v46  ;;  %v10914_v13 = vld [vmem:[#allocation8 + $0x964] sm:$0xf]  ;;  %v3576_v46 = vadd.f32 %v3575_v35, %v12789_v20  ;;  %v10912_v35 = vld [vmem:[#allocation8 + $0x954] sm:$0xf] }
 0x2e3   : > { %v10898_v20 = vld [vmem:[#allocation8 + $0x8e4] sm:$0xf]  ;;  %v9348_v33 = vor.u32 %v10912_v35, %v9345_v48  ;;  %v9145_v35 = vld [vmem:[#allocation8 + $0x7c8] sm:$0xf0] }
 0x2e4   : > { %5417 = vmatpush.bf16.msrb.mxu0 %v9576_v10  ;;  %v9353_v10 = vld [vmem:[#allocation8 + $0x968] sm:$0xf0]  ;;  %v10894_v48 = vld [vmem:[#allocation8 + $0x8c4] sm:$0xf] }
 0x2e5   : > { %5376 = vmatpush.bf16.msra.mxu1 %v9376_v59  ;;  %v9364_v59 = vor.u32 %v10916_v29, %v9361_v61  ;;  %v4379_v4 = vpop.f32.mrf.mxu3  ;;  %v10866_v29 = vld [vmem:[#allocation8 + $0x7e4] sm:$0xf]  ;;  %v10880_v61 = vld [vmem:[#allocation8 + $0x854] sm:$0xf] }
 0x2e6   : > { %5404 = vmatpush.bf16.msra.mxu3 %v9504_v44  ;;  %5390 = vmatpush.bf16.msrb.mxu2 %v9440_v6  ;;  %v12827_v44 = vpop.f32.mrf.mxu0  ;;  %v4380_v18 = vadd.f32 %v4379_v4, %v4365_v16  ;;  %v9356_v6 = vor.u32 %v10914_v13, %v9353_v10  ;;  %v9220_v0 = vor.u32 %v10880_v61, %v9217_v38  ;;  %v10910_v13 = vld [vmem:[#allocation8 + $0x944] sm:$0xf]  ;;  %v9337_v10 = vld [vmem:[#allocation8 + $0x948] sm:$0xf0] }
 0x2e7   : > { %13534 = vst [vmem:[#allocation66_spill] sm:$0xff] %v12827_v44  ;;  %v9292_v16 = vor.u32 %v10898_v20, %v9289_v36  ;;  %v10862_v38 = vld [vmem:[#allocation8 + $0x7c4] sm:$0xf]  ;;  %v9340_v36 = vor.u32 %v10910_v13, %v9337_v10  ;;  %v9265_v13 = vld [vmem:[#allocation8 + $0x8b8] sm:$0xf0] }
 0x2e8   : > { %5418 = vmatpush.bf16.msrb.mxu0 %v9568_v14  ;;  %v9161_v14 = vld [vmem:[#allocation8 + $0x7e8] sm:$0xf0] }
 0x2e9   : > { %5377 = vmatpush.bf16.msra.mxu1 %v9368_v54  ;;  %v12830_v54 = vpop.f32.mrf.mxu1  ;;  %v9164_v21 = vor.u32 %v10866_v29, %v9161_v14  ;;  %v9201_v14 = vld [vmem:[#allocation8 + $0x838] sm:$0xf0] }
 0x2ea   : > { %5405 = vmatpush.bf16.msra.mxu3 %v9496_v34  ;;  %5391 = vmatpush.bf16.msrb.mxu2 %v9432_v37  ;;  %v9209_v34 = vld [vmem:[#allocation8 + $0x848] sm:$0xf0] }
 0x2ec   : > { %5378 = vmatmul.bf16.vlgmr.msra.gmra.mxu1 %v12526_v5  ;;  %5419 = vmatpush.bf16.msrb.mxu0 %v9560_v63  ;;  %v9212_v63 = vor.u32 %v10878_v2, %v9209_v34  ;;  %v10908_v2 = vld [vmem:[#allocation8 + $0x934] sm:$0xf] }
 0x2ed   : > { %5440 = vmatpush.bf16.msrb.mxu1 %v9236_v24  ;;  %v9300_v24 = vor.u32 %v10900_v7, %v9297_v8  ;;  %v10896_v7 = vld [vmem:[#allocation8 + $0x8d4] sm:$0xf]  ;;  %v9281_v8 = vld [vmem:[#allocation8 + $0x8d8] sm:$0xf0]  ;;  %5392 = vmatmul.bf16.vlgmr.msrb.gmra.mxu2 %v12458_v57  ;;  %v12836_v4 = vpop.f32.mrf.mxu3 }
 0x2ee   : > { %5468 = vmatpush.bf16.msrb.mxu3 %v9364_v59  ;;  %v9153_v59 = vld [vmem:[#allocation8 + $0x7d8] sm:$0xf0]  ;;  %v3604_v37 = vpop.f32.mrf.mxu0  ;;  %v9284_v61 = vor.u32 %v10896_v7, %v9281_v8  ;;  %v10860_v34 = vld [vmem:[#allocation8 + $0x7b4] sm:$0xf]  ;;  %v9193_v7 = vld [vmem:[#allocation8 + $0x828] sm:$0xf0] }
 0x2ef   : > { %5454 = vmatpush.bf16.msra.mxu2 %v9300_v24  ;;  %5406 = vmatmul.bf16.vlgmr.msra.gmra.mxu3 %v12573_v15  ;;  %v9156_v29 = vor.u32 %v10864_v23, %v9153_v59  ;;  %v10874_v59 = vld [vmem:[#allocation8 + $0x824] sm:$0xf]  ;;  %v10892_v8 = vld [vmem:[#allocation8 + $0x8b4] sm:$0xf] }
 0x2f0   : > { %5426 = vmatpush.bf16.msra.mxu0 %v9172_v17  ;;  %v12838_v17 = vadd.f32 %v3604_v37, %v3576_v46  ;;  %v10906_v37 = vld [vmem:[#allocation8 + $0x924] sm:$0xf] }
 0x2f1   : > { %5441 = vmatpush.bf16.msrb.mxu1 %v9228_v30  ;;  %v12833_v30 = vpop.f32.mrf.mxu2  ;;  %v4393_v24 = vpop.f32.mrf.mxu1  ;;  %9589 = vmatmul.msk.bf16.vlgmr.msrb.gmra.mxu0 %vm1296_vm0, %v12635_v12 }
 0x2f2   : > { %5469 = vmatpush.bf16.msrb.mxu3 %v9356_v6  ;;  %13535 = vst [vmem:[#allocation67_spill] sm:$0xff] %v12833_v30  ;;  %v10876_v6 = vld [vmem:[#allocation8 + $0x834] sm:$0xf]  ;;  %v4394_v20 = vadd.f32 %v4393_v24, %v4380_v18  ;;  %v9321_v24 = vld [vmem:[#allocation8 + $0x928] sm:$0xf0] }
 0x2f3   : > { %5455 = vmatpush.bf16.msra.mxu2 %v9292_v16  ;;  %13536 = vst [vmem:[#allocation68_spill] sm:$0xff] %v12838_v17  ;;  %v9204_v46 = vor.u32 %v10876_v6, %v9201_v14  ;;  %v9148_v16 = vor.u32 %v10862_v38, %v9145_v35  ;;  %v9268_v6 = vor.u32 %v10892_v8, %v9265_v13  ;;  %v10858_v14 = vld [vmem:[#allocation8 + $0x7a4] sm:$0xf]  ;;  %v9185_v35 = vld [vmem:[#allocation8 + $0x818] sm:$0xf0] }
 0x2f4   : > { %5427 = vmatpush.bf16.msra.mxu0 %v9164_v21  ;;  %v9329_v21 = vld [vmem:[#allocation8 + $0x938] sm:$0xf0]  ;;  %v9305_v13 = vld [vmem:[#allocation8 + $0x908] sm:$0xf0] }
 0x2f5   : > { %5442 = vmatpush.bf16.msrb.mxu1 %v9220_v0  ;;  %v9273_v0 = vld [vmem:[#allocation8 + $0x8c8] sm:$0xf0]  ;;  %v9332_v18 = vor.u32 %v10908_v2, %v9329_v21  ;;  %v4407_v30 = vpop.f32.mrf.mxu3  ;;  %v10890_v2 = vld [vmem:[#allocation8 + $0x8a4] sm:$0xf] }
 0x2f6   : > { %5470 = vmatpush.bf16.msrb.mxu3 %v9348_v33  ;;  %v9276_v23 = vor.u32 %v10894_v48, %v9273_v0  ;;  %v9137_v33 = vld [vmem:[#allocation8 + $0x7b8] sm:$0xf0]  ;;  %v9324_v48 = vor.u32 %v10906_v37, %v9321_v24  ;;  %v9129_v0 = vld [vmem:[#allocation8 + $0x7a8] sm:$0xf0]  ;;  %v10948_v37 = vld [vmem:[#allocation8 + $0xa74] sm:$0xf] }
 0x2f7   : > { %5456 = vmatpush.bf16.msra.mxu2 %v9284_v61  ;;  %v12845_v61 = vadd.f32 %v4407_v30, %v4394_v20  ;;  %v9140_v38 = vor.u32 %v10860_v34, %v9137_v33  ;;  %v9257_v21 = vld [vmem:[#allocation8 + $0x8a8] sm:$0xf0]  ;;  %v9132_v30 = vor.u32 %v10858_v14, %v9129_v0  ;;  %v10902_v33 = vld [vmem:[#allocation8 + $0x904] sm:$0xf]  ;;  %v9489_v24 = vld [vmem:[#allocation8 + $0xa78] sm:$0xf0] }
 0x2f8   : > { %5428 = vmatpush.bf16.msra.mxu0 %v9156_v29  ;;  %v9196_v29 = vor.u32 %v10874_v59, %v9193_v7  ;;  %v9260_v20 = vor.u32 %v10890_v2, %v9257_v21  ;;  %v9177_v34 = vld [vmem:[#allocation8 + $0x808] sm:$0xf0]  ;;  %v10888_v7 = vld [vmem:[#allocation8 + $0x894] sm:$0xf]  ;;  %v10854_v0 = vld [vmem:[#allocation8 + $0x784] sm:$0xf]  ;;  %v9308_v2 = vor.u32 %v10902_v33, %v9305_v13  ;;  %v9492_v21 = vor.u32 %v10948_v37, %v9489_v24 }
 0x2f9   : > { %5443 = vmatpush.bf16.msrb.mxu1 %v9212_v63  ;;  %v3580_v10 = vpop.f32.mrf.mxu2  ;;  %v12843_v63 = vpop.f32.mrf.mxu0  ;;  %v10930_v13 = vld [vmem:[#allocation8 + $0x9e4] sm:$0xf]  ;;  %v9417_v37 = vld [vmem:[#allocation8 + $0x9e8] sm:$0xf0]  ;;  %v10944_v24 = vld [vmem:[#allocation8 + $0xa54] sm:$0xf] }
 0x2fa   : > { %5471 = vmatpush.bf16.msrb.mxu3 %v9340_v36  ;;  %v3581_v17 = vadd.f32 %v3580_v10, %v12801_v42  ;;  %13537 = vst [vmem:[#allocation69_spill] sm:$0xff] %v12843_v63  ;;  %v10872_v36 = vld [vmem:[#allocation8 + $0x814] sm:$0xf]  ;;  %v9313_v10 = vld [vmem:[#allocation8 + $0x918] sm:$0xf0] }
 0x2fb   : > { %5457 = vmatpush.bf16.msra.mxu2 %v9276_v23  ;;  %v10904_v42 = vld [vmem:[#allocation8 + $0x914] sm:$0xf]  ;;  %v10870_v23 = vld [vmem:[#allocation8 + $0x804] sm:$0xf] }
 0x2fc   : > { %5429 = vmatpush.bf16.msra.mxu0 %v9148_v16  ;;  %v10856_v63 = vld [vmem:[#allocation8 + $0x794] sm:$0xf]  ;;  %v9121_v16 = vld [vmem:[#allocation8 + $0x798] sm:$0xf0]  ;;  %v9316_v59 = vor.u32 %v10904_v42, %v9313_v10  ;;  %v9113_v42 = vld [vmem:[#allocation8 + $0x788] sm:$0xf0] }
 0x2fd   : > { %5444 = vmatpush.bf16.msrb.mxu1 %v9204_v46  ;;  %v9188_v46 = vor.u32 %v10872_v36, %v9185_v35  ;;  %v9180_v36 = vor.u32 %v10870_v23, %v9177_v34  ;;  %v9124_v35 = vor.u32 %v10856_v63, %v9121_v16  ;;  %v10886_v10 = vld [vmem:[#allocation8 + $0x884] sm:$0xf]  ;;  %v9481_v23 = vld [vmem:[#allocation8 + $0xa68] sm:$0xf0]  ;;  %v10964_v34 = vld [vmem:[#allocation8 + $0xaf4] sm:$0xf] }
 0x2fe   : > { %5472 = vmatpush.bf16.msrb.mxu3 %v9332_v18  ;;  %v9249_v18 = vld [vmem:[#allocation8 + $0x898] sm:$0xf0]  ;;  %v10970_v16 = vld [vmem:[#allocation8 + $0xb24] sm:$0xf] }
 0x2ff   : > { %5458 = vmatpush.bf16.msra.mxu2 %v9268_v6  ;;  %v9585_v6 = vld [vmem:[#allocation8 + $0xb38] sm:$0xf0] }
 0x300   : > { %5430 = vmatpush.bf16.msra.mxu0 %v9140_v38  ;;  %v10972_v38 = vld [vmem:[#allocation8 + $0xb34] sm:$0xf] }
 0x301   : > { %5445 = vmatpush.bf16.msrb.mxu1 %v9196_v29  ;;  %v12847_v8 = vpop.f32.mrf.mxu2  ;;  %v3609_v29 = vpop.f32.mrf.mxu0  ;;  %v9588_v44 = vor.u32 %v10972_v38, %v9585_v6  ;;  %v10962_v6 = vld [vmem:[#allocation8 + $0xae4] sm:$0xf] }
 0x302   : > { %5473 = vmatpush.bf16.msrb.mxu3 %v9324_v48  ;;  %13538 = vst [vmem:[#allocation70_spill] sm:$0xff] %v12847_v8  ;;  %v12849_v14 = vadd.f32 %v3609_v29, %v3581_v17  ;;  %v9252_v48 = vor.u32 %v10888_v7, %v9249_v18  ;;  %v9241_v8 = vld [vmem:[#allocation8 + $0x888] sm:$0xf0]  ;;  %v9116_v17 = vor.u32 %v10854_v0, %v9113_v42  ;;  %v12852_v29 = vpop.f32.mrf.mxu3  ;;  %v9569_v0 = vld [vmem:[#allocation8 + $0xb18] sm:$0xf0] }
 0x303   : > { %5459 = vmatpush.bf16.msra.mxu2 %v9260_v20  ;;  %v9244_v63 = vor.u32 %v10886_v10, %v9241_v8  ;;  %v9428_v20 = vor.u32 %v10932_v3, %v9425_v39  ;;  %v9473_v8 = vld [vmem:[#allocation8 + $0xa58] sm:$0xf0]  ;;  %v9545_v39 = vld [vmem:[#allocation8 + $0xae8] sm:$0xf0]  ;;  %v10960_v10 = vld [vmem:[#allocation8 + $0xad4] sm:$0xf] }
 0x304   : > { %5431 = vmatpush.bf16.msra.mxu0 %v9132_v30  ;;  %v9553_v30 = vld [vmem:[#allocation8 + $0xaf8] sm:$0xf0]  ;;  %v9465_v42 = vld [vmem:[#allocation8 + $0xa48] sm:$0xf0] }
 0x305   : > { %5446 = vmatpush.bf16.msrb.mxu1 %v9188_v46  ;;  %v10946_v46 = vld [vmem:[#allocation8 + $0xa64] sm:$0xf]  ;;  %v9556_v33 = vor.u32 %v10964_v34, %v9553_v30  ;;  %v9561_v30 = vld [vmem:[#allocation8 + $0xb08] sm:$0xf0] }
 0x306   : > { %5474 = vmatpush.bf16.msrb.mxu3 %v9316_v59  ;;  %v9577_v59 = vld [vmem:[#allocation8 + $0xb28] sm:$0xf0]  ;;  %v9484_v18 = vor.u32 %v10946_v46, %v9481_v23  ;;  %v9537_v46 = vld [vmem:[#allocation8 + $0xad8] sm:$0xf0]  ;;  %v10966_v34 = vld [vmem:[#allocation8 + $0xb04] sm:$0xf] }
 0x307   : > { %5460 = vmatpush.bf16.msra.mxu2 %v9252_v48  ;;  %v9580_v3 = vor.u32 %v10970_v16, %v9577_v59  ;;  %v10968_v48 = vld [vmem:[#allocation8 + $0xb14] sm:$0xf]  ;;  %v10926_v16 = vld [vmem:[#allocation8 + $0x9c4] sm:$0xf]  ;;  %v9401_v59 = vld [vmem:[#allocation8 + $0x9c8] sm:$0xf0] }
 0x308   : > { %5432 = vmatpush.bf16.msra.mxu0 %v9124_v35  ;;  %v9420_v35 = vor.u32 %v10930_v13, %v9417_v37 }
 0x309   : > { %5447 = vmatpush.bf16.msrb.mxu1 %v9180_v36  ;;  %v3585_v7 = vpop.f32.mrf.mxu2  ;;  %v12855_v38 = vpop.f32.mrf.mxu0 }
 0x30a   : > { %5475 = vmatpush.bf16.msrb.mxu3 %v9308_v2  ;;  %v3586_v36 = vadd.f32 %v3585_v7, %v12815_v26  ;;  %v10928_v2 = vld [vmem:[#allocation8 + $0x9d4] sm:$0xf]  ;;  %v9409_v26 = vld [vmem:[#allocation8 + $0x9d8] sm:$0xf0]  ;;  %v12862_v13 = vpop.f32.mrf.mxu3 }
 0x30b   : > { %5461 = vmatpush.bf16.msra.mxu2 %v9244_v63  ;;  %v9412_v23 = vor.u32 %v10928_v2, %v9409_v26  ;;  %v9521_v2 = vld [vmem:[#allocation8 + $0xab8] sm:$0xf0] }
 0x30c   : > { %5448 = vmatmul.bf16.vlgmr.msrb.gmra.mxu1 %v12255_v1  ;;  %5433 = vmatpush.bf16.msra.mxu0 %v9116_v17  ;;  %v9476_v1 = vor.u32 %v10944_v24, %v9473_v8  ;;  %v9564_v24 = vor.u32 %v10966_v34, %v9561_v30  ;;  %v9404_v8 = vor.u32 %v10926_v16, %v9401_v59  ;;  %v9441_v30 = vld [vmem:[#allocation8 + $0xa18] sm:$0xf0] }
 0x30d   : > { %5496 = vmatpush.bf16.msra.mxu1 %v9492_v21  ;;  %5476 = vmatmul.bf16.vlgmr.msrb.gmra.mxu3 %v12521_v27  ;;  %v10942_v21 = vld [vmem:[#allocation8 + $0xa44] sm:$0xf]  ;;  %v9572_v27 = vor.u32 %v10968_v48, %v9569_v0  ;;  %v4395_v0 = vpop.f32.mrf.mxu1 }
 0x30e   : > { %5528 = vmatpush.bf16.msra.mxu3 %v9588_v44  ;;  %v9548_v44 = vor.u32 %v10962_v6, %v9545_v39  ;;  %5462 = vmatmul.bf16.vlgmr.msra.gmra.mxu2 %v12495_v53  ;;  %v9468_v63 = vor.u32 %v10942_v21, %v9465_v42  ;;  %v10940_v53 = vld [vmem:[#allocation8 + $0xa34] sm:$0xf]  ;;  %v10938_v48 = vld [vmem:[#allocation8 + $0xa24] sm:$0xf] }
 0x30f   : > { %5510 = vmatpush.bf16.msrb.mxu2 %v9556_v33  ;;  %5434 = vmatmul.bf16.vlgmr.msra.gmra.mxu0 %v12241_v43  ;;  %v9457_v43 = vld [vmem:[#allocation8 + $0xa38] sm:$0xf0]  ;;  %v9529_v33 = vld [vmem:[#allocation8 + $0xac8] sm:$0xf0] }
 0x310   : > { %5482 = vmatpush.bf16.msrb.mxu0 %v9428_v20  ;;  %v9540_v20 = vor.u32 %v10960_v10, %v9537_v46  ;;  %v9460_v6 = vor.u32 %v10940_v53, %v9457_v43  ;;  %v10922_v10 = vld [vmem:[#allocation8 + $0x9a4] sm:$0xf]  ;;  %v9385_v46 = vld [vmem:[#allocation8 + $0x9a8] sm:$0xf0]  ;;  %v10920_v43 = vld [vmem:[#allocation8 + $0x994] sm:$0xf] }
 0x311   : > { %5497 = vmatpush.bf16.msra.mxu1 %v9484_v18  ;;  %v12860_v17 = vpop.f32.mrf.mxu2  ;;  %v3614_v7 = vpop.f32.mrf.mxu0  ;;  %v10958_v18 = vld [vmem:[#allocation8 + $0xac4] sm:$0xf]  ;;  %v9388_v16 = vor.u32 %v10922_v10, %v9385_v46 }
 0x312   : > { %5529 = vmatpush.bf16.msra.mxu3 %v9580_v3  ;;  %v12864_v37 = vadd.f32 %v3614_v7, %v3586_v36  ;;  %v9532_v39 = vor.u32 %v10958_v18, %v9529_v33  ;;  %v10924_v3 = vld [vmem:[#allocation8 + $0x9b4] sm:$0xf]  ;;  %v4465_v59 = vpop.f32.mrf.mxu3  ;;  %v9377_v18 = vld [vmem:[#allocation8 + $0x998] sm:$0xf0]  ;;  %v10934_v33 = vld [vmem:[#allocation8 + $0xa04] sm:$0xf] }
 0x313   : > { %5511 = vmatpush.bf16.msrb.mxu2 %v9548_v44  ;;  %v10956_v44 = vld [vmem:[#allocation8 + $0xab4] sm:$0xf] }
 0x314   : > { %5483 = vmatpush.bf16.msrb.mxu0 %v9420_v35  ;;  %v9393_v35 = vld [vmem:[#allocation8 + $0x9b8] sm:$0xf0]  ;;  %v9524_v42 = vor.u32 %v10956_v44, %v9521_v2  ;;  %v10950_v44 = vld [vmem:[#allocation8 + $0xa84] sm:$0xf]  ;;  %v9497_v2 = vld [vmem:[#allocation8 + $0xa88] sm:$0xf0] }
 0x315   : > { %5498 = vmatpush.bf16.msra.mxu1 %v9476_v1  ;;  %v9449_v1 = vld [vmem:[#allocation8 + $0xa28] sm:$0xf0]  ;;  %v9396_v26 = vor.u32 %v10924_v3, %v9393_v35  ;;  %v9500_v10 = vor.u32 %v10950_v44, %v9497_v2 }
 0x316   : > { %5530 = vmatpush.bf16.msra.mxu3 %v9572_v27  ;;  %v9452_v21 = vor.u32 %v10938_v48, %v9449_v1  ;;  %v10936_v27 = vld [vmem:[#allocation8 + $0xa14] sm:$0xf]  ;;  %v10918_v1 = vld [vmem:[#allocation8 + $0x984] sm:$0xf] }
 0x317   : > { %5512 = vmatpush.bf16.msrb.mxu2 %v9540_v20  ;;  %v9513_v20 = vld [vmem:[#allocation8 + $0xaa8] sm:$0xf0]  ;;  %v9444_v53 = vor.u32 %v10936_v27, %v9441_v30 }
 0x318   : > { %5484 = vmatpush.bf16.msrb.mxu0 %v9412_v23 }
 0x319   : > { %5499 = vmatpush.bf16.msra.mxu1 %v9468_v63  ;;  %v4421_v36 = vpop.f32.mrf.mxu2  ;;  %v12867_v34 = vpop.f32.mrf.mxu0  ;;  %v10954_v63 = vld [vmem:[#allocation8 + $0xaa4] sm:$0xf] }
 0x31a   : > { %5531 = vmatpush.bf16.msra.mxu3 %v9564_v24  ;;  %v4422_v23 = vadd.f32 %v4421_v36, %v12845_v61  ;;  %v9516_v7 = vor.u32 %v10954_v63, %v9513_v20  ;;  %v4449_v24 = vpop.f32.mrf.mxu1  ;;  %v9433_v61 = vld [vmem:[#allocation8 + $0xa08] sm:$0xf0]  ;;  %v4382_v36 = vadd.f32 %v12836_v4, %v12830_v54  ;;  %v4491_v30 = vpop.f32.mrf.mxu3 }
 0x31b   : > { %5513 = vmatpush.bf16.msrb.mxu2 %v9532_v39  ;;  %v9380_v39 = vor.u32 %v10920_v43, %v9377_v18  ;;  %v9436_v35 = vor.u32 %v10934_v33, %v9433_v61 }
 0x31c   : > { %5485 = vmatpush.bf16.msrb.mxu0 %v9404_v8  ;;  %v10952_v8 = vld [vmem:[#allocation8 + $0xa94] sm:$0xf]  ;;  %v4396_v46 = vadd.f32 %v4395_v0, %v4382_v36 }
 0x31d   : > { %5500 = vmatpush.bf16.msra.mxu1 %v9460_v6  ;;  %9590 = vmatmul.msk.bf16.vlgmr.msra.gmra.mxu3 %vm1296_vm0, %v12635_v12  ;;  %v9505_v6 = vld [vmem:[#allocation8 + $0xa98] sm:$0xf0]  ;;  %v9369_v12 = vld [vmem:[#allocation8 + $0x988] sm:$0xf0] }
 0x31e   : > { %v9508_v48 = vor.u32 %v10952_v8, %v9505_v6  ;;  %v4410_v63 = vadd.f32 %v12852_v29, %v4396_v46  ;;  %v3356_v29 = vadd.f32 %v12744_v31, %v12690_v40 }
 0x31f   : > { %5514 = vmatpush.bf16.msrb.mxu2 %v9524_v42  ;;  %v9372_v42 = vor.u32 %v10918_v1, %v9369_v12 }
 0x320   : > { %5486 = vmatpush.bf16.msrb.mxu0 %v9396_v26 }
 0x321   : > { %5501 = vmatpush.bf16.msra.mxu1 %v9452_v21  ;;  %v4423_v3 = vpop.f32.mrf.mxu2  ;;  %v4435_v26 = vpop.f32.mrf.mxu0 }
 0x322   : > { %v4436_v21 = vadd.f32 %v4435_v26, %v4422_v23  ;;  %v4451_v20 = vpop.f32.mrf.mxu1  ;;  %v4424_v54 = vadd.f32 %v4423_v3, %v4410_v63  ;;  %v12882_v18 = vpop.f32.mrf.mxu3  ;;  %v9641_v63 = vld [vmem:[#allocation9 + $0x60] sm:$0xf] }
 0x323   : > { %5515 = vmatpush.bf16.msrb.mxu2 %v9516_v7 }
 0x324   : > { %5487 = vmatpush.bf16.msrb.mxu0 %v9388_v16  ;;  %v4450_v27 = vadd.f32 %v4449_v24, %v4436_v21  ;;  %v9649_v21 = vld [vmem:[#allocation9 + $0x70] sm:$0xf] }
 0x325   : > { %5502 = vmatpush.bf16.msra.mxu1 %v9444_v53 }
 0x326   : > { %v4464_v16 = vadd.f32 %v12862_v13, %v4450_v27  ;;  %v3385_v13 = vadd.f32 %v12757_v56, %v3356_v29  ;;  %v9651_v27 = vld [vmem:[#allocation9 + $0x78] sm:$0xf0] }
 0x327   : > { %5516 = vmatpush.bf16.msrb.mxu2 %v9508_v48 }
 0x328   : > { %5488 = vmatpush.bf16.msrb.mxu0 %v9380_v39  ;;  %v4585_v4 = vadd.f32 %v4464_v16, %v12750_v41  ;;  %v10986_v16 = vld [vmem:[#allocation9 + $0x64] sm:$0xf] }
 0x329   : > { %5503 = vmatpush.bf16.msra.mxu1 %v9436_v35  ;;  %v4477_v53 = vpop.f32.mrf.mxu2  ;;  %v4437_v7 = vpop.f32.mrf.mxu0 }
 0x32a   : > { %v4492_v23 = vadd.f32 %v4491_v30, %v4477_v53  ;;  %v4438_v0 = vadd.f32 %v4437_v7, %v4424_v54  ;;  %v4519_v24 = vpop.f32.mrf.mxu1  ;;  %v5584_v61 = vadd.f32 %v12716_v60, %v4585_v4  ;;  %v9643_v54 = vld [vmem:[#allocation9 + $0x68] sm:$0xf0]  ;;  %v10985_v7 = vld [vmem:[#allocation9 + $0x54] sm:$0xf0] }
 0x32b   : > { %5517 = vmatpush.bf16.msrb.mxu2 %v9500_v10  ;;  %v10988_v10 = vld [vmem:[#allocation9 + $0x74] sm:$0xf] }
 0x32c   : > { %5504 = vmatmul.bf16.vlgmr.msra.gmra.mxu1 %v12458_v57  ;;  %5489 = vmatpush.bf16.msrb.mxu0 %v9372_v42  ;;  %v4452_v43 = vadd.f32 %v4451_v20, %v4438_v0  ;;  %v5600_v6 = vmax.f32 %v5584_v61, 0.0  ;;  %v10989_v42 = vld [vmem:[#allocation9 + $0x74] sm:$0xf0]  ;;  %v9654_v30 = vor.u32 %v10988_v10, %v9651_v27  ;;  %v10987_v20 = vld [vmem:[#allocation9 + $0x64] sm:$0xf0] }
 0x32d   : > { %v9650_v46 = vor.u32 %v10989_v42, %v9649_v21  ;;  %v9642_v53 = vor.u32 %v10987_v20, %v9641_v63  ;;  %v10984_v0 = vld [vmem:[#allocation9 + $0x54] sm:$0xf]  ;;  %v10978_v21 = vld [vmem:[#allocation9 + $0x24] sm:$0xf]  ;;  %v9611_v10 = vld [vmem:[#allocation9 + $0x28] sm:$0xf0] }
 0x32e   : > { %5518 = vmatmul.bf16.vlgmr.msrb.gmra.mxu2 %v12573_v15  ;;  %v4466_v57 = vadd.f32 %v4465_v59, %v4452_v43  ;;  %5862 = vmatpush.bf16.msrb.mxu1 %v9654_v30  ;;  %v9635_v43 = vld [vmem:[#allocation9 + $0x58] sm:$0xf0]  ;;  %v9601_v20 = vld [vmem:[#allocation9 + $0x10] sm:$0xf] }
 0x32f   : > { %5490 = vmatmul.bf16.vlgmr.msrb.gmra.mxu0 %v12526_v5  ;;  %5804 = vmatpush.bf16.msrb.mxu3 %v9650_v46  ;;  %v9614_v46 = vor.u32 %v10978_v21, %v9611_v10 }
 0x330   : > { %v4587_v41 = vadd.f32 %v4466_v57, %v3385_v13  ;;  %v9638_v13 = vor.u32 %v10984_v0, %v9635_v43  ;;  %v9625_v57 = vld [vmem:[#allocation9 + $0x40] sm:$0xf]  ;;  %v10974_v43 = vld [vmem:[#allocation9 + $0x4] sm:$0xf] }
 0x331   : > { %v12884_v33 = vpop.f32.mrf.mxu2  ;;  %v4505_v5 = vpop.f32.mrf.mxu0  ;;  %v9593_v0 = vld [vmem:[#allocation9] sm:$0xf] }
 0x332   : > { %v5586_v8 = vadd.f32 %v12716_v60, %v4587_v41  ;;  %v4506_v15 = vadd.f32 %v4505_v5, %v4492_v23  ;;  %v4547_v56 = vpop.f32.mrf.mxu3  ;;  %v12890_v35 = vpop.f32.mrf.mxu1  ;;  %v9646_v23 = vor.u32 %v10986_v16, %v9643_v54  ;;  %v10982_v41 = vld [vmem:[#allocation9 + $0x44] sm:$0xf]  ;;  %v9627_v5 = vld [vmem:[#allocation9 + $0x48] sm:$0xf0]  ;;  %v10977_v16 = vld [vmem:[#allocation9 + $0x14] sm:$0xf0] }
 0x333   : > { %5805 = vmatpush.bf16.msrb.mxu3 %v9642_v53  ;;  %v10976_v53 = vld [vmem:[#allocation9 + $0x14] sm:$0xf]  ;;  %v9602_v54 = vor.u32 %v10977_v16, %v9601_v20 }
 0x334   : > { %v5602_v39 = vmax.f32 %v5586_v8, 0.0  ;;  %v4520_v3 = vadd.f32 %v4519_v24, %v4506_v15  ;;  %5863 = vmatpush.bf16.msrb.mxu1 %v9646_v23  ;;  %v10983_v24 = vld [vmem:[#allocation9 + $0x44] sm:$0xf0]  ;;  %v9630_v8 = vor.u32 %v10982_v41, %v9627_v5  ;;  %v9603_v23 = vld [vmem:[#allocation9 + $0x18] sm:$0xf0] }
 0x335   : > { %v9626_v61 = vor.u32 %v10983_v24, %v9625_v57  ;;  %v9595_v57 = vld [vmem:[#allocation9 + $0x8] sm:$0xf0] }
 0x336   : > { %v12888_v40 = vpack.c.bf16 %v5602_v39, %v5600_v6  ;;  %v9598_v24 = vor.u32 %v10974_v43, %v9595_v57 }
 0x338   : > { %5864 = vmatpush.bf16.msrb.mxu1 %v9638_v13 }
 0x339   : > { %v4533_v31 = vpop.f32.mrf.mxu2  ;;  %v12892_v48 = vpop.f32.mrf.mxu0 }
 0x33a   : > { %v4534_v59 = vadd.f32 %v4533_v31, %v4520_v3  ;;  %v4575_v44 = vpop.f32.mrf.mxu1  ;;  %v12899_v15 = vpop.f32.mrf.mxu3  ;;  %v9617_v31 = vld [vmem:[#allocation9 + $0x30] sm:$0xf] }
 0x33c   : > { %v4548_v1 = vadd.f32 %v4547_v56, %v4534_v59  ;;  %5865 = vmatpush.bf16.msrb.mxu1 %v9630_v8  ;;  %v10981_v56 = vld [vmem:[#allocation9 + $0x34] sm:$0xf0]  ;;  %v10980_v59 = vld [vmem:[#allocation9 + $0x34] sm:$0xf] }
 0x341   : > { %v4561_v12 = vpop.f32.mrf.mxu0  ;;  %v12903_v39 = vpop.f32.mrf.mxu2 }
 0x342   : > { %v4562_v2 = vadd.f32 %v4561_v12, %v4548_v1  ;;  %v12897_v4 = vpop.f32.mrf.mxu1  ;;  %v9618_v1 = vor.u32 %v10981_v56, %v9617_v31  ;;  %v9619_v12 = vld [vmem:[#allocation9 + $0x38] sm:$0xf0] }
 0x344   : > { %v4576_v26 = vadd.f32 %v4575_v44, %v4562_v2  ;;  %v9622_v44 = vor.u32 %v10980_v59, %v9619_v12  ;;  %v9609_v2 = vld [vmem:[#allocation9 + $0x20] sm:$0xf] }
 0x346   : > { %v12895_v36 = vadd.f32 %v4576_v26, %v12864_v37  ;;  %v9633_v37 = vld [vmem:[#allocation9 + $0x50] sm:$0xf]  ;;  %5866 = vmatpush.bf16.msrb.mxu1 %v9622_v44  ;;  %v10979_v26 = vld [vmem:[#allocation9 + $0x24] sm:$0xf0] }
 0x347   : > { %v9634_v29 = vor.u32 %v10985_v7, %v9633_v37  ;;  %v9610_v42 = vor.u32 %v10979_v26, %v9609_v2  ;;  %v9606_v7 = vor.u32 %v10976_v53, %v9603_v23 }
 0x349   : > { %5806 = vmatpush.bf16.msrb.mxu3 %v9634_v29  ;;  %v12901_v6 = vpop.f32.mrf.mxu0  ;;  %v10975_v29 = vld [vmem:[#allocation9 + $0x4] sm:$0xf0] }
 0x34a   : > { %v5323_v3 = vpop.f32.mrf.mxu1  ;;  %5867 = vmatpush.bf16.msrb.mxu1 %v9614_v46  ;;  %v9594_v13 = vor.u32 %v10975_v29, %v9593_v0  ;;  %v11005_v0 = vld [vmem:[#allocation9 + $0xf4] sm:$0xf0]  ;;  %v11004_v29 = vld [vmem:[#allocation9 + $0xf4] sm:$0xf] }
 0x34d   : > { %5807 = vmatpush.bf16.msrb.mxu3 %v9626_v61 }
 0x34e   : > { %5868 = vmatpush.bf16.msrb.mxu1 %v9606_v7 }
 0x34f   : > { %v5337_v63 = vpop.f32.mrf.mxu2 }
 0x350   : > { %v5351_v30 = vpop.f32.mrf.mxu3  ;;  %v5338_v41 = vadd.f32 %v5337_v63, %v5323_v3 }
 0x351   : > { %5808 = vmatpush.bf16.msrb.mxu3 %v9618_v1 }
 0x352   : > { %v5325_v37 = vpop.f32.mrf.mxu1  ;;  %5869 = vmatpush.bf16.msrb.mxu1 %v9598_v24  ;;  %v5352_v56 = vadd.f32 %v5351_v30, %v5338_v41  ;;  %v9715_v24 = vld [vmem:[#allocation9 + $0xf8] sm:$0xf0] }
 0x353   : > { %v9718_v41 = vor.u32 %v11004_v29, %v9715_v24  ;;  %v9681_v24 = vld [vmem:[#allocation9 + $0xb0] sm:$0xf] }
 0x355   : > { %5809 = vmatpush.bf16.msrb.mxu3 %v9610_v42  ;;  %5891 = vmatpush.bf16.msra.mxu2 %v9718_v41  ;;  %v10997_v41 = vld [vmem:[#allocation9 + $0xb4] sm:$0xf0] }
 0x357   : > { %v5339_v8 = vpop.f32.mrf.mxu2 }
 0x358   : > { %v5353_v5 = vpop.f32.mrf.mxu3  ;;  %v5340_v1 = vadd.f32 %v5339_v8, %v5325_v37  ;;  %v9713_v37 = vld [vmem:[#allocation9 + $0xf0] sm:$0xf]  ;;  %v11003_v8 = vld [vmem:[#allocation9 + $0xe4] sm:$0xf0] }
 0x359   : > { %5810 = vmatpush.bf16.msrb.mxu3 %v9602_v54  ;;  %v9714_v57 = vor.u32 %v11005_v0, %v9713_v37  ;;  %v10531_v37 = vld [vmem:[#allocation6 + $0x64] sm:$0xf0] }
 0x35a   : > { %v5354_v42 = vadd.f32 %v5353_v5, %v5340_v1  ;;  %v9705_v5 = vld [vmem:[#allocation9 + $0xe0] sm:$0xf]  ;;  %v9707_v1 = vld [vmem:[#allocation9 + $0xe8] sm:$0xf0] }
 0x35b   : > { %5833 = vmatpush.bf16.msra.mxu0 %v9714_v57 }
 0x35c   : > { %v5365_v27 = vpop.f32.mrf.mxu0 }
 0x35d   : > { %5811 = vmatpush.bf16.msrb.mxu3 %v9594_v13  ;;  %v5366_v59 = vadd.f32 %v5365_v27, %v5352_v56 }
 0x364   : > { %v5367_v61 = vpop.f32.mrf.mxu0 }
 0x365   : > { %v5368_v20 = vadd.f32 %v5367_v61, %v5354_v42  ;;  %v9777_v42 = vld [vmem:[#allocation6 + $0x70] sm:$0xf] }
 0x369   : > { %v5379_v31 = vpop.f32.mrf.mxu1 }
 0x36a   : > { %v5380_v12 = vadd.f32 %v5379_v31, %v5366_v59  ;;  %v11002_v31 = vld [vmem:[#allocation9 + $0xe4] sm:$0xf]  ;;  %v9706_v59 = vor.u32 %v11003_v8, %v9705_v5  ;;  %v9682_v5 = vor.u32 %v10997_v41, %v9681_v24  ;;  %v9683_v8 = vld [vmem:[#allocation9 + $0xb8] sm:$0xf0]  ;;  %v10557_v24 = vld [vmem:[#allocation6 + $0x134] sm:$0xf0] }
 0x36c   : > { %5834 = vmatpush.bf16.msra.mxu0 %v9706_v59 }
 0x36e   : > { %v5421_v44 = vpop.f32.mrf.mxu0 }
 0x370   : > { %v5393_v2 = vpop.f32.mrf.mxu2 }
 0x371   : > { %v5394_v21 = vadd.f32 %v5393_v2, %v5380_v12  ;;  %v5381_v46 = vpop.f32.mrf.mxu1  ;;  %v9710_v12 = vor.u32 %v11002_v31, %v9707_v1  ;;  %v9697_v2 = vld [vmem:[#allocation9 + $0xd0] sm:$0xf] }
 0x372   : > { %v5407_v26 = vpop.f32.mrf.mxu3  ;;  %v5382_v16 = vadd.f32 %v5381_v46, %v5368_v20  ;;  %v9761_v31 = vld [vmem:[#allocation6 + $0x50] sm:$0xf] }
 0x373   : > { %v5408_v10 = vadd.f32 %v5407_v26, %v5394_v21  ;;  %5892 = vmatpush.bf16.msra.mxu2 %v9710_v12  ;;  %v11000_v26 = vld [vmem:[#allocation9 + $0xd4] sm:$0xf]  ;;  %v9889_v1 = vld [vmem:[#allocation6 + $0x150] sm:$0xf]  ;;  %v10561_v12 = vld [vmem:[#allocation6 + $0x154] sm:$0xf0] }
 0x375   : > { %v5422_v53 = vadd.f32 %v5421_v44, %v5408_v10  ;;  %v10533_v10 = vld [vmem:[#allocation6 + $0x74] sm:$0xf0] }
 0x376   : > { %v5423_v23 = vpop.f32.mrf.mxu0  ;;  %v9778_v20 = vor.u32 %v10533_v10, %v9777_v42  ;;  %v9675_v42 = vld [vmem:[#allocation9 + $0xa8] sm:$0xf0]  ;;  %v9753_v10 = vld [vmem:[#allocation6 + $0x40] sm:$0xf] }
 0x377   : > { %v5542_v7 = vadd.f32 %v5422_v53, %v12692_v11  ;;  %v10565_v53 = vld [vmem:[#allocation6 + $0x174] sm:$0xf0] }
 0x378   : > { %v5395_v54 = vpop.f32.mrf.mxu2  ;;  %6400 = vmatpush.bf16.msra.mxu3 %v9778_v20 }
 0x379   : > { %v5396_v63 = vadd.f32 %v5395_v54, %v5382_v16  ;;  %v5572_v43 = vadd.f32 %v12716_v60, %v5542_v7  ;;  %v9905_v16 = vld [vmem:[#allocation6 + $0x170] sm:$0xf] }
 0x37a   : > { %v5409_v3 = vpop.f32.mrf.mxu3  ;;  %v9906_v54 = vor.u32 %v10565_v53, %v9905_v16  ;;  %v9881_v53 = vld [vmem:[#allocation6 + $0x140] sm:$0xf] }
 0x37b   : > { %v5410_v30 = vadd.f32 %v5409_v3, %v5396_v63  ;;  %v5588_v11 = vmax.f32 %v5572_v43, 0.0  ;;  %v9689_v3 = vld [vmem:[#allocation9 + $0xc0] sm:$0xf]  ;;  %v10999_v63 = vld [vmem:[#allocation9 + $0xc4] sm:$0xf0] }
 0x37c   : > { %6458 = vmatpush.bf16.msra.mxu1 %v9906_v54  ;;  %v9690_v7 = vor.u32 %v10999_v63, %v9689_v3  ;;  %v9897_v43 = vld [vmem:[#allocation6 + $0x160] sm:$0xf]  ;;  %v10559_v54 = vld [vmem:[#allocation6 + $0x144] sm:$0xf0] }
 0x37d   : > { %v5424_v27 = vadd.f32 %v5423_v23, %v5410_v30  ;;  %v10998_v23 = vld [vmem:[#allocation9 + $0xc4] sm:$0xf]  ;;  %v9691_v30 = vld [vmem:[#allocation9 + $0xc8] sm:$0xf0]  ;;  %v9882_v63 = vor.u32 %v10559_v54, %v9881_v53  ;;  %v10553_v54 = vld [vmem:[#allocation6 + $0x114] sm:$0xf0] }
 0x37e   : > { %v9694_v0 = vor.u32 %v10998_v23, %v9691_v30  ;;  %v9665_v23 = vld [vmem:[#allocation9 + $0x90] sm:$0xf]  ;;  %v10992_v30 = vld [vmem:[#allocation9 + $0x94] sm:$0xf] }
 0x37f   : > { %v5544_v13 = vadd.f32 %v5424_v27, %v12702_v19  ;;  %v11001_v19 = vld [vmem:[#allocation9 + $0xd4] sm:$0xf0]  ;;  %v9769_v27 = vld [vmem:[#allocation6 + $0x60] sm:$0xf] }
 0x380   : > { %v9698_v21 = vor.u32 %v11001_v19, %v9697_v2  ;;  %v9770_v29 = vor.u32 %v10531_v37, %v9769_v27  ;;  %v9673_v19 = vld [vmem:[#allocation9 + $0xa0] sm:$0xf]  ;;  %v9667_v37 = vld [vmem:[#allocation9 + $0x98] sm:$0xf0] }
 0x381   : > { %v5574_v61 = vadd.f32 %v12716_v60, %v5544_v13  ;;  %v9699_v60 = vld [vmem:[#allocation9 + $0xd8] sm:$0xf0]  ;;  %v10563_v13 = vld [vmem:[#allocation6 + $0x164] sm:$0xf0] }
 0x382   : > { %v9702_v46 = vor.u32 %v11000_v26, %v9699_v60  ;;  %5835 = vmatpush.bf16.msra.mxu0 %v9698_v21  ;;  %v9898_v57 = vor.u32 %v10563_v13, %v9897_v43  ;;  %6401 = vmatpush.bf16.msra.mxu3 %v9770_v29  ;;  %v10995_v26 = vld [vmem:[#allocation9 + $0xa4] sm:$0xf0]  ;;  %v10994_v21 = vld [vmem:[#allocation9 + $0xa4] sm:$0xf]  ;;  %v10525_v29 = vld [vmem:[#allocation6 + $0x34] sm:$0xf0]  ;;  %v9670_v43 = vor.u32 %v10992_v30, %v9667_v37 }
 0x383   : > { %v5590_v56 = vmax.f32 %v5574_v61, 0.0  ;;  %v10996_v61 = vld [vmem:[#allocation9 + $0xb4] sm:$0xf]  ;;  %v9674_v60 = vor.u32 %v10995_v26, %v9673_v19  ;;  %v9678_v20 = vor.u32 %v10994_v21, %v9675_v42  ;;  %v9865_v21 = vld [vmem:[#allocation6 + $0x120] sm:$0xf] }
 0x384   : > { %5893 = vmatpush.bf16.msra.mxu2 %v9702_v46  ;;  %6459 = vmatpush.bf16.msra.mxu1 %v9898_v57  ;;  %v10527_v46 = vld [vmem:[#allocation6 + $0x44] sm:$0xf0]  ;;  %v9873_v57 = vld [vmem:[#allocation6 + $0x130] sm:$0xf]  ;;  %v9849_v37 = vld [vmem:[#allocation6 + $0x100] sm:$0xf] }
 0x385   : > { %v5604_v44 = vpack.c.bf16 %v5590_v56, %v5588_v11  ;;  %v10529_v11 = vld [vmem:[#allocation6 + $0x54] sm:$0xf0]  ;;  %v9686_v56 = vor.u32 %v10996_v61, %v9683_v8  ;;  %v9754_v16 = vor.u32 %v10527_v46, %v9753_v10  ;;  %v9657_v8 = vld [vmem:[#allocation9 + $0x80] sm:$0xf]  ;;  %v9729_v10 = vld [vmem:[#allocation6 + $0x10] sm:$0xf] }
 0x386   : > { %5836 = vmatpush.bf16.msra.mxu0 %v9690_v7  ;;  %v9762_v59 = vor.u32 %v10529_v11, %v9761_v31  ;;  %v10993_v7 = vld [vmem:[#allocation9 + $0x94] sm:$0xf0]  ;;  %v10991_v31 = vld [vmem:[#allocation9 + $0x84] sm:$0xf0]  ;;  %v10990_v11 = vld [vmem:[#allocation9 + $0x84] sm:$0xf] }
 0x387   : > { %5812 = vmatmul.bf16.vlgmr.msrb.gmra.mxu3 %v5604_v44  ;;  %5870 = vmatmul.bf16.vlgmr.msrb.gmra.mxu1 %v5604_v44  ;;  %v9890_v44 = vor.u32 %v10561_v12, %v9889_v1  ;;  %v9666_v27 = vor.u32 %v10993_v7, %v9665_v23  ;;  %v10523_v1 = vld [vmem:[#allocation6 + $0x24] sm:$0xf0]  ;;  %v10521_v46 = vld [vmem:[#allocation6 + $0x14] sm:$0xf0]  ;;  %v9841_v23 = vld [vmem:[#allocation6 + $0xf0] sm:$0xf] }
 0x388   : > { %5894 = vmatpush.bf16.msra.mxu2 %v9694_v0  ;;  %6402 = vmatpush.bf16.msra.mxu3 %v9762_v59  ;;  %v9745_v0 = vld [vmem:[#allocation6 + $0x30] sm:$0xf]  ;;  %v9737_v59 = vld [vmem:[#allocation6 + $0x20] sm:$0xf]  ;;  %v9730_v53 = vor.u32 %v10521_v46, %v9729_v10 }
 0x389   : > { %6460 = vmatpush.bf16.msra.mxu1 %v9890_v44  ;;  %v5449_v3 = vpop.f32.mrf.mxu1  ;;  %v9746_v13 = vor.u32 %v10525_v29, %v9745_v0  ;;  %v9738_v26 = vor.u32 %v10523_v1, %v9737_v59  ;;  %v9721_v7 = vld [vmem:[#allocation6] sm:$0xf]  ;;  %v10551_v0 = vld [vmem:[#allocation6 + $0x104] sm:$0xf0] }
 0x38a   : > { %5837 = vmatpush.bf16.msra.mxu0 %v9682_v5  ;;  %v9874_v5 = vor.u32 %v10557_v24, %v9873_v57  ;;  %v9833_v59 = vld [vmem:[#allocation6 + $0xe0] sm:$0xf]  ;;  %v10547_v1 = vld [vmem:[#allocation6 + $0xe4] sm:$0xf0] }
 0x38c   : > { %v5435_v2 = vpop.f32.mrf.mxu0  ;;  %5895 = vmatpush.bf16.msra.mxu2 %v9686_v56  ;;  %6403 = vmatpush.bf16.msra.mxu3 %v9754_v16  ;;  %v9658_v56 = vor.u32 %v10991_v31, %v9657_v8 }
 0x38d   : > { %6461 = vmatpush.bf16.msra.mxu1 %v9882_v63  ;;  %v5450_v12 = vadd.f32 %v5449_v3, %v5435_v2  ;;  %v10549_v2 = vld [vmem:[#allocation6 + $0xf4] sm:$0xf0] }
 0x38e   : > { %5838 = vmatpush.bf16.msra.mxu0 %v9674_v60  ;;  %v10555_v60 = vld [vmem:[#allocation6 + $0x124] sm:$0xf0]  ;;  %v9842_v30 = vor.u32 %v10549_v2, %v9841_v23  ;;  %v9825_v23 = vld [vmem:[#allocation6 + $0xd0] sm:$0xf]  ;;  %v10545_v2 = vld [vmem:[#allocation6 + $0xd4] sm:$0xf0] }
 0x38f   : > { %v9866_v42 = vor.u32 %v10555_v60, %v9865_v21 }
 0x390   : > { %5896 = vmatpush.bf16.msra.mxu2 %v9678_v20  ;;  %v5477_v41 = vpop.f32.mrf.mxu3  ;;  %6404 = vmatpush.bf16.msra.mxu3 %v9746_v13  ;;  %v9857_v20 = vld [vmem:[#allocation6 + $0x110] sm:$0xf]  ;;  %v10581_v13 = vld [vmem:[#allocation6 + $0x1f4] sm:$0xf0] }
 0x391   : > { %v5463_v61 = vpop.f32.mrf.mxu2  ;;  %6462 = vmatpush.bf16.msra.mxu1 %v9874_v5  ;;  %v5451_v16 = vpop.f32.mrf.mxu1  ;;  %v9858_v3 = vor.u32 %v10553_v54, %v9857_v20 }
 0x392   : > { %5839 = vmatpush.bf16.msra.mxu0 %v9666_v27  ;;  %v5464_v63 = vadd.f32 %v5463_v61, %v5450_v12  ;;  %v10519_v27 = vld [vmem:[#allocation6 + $0x4] sm:$0xf0]  ;;  %v9961_v12 = vld [vmem:[#allocation6 + $0x1e0] sm:$0xf] }
 0x393   : > { %v9722_v29 = vor.u32 %v10519_v27, %v9721_v7  ;;  %v9826_v7 = vor.u32 %v10545_v2, %v9825_v23 }
 0x394   : > { %5897 = vmatpush.bf16.msra.mxu2 %v9670_v43  ;;  %v5437_v44 = vpop.f32.mrf.mxu0  ;;  %6405 = vmatpush.bf16.msra.mxu3 %v9738_v26  ;;  %v9969_v43 = vld [vmem:[#allocation6 + $0x1f0] sm:$0xf]  ;;  %v5478_v31 = vadd.f32 %v5477_v41, %v5464_v63  ;;  %v9834_v41 = vor.u32 %v10547_v1, %v9833_v59  ;;  %v13541_v1 = vld [vmem:[#allocation58_spill] sm:$0xff] }
 0x395   : > { %6463 = vmatpush.bf16.msra.mxu1 %v9866_v42  ;;  %v9970_v5 = vor.u32 %v10581_v13, %v9969_v43  ;;  %v5452_v8 = vadd.f32 %v5451_v16, %v5437_v44  ;;  %v10579_v44 = vld [vmem:[#allocation6 + $0x1e4] sm:$0xf0] }
 0x396   : > { %5840 = vmatpush.bf16.msra.mxu0 %v9658_v56  ;;  %v9962_v21 = vor.u32 %v10579_v44, %v9961_v12 }
 0x397   : > { %5817 = vmatmul.bf16.gmra.mxu3 %v12726_v62  ;;  %5875 = vmatmul.bf16.gmra.mxu1 %v12726_v62  ;;  %v9659_v62 = vld [vmem:[#allocation9 + $0x88] sm:$0xf0] }
 0x398   : > { %v9662_v19 = vor.u32 %v10990_v11, %v9659_v62  ;;  %6406 = vmatpush.bf16.msra.mxu3 %v9730_v53  ;;  %v5479_v57 = vpop.f32.mrf.mxu3  ;;  %v9850_v11 = vor.u32 %v10551_v0, %v9849_v37 }
 0x399   : > { %v5465_v24 = vpop.f32.mrf.mxu2  ;;  %6464 = vmatpush.bf16.msra.mxu1 %v9858_v3 }
 0x39a   : > { %5898 = vmatpush.bf16.msra.mxu2 %v9662_v19  ;;  %6429 = vmatpush.bf16.msrb.mxu0 %v9842_v30  ;;  %v3428_v19 = vadd.f32 %v12707_v28, %v12704_v25  ;;  %v5466_v26 = vadd.f32 %v5465_v24, %v5452_v8  ;;  %v3433_v25 = vadd.f32 %v12729_v22, %v12723_v58  ;;  %v10577_v30 = vld [vmem:[#allocation6 + $0x1d4] sm:$0xf0]  ;;  %v9945_v8 = vld [vmem:[#allocation6 + $0x1c0] sm:$0xf] }
 0x39c   : > { %6407 = vmatpush.bf16.msra.mxu3 %v9722_v29  ;;  %v3457_v60 = vadd.f32 %v12763_v47, %v3428_v19  ;;  %v5480_v16 = vadd.f32 %v5479_v57, %v5466_v26  ;;  %v9953_v47 = vld [vmem:[#allocation6 + $0x1d0] sm:$0xf]  ;;  %v3462_v27 = vadd.f32 %v12777_v49, %v3433_v25  ;;  %v13539_v57 = vld [vmem:[#allocation66_spill] sm:$0xff]  ;;  %v11191_v49 = vld [vmem:[%s13374_s5] sm:$0x3] }
 0x39d   : > { %6465 = vmatpush.bf16.msra.mxu1 %v9850_v11  ;;  %v9954_v0 = vor.u32 %v10577_v30, %v9953_v47  ;;  %v13542_v26 = vld [vmem:[#allocation67_spill] sm:$0xff]  ;;  %v10573_v25 = vld [vmem:[#allocation6 + $0x1b4] sm:$0xf0]  ;;  %v13548_v30 = vld [vmem:[#allocation30_spill] sm:$0xff] }
 0x39e   : > { %6487 = vmatpush.bf16.msrb.mxu2 %v9970_v5  ;;  %6430 = vmatpush.bf16.msrb.mxu0 %v9834_v41  ;;  %v3491_v43 = vadd.f32 %v12787_v9, %v3462_v27  ;;  %v9817_v9 = vld [vmem:[#allocation6 + $0xc0] sm:$0xf]  ;;  %v13547_v47 = vld [vmem:[#allocation59_spill] sm:$0xff] }
 0x39f   : > { %v13549_v27 = vld [vmem:[#allocation47_spill] sm:$0xff] }
 0x3a0   : > { %v5533_v10 = vpop.f32.mrf.mxu3 }
 0x3a2   : > { %6488 = vmatpush.bf16.msrb.mxu2 %v9962_v21  ;;  %6431 = vmatpush.bf16.msrb.mxu0 %v9826_v7  ;;  %v13543_v21 = vld [vmem:[#allocation69_spill] sm:$0xff] }
 0x3a6   : > { %6489 = vmatpush.bf16.msrb.mxu2 %v9954_v0  ;;  %v10033_v0 = vld [vmem:[#allocation6 + $0x270] sm:$0xf] }
 0x3a7   : > { %5822 = vmatmul.bf16.gmra.mxu3 %v12746_v32  ;;  %5880 = vmatmul.bf16.gmra.mxu1 %v12746_v32  ;;  %v3486_v32 = vadd.f32 %v12771_v51, %v3457_v60 }
 0x3a8   : > { %v5535_v13 = vpop.f32.mrf.mxu3 }
 0x3a9   : > { %v5505_v62 = vpop.f32.mrf.mxu1  ;;  %v3515_v28 = vadd.f32 %v12775_v50, %v3486_v32 }
 0x3ab   : > { %v3544_v51 = vadd.f32 %v12779_v45, %v3515_v28  ;;  %v12929_v45 = vperm.slane %v11191_v49, 1  ;;  %v13546_v28 = vld [vmem:[#allocation51_spill] sm:$0xff] }
 0x3ac   : > { %v5491_v61 = vpop.f32.mrf.mxu0 }
 0x3ad   : > { %v5492_v56 = vadd.f32 %v5491_v61, %v5478_v31  ;;  %v3573_v58 = vadd.f32 %v12819_v52, %v3544_v51  ;;  %v10543_v52 = vld [vmem:[#allocation6 + $0xc4] sm:$0xf0]  ;;  %v9801_v51 = vld [vmem:[#allocation6 + $0xa0] sm:$0xf] }
 0x3af   : > { %v5506_v42 = vadd.f32 %v5505_v62, %v5492_v56  ;;  %v3602_v24 = vadd.f32 %v13539_v57, %v3573_v58  ;;  %v9818_v56 = vor.u32 %v10543_v52, %v9817_v9  ;;  %v10575_v62 = vld [vmem:[#allocation6 + $0x1c4] sm:$0xf0]  ;;  %v13551_v58 = vld [vmem:[#allocation68_spill] sm:$0xff]  ;;  %v10532_v57 = vld [vmem:[#allocation6 + $0x74] sm:$0xf] }
 0x3b0   : > { %v9946_v59 = vor.u32 %v10575_v62, %v9945_v8  ;;  %v10025_v9 = vld [vmem:[#allocation6 + $0x260] sm:$0xf]  ;;  %v10595_v52 = vld [vmem:[#allocation6 + $0x264] sm:$0xf0]  ;;  %v10530_v8 = vld [vmem:[#allocation6 + $0x64] sm:$0xf] }
 0x3b1   : > { %v5519_v46 = vpop.f32.mrf.mxu2  ;;  %v5507_v3 = vpop.f32.mrf.mxu1  ;;  %6432 = vmatpush.bf16.msrb.mxu0 %v9818_v56  ;;  %v9929_v56 = vld [vmem:[#allocation6 + $0x1a0] sm:$0xf]  ;;  %v10571_v62 = vld [vmem:[#allocation6 + $0x1a4] sm:$0xf0] }
 0x3b2   : > { %v5520_v20 = vadd.f32 %v5519_v46, %v5506_v42  ;;  %6490 = vmatpush.bf16.msrb.mxu2 %v9946_v59  ;;  %v13545_v46 = vld [vmem:[#allocation48_spill] sm:$0xff]  ;;  %v10026_v59 = vor.u32 %v10595_v52, %v10025_v9 }
 0x3b3   : > { %v10589_v52 = vld [vmem:[#allocation6 + $0x234] sm:$0xf0] }
 0x3b4   : > { %v5493_v53 = vpop.f32.mrf.mxu0  ;;  %v5534_v63 = vadd.f32 %v5533_v10, %v5520_v20  ;;  %v13544_v10 = vld [vmem:[#allocation28_spill] sm:$0xff]  ;;  %v9809_v20 = vld [vmem:[#allocation6 + $0xb0] sm:$0xf] }
 0x3b5   : > { %v5494_v54 = vadd.f32 %v5493_v53, %v5480_v16  ;;  %v3438_v32 = vadd.f32 %v13545_v46, %v13544_v10  ;;  %v10541_v16 = vld [vmem:[#allocation6 + $0xb4] sm:$0xf0]  ;;  %v9937_v53 = vld [vmem:[#allocation6 + $0x1b0] sm:$0xf] }
 0x3b6   : > { %v5543_v22 = vadd.f32 %v5534_v63, %v12823_v55  ;;  %v13540_v55 = vld [vmem:[#allocation35_spill] sm:$0xff]  ;;  %v9938_v2 = vor.u32 %v10573_v25, %v9937_v53 }
 0x3b7   : > { %v5508_v37 = vadd.f32 %v5507_v3, %v5494_v54  ;;  %5827 = vmatmul.bf16.gmra.mxu3 %v12888_v40  ;;  %5885 = vmatmul.bf16.gmra.mxu1 %v12888_v40  ;;  %v3520_v31 = vadd.f32 %v13540_v55, %v3491_v43  ;;  %v9810_v54 = vor.u32 %v10541_v16, %v9809_v20  ;;  %v13552_v55 = vld [vmem:[#allocation62_spill] sm:$0xff]  ;;  %v13555_v10 = vld [vmem:[#allocation55_spill] sm:$0xff]  ;;  %v10593_v16 = vld [vmem:[#allocation6 + $0x254] sm:$0xf0] }
 0x3b8   : > { %v5573_v61 = vadd.f32 %v12929_v45, %v5543_v22  ;;  %v3467_v63 = vadd.f32 %v13546_v28, %v3438_v32  ;;  %6491 = vmatpush.bf16.msrb.mxu2 %v9938_v2  ;;  %v5577_v22 = vadd.f32 %v12929_v45, %v13551_v58  ;;  %v10528_v53 = vld [vmem:[#allocation6 + $0x54] sm:$0xf]  ;;  %v10009_v28 = vld [vmem:[#allocation6 + $0x240] sm:$0xf] }
 0x3b9   : > { %v5521_v29 = vpop.f32.mrf.mxu2  ;;  %v3549_v12 = vadd.f32 %v13541_v1, %v3520_v31  ;;  %6433 = vmatpush.bf16.msrb.mxu0 %v9810_v54  ;;  %v13556_v2 = vld [vmem:[#allocation61_spill] sm:$0xff] }
 0x3ba   : > { %v5522_v50 = vadd.f32 %v5521_v29, %v5508_v37  ;;  %v5589_v40 = vmax.f32 %v5573_v61, 0.0  ;;  %v3496_v3 = vadd.f32 %v13547_v47, %v3467_v63  ;;  %v10539_v37 = vld [vmem:[#allocation6 + $0xa4] sm:$0xf0]  ;;  %v13550_v29 = vld [vmem:[#allocation60_spill] sm:$0xff]  ;;  %v4494_v61 = vadd.f32 %v12882_v18, %v12884_v33  ;;  %v9793_v18 = vld [vmem:[#allocation6 + $0x90] sm:$0xf] }
 0x3bb   : > { %v3578_v41 = vadd.f32 %v13542_v26, %v3549_v12  ;;  %v9930_v12 = vor.u32 %v10571_v62, %v9929_v56  ;;  %v13553_v26 = vld [vmem:[#allocation70_spill] sm:$0xff]  ;;  %v10537_v33 = vld [vmem:[#allocation6 + $0x94] sm:$0xf0]  ;;  %v9993_v62 = vld [vmem:[#allocation6 + $0x220] sm:$0xf] }
 0x3bc   : > { %v5536_v5 = vadd.f32 %v5535_v13, %v5522_v50  ;;  %v3525_v43 = vadd.f32 %v13550_v29, %v3496_v3  ;;  %v9802_v50 = vor.u32 %v10539_v37, %v9801_v51  ;;  %v10597_v13 = vld [vmem:[#allocation6 + $0x274] sm:$0xf0]  ;;  %v9794_v20 = vor.u32 %v10537_v33, %v9793_v18  ;;  %v10591_v63 = vld [vmem:[#allocation6 + $0x244] sm:$0xf0]  ;;  %v9921_v51 = vld [vmem:[#allocation6 + $0x190] sm:$0xf] }
 0x3bd   : > { %v3607_v60 = vadd.f32 %v13543_v21, %v3578_v41  ;;  %v10034_v49 = vor.u32 %v10597_v13, %v10033_v0  ;;  %6492 = vmatpush.bf16.msrb.mxu2 %v9930_v12  ;;  %v10569_v37 = vld [vmem:[#allocation6 + $0x194] sm:$0xf0]  ;;  %v13559_v13 = vld [vmem:[#allocation50_spill] sm:$0xff] }
 0x3be   : > { %v5545_v11 = vadd.f32 %v5536_v5, %v3602_v24  ;;  %v9779_v24 = vld [vmem:[#allocation6 + $0x78] sm:$0xf0]  ;;  %v3554_v31 = vadd.f32 %v13552_v55, %v3525_v43  ;;  %6434 = vmatpush.bf16.msrb.mxu0 %v9802_v50  ;;  %v9922_v29 = vor.u32 %v10569_v37, %v9921_v51  ;;  %v13557_v43 = vld [vmem:[#allocation63_spill] sm:$0xff]  ;;  %v13558_v50 = vld [vmem:[#allocation33_spill] sm:$0xff] }
 0x3bf   : > { %v5579_v23 = vadd.f32 %v12929_v45, %v3607_v60  ;;  %v9782_v5 = vor.u32 %v10532_v57, %v9779_v24  ;;  %6516 = vmatpush.bf16.msrb.mxu3 %v10034_v49  ;;  %v10017_v60 = vld [vmem:[#allocation6 + $0x250] sm:$0xf]  ;;  %v9785_v57 = vld [vmem:[#allocation6 + $0x80] sm:$0xf]  ;;  %v10535_v24 = vld [vmem:[#allocation6 + $0x84] sm:$0xf0]  ;;  %v5581_v49 = vadd.f32 %v12929_v45, %v12849_v14 }
 0x3c0   : > { %v5575_v19 = vadd.f32 %v12929_v45, %v5545_v11  ;;  %v9771_v11 = vld [vmem:[#allocation6 + $0x68] sm:$0xf0]  ;;  %v3583_v41 = vadd.f32 %v13553_v26, %v3554_v31  ;;  %v9786_v9 = vor.u32 %v10535_v24, %v9785_v57  ;;  %v9747_v55 = vld [vmem:[#allocation6 + $0x38] sm:$0xf0]  ;;  %v10567_v56 = vld [vmem:[#allocation6 + $0x184] sm:$0xf0] }
 0x3c1   : > { %v5595_v7 = vmax.f32 %v5579_v23, 0.0  ;;  %6574 = vmatpush.bf16.msrb.mxu1 %v9782_v5  ;;  %v9774_v1 = vor.u32 %v10530_v8, %v9771_v11  ;;  %v10526_v23 = vld [vmem:[#allocation6 + $0x44] sm:$0xf]  ;;  %6493 = vmatpush.bf16.msrb.mxu2 %v9922_v29  ;;  %v10524_v8 = vld [vmem:[#allocation6 + $0x34] sm:$0xf]  ;;  %v13562_v51 = vld [vmem:[#allocation36_spill] sm:$0xff]  ;;  %v5585_v29 = vadd.f32 %v12929_v45, %v12895_v36 }
 0x3c2   : > { %v5591_v44 = vmax.f32 %v5575_v19, 0.0  ;;  %v5593_v19 = vmax.f32 %v5577_v22, 0.0  ;;  %6435 = vmatpush.bf16.msrb.mxu0 %v9794_v20  ;;  %v9913_v11 = vld [vmem:[#allocation6 + $0x180] sm:$0xf]  ;;  %v10587_v14 = vld [vmem:[#allocation6 + $0x224] sm:$0xf0] }
 0x3c3   : > { %6517 = vmatpush.bf16.msrb.mxu3 %v10026_v59  ;;  %v13560_v59 = vld [vmem:[#allocation64_spill] sm:$0xff]  ;;  %v10522_v26 = vld [vmem:[#allocation6 + $0x24] sm:$0xf]  ;;  %v9835_v24 = vld [vmem:[#allocation6 + $0xe8] sm:$0xf0] }
 0x3c4   : > { %v5605_v42 = vpack.c.bf16 %v5591_v44, %v5589_v40  ;;  %v4508_v40 = vadd.f32 %v12892_v48, %v4494_v61  ;;  %v3612_v44 = vadd.f32 %v12855_v38, %v3583_v41  ;;  %v5607_v21 = vpack.c.bf16 %v5595_v7, %v5593_v19  ;;  %v9763_v48 = vld [vmem:[#allocation6 + $0x58] sm:$0xf0]  ;;  %v9755_v7 = vld [vmem:[#allocation6 + $0x48] sm:$0xf0]  ;;  %v13561_v41 = vld [vmem:[#allocation65_spill] sm:$0xff] }
 0x3c5   : > { %6575 = vmatpush.bf16.msrb.mxu1 %v9774_v1  ;;  %v10018_v38 = vor.u32 %v10593_v16, %v10017_v60  ;;  %v9766_v25 = vor.u32 %v10528_v53, %v9763_v48  ;;  %v9758_v0 = vor.u32 %v10526_v23, %v9755_v7  ;;  %v9750_v61 = vor.u32 %v10524_v8, %v9747_v55  ;;  %v10585_v16 = vld [vmem:[#allocation6 + $0x214] sm:$0xf0]  ;;  %v10520_v53 = vld [vmem:[#allocation6 + $0x14] sm:$0xf]  ;;  %v9731_v48 = vld [vmem:[#allocation6 + $0x18] sm:$0xf0] }
 0x3c6   : > { %5841 = vmatmul.bf16.vlgmr.msra.gmra.mxu0 %v5605_v42  ;;  %5899 = vmatmul.bf16.vlgmr.msra.gmra.mxu2 %v5605_v42  ;;  %v13554_v42 = vld [vmem:[#allocation54_spill] sm:$0xff]  ;;  %v4522_v32 = vadd.f32 %v12890_v35, %v4508_v40  ;;  %v5583_v54 = vadd.f32 %v12929_v45, %v3612_v44  ;;  %v10010_v35 = vor.u32 %v10591_v63, %v10009_v28  ;;  %v5597_v44 = vmax.f32 %v5581_v49, 0.0  ;;  %v10518_v28 = vld [vmem:[#allocation6 + $0x4] sm:$0xf]  ;;  %v10548_v23 = vld [vmem:[#allocation6 + $0xf4] sm:$0xf] }
 0x3c7   : > { %6408 = vmatmul.bf16.vlgmr.msra.gmra.mxu3 %v13548_v30  ;;  %6466 = vmatmul.bf16.vlgmr.msra.gmra.mxu1 %v13549_v27  ;;  %v3443_v46 = vadd.f32 %v13555_v10, %v13554_v42  ;;  %v9914_v19 = vor.u32 %v10567_v56, %v9913_v11  ;;  %v10097_v10 = vld [vmem:[#allocation6 + $0x2f0] sm:$0xf]  ;;  %v9723_v63 = vld [vmem:[#allocation6 + $0x8] sm:$0xf0]  ;;  %v13563_v37 = vld [vmem:[#allocation32_spill] sm:$0xff] }
 0x3c8   : > { %v4536_v3 = vadd.f32 %v12903_v39, %v4522_v32  ;;  %6518 = vmatpush.bf16.msrb.mxu3 %v10018_v38  ;;  %v5599_v22 = vmax.f32 %v5583_v54, 0.0  ;;  %v10001_v39 = vld [vmem:[#allocation6 + $0x230] sm:$0xf]  ;;  %6436 = vmatpush.bf16.msrb.mxu0 %v9786_v9  ;;  %v10546_v57 = vld [vmem:[#allocation6 + $0xe4] sm:$0xf] }
 0x3c9   : > { %v3472_v47 = vadd.f32 %v13556_v2, %v3443_v46  ;;  %6576 = vmatpush.bf16.msrb.mxu1 %v9766_v25  ;;  %v10002_v31 = vor.u32 %v10589_v52, %v10001_v39  ;;  %6494 = vmatpush.bf16.msrb.mxu2 %v9914_v19  ;;  %v10613_v46 = vld [vmem:[#allocation6 + $0x2f4] sm:$0xf0]  ;;  %v9985_v32 = vld [vmem:[#allocation6 + $0x210] sm:$0xf]  ;;  %v9734_v25 = vor.u32 %v10520_v53, %v9731_v48  ;;  %v9843_v2 = vld [vmem:[#allocation6 + $0xf8] sm:$0xf0] }
 0x3ca   : > { %v4550_v5 = vadd.f32 %v12899_v15, %v4536_v3  ;;  %v9739_v15 = vld [vmem:[#allocation6 + $0x28] sm:$0xf0]  ;;  %v5609_v42 = vpack.c.bf16 %v5599_v22, %v5597_v44  ;;  %v10098_v20 = vor.u32 %v10613_v46, %v10097_v10  ;;  %v9986_v38 = vor.u32 %v10585_v16, %v9985_v32  ;;  %v10609_v9 = vld [vmem:[#allocation6 + $0x2d4] sm:$0xf0]  ;;  %v10544_v8 = vld [vmem:[#allocation6 + $0xd4] sm:$0xf] }
 0x3cb   : > { %v3501_v58 = vadd.f32 %v13557_v43, %v3472_v47  ;;  %v9742_v18 = vor.u32 %v10522_v26, %v9739_v15  ;;  %v9726_v3 = vor.u32 %v10518_v28, %v9723_v63  ;;  %v9846_v7 = vor.u32 %v10548_v23, %v9843_v2  ;;  %v9827_v36 = vld [vmem:[#allocation6 + $0xd8] sm:$0xf0]  ;;  %v13564_v55 = vld [vmem:[#allocation39_spill] sm:$0xff]  ;;  %v10607_v11 = vld [vmem:[#allocation6 + $0x2c4] sm:$0xf0] }
 0x3cc   : > { %6519 = vmatpush.bf16.msrb.mxu3 %v10010_v35  ;;  %v4564_v12 = vadd.f32 %v12901_v6, %v4550_v5  ;;  %6545 = vmatpush.bf16.msra.mxu0 %v10098_v20  ;;  %v10089_v35 = vld [vmem:[#allocation6 + $0x2e0] sm:$0xf]  ;;  %v5601_v22 = vmax.f32 %v5585_v29, 0.0  ;;  %v9838_v39 = vor.u32 %v10546_v57, %v9835_v24  ;;  %v10081_v5 = vld [vmem:[#allocation6 + $0x2d0] sm:$0xf]  ;;  %v13569_v23 = vld [vmem:[#allocation42_spill] sm:$0xff] }
 0x3cd   : > { %6577 = vmatpush.bf16.msrb.mxu1 %v9758_v0  ;;  %v3530_v1 = vadd.f32 %v13560_v59, %v3501_v58  ;;  %v10611_v0 = vld [vmem:[#allocation6 + $0x2e4] sm:$0xf0]  ;;  %6603 = vmatpush.bf16.msra.mxu2 %v9846_v7  ;;  %v10082_v52 = vor.u32 %v10609_v9, %v10081_v5  ;;  %v9819_v59 = vld [vmem:[#allocation6 + $0xc8] sm:$0xf0]  ;;  %v13567_v19 = vld [vmem:[#allocation49_spill] sm:$0xff] }
 0x3ce   : > { %v4578_v60 = vadd.f32 %v12897_v4, %v4564_v12  ;;  %v10583_v4 = vld [vmem:[#allocation6 + $0x204] sm:$0xf0]  ;;  %v10090_v43 = vor.u32 %v10611_v0, %v10089_v35  ;;  %v13566_v12 = vld [vmem:[#allocation40_spill] sm:$0xff]  ;;  %v10596_v46 = vld [vmem:[#allocation6 + $0x274] sm:$0xf] }
 0x3cf   : > { %v3559_v40 = vadd.f32 %v13561_v41, %v3530_v1  ;;  %v10605_v26 = vld [vmem:[#allocation6 + $0x2b4] sm:$0xf0]  ;;  %v9811_v44 = vld [vmem:[#allocation6 + $0xb8] sm:$0xf0]  ;;  %v9803_v28 = vld [vmem:[#allocation6 + $0xa8] sm:$0xf0] }
 0x3d0   : > { %6520 = vmatpush.bf16.msrb.mxu3 %v10002_v31  ;;  %6546 = vmatpush.bf16.msra.mxu0 %v10090_v43  ;;  %v13565_v31 = vld [vmem:[#allocation52_spill] sm:$0xff]  ;;  %v13570_v2 = vld [vmem:[#allocation31_spill] sm:$0xff]  ;;  %v10590_v5 = vld [vmem:[#allocation6 + $0x244] sm:$0xf] }
 0x3d1   : > { %6578 = vmatpush.bf16.msrb.mxu1 %v9750_v61  ;;  %v3588_v33 = vadd.f32 %v12860_v17, %v3559_v40  ;;  %v9977_v17 = vld [vmem:[#allocation6 + $0x200] sm:$0xf]  ;;  %6604 = vmatpush.bf16.msra.mxu2 %v9838_v39  ;;  %v10540_v40 = vld [vmem:[#allocation6 + $0xb4] sm:$0xf]  ;;  %v9907_v10 = vld [vmem:[#allocation6 + $0x178] sm:$0xf0] }
 0x3d2   : > { %v10073_v61 = vld [vmem:[#allocation6 + $0x2c0] sm:$0xf]  ;;  %v10035_v32 = vld [vmem:[#allocation6 + $0x278] sm:$0xf0]  ;;  %v10560_v7 = vld [vmem:[#allocation6 + $0x154] sm:$0xf] }
 0x3d3   : > { %v3617_v6 = vadd.f32 %v12867_v34, %v3588_v33  ;;  %v9978_v34 = vor.u32 %v10583_v4, %v9977_v17  ;;  %v10074_v56 = vor.u32 %v10607_v11, %v10073_v61  ;;  %v10057_v33 = vld [vmem:[#allocation6 + $0x2a0] sm:$0xf]  ;;  %v10038_v16 = vor.u32 %v10596_v46, %v10035_v32  ;;  %v10027_v17 = vld [vmem:[#allocation6 + $0x268] sm:$0xf0]  ;;  %v10538_v4 = vld [vmem:[#allocation6 + $0xa4] sm:$0xf] }
 0x3d4   : > { %6547 = vmatpush.bf16.msra.mxu0 %v10082_v52  ;;  %v9806_v63 = vor.u32 %v10538_v4, %v9803_v28  ;;  %v9891_v0 = vld [vmem:[#allocation6 + $0x158] sm:$0xf0]  ;;  %v10592_v29 = vld [vmem:[#allocation6 + $0x254] sm:$0xf]  ;;  %v10558_v39 = vld [vmem:[#allocation6 + $0x144] sm:$0xf] }
 0x3d5   : > { %6579 = vmatpush.bf16.msrb.mxu1 %v9742_v18  ;;  %v4588_v54 = vadd.f32 %v4578_v60, %v3617_v6  ;;  %v13568_v18 = vld [vmem:[#allocation37_spill] sm:$0xff]  ;;  %v10603_v60 = vld [vmem:[#allocation6 + $0x2a4] sm:$0xf0]  ;;  %v10019_v43 = vld [vmem:[#allocation6 + $0x258] sm:$0xf0] }
 0x3d6   : > { %5846 = vmatmul.bf16.gmra.mxu0 %v5607_v21  ;;  %5904 = vmatmul.bf16.gmra.mxu2 %v5607_v21  ;;  %v9994_v21 = vor.u32 %v10587_v14, %v9993_v62  ;;  %v10542_v62 = vld [vmem:[#allocation6 + $0xc4] sm:$0xf]  ;;  %v10065_v14 = vld [vmem:[#allocation6 + $0x2b0] sm:$0xf]  ;;  %v10058_v6 = vor.u32 %v10603_v60, %v10057_v33  ;;  %v10022_v57 = vor.u32 %v10592_v29, %v10019_v43  ;;  %v10011_v52 = vld [vmem:[#allocation6 + $0x248] sm:$0xf0] }
 0x3d7   : > { %6413 = vmatmul.bf16.gmra.mxu3 %v13558_v50  ;;  %6471 = vmatmul.bf16.gmra.mxu1 %v13559_v13  ;;  %v5587_v47 = vadd.f32 %v12929_v45, %v4588_v54  ;;  %v9830_v45 = vor.u32 %v10544_v8, %v9827_v36  ;;  %v9822_v1 = vor.u32 %v10542_v62, %v9819_v59  ;;  %v10562_v54 = vld [vmem:[#allocation6 + $0x164] sm:$0xf]  ;;  %v10536_v8 = vld [vmem:[#allocation6 + $0x94] sm:$0xf]  ;;  %v9795_v36 = vld [vmem:[#allocation6 + $0x98] sm:$0xf0] }
 0x3d8   : > { %6521 = vmatpush.bf16.msrb.mxu3 %v9994_v21  ;;  %6548 = vmatpush.bf16.msra.mxu0 %v10074_v56  ;;  %v10066_v15 = vor.u32 %v10605_v26, %v10065_v14  ;;  %v9814_v21 = vor.u32 %v10540_v40, %v9811_v44  ;;  %v9798_v61 = vor.u32 %v10536_v8, %v9795_v36  ;;  %v13571_v11 = vld [vmem:[#allocation41_spill] sm:$0xff]  ;;  %v10599_v62 = vld [vmem:[#allocation6 + $0x284] sm:$0xf0]  ;;  %v10556_v59 = vld [vmem:[#allocation6 + $0x134] sm:$0xf] }
 0x3d9   : > { %6580 = vmatpush.bf16.msrb.mxu1 %v9734_v25  ;;  %v5603_v58 = vmax.f32 %v5587_v47, 0.0  ;;  %6605 = vmatpush.bf16.msra.mxu2 %v9830_v45  ;;  %v10049_v47 = vld [vmem:[#allocation6 + $0x290] sm:$0xf]  ;;  %v10014_v45 = vor.u32 %v10590_v5, %v10011_v52  ;;  %v10041_v56 = vld [vmem:[#allocation6 + $0x280] sm:$0xf] }
 0x3da   : > { %v9875_v14 = vld [vmem:[#allocation6 + $0x138] sm:$0xf0]  ;;  %v10588_v26 = vld [vmem:[#allocation6 + $0x234] sm:$0xf]  ;;  %v9787_v60 = vld [vmem:[#allocation6 + $0x88] sm:$0xf0] }
 0x3db   : > { %v5611_v49 = vpack.c.bf16 %v5603_v58, %v5601_v22  ;;  %v9894_v22 = vor.u32 %v10560_v7, %v9891_v0  ;;  %v9878_v40 = vor.u32 %v10556_v59, %v9875_v14  ;;  %v10586_v46 = vld [vmem:[#allocation6 + $0x224] sm:$0xf]  ;;  %v9995_v32 = vld [vmem:[#allocation6 + $0x228] sm:$0xf0]  ;;  %v9859_v28 = vld [vmem:[#allocation6 + $0x118] sm:$0xf0] }
 0x3dc   : > { %6522 = vmatpush.bf16.msrb.mxu3 %v9986_v38  ;;  %6549 = vmatpush.bf16.msra.mxu0 %v10066_v15  ;;  %v9899_v38 = vld [vmem:[#allocation6 + $0x168] sm:$0xf0]  ;;  %v10003_v15 = vld [vmem:[#allocation6 + $0x238] sm:$0xf0]  ;;  %v10550_v0 = vld [vmem:[#allocation6 + $0x104] sm:$0xf] }
 0x3dd   : > { %6581 = vmatpush.bf16.msrb.mxu1 %v9726_v3  ;;  %6606 = vmatpush.bf16.msra.mxu2 %v9822_v1  ;;  %v9902_v25 = vor.u32 %v10562_v54, %v9899_v38  ;;  %v10601_v3 = vld [vmem:[#allocation6 + $0x294] sm:$0xf0]  ;;  %v10042_v1 = vor.u32 %v10599_v62, %v10041_v56  ;;  %v10006_v44 = vor.u32 %v10588_v26, %v10003_v15  ;;  %v9851_v29 = vld [vmem:[#allocation6 + $0x108] sm:$0xf0]  ;;  %v10582_v43 = vld [vmem:[#allocation6 + $0x204] sm:$0xf] }
 0x3de   : > { %v10050_v35 = vor.u32 %v10601_v3, %v10049_v47  ;;  %v9998_v38 = vor.u32 %v10586_v46, %v9995_v32  ;;  %v10099_v5 = vld [vmem:[#allocation6 + $0x2f8] sm:$0xf0]  ;;  %v10578_v8 = vld [vmem:[#allocation6 + $0x1e4] sm:$0xf]  ;;  %v9963_v36 = vld [vmem:[#allocation6 + $0x1e8] sm:$0xf0] }
 0x3df   : > { %v10610_v62 = vld [vmem:[#allocation6 + $0x2e4] sm:$0xf]  ;;  %v10091_v59 = vld [vmem:[#allocation6 + $0x2e8] sm:$0xf0]  ;;  %v13576_v14 = vld [vmem:[#allocation56_spill] sm:$0xff] }
 0x3e0   : > { %6523 = vmatpush.bf16.msrb.mxu3 %v9978_v34  ;;  %6550 = vmatpush.bf16.msra.mxu0 %v10058_v6  ;;  %v10576_v26 = vld [vmem:[#allocation6 + $0x1d4] sm:$0xf]  ;;  %v9955_v15 = vld [vmem:[#allocation6 + $0x1d8] sm:$0xf0]  ;;  %v10574_v46 = vld [vmem:[#allocation6 + $0x1c4] sm:$0xf] }
 0x3e1   : > { %6607 = vmatpush.bf16.msra.mxu2 %v9814_v21  ;;  %6690 = vmatpush.bf16.msra.mxu1 %v10038_v16  ;;  %v13573_v16 = vld [vmem:[#allocation53_spill] sm:$0xff]  ;;  %v9947_v32 = vld [vmem:[#allocation6 + $0x1c8] sm:$0xf0] }
 0x3e4   : > { %6551 = vmatpush.bf16.msra.mxu0 %v10050_v35 }
 0x3e5   : > { %6608 = vmatpush.bf16.msra.mxu2 %v9806_v63  ;;  %v9987_v63 = vld [vmem:[#allocation6 + $0x218] sm:$0xf0] }
 0x3e6   : > { %5851 = vmatmul.bf16.gmra.mxu0 %v5609_v42  ;;  %5909 = vmatmul.bf16.gmra.mxu2 %v5609_v42  ;;  %v10564_v42 = vld [vmem:[#allocation6 + $0x174] sm:$0xf] }
 0x3e7   : > { %6418 = vmatmul.bf16.gmra.mxu3 %v13562_v51  ;;  %6476 = vmatmul.bf16.gmra.mxu1 %v13563_v37  ;;  %v9910_v20 = vor.u32 %v10564_v42, %v9907_v10  ;;  %v10554_v42 = vld [vmem:[#allocation6 + $0x124] sm:$0xf]  ;;  %v9867_v10 = vld [vmem:[#allocation6 + $0x128] sm:$0xf0] }
 0x3e8   : > { %6552 = vmatpush.bf16.msra.mxu0 %v10042_v1  ;;  %v9870_v54 = vor.u32 %v10554_v42, %v9867_v10  ;;  %v13575_v1 = vld [vmem:[#allocation46_spill] sm:$0xff]  ;;  %v10083_v42 = vld [vmem:[#allocation6 + $0x2d8] sm:$0xf0] }
 0x3e9   : > { %6632 = vmatpush.bf16.msra.mxu3 %v9910_v20  ;;  %6609 = vmatpush.bf16.msra.mxu2 %v9798_v61  ;;  %v13572_v20 = vld [vmem:[#allocation45_spill] sm:$0xff] }
 0x3ed   : > { %6633 = vmatpush.bf16.msra.mxu3 %v9902_v25  ;;  %v9971_v25 = vld [vmem:[#allocation6 + $0x1f8] sm:$0xf0] }
 0x3f1   : > { %6634 = vmatpush.bf16.msra.mxu3 %v9894_v22  ;;  %v13574_v22 = vld [vmem:[#allocation57_spill] sm:$0xff] }
 0x3f6   : > { %5856 = vmatmul.bf16.gmra.mxu0 %v5611_v49  ;;  %5914 = vmatmul.bf16.gmra.mxu2 %v5611_v49  ;;  %v9883_v49 = vld [vmem:[#allocation6 + $0x148] sm:$0xf0] }
 0x3f7   : > { %6423 = vmatmul.bf16.gmra.mxu3 %v13564_v55  ;;  %6481 = vmatmul.bf16.gmra.mxu1 %v13565_v31  ;;  %v9886_v9 = vor.u32 %v10558_v39, %v9883_v49  ;;  %v9979_v39 = vld [vmem:[#allocation6 + $0x208] sm:$0xf0]  ;;  %v10612_v49 = vld [vmem:[#allocation6 + $0x2f4] sm:$0xf] }
 0x3f8   : > { %v10102_v52 = vor.u32 %v10612_v49, %v10099_v5  ;;  %v10604_v49 = vld [vmem:[#allocation6 + $0x2b4] sm:$0xf]  ;;  %v10067_v5 = vld [vmem:[#allocation6 + $0x2b8] sm:$0xf0] }
 0x3f9   : > { %6635 = vmatpush.bf16.msra.mxu3 %v9886_v9  ;;  %v9982_v9 = vor.u32 %v10582_v43, %v9979_v39 }
 0x3fd   : > { %6636 = vmatpush.bf16.msra.mxu3 %v9878_v40  ;;  %v9958_v40 = vor.u32 %v10576_v26, %v9955_v15  ;;  %v13579_v15 = vld [vmem:[#allocation34_spill] sm:$0xff] }
 0x401   : > { %6637 = vmatpush.bf16.msra.mxu3 %v9870_v54  ;;  %v9950_v54 = vor.u32 %v10574_v46, %v9947_v32 }
 0x404   : > { %v12982_v41 = vpop.f32.mrf.mxu1 }
 0x406   : > { %6437 = vmatmul.bf16.vlgmr.msrb.gmra.mxu0 %v13566_v12  ;;  %6495 = vmatmul.bf16.vlgmr.msrb.gmra.mxu2 %v13567_v19 }
 0x407   : > { %6524 = vmatmul.bf16.vlgmr.msrb.gmra.mxu3 %v13568_v18  ;;  %6582 = vmatmul.bf16.vlgmr.msrb.gmra.mxu1 %v13548_v30  ;;  %v10594_v30 = vld [vmem:[#allocation6 + $0x264] sm:$0xf] }
 0x408   : > { %v10030_v34 = vor.u32 %v10594_v30, %v10027_v17  ;;  %v10580_v30 = vld [vmem:[#allocation6 + $0x1f4] sm:$0xf] }
 0x409   : > { %v10552_v17 = vld [vmem:[#allocation6 + $0x114] sm:$0xf]  ;;  %v9974_v4 = vor.u32 %v10580_v30, %v9971_v25 }
 0x40a   : > { %v12986_v53 = vpop.f32.mrf.mxu3  ;;  %6691 = vmatpush.bf16.msra.mxu1 %v10030_v34  ;;  %v10584_v34 = vld [vmem:[#allocation6 + $0x214] sm:$0xf]  ;;  %v9862_v3 = vor.u32 %v10552_v17, %v9859_v28  ;;  %v10075_v28 = vld [vmem:[#allocation6 + $0x2c8] sm:$0xf0] }
 0x40b   : > { %v9990_v7 = vor.u32 %v10584_v34, %v9987_v63  ;;  %6661 = vmatpush.bf16.msrb.mxu0 %v9974_v4  ;;  %v10606_v4 = vld [vmem:[#allocation6 + $0x2c4] sm:$0xf] }
 0x40c   : > { %v12988_v48 = vpop.f32.mrf.mxu1  ;;  %6638 = vmatpush.bf16.msra.mxu3 %v9862_v3  ;;  %v10078_v34 = vor.u32 %v10606_v4, %v10075_v28  ;;  %v13578_v63 = vld [vmem:[#allocation29_spill] sm:$0xff]  ;;  %v9939_v3 = vld [vmem:[#allocation6 + $0x1b8] sm:$0xf0]  ;;  %v9915_v28 = vld [vmem:[#allocation6 + $0x188] sm:$0xf0] }
 0x40d   : > { %v10566_v4 = vld [vmem:[#allocation6 + $0x184] sm:$0xf] }
 0x40e   : > { %6692 = vmatpush.bf16.msra.mxu1 %v10022_v57  ;;  %v9854_v57 = vor.u32 %v10550_v0, %v9851_v29 }
 0x410   : > { %6639 = vmatpush.bf16.msra.mxu3 %v9854_v57 }
 0x412   : > { %v12992_v58 = vpop.f32.mrf.mxu3  ;;  %6693 = vmatpush.bf16.msra.mxu1 %v10014_v45  ;;  %v9966_v45 = vor.u32 %v10578_v8, %v9963_v36 }
 0x414   : > { %v12994_v24 = vpop.f32.mrf.mxu1  ;;  %6662 = vmatpush.bf16.msrb.mxu0 %v9966_v45 }
 0x416   : > { %6442 = vmatmul.bf16.gmra.mxu0 %v13569_v23  ;;  %6500 = vmatmul.bf16.gmra.mxu2 %v13570_v2 }
 0x417   : > { %6529 = vmatmul.bf16.gmra.mxu3 %v13571_v11  ;;  %6587 = vmatmul.bf16.gmra.mxu1 %v13558_v50  ;;  %v10534_v50 = vld [vmem:[#allocation6 + $0x84] sm:$0xf] }
 0x418   : > { %6694 = vmatpush.bf16.msra.mxu1 %v10006_v44  ;;  %v9790_v6 = vor.u32 %v10534_v50, %v9787_v60  ;;  %6663 = vmatpush.bf16.msrb.mxu0 %v9958_v40  ;;  %v10608_v60 = vld [vmem:[#allocation6 + $0x2d4] sm:$0xf] }
 0x419   : > { %v10086_v10 = vor.u32 %v10608_v60, %v10083_v42  ;;  %v10568_v40 = vld [vmem:[#allocation6 + $0x194] sm:$0xf]  ;;  %v9923_v60 = vld [vmem:[#allocation6 + $0x198] sm:$0xf0] }
 0x41a   : > { %v12998_v21 = vpop.f32.mrf.mxu3  ;;  %6610 = vmatpush.bf16.msra.mxu2 %v9790_v6  ;;  %v13577_v6 = vld [vmem:[#allocation38_spill] sm:$0xff]  ;;  %v9926_v42 = vor.u32 %v10568_v40, %v9923_v60  ;;  %v11020_v60 = vld [vmem:[#allocation11 + $0x74] sm:$0xf] }
 0x41c   : > { %v13000_v33 = vpop.f32.mrf.mxu1  ;;  %6695 = vmatpush.bf16.msra.mxu1 %v9998_v38  ;;  %6664 = vmatpush.bf16.msrb.mxu0 %v9950_v54 }
 0x41e   : > { %6719 = vmatpush.bf16.msrb.mxu2 %v10102_v52  ;;  %v9931_v52 = vld [vmem:[#allocation6 + $0x1a8] sm:$0xf0] }
 0x420   : > { %6696 = vmatpush.bf16.msra.mxu1 %v9990_v7 }
 0x422   : > { %v13004_v47 = vpop.f32.mrf.mxu3 }
 0x424   : > { %v13006_v35 = vpop.f32.mrf.mxu1  ;;  %6697 = vmatpush.bf16.msra.mxu1 %v9982_v9  ;;  %v10570_v9 = vld [vmem:[#allocation6 + $0x1a4] sm:$0xf] }
 0x425   : > { %v9934_v8 = vor.u32 %v10570_v9, %v9931_v52  ;;  %v13580_v52 = vld [vmem:[#allocation43_spill] sm:$0xff] }
 0x426   : > { %6447 = vmatmul.bf16.gmra.mxu0 %v13572_v20  ;;  %6505 = vmatmul.bf16.gmra.mxu2 %v13573_v16 }
 0x427   : > { %6534 = vmatmul.bf16.gmra.mxu3 %v13574_v22  ;;  %6592 = vmatmul.bf16.gmra.mxu1 %v13562_v51  ;;  %v10094_v51 = vor.u32 %v10610_v62, %v10091_v59 }
 0x429   : > { %6720 = vmatpush.bf16.msrb.mxu2 %v10094_v51  ;;  %v10602_v51 = vld [vmem:[#allocation6 + $0x2a4] sm:$0xf] }
 0x42a   : > { %v13010_v61 = vpop.f32.mrf.mxu3 }
 0x42c   : > { %v13012_v56 = vpop.f32.mrf.mxu1 }
 0x42d   : > { %6721 = vmatpush.bf16.msrb.mxu2 %v10086_v10 }
 0x431   : > { %6722 = vmatpush.bf16.msrb.mxu2 %v10078_v34  ;;  %v10161_v34 = vld [vmem:[#allocation11 + $0x70] sm:$0xf] }
 0x432   : > { %v13016_v44 = vpop.f32.mrf.mxu3 }
 0x434   : > { %v13018_v50 = vpop.f32.mrf.mxu1 }
 0x436   : > { %6452 = vmatmul.bf16.gmra.mxu0 %v13575_v1  ;;  %6510 = vmatmul.bf16.gmra.mxu2 %v13576_v14 }
 0x437   : > { %6539 = vmatmul.bf16.gmra.mxu3 %v13577_v6  ;;  %6597 = vmatmul.bf16.gmra.mxu1 %v13564_v55  ;;  %v10572_v55 = vld [vmem:[#allocation6 + $0x1b4] sm:$0xf] }
 0x438   : > { %v9942_v7 = vor.u32 %v10572_v55, %v9939_v3  ;;  %v9918_v55 = vor.u32 %v10566_v4, %v9915_v28  ;;  %v11021_v3 = vld [vmem:[#allocation11 + $0x74] sm:$0xf0] }
 0x43a   : > { %v13022_v38 = vpop.f32.mrf.mxu3  ;;  %6665 = vmatpush.bf16.msrb.mxu0 %v9942_v7 }
 0x43c   : > { %v13024_v30 = vpop.f32.mrf.mxu1 }
 0x43e   : > { %6666 = vmatpush.bf16.msrb.mxu0 %v9934_v8  ;;  %v10153_v8 = vld [vmem:[#allocation11 + $0x60] sm:$0xf] }
 0x442   : > { %v13029_v0 = vpop.f32.mrf.mxu3  ;;  %6667 = vmatpush.bf16.msrb.mxu0 %v9926_v42  ;;  %v10163_v42 = vld [vmem:[#allocation11 + $0x78] sm:$0xf0] }
 0x443   : > { %v5842_v25 = vpop.f32.mrf.mxu0 }
 0x444   : > { %v5843_v17 = vadd.f32 %v5842_v25, %v12986_v53  ;;  %v13034_v57 = vpop.f32.mrf.mxu1  ;;  %v10600_v25 = vld [vmem:[#allocation6 + $0x294] sm:$0xf] }
 0x446   : > { %6553 = vmatmul.bf16.vlgmr.msra.gmra.mxu0 %v13578_v63  ;;  %6611 = vmatmul.bf16.vlgmr.msra.gmra.mxu2 %v13566_v12  ;;  %v10070_v12 = vor.u32 %v10604_v49, %v10067_v5  ;;  %v10598_v5 = vld [vmem:[#allocation6 + $0x284] sm:$0xf] }
 0x447   : > { %6640 = vmatmul.bf16.vlgmr.msra.gmra.mxu3 %v13549_v27  ;;  %6698 = vmatmul.bf16.vlgmr.msra.gmra.mxu1 %v13568_v18  ;;  %v10059_v18 = vld [vmem:[#allocation6 + $0x2a8] sm:$0xf0] }
 0x448   : > { %6723 = vmatpush.bf16.msrb.mxu2 %v10070_v12  ;;  %v10062_v26 = vor.u32 %v10602_v51, %v10059_v18  ;;  %6668 = vmatpush.bf16.msrb.mxu0 %v9918_v55  ;;  %v10043_v12 = vld [vmem:[#allocation6 + $0x288] sm:$0xf0] }
 0x449   : > { %v5900_v29 = vpop.f32.mrf.mxu2  ;;  %v10046_v9 = vor.u32 %v10598_v5, %v10043_v12  ;;  %v10137_v5 = vld [vmem:[#allocation11 + $0x40] sm:$0xf]  ;;  %v11015_v12 = vld [vmem:[#allocation11 + $0x44] sm:$0xf0] }
 0x44a   : > { %v13032_v43 = vadd.f32 %v5900_v29, %v12982_v41  ;;  %v6409_v36 = vpop.f32.mrf.mxu3 }
 0x44b   : > { %v5844_v53 = vpop.f32.mrf.mxu0  ;;  %v13041_v45 = vadd.f32 %v6409_v36, %v5843_v17  ;;  %v10051_v17 = vld [vmem:[#allocation6 + $0x298] sm:$0xf0]  ;;  %v11019_v36 = vld [vmem:[#allocation11 + $0x64] sm:$0xf0] }
 0x44c   : > { %v13037_v39 = vadd.f32 %v5844_v53, %v12992_v58  ;;  %v13046_v58 = vpop.f32.mrf.mxu1  ;;  %6724 = vmatpush.bf16.msrb.mxu2 %v10062_v26 }
 0x451   : > { %v5902_v41 = vpop.f32.mrf.mxu2 }
 0x452   : > { %v13044_v62 = vadd.f32 %v5902_v41, %v12988_v48  ;;  %v13051_v10 = vpop.f32.mrf.mxu3  ;;  %v10225_v41 = vld [vmem:[#allocation11 + $0xf0] sm:$0xf] }
 0x453   : > { %v5847_v59 = vpop.f32.mrf.mxu0 }
 0x454   : > { %v5848_v27 = vadd.f32 %v5847_v59, %v12998_v21  ;;  %v13056_v32 = vpop.f32.mrf.mxu1  ;;  %v10154_v59 = vor.u32 %v11019_v36, %v10153_v8  ;;  %v11033_v8 = vld [vmem:[#allocation11 + $0xd4] sm:$0xf0] }
 0x456   : > { %6558 = vmatmul.bf16.gmra.mxu0 %v13579_v15  ;;  %6616 = vmatmul.bf16.gmra.mxu2 %v13569_v23  ;;  %v10054_v23 = vor.u32 %v10600_v25, %v10051_v17  ;;  %v11017_v25 = vld [vmem:[#allocation11 + $0x54] sm:$0xf0]  ;;  %v10217_v17 = vld [vmem:[#allocation11 + $0xe0] sm:$0xf] }
 0x457   : > { %6645 = vmatmul.bf16.gmra.mxu3 %v13559_v13  ;;  %6703 = vmatmul.bf16.gmra.mxu1 %v13571_v11 }
 0x458   : > { %6725 = vmatpush.bf16.msrb.mxu2 %v10054_v23  ;;  %v11035_v23 = vld [vmem:[#allocation11 + $0xe4] sm:$0xf0] }
 0x459   : > { %v5905_v48 = vpop.f32.mrf.mxu2  ;;  %v10218_v4 = vor.u32 %v11035_v23, %v10217_v17  ;;  %v11011_v17 = vld [vmem:[#allocation11 + $0x24] sm:$0xf0] }
 0x45a   : > { %v13054_v46 = vadd.f32 %v5905_v48, %v12994_v24  ;;  %v10162_v24 = vor.u32 %v11021_v3, %v10161_v34  ;;  %v6414_v7 = vpop.f32.mrf.mxu3  ;;  %v10145_v48 = vld [vmem:[#allocation11 + $0x50] sm:$0xf] }
 0x45b   : > { %v5849_v21 = vpop.f32.mrf.mxu0  ;;  %v13063_v53 = vadd.f32 %v6414_v7, %v5848_v27  ;;  %v11037_v27 = vld [vmem:[#allocation11 + $0xf4] sm:$0xf0]  ;;  %v10155_v7 = vld [vmem:[#allocation11 + $0x68] sm:$0xf0] }
 0x45c   : > { %v13059_v54 = vadd.f32 %v5849_v21, %v13004_v47  ;;  %7081 = vmatpush.bf16.msrb.mxu3 %v10162_v24  ;;  %v13068_v13 = vpop.f32.mrf.mxu1  ;;  %6726 = vmatpush.bf16.msrb.mxu2 %v10046_v9  ;;  %v10226_v51 = vor.u32 %v11037_v27, %v10225_v41  ;;  %v10166_v21 = vor.u32 %v11020_v60, %v10163_v42  ;;  %v11018_v24 = vld [vmem:[#allocation11 + $0x64] sm:$0xf]  ;;  %v10209_v9 = vld [vmem:[#allocation11 + $0xd0] sm:$0xf]  ;;  %v11045_v42 = vld [vmem:[#allocation11 + $0x134] sm:$0xf0] }
 0x45d   : > { %v10210_v36 = vor.u32 %v11033_v8, %v10209_v9  ;;  %v10129_v27 = vld [vmem:[#allocation11 + $0x30] sm:$0xf] }
 0x45e   : > { %7094 = vmatpush.bf16.msra.mxu0 %v10226_v51  ;;  %v11013_v51 = vld [vmem:[#allocation11 + $0x34] sm:$0xf0]  ;;  %v10257_v60 = vld [vmem:[#allocation11 + $0x130] sm:$0xf] }
 0x45f   : > { %v10113_v9 = vld [vmem:[#allocation11 + $0x10] sm:$0xf] }
 0x460   : > { %7082 = vmatpush.bf16.msrb.mxu3 %v10154_v59  ;;  %7120 = vmatpush.bf16.msra.mxu2 %v10166_v21  ;;  %v10258_v21 = vor.u32 %v11045_v42, %v10257_v60  ;;  %v10105_v60 = vld [vmem:[#allocation11] sm:$0xf]  ;;  %v11007_v42 = vld [vmem:[#allocation11 + $0x4] sm:$0xf0] }
 0x461   : > { %v5907_v29 = vpop.f32.mrf.mxu2 }
 0x462   : > { %v13066_v47 = vadd.f32 %v5907_v29, %v13000_v33  ;;  %v13073_v33 = vpop.f32.mrf.mxu3  ;;  %7095 = vmatpush.bf16.msra.mxu0 %v10218_v4  ;;  %v10158_v29 = vor.u32 %v11018_v24, %v10155_v7  ;;  %v10201_v4 = vld [vmem:[#allocation11 + $0xc0] sm:$0xf]  ;;  %7111 = vmatpush.bf16.msrb.mxu1 %v10258_v21  ;;  %v13112_v7 = vld [vmem:[%s11665_s24 + $0x30] sm:$0xff] }
 0x463   : > { %v5852_v11 = vpop.f32.mrf.mxu0  ;;  %v13126_v21 = vld [vmem:[%s11665_s24 + $0x3c] sm:$0xff] }
 0x464   : > { %v5853_v49 = vadd.f32 %v5852_v11, %v13010_v61  ;;  %v13078_v26 = vpop.f32.mrf.mxu1  ;;  %v13581_v11 = vld [vmem:[#allocation44_spill] sm:$0xff]  ;;  %7121 = vmatpush.bf16.msra.mxu2 %v10158_v29  ;;  %v6760_v29 = vunpack.c.l.bf16 %v13112_v7 }
 0x466   : > { %6563 = vmatmul.bf16.gmra.mxu0 %v13580_v52  ;;  %6621 = vmatmul.bf16.gmra.mxu2 %v13572_v20 }
 0x467   : > { %6650 = vmatmul.bf16.gmra.mxu3 %v13563_v37  ;;  %6708 = vmatmul.bf16.gmra.mxu1 %v13574_v22 }
 0x468   : > { %7096 = vmatpush.bf16.msra.mxu0 %v10210_v36 }
 0x469   : > { %v5910_v18 = vpop.f32.mrf.mxu2 }
 0x46a   : > { %v13076_v61 = vadd.f32 %v5910_v18, %v13006_v35  ;;  %v10146_v35 = vor.u32 %v11017_v25, %v10145_v48  ;;  %v6419_v28 = vpop.f32.mrf.mxu3  ;;  %v10130_v18 = vor.u32 %v11013_v51, %v10129_v27  ;;  %v11016_v48 = vld [vmem:[#allocation11 + $0x54] sm:$0xf]  ;;  %v10121_v25 = vld [vmem:[#allocation11 + $0x20] sm:$0xf]  ;;  %v10139_v27 = vld [vmem:[#allocation11 + $0x48] sm:$0xf0] }
 0x46b   : > { %v5854_v40 = vpop.f32.mrf.mxu0  ;;  %v13582_v51 = vld [vmem:[#allocation25_spill] sm:$0xff] }
 0x46c   : > { %v13081_v20 = vadd.f32 %v5854_v40, %v13016_v44  ;;  %7083 = vmatpush.bf16.msrb.mxu3 %v10146_v35  ;;  %v13085_v44 = vadd.f32 %v6419_v28, %v5853_v49  ;;  %v13090_v3 = vpop.f32.mrf.mxu1  ;;  %v10138_v49 = vor.u32 %v11015_v12, %v10137_v5  ;;  %v10122_v35 = vor.u32 %v11011_v17, %v10121_v25  ;;  %v11031_v28 = vld [vmem:[#allocation11 + $0xc4] sm:$0xf0]  ;;  %v11029_v17 = vld [vmem:[#allocation11 + $0xb4] sm:$0xf0] }
 0x46d   : > { %v10106_v25 = vor.u32 %v11007_v42, %v10105_v60  ;;  %v11012_v60 = vld [vmem:[#allocation11 + $0x34] sm:$0xf]  ;;  %v10131_v42 = vld [vmem:[#allocation11 + $0x38] sm:$0xf0] }
 0x470   : > { %7084 = vmatpush.bf16.msrb.mxu3 %v10138_v49  ;;  %v11009_v49 = vld [vmem:[#allocation11 + $0x14] sm:$0xf0] }
 0x471   : > { %v5912_v34 = vpop.f32.mrf.mxu2  ;;  %v10114_v36 = vor.u32 %v11009_v49, %v10113_v9  ;;  %v13138_v49 = vld [vmem:[%s11665_s24 + $0x54] sm:$0xff] }
 0x472   : > { %v13088_v55 = vadd.f32 %v5912_v34, %v13012_v56  ;;  %v13095_v56 = vpop.f32.mrf.mxu3  ;;  %v13106_v34 = vld [vmem:[%s11665_s24 + $0x24] sm:$0xff] }
 0x473   : > { %v5857_v37 = vpop.f32.mrf.mxu0 }
 0x474   : > { %v5858_v22 = vadd.f32 %v5857_v37, %v13022_v38  ;;  %v13100_v59 = vpop.f32.mrf.mxu1  ;;  %7085 = vmatpush.bf16.msrb.mxu3 %v10130_v18  ;;  %v6757_v37 = vunpack.c.l.bf16 %v13106_v34 }
 0x476   : > { %6568 = vmatmul.bf16.gmra.mxu0 %v13581_v11  ;;  %6626 = vmatmul.bf16.gmra.mxu2 %v13575_v1 }
 0x477   : > { %6655 = vmatmul.bf16.gmra.mxu3 %v13565_v31  ;;  %6713 = vmatmul.bf16.gmra.mxu1 %v13577_v6 }
 0x478   : > { %7086 = vmatpush.bf16.msrb.mxu3 %v10122_v35 }
 0x479   : > { %v5915_v41 = vpop.f32.mrf.mxu2 }
 0x47a   : > { %v13098_v38 = vadd.f32 %v5915_v41, %v13018_v50  ;;  %v10147_v50 = vld [vmem:[#allocation11 + $0x58] sm:$0xf0]  ;;  %v6424_v24 = vpop.f32.mrf.mxu3 }
 0x47b   : > { %v5859_v1 = vpop.f32.mrf.mxu0  ;;  %v10150_v23 = vor.u32 %v11016_v48, %v10147_v50  ;;  %v13109_v6 = vadd.f32 %v6424_v24, %v5858_v22  ;;  %v11014_v22 = vld [vmem:[#allocation11 + $0x44] sm:$0xf]  ;;  %v10193_v48 = vld [vmem:[#allocation11 + $0xb0] sm:$0xf]  ;;  %v6763_v50 = vunpack.c.l.bf16 %v13126_v21 }
 0x47c   : > { %v5860_v40 = vadd.f32 %v5859_v1, %v13029_v0  ;;  %v10202_v0 = vor.u32 %v11031_v28, %v10201_v4  ;;  %v13118_v12 = vpop.f32.mrf.mxu1  ;;  %v6774_v1 = vadd.f32 %v13582_v51, %v6757_v37  ;;  %v10142_v18 = vor.u32 %v11014_v22, %v10139_v27  ;;  %7087 = vmatpush.bf16.msrb.mxu3 %v10114_v36 }
 0x47d   : > { %7122 = vmatpush.bf16.msra.mxu2 %v10150_v23  ;;  %v11036_v23 = vld [vmem:[#allocation11 + $0xf4] sm:$0xf]  ;;  %v6412_v37 = vadd.f32 %v13051_v10, %v13037_v39  ;;  %v11034_v39 = vld [vmem:[#allocation11 + $0xe4] sm:$0xf]  ;;  %v10219_v10 = vld [vmem:[#allocation11 + $0xe8] sm:$0xf0] }
 0x47e   : > { %7097 = vmatpush.bf16.msra.mxu0 %v10202_v0 }
 0x480   : > { %7088 = vmatpush.bf16.msrb.mxu3 %v10106_v25  ;;  %v6758_v25 = vunpack.c.h.bf16 %v13106_v34 }
 0x481   : > { %v5917_v31 = vpop.f32.mrf.mxu2  ;;  %7123 = vmatpush.bf16.msra.mxu2 %v10142_v18  ;;  %v10222_v18 = vor.u32 %v11034_v39, %v10219_v10 }
 0x482   : > { %v13116_v5 = vadd.f32 %v5917_v31, %v13024_v30  ;;  %v6426_v35 = vpop.f32.mrf.mxu3 }
 0x483   : > { %v6438_v8 = vpop.f32.mrf.mxu0  ;;  %v13135_v24 = vadd.f32 %v6426_v35, %v5860_v40  ;;  %v10249_v40 = vld [vmem:[#allocation11 + $0x120] sm:$0xf]  ;;  %v10211_v35 = vld [vmem:[#allocation11 + $0xd8] sm:$0xf0] }
 0x484   : > { %v6439_v41 = vadd.f32 %v6438_v8, %v13041_v45  ;;  %v6775_v45 = vadd.f32 %v6774_v1, %v6760_v29  ;;  %v6583_v9 = vpop.f32.mrf.mxu1  ;;  %v6769_v8 = vunpack.c.l.bf16 %v13138_v49 }
 0x485   : > { %v13142_v27 = vadd.f32 %v6583_v9, %v13032_v43 }
 0x486   : > { %6669 = vmatmul.bf16.vlgmr.msrb.gmra.mxu0 %v13567_v19  ;;  %6727 = vmatmul.bf16.vlgmr.msrb.gmra.mxu2 %v13578_v63  ;;  %v6468_v30 = vadd.f32 %v13034_v57, %v6439_v41  ;;  %v10227_v19 = vld [vmem:[#allocation11 + $0xf8] sm:$0xf0]  ;;  %v10194_v63 = vor.u32 %v11029_v17, %v10193_v48  ;;  %v13130_v57 = vld [vmem:[%s11665_s24 + $0x48] sm:$0xff]  ;;  %v6776_v0 = vadd.f32 %v6775_v45, %v6763_v50  ;;  %v11468_v41 = vmov 64.0   ;;  %v10185_v45 = vld [vmem:[#allocation11 + $0xa0] sm:$0xf] }
 0x487   : > { %v10230_v4 = vor.u32 %v11036_v23, %v10227_v19  ;;  %v6766_v28 = vunpack.c.l.bf16 %v13130_v57  ;;  %11188 = vrcp.f32 %v11468_v41  ;;  %v10134_v50 = vor.u32 %v11012_v60, %v10131_v42  ;;  %v11027_v17 = vld [vmem:[#allocation11 + $0xa4] sm:$0xf0]  ;;  %v11032_v23 = vld [vmem:[#allocation11 + $0xd4] sm:$0xf]  ;;  %v10123_v42 = vld [vmem:[#allocation11 + $0x28] sm:$0xf0] }
 0x488   : > { %7098 = vmatpush.bf16.msra.mxu0 %v10194_v63  ;;  %v10186_v19 = vor.u32 %v11027_v17, %v10185_v45 }
 0x489   : > { %v6496_v31 = vpop.f32.mrf.mxu2  ;;  %v6777_v36 = vadd.f32 %v6776_v0, %v6766_v28  ;;  %7133 = vmatpush.bf16.msra.mxu3 %v10230_v4  ;;  %v10214_v0 = vor.u32 %v11032_v23, %v10211_v35  ;;  %7124 = vmatpush.bf16.msra.mxu2 %v10134_v50  ;;  %v11025_v23 = vld [vmem:[#allocation11 + $0x94] sm:$0xf0] }
 0x48a   : > { %v6497_v29 = vadd.f32 %v6496_v31, %v6468_v30  ;;  %v11043_v30 = vld [vmem:[#allocation11 + $0x124] sm:$0xf0]  ;;  %v6525_v28 = vpop.f32.mrf.mxu3 }
 0x48b   : > { %v6440_v22 = vpop.f32.mrf.mxu0  ;;  %v6778_v1 = vadd.f32 %v6777_v36, %v6769_v8  ;;  %v10250_v48 = vor.u32 %v11043_v30, %v10249_v40  ;;  %v11030_v40 = vld [vmem:[#allocation11 + $0xc4] sm:$0xf]  ;;  %v13583_v30 = vld [vmem:[#allocation26_spill] sm:$0xff] }
 0x48c   : > { %v6441_v51 = vadd.f32 %v6440_v22, %v6412_v37  ;;  %v13146_v31 = vadd.f32 %v6525_v28, %v6497_v29  ;;  %7099 = vmatpush.bf16.msra.mxu0 %v10186_v19  ;;  %v6585_v41 = vpop.f32.mrf.mxu1  ;;  %v10203_v29 = vld [vmem:[#allocation11 + $0xc8] sm:$0xf0]  ;;  %v6787_v60 = vadd.f32 %v13583_v30, %v6758_v25  ;;  %v11028_v25 = vld [vmem:[#allocation11 + $0xb4] sm:$0xf]  ;;  %v6764_v28 = vunpack.c.h.bf16 %v13126_v21 }
 0x48d   : > { %v6779_v43 = vrot.slane %v6778_v1, 4  ;;  %v11189_v63 = vpop.eup %11188  ;;  %7134 = vmatpush.bf16.msra.mxu3 %v10222_v18  ;;  %7112 = vmatpush.bf16.msrb.mxu1 %v10250_v48  ;;  %v13149_v39 = vadd.f32 %v6585_v41, %v13044_v62  ;;  %v11010_v18 = vld [vmem:[#allocation11 + $0x24] sm:$0xf]  ;;  %v6417_v21 = vadd.f32 %v13073_v33, %v13059_v54 }
 0x48e   : > { %v6470_v4 = vadd.f32 %v13046_v58, %v6441_v51  ;;  %v6820_v8 = vmul.f32 64.0, %v11189_v63  ;;  %v6761_v58 = vunpack.c.h.bf16 %v13112_v7  ;;  %v10126_v45 = vor.u32 %v11010_v18, %v10123_v42  ;;  %v13584_v7 = vld [vmem:[#allocation27_spill] sm:$0xff] }
 0x48f   : > { %v6780_v9 = vadd.f32 %v6779_v43, %v6778_v1  ;;  %v10206_v1 = vor.u32 %v11030_v40, %v10203_v29  ;;  %v6813_v17 = vrot.slane %v13584_v7, 4  ;;  %vm6824_vm3 = vweird.f32 %v11189_v63 }
 0x490   : > { %v6821_v10 = vsub.f32 1.0, %v6820_v8  ;;  %7125 = vmatpush.bf16.msra.mxu2 %v10126_v45 }
 0x491   : > { %v6498_v37 = vpop.f32.mrf.mxu2  ;;  %v6781_v34 = vrot.slane %v6780_v9, 2  ;;  %7135 = vmatpush.bf16.msra.mxu3 %v10214_v0 }
 0x492   : > { %v6499_v36 = vadd.f32 %v6498_v37, %v6470_v4  ;;  %v6822_v50 = vmul.f32 %v11189_v63, %v6821_v10  ;;  %v10195_v4 = vld [vmem:[#allocation11 + $0xb8] sm:$0xf0]  ;;  %v6527_v0 = vpop.f32.mrf.mxu3  ;;  %v6788_v37 = vadd.f32 %v6787_v60, %v6761_v58  ;;  %v10187_v60 = vld [vmem:[#allocation11 + $0xa8] sm:$0xf0] }
 0x493   : > { %v6443_v22 = vpop.f32.mrf.mxu0  ;;  %v6782_v48 = vadd.f32 %v6781_v34, %v6780_v9 }
 0x494   : > { %v6444_v51 = vadd.f32 %v6443_v22, %v13063_v53  ;;  %v10177_v53 = vld [vmem:[#allocation11 + $0x90] sm:$0xf]  ;;  %v6823_v35 = vadd.f32 %v11189_v63, %v6822_v50  ;;  %v13161_v8 = vadd.f32 %v6527_v0, %v6499_v36  ;;  %v6588_v10 = vpop.f32.mrf.mxu1  ;;  %v6789_v40 = vadd.f32 %v6788_v37, %v6764_v28  ;;  %v11008_v50 = vld [vmem:[#allocation11 + $0x14] sm:$0xf] }
 0x495   : > { %v6783_v19 = vrot.slane %v6782_v48, 1  ;;  %v10178_v43 = vor.u32 %v11025_v23, %v10177_v53  ;;  %7136 = vmatpush.bf16.msra.mxu3 %v10206_v1  ;;  %v13169_v18 = vadd.f32 %v6588_v10, %v13054_v46  ;;  %v6770_v36 = vunpack.c.h.bf16 %v13138_v49  ;;  %v10241_v1 = vld [vmem:[#allocation11 + $0x110] sm:$0xf]  ;;  %v11023_v53 = vld [vmem:[#allocation11 + $0x84] sm:$0xf0] }
 0x496   : > { %6674 = vmatmul.bf16.gmra.mxu0 %v13570_v2  ;;  %6732 = vmatmul.bf16.gmra.mxu2 %v13579_v15  ;;  %v6473_v62 = vadd.f32 %v13056_v32, %v6444_v51  ;;  %v6814_v2 = vadd.f32 %v6813_v17, %v13584_v7  ;;  %v10198_v15 = vor.u32 %v11028_v25, %v10195_v4  ;;  %v6767_v32 = vunpack.c.h.bf16 %v13130_v57  ;;  %v10169_v17 = vld [vmem:[#allocation11 + $0x80] sm:$0xf]  ;;  %v11024_v23 = vld [vmem:[#allocation11 + $0x94] sm:$0xf]  ;;  %v11006_v10 = vld [vmem:[#allocation11 + $0x4] sm:$0xf] }
 0x497   : > { %v6784_v41 = vadd.f32 %v6783_v19, %v6782_v48  ;;  %v13164_v22 = vsel %vm6824_vm3, %v11189_v63, %v6823_v35  ;;  %7100 = vmatpush.bf16.msra.mxu0 %v10178_v43  ;;  %v11026_v63 = vld [vmem:[#allocation11 + $0xa4] sm:$0xf]  ;;  %v11041_v48 = vld [vmem:[#allocation11 + $0x114] sm:$0xf0]  ;;  %v10170_v49 = vor.u32 %v11023_v53, %v10169_v17  ;;  %v10179_v19 = vld [vmem:[#allocation11 + $0x98] sm:$0xf0] }
 0x498   : > { %v6815_v51 = vrot.slane %v6814_v2, 2  ;;  %v6790_v42 = vadd.f32 %v6789_v40, %v6767_v32  ;;  %v10190_v33 = vor.u32 %v11026_v63, %v10187_v60  ;;  %v10242_v46 = vor.u32 %v11041_v48, %v10241_v1  ;;  %v11022_v40 = vld [vmem:[#allocation11 + $0x84] sm:$0xf]  ;;  %v10251_v17 = vld [vmem:[#allocation11 + $0x128] sm:$0xf0] }
 0x499   : > { %v6501_v9 = vpop.f32.mrf.mxu2  ;;  %v6826_v57 = vmul.f32 %v13164_v22, %v6784_v41  ;;  %7137 = vmatpush.bf16.msra.mxu3 %v10198_v15  ;;  %v10182_v4 = vor.u32 %v11024_v23, %v10179_v19 }
 0x49a   : > { %v6502_v34 = vadd.f32 %v6501_v9, %v6473_v62  ;;  %v6816_v30 = vadd.f32 %v6815_v51, %v6814_v2  ;;  %v10115_v62 = vld [vmem:[#allocation11 + $0x18] sm:$0xf0]  ;;  %v6791_v35 = vadd.f32 %v6790_v42, %v6770_v36  ;;  %v6530_v43 = vpop.f32.mrf.mxu3  ;;  %7113 = vmatpush.bf16.msrb.mxu1 %v10242_v46  ;;  %v10107_v51 = vld [vmem:[#allocation11 + $0x8] sm:$0xf0]  ;;  %v10233_v36 = vld [vmem:[#allocation11 + $0x100] sm:$0xf] }
 0x49b   : > { %v6445_v29 = vpop.f32.mrf.mxu0  ;;  %v13173_v54 = vpack.c.bf16 %v6826_v57, %v6826_v57  ;;  %v10118_v7 = vor.u32 %v11008_v50, %v10115_v62  ;;  %7101 = vmatpush.bf16.msra.mxu0 %v10170_v49  ;;  %v10171_v57 = vld [vmem:[#allocation11 + $0x88] sm:$0xf0]  ;;  %v10259_v42 = vld [vmem:[#allocation11 + $0x138] sm:$0xf0] }
 0x49c   : > { %v6446_v58 = vadd.f32 %v6445_v29, %v6417_v21  ;;  %v6817_v45 = vrot.slane %v6816_v30, 1  ;;  %v13176_v0 = vadd.f32 %v6530_v43, %v6502_v34  ;;  %v6792_v2 = vrot.slane %v6791_v35, 4  ;;  %v6590_v15 = vpop.f32.mrf.mxu1  ;;  %v11040_v43 = vld [vmem:[#allocation11 + $0x114] sm:$0xf] }
 0x49d   : > { %7089 = vmatmul.bf16.vlgmr.msrb.gmra.mxu3 %v13173_v54  ;;  %7126 = vmatpush.bf16.msra.mxu2 %v10118_v7  ;;  %v13179_v37 = vadd.f32 %v6590_v15, %v13066_v47  ;;  %v10110_v29 = vor.u32 %v11006_v10, %v10107_v51  ;;  %v10174_v63 = vor.u32 %v11022_v40, %v10171_v57  ;;  %v11042_v7 = vld [vmem:[#allocation11 + $0x124] sm:$0xf] }
 0x49e   : > { %v6818_v25 = vadd.f32 %v6817_v45, %v6816_v30  ;;  %7138 = vmatpush.bf16.msra.mxu3 %v10190_v33  ;;  %v6793_v41 = vadd.f32 %v6792_v2, %v6791_v35  ;;  %v6475_v34 = vadd.f32 %v13068_v13, %v6446_v58  ;;  %v11039_v30 = vld [vmem:[#allocation11 + $0x104] sm:$0xf0]  ;;  %v10254_v23 = vor.u32 %v11042_v7, %v10251_v17 }
 0x49f   : > { %v10234_v60 = vor.u32 %v11039_v30, %v10233_v36 }
 0x4a0   : > { %v6828_v9 = vmul.f32 %v13164_v22, %v6818_v25  ;;  %v6794_v1 = vrot.slane %v6793_v41, 2  ;;  %v10243_v25 = vld [vmem:[#allocation11 + $0x118] sm:$0xf0] }
 0x4a1   : > { %v6503_v28 = vpop.f32.mrf.mxu2  ;;  %7127 = vmatpush.bf16.msra.mxu2 %v10110_v29  ;;  %7114 = vmatpush.bf16.msrb.mxu1 %v10234_v60 }
 0x4a2   : > { %7139 = vmatpush.bf16.msra.mxu3 %v10182_v4  ;;  %v6504_v33 = vadd.f32 %v6503_v28, %v6475_v34  ;;  %v13187_v50 = vpack.c.bf16 %v6828_v9, %v6828_v9  ;;  %v6532_v13 = vpop.f32.mrf.mxu3  ;;  %v6795_v58 = vadd.f32 %v6794_v1, %v6793_v41  ;;  %v10246_v4 = vor.u32 %v11040_v43, %v10243_v25  ;;  %v11038_v41 = vld [vmem:[#allocation11 + $0x104] sm:$0xf] }
 0x4a3   : > { %v6448_v32 = vpop.f32.mrf.mxu0 }
 0x4a4   : > { %v6449_v21 = vadd.f32 %v6448_v32, %v13085_v44  ;;  %v11044_v44 = vld [vmem:[#allocation11 + $0x134] sm:$0xf]  ;;  %v6593_v45 = vpop.f32.mrf.mxu1  ;;  %v6796_v46 = vrot.slane %v6795_v58, 1  ;;  %10263 = vmatmul.msk.bf16.vlgmr.msrb.gmra.mxu1 %vm1296_vm0, %v13187_v50 }
 0x4a5   : > { %v10262_v48 = vor.u32 %v11044_v44, %v10259_v42  ;;  %v13194_v49 = vadd.f32 %v6593_v45, %v13076_v61 }
 0x4a6   : > { %6679 = vmatmul.bf16.gmra.mxu0 %v13573_v16  ;;  %6737 = vmatmul.bf16.gmra.mxu2 %v13580_v52  ;;  %v6478_v47 = vadd.f32 %v13078_v26, %v6449_v21  ;;  %v13189_v16 = vadd.f32 %v6532_v13, %v6504_v33  ;;  %v6422_v52 = vadd.f32 %v13095_v56, %v13081_v20  ;;  %v10235_v21 = vld [vmem:[#allocation11 + $0x108] sm:$0xf0] }
 0x4a7   : > { %7140 = vmatpush.bf16.msra.mxu3 %v10174_v63  ;;  %7150 = vmatpush.bf16.msrb.mxu0 %v10262_v48  ;;  %v6797_v35 = vadd.f32 %v6796_v46, %v6795_v58  ;;  %v10238_v40 = vor.u32 %v11038_v41, %v10235_v21 }
 0x4a9   : > { %v6506_v62 = vpop.f32.mrf.mxu2  ;;  %v6827_v56 = vmul.f32 %v13164_v22, %v6797_v35 }
 0x4aa   : > { %v6507_v26 = vadd.f32 %v6506_v62, %v6478_v47  ;;  %v6535_v28 = vpop.f32.mrf.mxu3 }
 0x4ab   : > { %v6450_v53 = vpop.f32.mrf.mxu0  ;;  %7151 = vmatpush.bf16.msrb.mxu0 %v10254_v23  ;;  %v6830_v2 = vpack.c.bf16 %v6827_v56, %v6827_v56 }
 0x4ac   : > { %v6451_v19 = vadd.f32 %v6450_v53, %v6422_v52  ;;  %v6536_v32 = vadd.f32 %v6535_v28, %v6507_v26  ;;  %v6595_v9 = vpop.f32.mrf.mxu1 }
 0x4ad   : > { %7141 = vmatmul.bf16.vlgmr.msra.gmra.mxu3 %v6830_v2  ;;  %v13201_v51 = vadd.f32 %v6595_v9, %v13088_v55 }
 0x4ae   : > { %v6480_v20 = vadd.f32 %v13090_v3, %v6451_v19 }
 0x4af   : > { %7152 = vmatpush.bf16.msrb.mxu0 %v10246_v4 }
 0x4b1   : > { %v6508_v15 = vpop.f32.mrf.mxu2 }
 0x4b2   : > { %v6509_v61 = vadd.f32 %v6508_v15, %v6480_v20  ;;  %v6537_v22 = vpop.f32.mrf.mxu3 }
 0x4b3   : > { %v6453_v10 = vpop.f32.mrf.mxu0  ;;  %7153 = vmatpush.bf16.msrb.mxu0 %v10238_v40 }
 0x4b4   : > { %v6454_v34 = vadd.f32 %v6453_v10, %v13109_v6  ;;  %v6538_v57 = vadd.f32 %v6537_v22, %v6509_v61  ;;  %v6598_v30 = vpop.f32.mrf.mxu1 }
 0x4b5   : > { %v6599_v63 = vadd.f32 %v6598_v30, %v13098_v38 }
 0x4b6   : > { %6684 = vmatmul.bf16.gmra.mxu0 %v13576_v14  ;;  %6742 = vmatmul.bf16.gmra.mxu2 %v13581_v11  ;;  %v6483_v3 = vadd.f32 %v13100_v59, %v6454_v34 }
 0x4b9   : > { %v6511_v29 = vpop.f32.mrf.mxu2 }
 0x4ba   : > { %v6512_v36 = vadd.f32 %v6511_v29, %v6483_v3  ;;  %v6540_v6 = vpop.f32.mrf.mxu3 }
 0x4bb   : > { %v6455_v47 = vpop.f32.mrf.mxu0 }
 0x4bc   : > { %v6456_v55 = vadd.f32 %v6455_v47, %v13135_v24  ;;  %v6541_v44 = vadd.f32 %v6540_v6, %v6512_v36  ;;  %v6600_v42 = vpop.f32.mrf.mxu1 }
 0x4bd   : > { %v6601_v59 = vadd.f32 %v6600_v42, %v13116_v5 }
 0x4be   : > { %v6485_v60 = vadd.f32 %v13118_v12, %v6456_v55 }
 0x4c1   : > { %v6513_v1 = vpop.f32.mrf.mxu2 }
 0x4c2   : > { %v6514_v14 = vadd.f32 %v6513_v1, %v6485_v60  ;;  %v6542_v48 = vpop.f32.mrf.mxu3 }
 0x4c3   : > { %v6554_v11 = vpop.f32.mrf.mxu0 }
 0x4c4   : > { %v13212_v33 = vadd.f32 %v6554_v11, %v13146_v31  ;;  %v6543_v38 = vadd.f32 %v6542_v48, %v6514_v14  ;;  %v10323_v11 = vld [vmem:[#allocation12 + $0x70] sm:$0xf]  ;;  %v11061_v48 = vld [vmem:[#allocation12 + $0x74] sm:$0xf0] }
 0x4c6   : > { %7102 = vmatmul.bf16.vlgmr.msra.gmra.mxu0 %v6830_v2  ;;  %7128 = vmatmul.bf16.vlgmr.msra.gmra.mxu2 %v13173_v54 }
 0x4c9   : > { %v6612_v13 = vpop.f32.mrf.mxu2 }
 0x4ca   : > { %v6613_v24 = vadd.f32 %v6612_v13, %v13142_v27  ;;  %v6641_v62 = vpop.f32.mrf.mxu3  ;;  %v6699_v27 = vpop.f32.mrf.mxu1  ;;  %v10324_v13 = vor.u32 %v11061_v48, %v10323_v11  ;;  %v10379_v11 = vld [vmem:[#allocation12 + $0xe0] sm:$0xf] }
 0x4cb   : > { %v6556_v12 = vpop.f32.mrf.mxu0 }
 0x4cc   : > { %v13217_v58 = vadd.f32 %v6556_v12, %v13161_v8  ;;  %v6642_v26 = vadd.f32 %v6641_v62, %v6613_v24  ;;  %v10325_v24 = vld [vmem:[#allocation12 + $0x78] sm:$0xf0]  ;;  %7355 = vmatpush.bf16.msra.mxu1 %v10324_v13  ;;  %v10381_v13 = vld [vmem:[#allocation12 + $0xe8] sm:$0xf0] }
 0x4d1   : > { %v6614_v52 = vpop.f32.mrf.mxu2 }
 0x4d2   : > { %v6615_v5 = vadd.f32 %v6614_v52, %v13149_v39  ;;  %v6643_v54 = vpop.f32.mrf.mxu3  ;;  %v6701_v43 = vpop.f32.mrf.mxu1 }
 0x4d3   : > { %v6559_v45 = vpop.f32.mrf.mxu0 }
 0x4d4   : > { %v13221_v31 = vadd.f32 %v6559_v45, %v13176_v0  ;;  %v6644_v7 = vadd.f32 %v6643_v54, %v6615_v5  ;;  %v11059_v5 = vld [vmem:[#allocation12 + $0x64] sm:$0xf0]  ;;  %v11058_v45 = vld [vmem:[#allocation12 + $0x64] sm:$0xf] }
 0x4d6   : > { %10264 = vmatmul.msk.bf16.vlgmr.msrb.gmra.mxu0 %vm1296_vm0, %v13187_v50 }
 0x4d9   : > { %v6617_v46 = vpop.f32.mrf.mxu2 }
 0x4da   : > { %v6618_v17 = vadd.f32 %v6617_v46, %v13169_v18  ;;  %v6646_v23 = vpop.f32.mrf.mxu3 }
 0x4db   : > { %v6561_v8 = vpop.f32.mrf.mxu0 }
 0x4dc   : > { %v13227_v53 = vadd.f32 %v6561_v8, %v13189_v16  ;;  %v6647_v39 = vadd.f32 %v6646_v23, %v6618_v17  ;;  %v6704_v16 = vpop.f32.mrf.mxu1  ;;  %v10307_v8 = vld [vmem:[#allocation12 + $0x50] sm:$0xf]  ;;  %v11057_v23 = vld [vmem:[#allocation12 + $0x54] sm:$0xf0] }
 0x4e1   : > { %v6619_v19 = vpop.f32.mrf.mxu2 }
 0x4e2   : > { %v6620_v35 = vadd.f32 %v6619_v19, %v13179_v37  ;;  %v6648_v50 = vpop.f32.mrf.mxu3  ;;  %v11056_v19 = vld [vmem:[#allocation12 + $0x54] sm:$0xf] }
 0x4e3   : > { %v6564_v0 = vpop.f32.mrf.mxu0 }
 0x4e4   : > { %v13230_v25 = vadd.f32 %v6564_v0, %v6536_v32  ;;  %v13232_v20 = vadd.f32 %v6648_v50, %v6620_v35  ;;  %v13242_v32 = vpop.f32.mrf.mxu1  ;;  %v10308_v35 = vor.u32 %v11057_v23, %v10307_v8  ;;  %v10309_v0 = vld [vmem:[#allocation12 + $0x58] sm:$0xf0]  ;;  %v10371_v23 = vld [vmem:[#allocation12 + $0xd0] sm:$0xf] }
 0x4e9   : > { %v6622_v4 = vpop.f32.mrf.mxu2 }
 0x4ea   : > { %v6623_v56 = vadd.f32 %v6622_v4, %v13194_v49  ;;  %v6651_v2 = vpop.f32.mrf.mxu3  ;;  %v10312_v4 = vor.u32 %v11056_v19, %v10309_v0  ;;  %v11073_v19 = vld [vmem:[#allocation12 + $0xd4] sm:$0xf0] }
 0x4eb   : > { %v6566_v18 = vpop.f32.mrf.mxu0  ;;  %v10372_v0 = vor.u32 %v11073_v19, %v10371_v23 }
 0x4ec   : > { %v13235_v28 = vadd.f32 %v6566_v18, %v6538_v57  ;;  %v13237_v61 = vadd.f32 %v6651_v2, %v6623_v56  ;;  %v13250_v36 = vpop.f32.mrf.mxu1  ;;  %v10299_v2 = vld [vmem:[#allocation12 + $0x40] sm:$0xf] }
 0x4f1   : > { %v6624_v15 = vpop.f32.mrf.mxu2 }
 0x4f2   : > { %v6625_v37 = vadd.f32 %v6624_v15, %v13201_v51  ;;  %v6653_v21 = vpop.f32.mrf.mxu3  ;;  %v11055_v15 = vld [vmem:[#allocation12 + $0x44] sm:$0xf0] }
 0x4f3   : > { %v6569_v9 = vpop.f32.mrf.mxu0 }
 0x4f4   : > { %v13240_v41 = vadd.f32 %v6569_v9, %v6541_v44  ;;  %v13244_v40 = vadd.f32 %v6653_v21, %v6625_v37  ;;  %v13256_v14 = vpop.f32.mrf.mxu1  ;;  %v10300_v37 = vor.u32 %v11055_v15, %v10299_v2  ;;  %v11054_v9 = vld [vmem:[#allocation12 + $0x44] sm:$0xf]  ;;  %v10301_v21 = vld [vmem:[#allocation12 + $0x48] sm:$0xf0] }
 0x4f9   : > { %v6627_v10 = vpop.f32.mrf.mxu2 }
 0x4fa   : > { %v6628_v49 = vadd.f32 %v6627_v10, %v6599_v63  ;;  %v6656_v22 = vpop.f32.mrf.mxu3 }
 0x4fb   : > { %v6571_v34 = vpop.f32.mrf.mxu0 }
 0x4fc   : > { %v13246_v3 = vadd.f32 %v6571_v34, %v6543_v38  ;;  %v13248_v57 = vadd.f32 %v6656_v22, %v6628_v49  ;;  %v11060_v38 = vld [vmem:[#allocation12 + $0x74] sm:$0xf]  ;;  %v10304_v49 = vor.u32 %v11054_v9, %v10301_v21  ;;  %v10387_v34 = vld [vmem:[#allocation12 + $0xf0] sm:$0xf]  ;;  %v11077_v22 = vld [vmem:[#allocation12 + $0xf4] sm:$0xf0] }
 0x4fd   : > { %v11049_v9 = vld [vmem:[#allocation12 + $0x14] sm:$0xf0]  ;;  %v11048_v21 = vld [vmem:[#allocation12 + $0x14] sm:$0xf] }
 0x501   : > { %v6629_v29 = vpop.f32.mrf.mxu2 }
 0x502   : > { %v6630_v51 = vadd.f32 %v6629_v29, %v6601_v59  ;;  %v6658_v60 = vpop.f32.mrf.mxu3  ;;  %v10328_v59 = vor.u32 %v11060_v38, %v10325_v24  ;;  %v11076_v29 = vld [vmem:[#allocation12 + $0xf4] sm:$0xf]  ;;  %v11074_v38 = vld [vmem:[#allocation12 + $0xe4] sm:$0xf] }
 0x503   : > { %v6670_v30 = vpop.f32.mrf.mxu0 }
 0x504   : > { %v6671_v47 = vadd.f32 %v6670_v30, %v6642_v26  ;;  %v13252_v6 = vadd.f32 %v6658_v60, %v6630_v51  ;;  %7381 = vmatpush.bf16.msra.mxu0 %v10328_v59  ;;  %v10315_v26 = vld [vmem:[#allocation12 + $0x60] sm:$0xf]  ;;  %v10389_v51 = vld [vmem:[#allocation12 + $0xf8] sm:$0xf0]  ;;  %v10291_v30 = vld [vmem:[#allocation12 + $0x30] sm:$0xf]  ;;  %v10384_v59 = vor.u32 %v11074_v38, %v10381_v13 }
 0x505   : > { %v10316_v46 = vor.u32 %v11059_v5, %v10315_v26  ;;  %v10392_v60 = vor.u32 %v11076_v29, %v10389_v51  ;;  %v10283_v5 = vld [vmem:[#allocation12 + $0x20] sm:$0xf]  ;;  %v11071_v29 = vld [vmem:[#allocation12 + $0xc4] sm:$0xf0]  ;;  %v11069_v38 = vld [vmem:[#allocation12 + $0xb4] sm:$0xf0] }
 0x506   : > { %v6700_v55 = vadd.f32 %v6699_v27, %v6671_v47  ;;  %v10317_v27 = vld [vmem:[#allocation12 + $0x68] sm:$0xf0]  ;;  %v11053_v47 = vld [vmem:[#allocation12 + $0x34] sm:$0xf0] }
 0x507   : > { %7356 = vmatpush.bf16.msra.mxu1 %v10316_v46  ;;  %7394 = vmatpush.bf16.msrb.mxu3 %v10392_v60  ;;  %v10267_v60 = vld [vmem:[#allocation12] sm:$0xf] }
 0x509   : > { %v6728_v1 = vpop.f32.mrf.mxu2 }
 0x50a   : > { %v13254_v44 = vadd.f32 %v6728_v1, %v6700_v55  ;;  %v10292_v1 = vor.u32 %v11053_v47, %v10291_v30  ;;  %v11070_v30 = vld [vmem:[#allocation12 + $0xc4] sm:$0xf]  ;;  %v10365_v47 = vld [vmem:[#allocation12 + $0xc8] sm:$0xf0] }
 0x50b   : > { %v6672_v63 = vpop.f32.mrf.mxu0  ;;  %7357 = vmatpush.bf16.msra.mxu1 %v10308_v35  ;;  %7395 = vmatpush.bf16.msrb.mxu3 %v10384_v59  ;;  %v11072_v35 = vld [vmem:[#allocation12 + $0xd4] sm:$0xf]  ;;  %v10357_v59 = vld [vmem:[#allocation12 + $0xb8] sm:$0xf0] }
 0x50c   : > { %v6673_v42 = vadd.f32 %v6672_v63, %v6644_v7  ;;  %v10320_v7 = vor.u32 %v11058_v45, %v10317_v27  ;;  %v11052_v63 = vld [vmem:[#allocation12 + $0x34] sm:$0xf]  ;;  %v11051_v45 = vld [vmem:[#allocation12 + $0x24] sm:$0xf0] }
 0x50d   : > { %v10284_v27 = vor.u32 %v11051_v45, %v10283_v5  ;;  %v11067_v45 = vld [vmem:[#allocation12 + $0xa4] sm:$0xf0] }
 0x50e   : > { %v6702_v12 = vadd.f32 %v6701_v43, %v6673_v42  ;;  %v13260_v43 = vpop.f32.mrf.mxu1  ;;  %7382 = vmatpush.bf16.msra.mxu0 %v10320_v7  ;;  %v10293_v42 = vld [vmem:[#allocation12 + $0x38] sm:$0xf0] }
 0x50f   : > { %7358 = vmatpush.bf16.msra.mxu1 %v10300_v37  ;;  %v10296_v48 = vor.u32 %v11052_v63, %v10293_v42  ;;  %v10275_v37 = vld [vmem:[#allocation12 + $0x10] sm:$0xf]  ;;  %v11046_v63 = vld [vmem:[#allocation12 + $0x4] sm:$0xf] }
 0x511   : > { %v6730_v62 = vpop.f32.mrf.mxu2 }
 0x512   : > { %v13258_v52 = vadd.f32 %v6730_v62, %v6702_v12  ;;  %7383 = vmatpush.bf16.msra.mxu0 %v10312_v4 }
 0x513   : > { %v6675_v54 = vpop.f32.mrf.mxu0  ;;  %7359 = vmatpush.bf16.msra.mxu1 %v10292_v1  ;;  %v11047_v1 = vld [vmem:[#allocation12 + $0x4] sm:$0xf0] }
 0x514   : > { %v6676_v17 = vadd.f32 %v6675_v54, %v6647_v39  ;;  %v11050_v54 = vld [vmem:[#allocation12 + $0x24] sm:$0xf] }
 0x516   : > { %v6705_v50 = vadd.f32 %v6704_v16, %v6676_v17  ;;  %v10388_v16 = vor.u32 %v11077_v22, %v10387_v34  ;;  %7384 = vmatpush.bf16.msra.mxu0 %v10304_v49  ;;  %v13266_v24 = vpop.f32.mrf.mxu1  ;;  %v10285_v17 = vld [vmem:[#allocation12 + $0x28] sm:$0xf0]  ;;  %v10276_v49 = vor.u32 %v11049_v9, %v10275_v37  ;;  %v10277_v34 = vld [vmem:[#allocation12 + $0x18] sm:$0xf0]  ;;  %v10363_v22 = vld [vmem:[#allocation12 + $0xc0] sm:$0xf] }
 0x517   : > { %v10288_v8 = vor.u32 %v11050_v54, %v10285_v17  ;;  %7360 = vmatpush.bf16.msra.mxu1 %v10284_v27  ;;  %v10364_v51 = vor.u32 %v11071_v29, %v10363_v22  ;;  %v11066_v54 = vld [vmem:[#allocation12 + $0xa4] sm:$0xf]  ;;  %v10341_v9 = vld [vmem:[#allocation12 + $0x98] sm:$0xf0]  ;;  %v10333_v22 = vld [vmem:[#allocation12 + $0x88] sm:$0xf0] }
 0x518   : > { %7368 = vmatpush.bf16.msrb.mxu2 %v10388_v16  ;;  %v10280_v16 = vor.u32 %v11048_v21, %v10277_v34  ;;  %v10331_v21 = vld [vmem:[#allocation12 + $0x80] sm:$0xf]  ;;  %v11062_v34 = vld [vmem:[#allocation12 + $0x84] sm:$0xf] }
 0x519   : > { %v6733_v56 = vpop.f32.mrf.mxu2 }
 0x51a   : > { %v13262_v18 = vadd.f32 %v6733_v56, %v6705_v50  ;;  %7385 = vmatpush.bf16.msra.mxu0 %v10296_v48  ;;  %v10373_v50 = vld [vmem:[#allocation12 + $0xd8] sm:$0xf0]  ;;  %v10269_v48 = vld [vmem:[#allocation12 + $0x8] sm:$0xf0] }
 0x51b   : > { %v6677_v39 = vpop.f32.mrf.mxu0  ;;  %v10376_v56 = vor.u32 %v11072_v35, %v10373_v50  ;;  %7361 = vmatpush.bf16.msra.mxu1 %v10276_v49  ;;  %v10272_v13 = vor.u32 %v11046_v63, %v10269_v48  ;;  %v6872_v50 = vld [vmem:[%s13377_s8] sm:$0x3] }
 0x51c   : > { %v6678_v10 = vadd.f32 %v6677_v39, %v13232_v20  ;;  %v11075_v20 = vld [vmem:[#allocation12 + $0xe4] sm:$0xf0] }
 0x51d   : > { %v10380_v12 = vor.u32 %v11075_v20, %v10379_v11  ;;  %7396 = vmatpush.bf16.msrb.mxu3 %v10376_v56  ;;  %v10268_v11 = vor.u32 %v11047_v1, %v10267_v60  ;;  %v10355_v20 = vld [vmem:[#allocation12 + $0xb0] sm:$0xf]  ;;  %v11065_v56 = vld [vmem:[#allocation12 + $0x94] sm:$0xf0] }
 0x51e   : > { %v6707_v55 = vadd.f32 %v13242_v32, %v6678_v10  ;;  %7386 = vmatpush.bf16.msra.mxu0 %v10288_v8 }
 0x51f   : > { %7369 = vmatpush.bf16.msrb.mxu2 %v10380_v12  ;;  %v11068_v12 = vld [vmem:[#allocation12 + $0xb4] sm:$0xf]  ;;  %7362 = vmatpush.bf16.msra.mxu1 %v10268_v11 }
 0x520   : > { %v13270_v32 = vpop.f32.mrf.mxu3  ;;  %v10360_v5 = vor.u32 %v11068_v12, %v10357_v59 }
 0x521   : > { %v6735_v62 = vpop.f32.mrf.mxu2  ;;  %v13274_v2 = vpop.f32.mrf.mxu1 }
 0x522   : > { %v13268_v26 = vadd.f32 %v6735_v62, %v6707_v55  ;;  %v10368_v55 = vor.u32 %v11070_v30, %v10365_v47  ;;  %7387 = vmatpush.bf16.msra.mxu0 %v10280_v16  ;;  %v10347_v62 = vld [vmem:[#allocation12 + $0xa0] sm:$0xf] }
 0x523   : > { %v6680_v46 = vpop.f32.mrf.mxu0  ;;  %7370 = vmatpush.bf16.msrb.mxu2 %v10372_v0 }
 0x524   : > { %v6681_v7 = vadd.f32 %v6680_v46, %v13237_v61  ;;  %7397 = vmatpush.bf16.msrb.mxu3 %v10368_v55  ;;  %v10349_v46 = vld [vmem:[#allocation12 + $0xa8] sm:$0xf0] }
 0x525   : > { %v10352_v23 = vor.u32 %v11066_v54, %v10349_v46 }
 0x526   : > { %v6710_v4 = vadd.f32 %v13250_v36, %v6681_v7  ;;  %7388 = vmatpush.bf16.msra.mxu0 %v10272_v13  ;;  %v10348_v7 = vor.u32 %v11067_v45, %v10347_v62 }
 0x527   : > { %7371 = vmatpush.bf16.msrb.mxu2 %v10364_v51  ;;  %v10336_v51 = vor.u32 %v11062_v34, %v10333_v22 }
 0x528   : > { %v7092_v61 = vpop.f32.mrf.mxu3  ;;  %7398 = vmatpush.bf16.msrb.mxu3 %v10360_v5 }
 0x529   : > { %v6738_v15 = vpop.f32.mrf.mxu2  ;;  %v7118_v27 = vpop.f32.mrf.mxu1 }
 0x52a   : > { %v13276_v39 = vadd.f32 %v6738_v15, %v6710_v4  ;;  %v10339_v4 = vld [vmem:[#allocation12 + $0x90] sm:$0xf]  ;;  %v11064_v15 = vld [vmem:[#allocation12 + $0x94] sm:$0xf] }
 0x52b   : > { %v6682_v10 = vpop.f32.mrf.mxu0  ;;  %v10340_v37 = vor.u32 %v11065_v56, %v10339_v4 }
 0x52c   : > { %v6683_v36 = vadd.f32 %v6682_v10, %v13244_v40  ;;  %v10356_v40 = vor.u32 %v11069_v38, %v10355_v20  ;;  %7399 = vmatpush.bf16.msrb.mxu3 %v10352_v23  ;;  %v11063_v10 = vld [vmem:[#allocation12 + $0x84] sm:$0xf0]  ;;  %v6875_v20 = vperm.slane %v6872_v50, 1 }
 0x52d   : > { %v10332_v29 = vor.u32 %v11063_v10, %v10331_v21 }
 0x52e   : > { %v6712_v42 = vadd.f32 %v13256_v14, %v6683_v36  ;;  %7372 = vmatpush.bf16.msrb.mxu2 %v10356_v40  ;;  %v6874_v36 = vperm.slane %v6872_v50, 0 }
 0x530   : > { %v7142_v35 = vpop.f32.mrf.mxu3  ;;  %v7091_v55 = vadd.f32 %v13270_v32, %v6874_v36 }
 0x531   : > { %v6740_v17 = vpop.f32.mrf.mxu2 }
 0x532   : > { %v13280_v14 = vadd.f32 %v6740_v17, %v6712_v42  ;;  %7373 = vmatpush.bf16.msrb.mxu2 %v10348_v7  ;;  %v7425_v7 = vld [vmem:[%s13379_s10] sm:$0x3] }
 0x533   : > { %v6685_v8 = vpop.f32.mrf.mxu0 }
 0x534   : > { %v6686_v19 = vadd.f32 %v6685_v8, %v13248_v57  ;;  %v10344_v57 = vor.u32 %v11064_v15, %v10341_v9 }
 0x536   : > { %v6715_v0 = vadd.f32 %v13260_v43, %v6686_v19  ;;  %7374 = vmatpush.bf16.msrb.mxu2 %v10340_v37  ;;  %7400 = vmatpush.bf16.msrb.mxu3 %v10344_v57 }
 0x538   : > { %v7144_v30 = vpop.f32.mrf.mxu3 }
 0x539   : > { %v6743_v61 = vpop.f32.mrf.mxu2  ;;  %v7428_v30 = vperm.slane %v7425_v7, 1 }
 0x53a   : > { %v13287_v49 = vadd.f32 %v6743_v61, %v6715_v0  ;;  %7375 = vmatpush.bf16.msrb.mxu2 %v10332_v29  ;;  %7401 = vmatpush.bf16.msrb.mxu3 %v10336_v51  ;;  %v7427_v0 = vperm.slane %v7425_v7, 0 }
 0x53b   : > { %v6687_v43 = vpop.f32.mrf.mxu0 }
 0x53c   : > { %v6688_v16 = vadd.f32 %v6687_v43, %v13252_v6 }
 0x53e   : > { %v6717_v47 = vadd.f32 %v13266_v24, %v6688_v16 }
 0x541   : > { %v6745_v60 = vpop.f32.mrf.mxu2 }
 0x542   : > { %v13292_v1 = vadd.f32 %v6745_v60, %v6717_v47 }
 0x543   : > { %v7103_v63 = vpop.f32.mrf.mxu0 }
 0x544   : > { %v7104_v42 = vadd.f32 %v7103_v63, %v7091_v55 }
 0x546   : > { %v7117_v11 = vadd.f32 %v13274_v2, %v7104_v42 }
 0x548   : > { %v7159_v48 = vmax.f32 %v7117_v11, 0.0 }
 0x549   : > { %v7129_v38 = vpop.f32.mrf.mxu2 }
 0x54a   : > { %v7161_v6 = vpack.c.bf16 %v7159_v48, %v7159_v48  ;;  %v7130_v40 = vadd.f32 %v7129_v38, %v6875_v20 }
 0x54b   : > { %v7105_v13 = vpop.f32.mrf.mxu0 }
 0x54c   : > { %7363 = vmatmul.bf16.vlgmr.msra.gmra.mxu1 %v7161_v6  ;;  %7389 = vmatmul.bf16.vlgmr.msra.gmra.mxu0 %v7161_v6  ;;  %v7143_v24 = vadd.f32 %v7142_v35, %v7130_v40 }
 0x551   : > { %v7131_v12 = vpop.f32.mrf.mxu2 }
 0x553   : > { %v7155_v59 = vpop.f32.mrf.mxu0 }
 0x554   : > { %v7156_v32 = vadd.f32 %v7155_v59, %v7143_v24 }
 0x556   : > { %v7160_v62 = vmax.f32 %v7156_v32, 0.0 }
 0x558   : > { %v7162_v5 = vpack.c.bf16 %v7160_v62, %v7160_v62 }
 0x55a   : > { %7376 = vmatmul.bf16.vlgmr.msrb.gmra.mxu2 %v7162_v5  ;;  %7402 = vmatmul.bf16.vlgmr.msrb.gmra.mxu3 %v7162_v5 }
 0x55b   : > { %v7157_v45 = vpop.f32.mrf.mxu0 }
 0x5c9   : > { %v7364_v2 = vpop.f32.mrf.mxu1  ;;  %v7390_v54 = vpop.f32.mrf.mxu0 }
 0x5d1   : > { %v7366_v46 = vpop.f32.mrf.mxu1  ;;  %v7392_v27 = vpop.f32.mrf.mxu0 }
 0x5dd   : > { %v7377_v17 = vpop.f32.mrf.mxu2  ;;  %v7403_v8 = vpop.f32.mrf.mxu3 }
 0x5de   : > { %v7378_v23 = vadd.f32 %v7377_v17, %v7364_v2  ;;  %v7404_v19 = vadd.f32 %v7403_v8, %v7390_v54 }
 0x5e0   : > { %v7407_v35 = vperm.slane %v7378_v23, 0  ;;  %v7408_v50 = vperm.slane %v7404_v19, 0 }
 0x5e2   : > { %v7409_v4 = vadd.f32 %v7407_v35, %v13212_v33  ;;  %v7411_v56 = vadd.f32 %v7407_v35, %v13217_v58  ;;  %v7413_v15 = vadd.f32 %v7407_v35, %v13221_v31  ;;  %v7415_v61 = vadd.f32 %v7407_v35, %v13227_v53 }
 0x5e3   : > { %v7417_v37 = vadd.f32 %v7407_v35, %v13230_v25  ;;  %v7419_v9 = vadd.f32 %v7407_v35, %v13235_v28  ;;  %v7421_v21 = vadd.f32 %v7407_v35, %v13240_v41  ;;  %v7423_v10 = vadd.f32 %v7407_v35, %v13246_v3 }
 0x5e4   : > { %v7431_v57 = vadd.f32 %v7427_v0, %v7409_v4  ;;  %v7433_v34 = vadd.f32 %v7427_v0, %v7411_v56  ;;  %v7435_v22 = vadd.f32 %v7427_v0, %v7413_v15  ;;  %v7437_v43 = vadd.f32 %v7427_v0, %v7415_v61 }
 0x5e5   : > { %v7439_v29 = vadd.f32 %v7427_v0, %v7417_v37  ;;  %v7441_v33 = vadd.f32 %v7427_v0, %v7419_v9  ;;  %v7443_v36 = vadd.f32 %v7427_v0, %v7421_v21  ;;  %v7379_v58 = vpop.f32.mrf.mxu2  ;;  %v7405_v16 = vpop.f32.mrf.mxu3  ;;  %v7445_v25 = vadd.f32 %v7427_v0, %v7423_v10 }
 0x5e6   : > { %v7447_v31 = vmax.f32 %v7431_v57, 0.0  ;;  %v7449_v51 = vmax.f32 %v7433_v34, 0.0  ;;  %v7451_v53 = vmax.f32 %v7435_v22, 0.0  ;;  %v7453_v47 = vmax.f32 %v7437_v43, 0.0 }
 0x5e7   : > { %v7455_v28 = vmax.f32 %v7439_v29, 0.0  ;;  %v7410_v41 = vadd.f32 %v7408_v50, %v13254_v44  ;;  %v7412_v3 = vadd.f32 %v7408_v50, %v13258_v52  ;;  %v7414_v55 = vadd.f32 %v7408_v50, %v13262_v18 }
 0x5e8   : > { %7463 = vst [vmem:[%s13309_s30] sm:$0xff] %v7447_v31  ;;  %v7416_v60 = vadd.f32 %v7408_v50, %v13268_v26  ;;  %v7457_v63 = vmax.f32 %v7441_v33, 0.0  ;;  %v7459_v42 = vmax.f32 %v7443_v36, 0.0  ;;  %v7418_v11 = vadd.f32 %v7408_v50, %v13276_v39 }
 0x5e9   : > { %7465 = vst [vmem:[%s13309_s30 + $0x10] sm:$0xff] %v7449_v51  ;;  %v7420_v48 = vadd.f32 %v7408_v50, %v13280_v14  ;;  %v7422_v44 = vadd.f32 %v7408_v50, %v13287_v49  ;;  %v7432_v20 = vadd.f32 %v7428_v30, %v7410_v41  ;;  %v7434_v52 = vadd.f32 %v7428_v30, %v7412_v3 }
 0x5ea   : > { %7467 = vst [vmem:[%s13309_s30 + $0x20] sm:$0xff] %v7451_v53  ;;  %v7436_v38 = vadd.f32 %v7428_v30, %v7414_v55  ;;  %v7461_v18 = vmax.f32 %v7445_v25, 0.0  ;;  %v7424_v26 = vadd.f32 %v7408_v50, %v13292_v1  ;;  %v7438_v6 = vadd.f32 %v7428_v30, %v7416_v60 }
 0x5eb   : > { %7469 = vst [vmem:[%s13309_s30 + $0x30] sm:$0xff] %v7453_v47  ;;  %v7440_v39 = vadd.f32 %v7428_v30, %v7418_v11  ;;  %v7448_v14 = vmax.f32 %v7432_v20, 0.0  ;;  %v7442_v13 = vadd.f32 %v7428_v30, %v7420_v48  ;;  %v7450_v49 = vmax.f32 %v7434_v52, 0.0 }
 0x5ec   : > { %7471 = vst [vmem:[%s13309_s30 + $0x40] sm:$0xff] %v7455_v28  ;;  %v7444_v40 = vadd.f32 %v7428_v30, %v7422_v44  ;;  %v7452_v24 = vmax.f32 %v7436_v38, 0.0  ;;  %v7446_v1 = vadd.f32 %v7428_v30, %v7424_v26  ;;  %v7454_v12 = vmax.f32 %v7438_v6, 0.0 }
 0x5ed   : > { %7473 = vst [vmem:[%s13309_s30 + $0x50] sm:$0xff] %v7457_v63  ;;  %v7456_v59 = vmax.f32 %v7440_v39, 0.0  ;;  %v7458_v32 = vmax.f32 %v7442_v13, 0.0 }
 0x5ee   : > { %7475 = vst [vmem:[%s13309_s30 + $0x60] sm:$0xff] %v7459_v42  ;;  %v7460_v62 = vmax.f32 %v7444_v40, 0.0  ;;  %v7462_v5 = vmax.f32 %v7446_v1, 0.0 }
 0x5ef   : > { %7477 = vst [vmem:[%s13309_s30 + $0x70] sm:$0xff] %v7461_v18 }
 0x5f0   : > { %7464 = vst [vmem:[%s13309_s30 + $0x8] sm:$0xff] %v7448_v14 }
 0x5f1   : > { %7466 = vst [vmem:[%s13309_s30 + $0x18] sm:$0xff] %v7450_v49 }
 0x5f2   : > { %7468 = vst [vmem:[%s13309_s30 + $0x28] sm:$0xff] %v7452_v24 }
 0x5f3   : > { %7470 = vst [vmem:[%s13309_s30 + $0x38] sm:$0xff] %v7454_v12 }
 0x5f4   : > { %7472 = vst [vmem:[%s13309_s30 + $0x48] sm:$0xff] %v7456_v59 }
 0x5f5   : > { %7474 = vst [vmem:[%s13309_s30 + $0x58] sm:$0xff] %v7458_v32 }
 0x5f6   : > { %7476 = vst [vmem:[%s13309_s30 + $0x68] sm:$0xff] %v7460_v62 }
 0x5f7   : > { %7478 = vst [vmem:[%s13309_s30 + $0x78] sm:$0xff] %v7462_v5 }
 0x5f8   : > { %11404 = shalt.err (!%p11401_p8)
}
 0x5f9   : > { %s11469_s1 = smov 256   ;;  %s11470_s17 = smov 16  }
 0x5fa   : > { %11104 = dma.vmem_to_hbm [thread:$0]  (%p11569_p5), %s7493_s21, 2048, %s7495_s14, %s7480_s19, %s11469_s1, %s11469_s1, %s11470_s17  }
 0x5fb PF: > { %s13585_s29 = sld [smem:[#allocation20_spill]]  ;;  %p11141_p9 = scmp.ge.s32.totalorder %s11455_s20, 2 }
 0x5fd   : > { %p11126_p10 = pnand %p11141_p9, %p11573_p6 }
 0x5ff   : > { %p11127_p11 = pneg %p11126_p10 }
 0x601   : > { %s7509_s30 = sand.u32 1, %s13585_s29  }
 0x602   : > { %s7510_s12 = scalar_lea.sflag [#allocation5], %s7509_s30 }
 0x603   : > { %11438 = dma.done.wait (%p11127_p11), %s7510_s12, 2048  }
 0x604   : > { %11440 = vsyncadd (%p11127_p11), %s7510_s12, 4294965248  ;;  %s13587_s20 = sld [smem:[#allocation22_spill]]  ;;  %s13590_s17 = smov %s11447_s18 }
 0x605   : > { %s13588_s24 = sld [smem:[#allocation21_spill]] }
 0x606   : > { %s13589_s19 = sld [smem:[#allocation23_spill]] }
 0x60a   : > { %p25_p12 = scmp.ge.s32.totalorder %s13587_s20, 4  }
 0x60b   : > { %s13591_s18 = smov %s13588_s24 }
 0x60c   :  { %27 = sbr.rel (!%p25_p12) target bundleno = 11 (0xb), region = 127 }
 0x611   :  { %7516 = vsyncpa [#allocation4], 1 }
 0x612   :  { %7518 = vsyncpa [#allocation4 + $0x1], 1 }
 0x613   :  { %7519 = vsyncpa [#allocation7], 1 }
 0x614   :  { %7520 = vsyncpa [#allocation10], 1 }
 0x615   :  { %7521 = vsyncpa [#allocation13], 1 }
 0x616   :  { %7522 = vsyncpa [#allocation5], 1 }
 0x617   :  { %7524 = vsyncpa [#allocation5 + $0x1], 1 }

</bundles_post_ra>
